<compile_context>
chip_gen: v5e
topology: v5e:2x2
jax: 0.10.0
libtpu: 0.0.40
codegen_flags: <defaults>
</compile_context>

<pallas_src>
import jax
import jax.numpy as jnp
from jax.experimental import pallas as pl
from jax.experimental.pallas import tpu as pltpu

NX = 2
NGAMMA = 1          # `ngamma` is undefined in the source snippet; chosen as 1.
N = NX + NGAMMA     # state dim of y
IN_DIM = N + 1      # MLP input width: cos(th), sin(th), th_dot/5, gamma
HIDDEN = 1024
VELOCITY_NORM = 5.0


def _round_up(x, m):
    return (x + m - 1) // m * m


def _max_batch_tile():
    """Batch-tile cap: 512 on v5-class chips, 1024 on v6e / v7x."""
    try:
        kind = jax.devices()[0].device_kind.lower()
    except Exception:
        return 512
    return 512 if "v5" in kind else 1024


def _vmem_tile_bytes(shape, dtype):
    """Approximate VMEM footprint of a 2-D tile after (sublane, lane) padding."""
    r, c = shape
    itemsize = jnp.dtype(dtype).itemsize
    packing = max(1, 4 // itemsize)
    return _round_up(r, 8 * packing) * _round_up(c, 128) * itemsize


def odefunc_kernel(y_ref, w1_ref, b1_ref, w2_ref, b2_ref, w3_ref, b3_ref, out_ref):
    """One batch tile: feature build + 3-layer MLP (bf16 matmuls, f32 accum)."""
    y = y_ref[...]                                   # (tb, N) f32
    th = y[:, 0:1]                                   # (tb, 1)
    th_dot = y[:, 1:2] / VELOCITY_NORM               # (tb, 1)

    # Layer 1 (K = IN_DIM = 4) as rank-1 broadcast FMAs on the VPU: a 4-wide
    # matmul would waste the MXU, and the lane-dim concatenate feeding it
    # forces cross-lane relayout.  f32 math (v5e has no bf16 VPU), cast after.
    w1 = w1_ref[...]                                 # (IN_DIM, HIDDEN) f32
    h1 = (b1_ref[...]
          + jnp.cos(th) * w1[0:1, :]
          + jnp.sin(th) * w1[1:2, :]
          + th_dot * w1[2:3, :])
    for g in range(NGAMMA):                          # unrolled; NGAMMA is tiny
        h1 = h1 + y[:, NX + g:NX + g + 1] * w1[3 + g:4 + g, :]
    h1 = jnp.maximum(h1, 0.0).astype(jnp.bfloat16)   # ReLU

    h2 = jnp.dot(h1, w2_ref[...], preferred_element_type=jnp.float32) + b2_ref[...]
    h2 = jnp.maximum(h2, 0.0).astype(jnp.bfloat16)   # ReLU

    # w3/b3 are padded to N output columns (last NGAMMA columns are zero), so
    # this single matmul already produces cat(state, zeros) of shape (tb, N).
    out = jnp.dot(h2, w3_ref[...], preferred_element_type=jnp.float32) + b3_ref[...]
    out_ref[...] = out.astype(out_ref.dtype)


def odefunc_forward(t, y, params):
    """Matches ODEFunc.forward(t, y); `t` is unused, as in the PyTorch module."""
    del t
    w1, b1, w2, b2, w3p, b3p = params
    B = y.shape[0]
    max_tb = _max_batch_tile()

    # Batch tile: multiple of 8 sublanes; aim for >= 2 grid steps when B > 8 so
    # v7x's two TensorCores both get work (the batch axis is "parallel").
    if B <= 8:
        tb = 8
    else:
        tb = min(max_tb, _round_up(pl.cdiv(B, 2), 8))
    Bp = _round_up(max(B, tb), tb)
    if Bp != B:
        y = jnp.pad(y, ((0, Bp - B), (0, 0)))
    grid = (Bp // tb,)

    weights = (w1, b1, w2, b2, w3p, b3p)
    weight_vmem = sum(_vmem_tile_bytes(w.shape, w.dtype) for w in weights)
    weight_hbm = sum(w.size * jnp.dtype(w.dtype).itemsize for w in weights)
    cost = pl.CostEstimate(
        flops=2 * Bp * (IN_DIM * HIDDEN + HIDDEN * HIDDEN + HIDDEN * N),
        transcendentals=2 * Bp,                       # cos + sin per row
        bytes_accessed=weight_hbm + 2 * Bp * N * 4,
    )

    def run(weight_buffers):
        def tiled(shape):
            # y / out: a fresh batch tile every grid step.
            return pl.BlockSpec(shape, lambda i: (i, 0))

        def resident(shape):
            # Constant block index -> fetched from HBM once, VMEM-resident for
            # all grid steps.  Single-buffered when supported: no pipelining is
            # needed, and double-buffering w2 alone would waste ~2 MiB of VMEM.
            if weight_buffers == 1:
                return pl.BlockSpec(shape, lambda i: (0, 0),
                                    pipeline_mode=pl.Buffered(buffer_count=1))
            return pl.BlockSpec(shape, lambda i: (0, 0))

        # Explicit VMEM budget so the large batch tile never hits the default
        # scoped limit (16 MiB on v5e): weights (x buffering) + double-buffered
        # lane-padded y/out tiles + f32/bf16 h1/h2 intermediates, 1.5x headroom,
        # capped at 48 MiB (v7x physical VMEM is 64 MiB per TensorCore).
        io_bytes = 4 * tb * 128 * 4
        inter_bytes = 2 * tb * HIDDEN * (4 + 2)
        budget = (weight_buffers * weight_vmem + io_bytes + inter_bytes) * 3 // 2
        vmem_limit = int(min(max(budget, 16 << 20), 48 << 20))

        return pl.pallas_call(
            odefunc_kernel,
            out_shape=jax.ShapeDtypeStruct((Bp, N), y.dtype),
            grid=grid,
            in_specs=[
                tiled((tb, N)),
                resident(w1.shape), resident(b1.shape),
                resident(w2.shape), resident(b2.shape),
                resident(w3p.shape), resident(b3p.shape),
            ],
            out_specs=tiled((tb, N)),
            compiler_params=pltpu.CompilerParams(
                # Batch blocks are independent -> shard grid across v7x's 2 TCs.
                dimension_semantics=("parallel",),
                vmem_limit_bytes=vmem_limit,
            ),
            cost_estimate=cost,
        )(y, w1, b1, w2, b2, w3p, b3p)

    try:
        out = run(weight_buffers=1)
    except Exception:
        # Fallback for JAX versions without BlockSpec pipeline_mode support.
        out = run(weight_buffers=2)
    return out[:B]


def init_params(key):
    """PyTorch-style nn.Linear init (uniform +-1/sqrt(fan_in)).

    Returns (kernel_params, f32_reference_params).  Kernel weights are stored
    (in_features, out_features); w2/w3 in bf16 (the dominant HBM stream), w1
    and all biases in f32.  w3/b3 are zero-padded from NX to N output columns
    so the (always-zero) gamma derivative falls out of the last matmul free.
    """
    def linear(k, fan_in, fan_out):
        kw, kb = jax.random.split(k)
        bound = 1.0 / (fan_in ** 0.5)
        w = jax.random.uniform(kw, (fan_in, fan_out), jnp.float32, -bound, bound)
        b = jax.random.uniform(kb, (1, fan_out), jnp.float32, -bound, bound)
        return w, b

    k1, k2, k3 = jax.random.split(key, 3)
    w1, b1 = linear(k1, IN_DIM, HIDDEN)
    w2, b2 = linear(k2, HIDDEN, HIDDEN)
    w3, b3 = linear(k3, HIDDEN, NX)
    w3p = jnp.pad(w3, ((0, 0), (0, NGAMMA)))
    b3p = jnp.pad(b3, ((0, 0), (0, NGAMMA)))
    kernel_params = (w1, b1, w2.astype(jnp.bfloat16), b2,
                     w3p.astype(jnp.bfloat16), b3p)
    f32_params = (w1, b1, w2, b2, w3p, b3p)
    return kernel_params, f32_params


def odefunc_reference(t, y, params):
    """Pure-JAX f32 reference matching the PyTorch module's math."""
    del t
    w1, b1, w2, b2, w3p, b3p = params
    th = y[:, :1]
    th_dot = y[:, 1:2] / VELOCITY_NORM
    gam = y[:, NX:]
    x = jnp.concatenate([jnp.cos(th), jnp.sin(th), th_dot, gam], axis=1)
    h1 = jnp.maximum(x @ w1 + b1, 0.0)
    h2 = jnp.maximum(h1 @ w2 + b2, 0.0)
    return h2 @ w3p + b3p   # zero gamma columns == cat(state, zeros)


if __name__ == "__main__":
    key = jax.random.PRNGKey(0)
    kp, ky = jax.random.split(key)

    kernel_params, f32_params = init_params(kp)
    t = jnp.float32(0.0)

    for B in (8, 40):   # exercise the single-step and multi-step grid paths
        yB = jax.random.normal(jax.random.fold_in(ky, B), (B, N), dtype=jnp.float32)
        out = jax.block_until_ready(odefunc_forward(t, yB, kernel_params))
        ref = jax.block_until_ready(odefunc_reference(t, yB, f32_params))

        assert out.shape == (B, N), out.shape
        # bf16 weights/activations vs a true-f32-weight reference -> loose tol.
        max_err = float(jnp.max(jnp.abs(out - ref)))
        assert jnp.allclose(out, ref, atol=3e-2, rtol=3e-2), (B, max_err)
        # Gamma derivative must be exactly zero (zero-padded w3/b3 columns).
        assert float(jnp.max(jnp.abs(out[:, NX:]))) == 0.0

    print("KERNEL_OK")
</pallas_src>

<mosaic_0001>
module attributes {stable_mosaic.version = 11 : i64} {
  func.func @odefunc_kernel(%arg0: i32, %arg1: memref<8x3xf32, #tpu.memory_space<vmem>>, %arg2: memref<4x1024xf32, #tpu.memory_space<vmem>>, %arg3: memref<1x1024xf32, #tpu.memory_space<vmem>>, %arg4: memref<1024x1024xbf16, #tpu.memory_space<vmem>>, %arg5: memref<1x1024xf32, #tpu.memory_space<vmem>>, %arg6: memref<1024x3xbf16, #tpu.memory_space<vmem>>, %arg7: memref<1x3xf32, #tpu.memory_space<vmem>>, %arg8: memref<8x3xf32, #tpu.memory_space<vmem>>) attributes {dimension_semantics = [#tpu.dimension_semantics<parallel>], iteration_bounds = array<i64: 1>, scalar_prefetch = 0 : i64, scratch_operands = 0 : i64, tpu.core_type = #tpu.core_type<tc>, window_params = [{transform_indices = @transform_0, window_bounds = array<i64: 8, 3>}, {pipeline_mode = #tpu.pipeline_mode<synchronous>, transform_indices = @transform_1, window_bounds = array<i64: 4, 1024>}, {pipeline_mode = #tpu.pipeline_mode<synchronous>, transform_indices = @transform_2, window_bounds = array<i64: 1, 1024>}, {pipeline_mode = #tpu.pipeline_mode<synchronous>, transform_indices = @transform_3, window_bounds = array<i64: 1024, 1024>}, {pipeline_mode = #tpu.pipeline_mode<synchronous>, transform_indices = @transform_4, window_bounds = array<i64: 1, 1024>}, {pipeline_mode = #tpu.pipeline_mode<synchronous>, transform_indices = @transform_5, window_bounds = array<i64: 1024, 3>}, {pipeline_mode = #tpu.pipeline_mode<synchronous>, transform_indices = @transform_6, window_bounds = array<i64: 1, 3>}, {transform_indices = @transform_7, window_bounds = array<i64: 8, 3>}]} {
    %c0 = arith.constant 0 : index
    %c0_0 = arith.constant 0 : index
    %0 = vector.load %arg1[%c0, %c0_0] : memref<8x3xf32, #tpu.memory_space<vmem>>, vector<8x3xf32>
    %1 = vector.extract_strided_slice %0 {offsets = [0, 0], sizes = [8, 1], strides = [1, 1]} : vector<8x3xf32> to vector<8x1xf32>
    %2 = vector.extract_strided_slice %0 {offsets = [0, 1], sizes = [8, 1], strides = [1, 1]} : vector<8x3xf32> to vector<8x1xf32>
    %cst = arith.constant 5.000000e+00 : f32
    %3 = vector.broadcast %cst : f32 to vector<8x1xf32>
    %4 = arith.divf %2, %3 : vector<8x1xf32>
    %c0_1 = arith.constant 0 : index
    %c0_2 = arith.constant 0 : index
    %5 = vector.load %arg2[%c0_1, %c0_2] : memref<4x1024xf32, #tpu.memory_space<vmem>>, vector<4x1024xf32>
    %c0_3 = arith.constant 0 : index
    %c0_4 = arith.constant 0 : index
    %6 = vector.load %arg3[%c0_3, %c0_4] : memref<1x1024xf32, #tpu.memory_space<vmem>>, vector<1x1024xf32>
    %7 = math.cos %1 : vector<8x1xf32>
    %8 = vector.extract_strided_slice %5 {offsets = [0, 0], sizes = [1, 1024], strides = [1, 1]} : vector<4x1024xf32> to vector<1x1024xf32>
    %9 = vector.broadcast %7 : vector<8x1xf32> to vector<8x1024xf32>
    %10 = vector.broadcast %8 : vector<1x1024xf32> to vector<8x1024xf32>
    %11 = arith.mulf %9, %10 : vector<8x1024xf32>
    %12 = vector.broadcast %6 : vector<1x1024xf32> to vector<8x1024xf32>
    %13 = arith.addf %12, %11 : vector<8x1024xf32>
    %14 = math.sin %1 : vector<8x1xf32>
    %15 = vector.extract_strided_slice %5 {offsets = [1, 0], sizes = [1, 1024], strides = [1, 1]} : vector<4x1024xf32> to vector<1x1024xf32>
    %16 = vector.broadcast %14 : vector<8x1xf32> to vector<8x1024xf32>
    %17 = vector.broadcast %15 : vector<1x1024xf32> to vector<8x1024xf32>
    %18 = arith.mulf %16, %17 : vector<8x1024xf32>
    %19 = arith.addf %13, %18 : vector<8x1024xf32>
    %20 = vector.extract_strided_slice %5 {offsets = [2, 0], sizes = [1, 1024], strides = [1, 1]} : vector<4x1024xf32> to vector<1x1024xf32>
    %21 = vector.broadcast %4 : vector<8x1xf32> to vector<8x1024xf32>
    %22 = vector.broadcast %20 : vector<1x1024xf32> to vector<8x1024xf32>
    %23 = arith.mulf %21, %22 : vector<8x1024xf32>
    %24 = arith.addf %19, %23 : vector<8x1024xf32>
    %25 = vector.extract_strided_slice %0 {offsets = [0, 2], sizes = [8, 1], strides = [1, 1]} : vector<8x3xf32> to vector<8x1xf32>
    %26 = vector.extract_strided_slice %5 {offsets = [3, 0], sizes = [1, 1024], strides = [1, 1]} : vector<4x1024xf32> to vector<1x1024xf32>
    %27 = vector.broadcast %25 : vector<8x1xf32> to vector<8x1024xf32>
    %28 = vector.broadcast %26 : vector<1x1024xf32> to vector<8x1024xf32>
    %29 = arith.mulf %27, %28 : vector<8x1024xf32>
    %30 = arith.addf %24, %29 : vector<8x1024xf32>
    %cst_5 = arith.constant 0.000000e+00 : f32
    %31 = vector.broadcast %cst_5 : f32 to vector<8x1024xf32>
    %32 = arith.maximumf %30, %31 : vector<8x1024xf32>
    %33 = arith.truncf %32 : vector<8x1024xf32> to vector<8x1024xbf16>
    %c0_6 = arith.constant 0 : index
    %c0_7 = arith.constant 0 : index
    %34 = vector.load %arg4[%c0_6, %c0_7] : memref<1024x1024xbf16, #tpu.memory_space<vmem>>, vector<1024x1024xbf16>
    %cst_8 = arith.constant dense<0.000000e+00> : vector<8x1024xf32>
    %35 = tpu.matmul %33, %34, %cst_8 {dimension_numbers = #tpu.dot_dimension_numbers<[1], [0], [0], [1], [0, 0, 1, 1], [], []>} : vector<8x1024xbf16>, vector<1024x1024xbf16>, vector<8x1024xf32> -> vector<8x1024xf32>
    %c0_9 = arith.constant 0 : index
    %c0_10 = arith.constant 0 : index
    %36 = vector.load %arg5[%c0_9, %c0_10] : memref<1x1024xf32, #tpu.memory_space<vmem>>, vector<1x1024xf32>
    %37 = vector.broadcast %36 : vector<1x1024xf32> to vector<8x1024xf32>
    %38 = arith.addf %35, %37 : vector<8x1024xf32>
    %cst_11 = arith.constant 0.000000e+00 : f32
    %39 = vector.broadcast %cst_11 : f32 to vector<8x1024xf32>
    %40 = arith.maximumf %38, %39 : vector<8x1024xf32>
    %41 = arith.truncf %40 : vector<8x1024xf32> to vector<8x1024xbf16>
    %c0_12 = arith.constant 0 : index
    %c0_13 = arith.constant 0 : index
    %42 = vector.load %arg6[%c0_12, %c0_13] : memref<1024x3xbf16, #tpu.memory_space<vmem>>, vector<1024x3xbf16>
    %cst_14 = arith.constant dense<0.000000e+00> : vector<8x3xf32>
    %43 = tpu.matmul %41, %42, %cst_14 {dimension_numbers = #tpu.dot_dimension_numbers<[1], [0], [0], [1], [0, 0, 1, 1], [], []>} : vector<8x1024xbf16>, vector<1024x3xbf16>, vector<8x3xf32> -> vector<8x3xf32>
    %c0_15 = arith.constant 0 : index
    %c0_16 = arith.constant 0 : index
    %44 = vector.load %arg7[%c0_15, %c0_16] : memref<1x3xf32, #tpu.memory_space<vmem>>, vector<1x3xf32>
    %45 = vector.broadcast %44 : vector<1x3xf32> to vector<8x3xf32>
    %46 = arith.addf %43, %45 : vector<8x3xf32>
    %c0_17 = arith.constant 0 : index
    %c0_18 = arith.constant 0 : index
    %47 = vector.load %arg8[%c0_17, %c0_18] : memref<8x3xf32, #tpu.memory_space<vmem>>, vector<8x3xf32>
    tpu.vector_store %arg8[%c0_17, %c0_18], %46 {strides = array<i32>} : memref<8x3xf32, #tpu.memory_space<vmem>>, vector<8x3xf32>,
    return
  }
  func.func @transform_0(%arg0: i32) -> (i32, i32) {
    %c0_i32 = arith.constant 0 : i32
    %c0_i32_0 = arith.constant 0 : i32
    return %arg0, %c0_i32 : i32, i32
  }
  func.func @transform_1(%arg0: i32) -> (i32, i32) {
    %c0_i32 = arith.constant 0 : i32
    %c0_i32_0 = arith.constant 0 : i32
    %c0_i32_1 = arith.constant 0 : i32
    return %c0_i32, %c0_i32_0 : i32, i32
  }
  func.func @transform_2(%arg0: i32) -> (i32, i32) {
    %c0_i32 = arith.constant 0 : i32
    %c0_i32_0 = arith.constant 0 : i32
    %c0_i32_1 = arith.constant 0 : i32
    return %c0_i32, %c0_i32_0 : i32, i32
  }
  func.func @transform_3(%arg0: i32) -> (i32, i32) {
    %c0_i32 = arith.constant 0 : i32
    %c0_i32_0 = arith.constant 0 : i32
    %c0_i32_1 = arith.constant 0 : i32
    return %c0_i32, %c0_i32_0 : i32, i32
  }
  func.func @transform_4(%arg0: i32) -> (i32, i32) {
    %c0_i32 = arith.constant 0 : i32
    %c0_i32_0 = arith.constant 0 : i32
    %c0_i32_1 = arith.constant 0 : i32
    return %c0_i32, %c0_i32_0 : i32, i32
  }
  func.func @transform_5(%arg0: i32) -> (i32, i32) {
    %c0_i32 = arith.constant 0 : i32
    %c0_i32_0 = arith.constant 0 : i32
    %c0_i32_1 = arith.constant 0 : i32
    return %c0_i32, %c0_i32_0 : i32, i32
  }
  func.func @transform_6(%arg0: i32) -> (i32, i32) {
    %c0_i32 = arith.constant 0 : i32
    %c0_i32_0 = arith.constant 0 : i32
    %c0_i32_1 = arith.constant 0 : i32
    return %c0_i32, %c0_i32_0 : i32, i32
  }
  func.func @transform_7(%arg0: i32) -> (i32, i32) {
    %c0_i32 = arith.constant 0 : i32
    %c0_i32_0 = arith.constant 0 : i32
    return %arg0, %c0_i32 : i32, i32
  }
}

module attributes {stable_mosaic.version = 11 : i64} {
  func.func @odefunc_kernel(%arg0: i32, %arg1: memref<8x3xf32, #tpu.memory_space<vmem>>, %arg2: memref<4x1024xf32, #tpu.memory_space<vmem>>, %arg3: memref<1x1024xf32, #tpu.memory_space<vmem>>, %arg4: memref<1024x1024xbf16, #tpu.memory_space<vmem>>, %arg5: memref<1x1024xf32, #tpu.memory_space<vmem>>, %arg6: memref<1024x3xbf16, #tpu.memory_space<vmem>>, %arg7: memref<1x3xf32, #tpu.memory_space<vmem>>, %arg8: memref<8x3xf32, #tpu.memory_space<vmem>>) attributes {dimension_semantics = [#tpu.dimension_semantics<parallel>], iteration_bounds = array<i64: 1>, scalar_prefetch = 0 : i64, scratch_operands = 0 : i64, tpu.core_type = #tpu.core_type<tc>, window_params = [{transform_indices = @transform_0, window_bounds = array<i64: 8, 3>}, {pipeline_mode = #tpu.pipeline_mode<synchronous>, transform_indices = @transform_1, window_bounds = array<i64: 4, 1024>}, {pipeline_mode = #tpu.pipeline_mode<synchronous>, transform_indices = @transform_2, window_bounds = array<i64: 1, 1024>}, {pipeline_mode = #tpu.pipeline_mode<synchronous>, transform_indices = @transform_3, window_bounds = array<i64: 1024, 1024>}, {pipeline_mode = #tpu.pipeline_mode<synchronous>, transform_indices = @transform_4, window_bounds = array<i64: 1, 1024>}, {pipeline_mode = #tpu.pipeline_mode<synchronous>, transform_indices = @transform_5, window_bounds = array<i64: 1024, 3>}, {pipeline_mode = #tpu.pipeline_mode<synchronous>, transform_indices = @transform_6, window_bounds = array<i64: 1, 3>}, {transform_indices = @transform_7, window_bounds = array<i64: 8, 3>}]} {
    %c0 = arith.constant 0 : index
    %c0_0 = arith.constant 0 : index
    %0 = vector.load %arg1[%c0, %c0_0] : memref<8x3xf32, #tpu.memory_space<vmem>>, vector<8x3xf32>
    %1 = vector.extract_strided_slice %0 {offsets = [0, 0], sizes = [8, 1], strides = [1, 1]} : vector<8x3xf32> to vector<8x1xf32>
    %2 = vector.extract_strided_slice %0 {offsets = [0, 1], sizes = [8, 1], strides = [1, 1]} : vector<8x3xf32> to vector<8x1xf32>
    %cst = arith.constant 5.000000e+00 : f32
    %3 = vector.broadcast %cst : f32 to vector<8x1xf32>
    %4 = arith.divf %2, %3 : vector<8x1xf32>
    %c0_1 = arith.constant 0 : index
    %c0_2 = arith.constant 0 : index
    %5 = vector.load %arg2[%c0_1, %c0_2] : memref<4x1024xf32, #tpu.memory_space<vmem>>, vector<4x1024xf32>
    %c0_3 = arith.constant 0 : index
    %c0_4 = arith.constant 0 : index
    %6 = vector.load %arg3[%c0_3, %c0_4] : memref<1x1024xf32, #tpu.memory_space<vmem>>, vector<1x1024xf32>
    %7 = math.cos %1 : vector<8x1xf32>
    %8 = vector.extract_strided_slice %5 {offsets = [0, 0], sizes = [1, 1024], strides = [1, 1]} : vector<4x1024xf32> to vector<1x1024xf32>
    %9 = vector.broadcast %7 : vector<8x1xf32> to vector<8x1024xf32>
    %10 = vector.broadcast %8 : vector<1x1024xf32> to vector<8x1024xf32>
    %11 = arith.mulf %9, %10 : vector<8x1024xf32>
    %12 = vector.broadcast %6 : vector<1x1024xf32> to vector<8x1024xf32>
    %13 = arith.addf %12, %11 : vector<8x1024xf32>
    %14 = math.sin %1 : vector<8x1xf32>
    %15 = vector.extract_strided_slice %5 {offsets = [1, 0], sizes = [1, 1024], strides = [1, 1]} : vector<4x1024xf32> to vector<1x1024xf32>
    %16 = vector.broadcast %14 : vector<8x1xf32> to vector<8x1024xf32>
    %17 = vector.broadcast %15 : vector<1x1024xf32> to vector<8x1024xf32>
    %18 = arith.mulf %16, %17 : vector<8x1024xf32>
    %19 = arith.addf %13, %18 : vector<8x1024xf32>
    %20 = vector.extract_strided_slice %5 {offsets = [2, 0], sizes = [1, 1024], strides = [1, 1]} : vector<4x1024xf32> to vector<1x1024xf32>
    %21 = vector.broadcast %4 : vector<8x1xf32> to vector<8x1024xf32>
    %22 = vector.broadcast %20 : vector<1x1024xf32> to vector<8x1024xf32>
    %23 = arith.mulf %21, %22 : vector<8x1024xf32>
    %24 = arith.addf %19, %23 : vector<8x1024xf32>
    %25 = vector.extract_strided_slice %0 {offsets = [0, 2], sizes = [8, 1], strides = [1, 1]} : vector<8x3xf32> to vector<8x1xf32>
    %26 = vector.extract_strided_slice %5 {offsets = [3, 0], sizes = [1, 1024], strides = [1, 1]} : vector<4x1024xf32> to vector<1x1024xf32>
    %27 = vector.broadcast %25 : vector<8x1xf32> to vector<8x1024xf32>
    %28 = vector.broadcast %26 : vector<1x1024xf32> to vector<8x1024xf32>
    %29 = arith.mulf %27, %28 : vector<8x1024xf32>
    %30 = arith.addf %24, %29 : vector<8x1024xf32>
    %cst_5 = arith.constant 0.000000e+00 : f32
    %31 = vector.broadcast %cst_5 : f32 to vector<8x1024xf32>
    %32 = arith.maximumf %30, %31 : vector<8x1024xf32>
    %33 = arith.truncf %32 : vector<8x1024xf32> to vector<8x1024xbf16>
    %c0_6 = arith.constant 0 : index
    %c0_7 = arith.constant 0 : index
    %34 = vector.load %arg4[%c0_6, %c0_7] : memref<1024x1024xbf16, #tpu.memory_space<vmem>>, vector<1024x1024xbf16>
    %cst_8 = arith.constant dense<0.000000e+00> : vector<8x1024xf32>
    %35 = tpu.matmul %33, %34, %cst_8 {dimension_numbers = #tpu.dot_dimension_numbers<[1], [0], [0], [1], [0, 0, 1, 1], [], []>} : vector<8x1024xbf16>, vector<1024x1024xbf16>, vector<8x1024xf32> -> vector<8x1024xf32>
    %c0_9 = arith.constant 0 : index
    %c0_10 = arith.constant 0 : index
    %36 = vector.load %arg5[%c0_9, %c0_10] : memref<1x1024xf32, #tpu.memory_space<vmem>>, vector<1x1024xf32>
    %37 = vector.broadcast %36 : vector<1x1024xf32> to vector<8x1024xf32>
    %38 = arith.addf %35, %37 : vector<8x1024xf32>
    %cst_11 = arith.constant 0.000000e+00 : f32
    %39 = vector.broadcast %cst_11 : f32 to vector<8x1024xf32>
    %40 = arith.maximumf %38, %39 : vector<8x1024xf32>
    %41 = arith.truncf %40 : vector<8x1024xf32> to vector<8x1024xbf16>
    %c0_12 = arith.constant 0 : index
    %c0_13 = arith.constant 0 : index
    %42 = vector.load %arg6[%c0_12, %c0_13] : memref<1024x3xbf16, #tpu.memory_space<vmem>>, vector<1024x3xbf16>
    %cst_14 = arith.constant dense<0.000000e+00> : vector<8x3xf32>
    %43 = tpu.matmul %41, %42, %cst_14 {dimension_numbers = #tpu.dot_dimension_numbers<[1], [0], [0], [1], [0, 0, 1, 1], [], []>} : vector<8x1024xbf16>, vector<1024x3xbf16>, vector<8x3xf32> -> vector<8x3xf32>
    %c0_15 = arith.constant 0 : index
    %c0_16 = arith.constant 0 : index
    %44 = vector.load %arg7[%c0_15, %c0_16] : memref<1x3xf32, #tpu.memory_space<vmem>>, vector<1x3xf32>
    %45 = vector.broadcast %44 : vector<1x3xf32> to vector<8x3xf32>
    %46 = arith.addf %43, %45 : vector<8x3xf32>
    %c0_17 = arith.constant 0 : index
    %c0_18 = arith.constant 0 : index
    %47 = vector.load %arg8[%c0_17, %c0_18] : memref<8x3xf32, #tpu.memory_space<vmem>>, vector<8x3xf32>
    tpu.vector_store %arg8[%c0_17, %c0_18], %46 {strides = array<i32>} : memref<8x3xf32, #tpu.memory_space<vmem>>, vector<8x3xf32>,
    return
  }
  func.func @transform_0(%arg0: i32) -> (i32, i32) {
    %c0_i32 = arith.constant 0 : i32
    %c0_i32_0 = arith.constant 0 : i32
    return %arg0, %c0_i32 : i32, i32
  }
  func.func @transform_1(%arg0: i32) -> (i32, i32) {
    %c0_i32 = arith.constant 0 : i32
    %c0_i32_0 = arith.constant 0 : i32
    %c0_i32_1 = arith.constant 0 : i32
    return %c0_i32, %c0_i32_0 : i32, i32
  }
  func.func @transform_2(%arg0: i32) -> (i32, i32) {
    %c0_i32 = arith.constant 0 : i32
    %c0_i32_0 = arith.constant 0 : i32
    %c0_i32_1 = arith.constant 0 : i32
    return %c0_i32, %c0_i32_0 : i32, i32
  }
  func.func @transform_3(%arg0: i32) -> (i32, i32) {
    %c0_i32 = arith.constant 0 : i32
    %c0_i32_0 = arith.constant 0 : i32
    %c0_i32_1 = arith.constant 0 : i32
    return %c0_i32, %c0_i32_0 : i32, i32
  }
  func.func @transform_4(%arg0: i32) -> (i32, i32) {
    %c0_i32 = arith.constant 0 : i32
    %c0_i32_0 = arith.constant 0 : i32
    %c0_i32_1 = arith.constant 0 : i32
    return %c0_i32, %c0_i32_0 : i32, i32
  }
  func.func @transform_5(%arg0: i32) -> (i32, i32) {
    %c0_i32 = arith.constant 0 : i32
    %c0_i32_0 = arith.constant 0 : i32
    %c0_i32_1 = arith.constant 0 : i32
    return %c0_i32, %c0_i32_0 : i32, i32
  }
  func.func @transform_6(%arg0: i32) -> (i32, i32) {
    %c0_i32 = arith.constant 0 : i32
    %c0_i32_0 = arith.constant 0 : i32
    %c0_i32_1 = arith.constant 0 : i32
    return %c0_i32, %c0_i32_0 : i32, i32
  }
  func.func @transform_7(%arg0: i32) -> (i32, i32) {
    %c0_i32 = arith.constant 0 : i32
    %c0_i32_0 = arith.constant 0 : i32
    return %arg0, %c0_i32 : i32, i32
  }
}

</mosaic_0001>

<bundles_post_ra>
// kernel: tpu_custom_call.1
= control target key start
LH: loop header
LB: loop body
LE: loop exit
PB: predicated region body
PF: predicated region fallthrough
CT: control target
= control target key end

     0   :  { %12 = vsyncpa [#allocation3], 0  ;;  %s8908_s0 = inlined_call_operand.vmem [shape: f32[8,3], index: 0, kind: input, shape index: {}]   ;;  %s8909_s1 = inlined_call_operand.hbm [shape: f32[4,1024], index: 1, kind: input, shape index: {}]   ;;  %s8910_s2 = inlined_call_operand.hbm [shape: f32[1,1024], index: 2, kind: input, shape index: {}]   ;;  %s8911_s3 = inlined_call_operand.hbm [shape: bf16[1024,1024], index: 3, kind: input, shape index: {}]   ;;  %s8912_s4 = inlined_call_operand.hbm [shape: f32[1,1024], index: 4, kind: input, shape index: {}]   ;;  %s8913_s5 = inlined_call_operand.vmem [shape: bf16[1024,3], index: 5, kind: input, shape index: {}]   ;;  %s8914_s6 = inlined_call_operand.hbm [shape: f32[1,3], index: 6, kind: input, shape index: {}]   ;;  %s8915_s7 = inlined_call_operand.vmem [shape: f32[8,3], index: 7, kind: output, shape index: {}]  }
   0x1   :  { %13 = vsyncpa [#allocation5], 0  ;;  %s33_s26 = sshll.u32 %s8910_s2, 4  ;;  %s34_s26 = int_to_ptr.hbm [resolvable:$true] %s33_s26 }
   0x2   :  { %14 = vsyncpa [#allocation8], 0  ;;  %s8241_s27 = smov [#allocation4]   ;;  %s57_s8 = sshll.u32 %s8912_s4, 4  ;;  %s58_s8 = int_to_ptr.hbm [resolvable:$true] %s57_s8 }
   0x3   :  { %s35_s28 = sshll.u32 %s8241_s27, 4  ;;  %s8242_s9 = smov [#allocation7]   ;;  %s36_s28 = int_to_ptr.vmem [resolvable:$true] %s35_s28 }
   0x4   :  { %38 = dma.hbm_to_vmem [thread:$0]  %s34_s26, 128, %s36_s28, [#allocation5]  }
   0x5   :  { %s59_s10 = sshll.u32 %s8242_s9, 4  ;;  %s22_s13 = sshll.u32 %s8909_s1, 4  ;;  %s60_s10 = int_to_ptr.vmem [resolvable:$true] %s59_s10  ;;  %s23_s13 = int_to_ptr.hbm [resolvable:$true] %s22_s13 }
   0x6   :  { %62 = dma.hbm_to_vmem [thread:$0]  %s58_s8, 128, %s60_s10, [#allocation8]  }
   0x7   :  { %s43_s15 = sshll.u32 %s8911_s3, 4  ;;  %s8243_s16 = smov [#allocation2]   ;;  %s44_s15 = int_to_ptr.hbm [resolvable:$true] %s43_s15 }
   0x8   :  { %s24_s17 = sshll.u32 %s8243_s16, 4  ;;  %s8244_s4 = smov [#allocation6]   ;;  %s25_s17 = int_to_ptr.vmem [resolvable:$true] %s24_s17 }
   0x9   :  { %27 = dma.hbm_to_vmem [thread:$0]  %s23_s13, 512, %s25_s17, [#allocation3]  }
   0xa   :  { %s45_s18 = sshll.u32 %s8244_s4, 4  ;;  %s8245_s19 = smov 512   ;;  %s46_s18 = int_to_ptr.vmem [resolvable:$true] %s45_s18 }
   0xb   :  { %s8246_s20 = smov 32   ;;  %s70_s22 = sshll.u32 %s8914_s6, 4  ;;  %s71_s22 = int_to_ptr.hbm [resolvable:$true] %s70_s22 }
   0xc   :  { %51 = dma.hbm_to_vmem [thread:$0]  %s44_s15, 65536, %s46_s18, [#allocation5], %s8245_s19, %s8245_s19, %s8246_s20  }
   0xd   :  { %s8247_s23 = smov [#allocation9]  }
   0xe   :  { %s72_s24 = sshll.u32 %s8247_s23, 4  ;;  %s73_s24 = int_to_ptr.vmem [resolvable:$true] %s72_s24 }
   0xf   :  { %75 = dma.hbm_to_vmem [thread:$0]  %s71_s22, 16, %s73_s24, [#allocation8]  }
  0x10   :  { %8235 = dma.done.wait [#allocation3], 512  }
  0x11   :  { %8236 = vsyncadd [#allocation3], 4294966784 }
  0x12   :  { %8237 = dma.done.wait [#allocation5], 65664  }
  0x13   :  { %8238 = vsyncadd [#allocation5], 4294901632 }
  0x14   :  { %8239 = dma.done.wait [#allocation8], 144  }
  0x15   :  { %8240 = vsyncadd [#allocation8], 4294967152  ;;  %v8248_v0 = vmov 0   ;;  %v8317_v1 = vld [vmem:[%s8908_s0] sm:$0xff]  ;;  %v8249_v13 = vmov 683565275  }
  0x16   :  { %8106 = vset.pattern.permute.xlu0 %v8248_v0  ;;  %v113_v2 = vand.u32 2139095040, %v8317_v1  ;;  %v110_v3 = vand.u32 2147483647, %v8317_v1  ;;  %v8250_v15 = vmov 2475754826   ;;  %vm112_vm12 = vcmp.lt.s32.totalorder %v8317_v1, 0 }
  0x17   :  { %v8251_v17 = vmov 2131351028   ;;  %v8252_v19 = vmov 2102212464   ;;  %v8253_v21 = vmov 920167782  }
  0x18   :  { %v114_v4 = vshrl.u32 %v113_v2, 23  ;;  %v117_v6 = vand.u32 8388607, %v110_v3  ;;  %v8254_v28 = vmov 1326507024  }
  0x19   :  { %vm8368_vm14 = vcmp.le.f32.partialorder %v110_v3, 0.7853982 }
  0x1a   :  { %v5203_v5 = vadd.s32 4294967169, %v114_v4  ;;  %v118_v8 = vor.u32 8388608, %v117_v6 }
  0x1c   :  { %v120_v7 = vadd.s32 1, %v5203_v5  ;;  %v8325_v23 = vshll.u32 %v118_v8, 8 }
  0x1e   :  { %vm121_vm0 = vcmp.gt.s32.totalorder %v120_v7, 0  ;;  %v159_v40 = vand.u32 65535, %v8325_v23  ;;  %v160_v41 = vshrl.u32 %v8325_v23, 16 }
  0x1f   :  { %v122_v9 = vsel %vm121_vm0, %v120_v7, 0 }
  0x20   :  { %v124_v10 = vand.u32 31, %v122_v9  ;;  %v8323_v11 = vshrl.u32 %v122_v9, 5 }
  0x22   :  { %v125_v12 = vsub.s32 32, %v124_v10  ;;  %v127_v14 = vshll.u32 %v8249_v13, %v124_v10  ;;  %v130_v16 = vshll.u32 %v8250_v15, %v124_v10  ;;  %v133_v18 = vshll.u32 %v8251_v17, %v124_v10 }
  0x23   :  { %v136_v20 = vshll.u32 %v8252_v19, %v124_v10  ;;  %v139_v22 = vshll.u32 %v8253_v21, %v124_v10  ;;  %vm142_vm1 = vcmp.lt.s32.totalorder %v8323_v11, 1  ;;  %vm144_vm2 = vcmp.lt.s32.totalorder %v8323_v11, 3 }
  0x24   :  { %v128_v24 = vshrl.u32 %v8250_v15, %v125_v12  ;;  %v131_v25 = vshrl.u32 %v8251_v17, %v125_v12  ;;  %v134_v26 = vshrl.u32 %v8252_v19, %v125_v12  ;;  %v137_v27 = vshrl.u32 %v8253_v21, %v125_v12 }
  0x25   :  { %v140_v29 = vshrl.u32 %v8254_v28, %v125_v12  ;;  %vm145_vm3 = vcmp.lt.s32.totalorder %v8323_v11, 4  ;;  %vm143_vm4 = vcmp.lt.s32.totalorder %v8323_v11, 2  ;;  %v126_v52 = vshrl.u32 %v8249_v13, %v125_v12 }
  0x26   :  { %v129_v30 = vor.u32 %v128_v24, %v127_v14  ;;  %v132_v31 = vor.u32 %v131_v25, %v130_v16  ;;  %v135_v32 = vor.u32 %v134_v26, %v133_v18  ;;  %v138_v33 = vor.u32 %v137_v27, %v136_v20 }
  0x27   :  { %v141_v34 = vor.u32 %v140_v29, %v139_v22 }
  0x28   :  { %v150_v35 = vsel %vm142_vm1, %v129_v30, %v132_v31  ;;  %v151_v36 = vsel %vm145_vm3, %v138_v33, 920167782  ;;  %v154_v37 = vsel %vm142_vm1, %v132_v31, %v135_v32  ;;  %v147_v59 = vsel %vm145_vm3, %v135_v32, 2102212464 }
  0x29   :  { %v152_v38 = vsel %vm144_vm2, %v135_v32, %v151_v36  ;;  %v155_v39 = vsel %vm145_vm3, %v141_v34, 1326507024  ;;  %v146_v2 = vsel %vm142_vm1, %v126_v52, %v129_v30  ;;  %v148_v6 = vsel %vm144_vm2, %v132_v31, %v147_v59 }
  0x2a   :  { %v153_v42 = vsel %vm143_vm4, %v150_v35, %v152_v38  ;;  %v156_v43 = vsel %vm144_vm2, %v138_v33, %v155_v39  ;;  %v149_v20 = vsel %vm143_vm4, %v146_v2, %v148_v6  ;;  %v8255_v33 = vmov 5.0  }
  0x2b   :  { %v157_v44 = vsel %vm143_vm4, %v154_v37, %v156_v43  ;;  %v183_v45 = vand.u32 65535, %v153_v42  ;;  %v184_v46 = vshrl.u32 %v153_v42, 16  ;;  %v203_v26 = vmul.u32 %v8325_v23, %v149_v20  ;;  %v5403_v20 = vld [vmem:[#allocation6 + $0x180] sm:$0xf] }
  0x2c   :  { %v161_v47 = vand.u32 65535, %v157_v44  ;;  %v162_v48 = vshrl.u32 %v157_v44, 16  ;;  %8111 = vrcp.f32 %v8255_v33  ;;  %v5371_v33 = vld [vmem:[#allocation6 + $0x140] sm:$0xf]  ;;  %vm253_vm3 = vweird.f32 %v8317_v1 }
  0x2d   :  { %v185_v49 = vmul.u32 %v183_v45, %v159_v40  ;;  %v186_v50 = vmul.u32 %v184_v46, %v159_v40  ;;  %v187_v51 = vmul.u32 %v183_v45, %v160_v41  ;;  %v188_v56 = vmul.u32 %v184_v46, %v160_v41 }
  0x2e   :  { %v163_v53 = vmul.u32 %v161_v47, %v159_v40  ;;  %v164_v54 = vmul.u32 %v162_v48, %v159_v40  ;;  %v165_v55 = vmul.u32 %v161_v47, %v160_v41  ;;  %v166_v60 = vmul.u32 %v162_v48, %v160_v41 }
  0x2f   :  { %v189_v57 = vshll.u32 %v186_v50, 16  ;;  %v191_v58 = vshll.u32 %v187_v51, 16  ;;  %v190_v8 = vshrl.u32 %v186_v50, 16  ;;  %v192_v15 = vshrl.u32 %v187_v51, 16 }
  0x30   :  { %v167_v61 = vshll.u32 %v164_v54, 16  ;;  %v169_v62 = vshll.u32 %v165_v55, 16  ;;  %v168_v10 = vshrl.u32 %v164_v54, 16  ;;  %v170_v17 = vshrl.u32 %v165_v55, 16 }
  0x31   :  { %vm193_vm5 = vc.u32 %v185_v49, %v189_v57  ;;  %v195_v63 = vadd.s32 %v189_v57, %v185_v49  ;;  %v8256_v55 = vmov 1   ;;  %v7677_v57 = vld [vmem:[#allocation6 + $0x51c] sm:$0xf0] }
  0x32   :  { %vm171_vm6 = vc.u32 %v163_v53, %v167_v61  ;;  %v173_v4 = vadd.s32 %v167_v61, %v163_v53  ;;  %v194_v5 = vsel %vm193_vm5, 1, %v8248_v0  ;;  %v8112_v36 = vpop.eup %8111  ;;  %8107 = vset.pattern.permute.xlu1 %v8256_v55  ;;  %v5851_v55 = vld [vmem:[#allocation6 + $0x500] sm:$0xf] }
  0x33   :  { %v172_v7 = vsel %vm171_vm6, 1, %v8248_v0  ;;  %v196_v9 = vadd.s32 %v194_v5, %v188_v56  ;;  %vm197_vm7 = vc.u32 %v195_v63, %v191_v58  ;;  %v199_v22 = vadd.s32 %v195_v63, %v191_v58  ;;  %v7573_v5 = vld [vmem:[#allocation6 + $0x1dc] sm:$0xf0] }
  0x34   :  { %v174_v12 = vadd.s32 %v172_v7, %v166_v60  ;;  %vm175_vm8 = vc.u32 %v173_v4, %v169_v62  ;;  %v198_v13 = vsel %vm197_vm7, 1, %v8248_v0  ;;  %v98_v38 = vmul.f32 5.0, %v8112_v36  ;;  %v5435_v4 = vld [vmem:[#allocation6 + $0x1c0] sm:$0xf] }
  0x35   :  { %v176_v14 = vsel %vm175_vm8, 1, %v8248_v0  ;;  %v200_v16 = vadd.s32 %v198_v13, %v196_v9  ;;  %vm102_vm13 = vweird.f32 %v8112_v36  ;;  %v5436_v6 = vor.u32 %v7573_v5, %v5435_v4  ;;  %v5691_v7 = vld [vmem:[#allocation6 + $0x3c0] sm:$0xf] }
  0x36   :  { %v178_v18 = vadd.s32 %v176_v14, %v174_v12  ;;  %v99_v40 = vsub.f32 1.0, %v98_v38  ;;  %v5947_v9 = vld [vmem:[#allocation6 + $0x5c0] sm:$0xf]  ;;  %vm5194_vm6 = vcmask 23552  }
  0x37   :  { %v201_v19 = vadd.s32 %v200_v16, %v190_v8  ;;  %v7637_v8 = vld [vmem:[#allocation6 + $0x3dc] sm:$0xf0]  ;;  %3726 = vmatpush.bf16.msra.mxu0 %v5436_v6 }
  0x38   :  { %v179_v21 = vadd.s32 %v178_v18, %v168_v10  ;;  %v100_v45 = vmul.f32 %v8112_v36, %v99_v40  ;;  %v5692_v12 = vor.u32 %v7637_v8, %v5691_v7  ;;  %v7701_v13 = vld [vmem:[#allocation6 + $0x5dc] sm:$0xf0] }
  0x39   :  { %v202_v24 = vadd.s32 %v201_v19, %v192_v15  ;;  %v6203_v14 = vld [vmem:[#allocation6 + $0x7c0] sm:$0xf]  ;;  %v5948_v18 = vor.u32 %v7701_v13, %v5947_v9 }
  0x3a   :  { %v180_v25 = vadd.s32 %v179_v21, %v170_v17  ;;  %v101_v48 = vadd.f32 %v8112_v36, %v100_v45  ;;  %v7765_v15 = vld [vmem:[#allocation6 + $0x7dc] sm:$0xf0]  ;;  %v8257_v17 = vmov 2   ;;  %3739 = vmatpush.bf16.msra.mxu1 %v5692_v12 }
  0x3b   :  { %v206_v27 = vadd.s32 1, %v202_v24  ;;  %v6204_v19 = vor.u32 %v7765_v15, %v6203_v14  ;;  %v7565_v21 = vld [vmem:[#allocation6 + $0x19c] sm:$0xf0]  ;;  %3752 = vmatpush.bf16.msra.mxu2 %v5948_v18 }
  0x3c   :  { %vm205_vm9 = vc.u32 %v180_v25, %v199_v22  ;;  %v204_v39 = vadd.s32 %v199_v22, %v180_v25  ;;  %v103_v52 = vsel %vm102_vm13, %v8112_v36, %v101_v48  ;;  %v5659_v22 = vld [vmem:[#allocation6 + $0x380] sm:$0xf] }
  0x3d   :  { %v207_v28 = vsel %vm205_vm9, %v206_v27, %v202_v24  ;;  %v104_v56 = vmul.f32 %v103_v52, %v8317_v1  ;;  %v5404_v24 = vor.u32 %v7565_v21, %v5403_v20  ;;  %v7629_v25 = vld [vmem:[#allocation6 + $0x39c] sm:$0xf0]  ;;  %3765 = vmatpush.bf16.msra.mxu3 %v6204_v19 }
  0x3e   :  { %v208_v29 = vadd.s32 %v207_v28, %v203_v26  ;;  %v5915_v26 = vld [vmem:[#allocation6 + $0x580] sm:$0xf] }
  0x3f   :  { %532 = vperm.xlu1 %8107, %v104_v56   ;;  %v7693_v27 = vld [vmem:[#allocation6 + $0x59c] sm:$0xf0]  ;;  %3727 = vmatpush.bf16.msra.mxu0 %v5404_v24 }
  0x40   :  { %v209_v30 = vadd.s32 536870912, %v208_v29  ;;  %v5627_v38 = vld [vmem:[#allocation6 + $0x340] sm:$0xf] }
  0x41   :  { %v7685_v40 = vld [vmem:[#allocation6 + $0x55c] sm:$0xf0] }
  0x42   :  { %v210_v0 = vshrl.u32 %v209_v30, 30  ;;  %v5660_v30 = vor.u32 %v7629_v25, %v5659_v22  ;;  %v7749_v45 = vld [vmem:[#allocation6 + $0x75c] sm:$0xf0] }
  0x43   :  { %v5307_v4 = vld [vmem:[#allocation6 + $0xc0] sm:$0xf] }
  0x44   :  { %v211_v31 = vshll.u32 %v210_v0, 30  ;;  %v234_v44 = vsub.s32 4, %v210_v0  ;;  %3740 = vmatpush.bf16.msra.mxu1 %v5660_v30  ;;  %v7541_v5 = vld [vmem:[#allocation6 + $0xdc] sm:$0xf0] }
  0x45   :  { %v7605_v7 = vld [vmem:[#allocation6 + $0x2dc] sm:$0xf0]  ;;  %v5308_v14 = vor.u32 %v7541_v5, %v5307_v4 }
  0x46   :  { %v212_v32 = vsub.s32 %v208_v29, %v211_v31  ;;  %v235_v51 = vsel %vm112_vm12, %v234_v44, %v210_v0  ;;  %v5916_v0 = vor.u32 %v7693_v27, %v5915_v26  ;;  %v6171_v31 = vld [vmem:[#allocation6 + $0x780] sm:$0xf] }
  0x47   :  { %v237_v59 = vsel %vm8368_vm14, 0, %v235_v51  ;;  %8108 = vset.pattern.permute.xlu1 %v8257_v17  ;;  %v6139_v44 = vld [vmem:[#allocation6 + $0x740] sm:$0xf] }
  0x48   :  { %vm213_vm10 = vcmp.lt.s32.totalorder %v212_v32, 0  ;;  %v214_v34 = vsub.s32 0, %v212_v32  ;;  %v474_v60 = vadd.s32 3, %v237_v59  ;;  %v8374_v63 = vand.u32 3, %v237_v59  ;;  %577 = vperm.xlu1 %8108, %v8317_v1   ;;  %3753 = vmatpush.bf16.msra.mxu2 %v5916_v0  ;;  %v7613_v51 = vld [vmem:[#allocation6 + $0x31c] sm:$0xf0] }
  0x49   :  { %v6140_v48 = vor.u32 %v7749_v45, %v6139_v44  ;;  %v7741_v59 = vld [vmem:[#allocation6 + $0x71c] sm:$0xf0] }
  0x4a   :  { %v215_v11 = vsel %vm213_vm10, %v214_v34, %v212_v32  ;;  %v8376_v2 = vand.u32 3, %v474_v60  ;;  %v7557_v34 = vld [vmem:[#allocation6 + $0x15c] sm:$0xf0]  ;;  %vm259_vm15 = vcmp.eq.s32.totalorder %v8374_v63, 2  ;;  %vm256_vm0 = vcmp.eq.s32.totalorder %v8374_v63, 0 }
  0x4b   :  { %v216_v35 = vclz %v215_v11  ;;  %vm255_vm1 = vcmp.lt.s32.totalorder %v8374_v63, 2  ;;  %v5819_v8 = vld [vmem:[#allocation6 + $0x4c0] sm:$0xf] }
  0x4c   :  { %v7669_v9 = vld [vmem:[#allocation6 + $0x4dc] sm:$0xf0]  ;;  %vm476_vm2 = vcmp.lt.s32.totalorder %v8376_v2, 2  ;;  %vm477_vm4 = vcmp.eq.s32.totalorder %v8376_v2, 0  ;;  %vm480_vm5 = vcmp.eq.s32.totalorder %v8376_v2, 2 }
  0x4d   :  { %v5204_v37 = vadd.s32 4294967294, %v216_v35  ;;  %v6075_v15 = vld [vmem:[#allocation6 + $0x6c0] sm:$0xf]  ;;  %v5820_v25 = vor.u32 %v7669_v9, %v5819_v8 }
  0x4e   :  { %v7733_v18 = vld [vmem:[#allocation6 + $0x6dc] sm:$0xf0] }
  0x4f   :  { %vm5205_vm11 = vcmp.lt.s32.totalorder %v5204_v37, 0  ;;  %v5275_v20 = vld [vmem:[#allocation6 + $0x80] sm:$0xf]  ;;  %v6076_v26 = vor.u32 %v7733_v18, %v6075_v15 }
  0x50   :  { %v219_v23 = vsel %vm5205_vm11, 0, %v5204_v37  ;;  %v5372_v37 = vor.u32 %v7557_v34, %v5371_v33  ;;  %v5531_v21 = vld [vmem:[#allocation6 + $0x280] sm:$0xf] }
  0x51   :  { %v220_v41 = vsub.s32 32, %v219_v23  ;;  %v221_v42 = vshll.u32 %v212_v32, %v219_v23  ;;  %v224_v43 = vsub.s32 4294967266, %v219_v23  ;;  %v7757_v32 = vld [vmem:[#allocation6 + $0x79c] sm:$0xf0] }
  0x52   :  { %v6172_v36 = vor.u32 %v7757_v32, %v6171_v31  ;;  %v5883_v23 = vld [vmem:[#allocation6 + $0x540] sm:$0xf]  ;;  %3728 = vmatpush.bf16.msra.mxu0 %v5372_v37 }
  0x53   :  { %v222_v46 = vshrl.u32 %v204_v39, %v220_v41  ;;  %v225_v47 = vadd.s32 127, %v224_v43  ;;  %v7621_v39 = vld [vmem:[#allocation6 + $0x35c] sm:$0xf0] }
  0x54   :  { %3766 = vmatpush.bf16.msra.mxu3 %v6172_v36  ;;  %v5628_v43 = vor.u32 %v7621_v39, %v5627_v38  ;;  %v7597_v27 = vld [vmem:[#allocation6 + $0x29c] sm:$0xf0] }
  0x55   :  { %v223_v49 = vor.u32 %v222_v46, %v221_v42  ;;  %v226_v50 = vshll.u32 %v225_v47, 23  ;;  %v5339_v46 = vld [vmem:[#allocation6 + $0x100] sm:$0xf]  ;;  %v5884_v47 = vor.u32 %v7685_v40, %v5883_v23 }
  0x56   :  { %3741 = vmatpush.bf16.msra.mxu1 %v5628_v43  ;;  %v6043_v30 = vld [vmem:[#allocation6 + $0x680] sm:$0xf] }
  0x57   :  { %v227_v53 = vor.u32 4788187, %v226_v50  ;;  %v230_v54 = vcvt.s32.f32 %v223_v49  ;;  %v7549_v49 = vld [vmem:[#allocation6 + $0x11c] sm:$0xf0]  ;;  %3754 = vmatpush.bf16.msra.mxu2 %v5884_v47 }
  0x58   :  { %v5595_v50 = vld [vmem:[#allocation6 + $0x300] sm:$0xf]  ;;  %3767 = vmatpush.bf16.msra.mxu3 %v6140_v48 }
  0x59   :  { %v228_v58 = vand.u32 2147483647, %v227_v53  ;;  %v5596_v56 = vor.u32 %v7613_v51, %v5595_v50  ;;  %v7725_v0 = vld [vmem:[#allocation6 + $0x69c] sm:$0xf0] }
  0x5a   :  { %v5243_v34 = vld [vmem:[#allocation6 + $0x40] sm:$0xf]  ;;  %v6044_v37 = vor.u32 %v7725_v0, %v6043_v30 }
  0x5b   :  { %v231_v61 = vmul.f32 %v230_v54, %v228_v58  ;;  %v5340_v54 = vor.u32 %v7549_v49, %v5339_v46  ;;  %v6107_v58 = vld [vmem:[#allocation6 + $0x700] sm:$0xf]  ;;  %3742 = vmatpush.bf16.msra.mxu1 %v5596_v56 }
  0x5c   :  { %v6108_v6 = vor.u32 %v7741_v59, %v6107_v58  ;;  %v5499_v38 = vld [vmem:[#allocation6 + $0x240] sm:$0xf] }
  0x5d   :  { %v232_v62 = vxor.u32 2147483648, %v231_v61  ;;  %3729 = vmatpush.bf16.msra.mxu0 %v5340_v54  ;;  %v7589_v39 = vld [vmem:[#allocation6 + $0x25c] sm:$0xf0] }
  0x5e   :  { %3768 = vmatpush.bf16.msra.mxu3 %v6108_v6  ;;  %v5755_v23 = vld [vmem:[#allocation6 + $0x440] sm:$0xf]  ;;  %v5500_v49 = vor.u32 %v7589_v39, %v5499_v38 }
  0x5f   :  { %v233_v3 = vsel %vm112_vm12, %v232_v62, %v231_v61  ;;  %v5852_v62 = vor.u32 %v7677_v57, %v5851_v55  ;;  %v7717_v43 = vld [vmem:[#allocation6 + $0x65c] sm:$0xf0] }
  0x60   :  { %v8383_v10 = vsel %vm8368_vm14, %v8317_v1, %v233_v3  ;;  %v5563_v3 = vld [vmem:[#allocation6 + $0x2c0] sm:$0xf] }
  0x61   :  { %v238_v16 = vmul.f32 %v8383_v10, %v8383_v10  ;;  %v5564_v19 = vor.u32 %v7605_v7, %v5563_v3  ;;  %3755 = vmatpush.bf16.msra.mxu2 %v5852_v62  ;;  %3730 = vmatpush.bf16.msra.mxu0 %v5308_v14  ;;  %v5211_v48 = vld [vmem:[#allocation6] sm:$0xf] }
  0x62   :  { %3769 = vmatpush.bf16.msra.mxu3 %v6076_v26  ;;  %v7517_v63 = vld [vmem:[#allocation6 + $0x1c] sm:$0xf0] }
  0x63   :  { %v239_v28 = vmul.f32 -0.001358992, %v238_v16  ;;  %v246_v29 = vmul.f32 -0.00019511016, %v238_v16  ;;  %3743 = vmatpush.bf16.msra.mxu1 %v5564_v19  ;;  %v5467_v50 = vld [vmem:[#allocation6 + $0x200] sm:$0xf] }
  0x64   :  { %v7581_v51 = vld [vmem:[#allocation6 + $0x21c] sm:$0xf0] }
  0x65   :  { %v240_v11 = vadd.f32 0.041655596, %v239_v28  ;;  %v247_v35 = vadd.f32 0.008332121, %v246_v29  ;;  %v5787_v28 = vld [vmem:[#allocation6 + $0x480] sm:$0xf]  ;;  %3756 = vmatpush.bf16.msra.mxu2 %v5820_v25  ;;  %v5468_v3 = vor.u32 %v7581_v51, %v5467_v50 }
  0x66   :  { %v7661_v29 = vld [vmem:[#allocation6 + $0x49c] sm:$0xf0]  ;;  %3770 = vmatpush.bf16.msra.mxu3 %v6044_v37 }
  0x67   :  { %v241_v41 = vmul.f32 %v240_v11, %v238_v16  ;;  %v248_v42 = vmul.f32 %v247_v35, %v238_v16  ;;  %v7525_v11 = vld [vmem:[#allocation6 + $0x5c] sm:$0xf0]  ;;  %v5788_v36 = vor.u32 %v7661_v29, %v5787_v28 }
  0x68   :  { %v5244_v47 = vor.u32 %v7525_v11, %v5243_v34  ;;  %v5723_v54 = vld [vmem:[#allocation6 + $0x400] sm:$0xf] }
  0x69   :  { %v242_v52 = vadd.f32 -0.4999988, %v241_v41  ;;  %v249_v53 = vadd.f32 -0.16666654, %v248_v42  ;;  %v7653_v41 = vld [vmem:[#allocation6 + $0x45c] sm:$0xf0]  ;;  %3757 = vmatpush.bf16.msra.mxu2 %v5788_v36 }
  0x6a   :  { %v6011_v42 = vld [vmem:[#allocation6 + $0x640] sm:$0xf] }
  0x6b   :  { %v243_v60 = vmul.f32 %v242_v52, %v238_v16  ;;  %v250_v61 = vmul.f32 %v249_v53, %v238_v16  ;;  %v7533_v16 = vld [vmem:[#allocation6 + $0x9c] sm:$0xf0]  ;;  %v5756_v52 = vor.u32 %v7653_v41, %v5755_v23  ;;  %v6012_v53 = vor.u32 %v7717_v43, %v6011_v42 }
  0x6c   :  { %v5276_v33 = vor.u32 %v7533_v16, %v5275_v20  ;;  %v7645_v55 = vld [vmem:[#allocation6 + $0x41c] sm:$0xf0] }
  0x6d   :  { %v244_v12 = vadd.f32 1.0, %v243_v60  ;;  %v251_v13 = vadd.f32 1.0, %v250_v61  ;;  %v5979_v56 = vld [vmem:[#allocation6 + $0x600] sm:$0xf]  ;;  %v5212_v61 = vor.u32 %v7517_v63, %v5211_v48  ;;  %3758 = vmatpush.bf16.msra.mxu2 %v5756_v52  ;;  %3771 = vmatpush.bf16.msra.mxu3 %v6012_v53  ;;  %v5724_v2 = vor.u32 %v7645_v55, %v5723_v54 }
  0x6e   :  { %3731 = vmatpush.bf16.msra.mxu0 %v5276_v33  ;;  %v7709_v58 = vld [vmem:[#allocation6 + $0x61c] sm:$0xf0] }
  0x6f   :  { %v252_v22 = vmul.f32 %v251_v13, %v8383_v10  ;;  %v260_v24 = vxor.u32 2147483648, %v244_v12  ;;  %v5532_v10 = vor.u32 %v7597_v27, %v5531_v21  ;;  %v6459_v59 = vld [vmem:[#allocation6 + $0x9c0] sm:$0xf] }
  0x70   :  { %v7829_v60 = vld [vmem:[#allocation6 + $0x9dc] sm:$0xf0] }
  0x71   :  { %v257_v31 = vxor.u32 2147483648, %v252_v22  ;;  %v261_v32 = vsel %vm259_vm15, %v260_v24, %v252_v22  ;;  %v482_v46 = vsel %vm480_vm5, %v260_v24, %v252_v22  ;;  %3744 = vmatpush.bf16.msra.mxu1 %v5532_v10  ;;  %v6715_v62 = vld [vmem:[#allocation6 + $0xbc0] sm:$0xf]  ;;  %v6460_v13 = vor.u32 %v7829_v60, %v6459_v59  ;;  %3759 = vmatpush.bf16.msra.mxu2 %v5724_v2  ;;  %v8418_v60 = vld [vmem:[#allocation2 + $0x10] sm:$0xff] }
  0x72   :  { %3732 = vmatpush.bf16.msra.mxu0 %v5244_v47  ;;  %v7893_v4 = vld [vmem:[#allocation6 + $0xbdc] sm:$0xf0] }
  0x73   :  { %v258_v35 = vsel %vm256_vm0, %v244_v12, %v257_v31  ;;  %v479_v45 = vsel %vm477_vm4, %v244_v12, %v257_v31  ;;  %v6971_v5 = vld [vmem:[#allocation6 + $0xdc0] sm:$0xf]  ;;  %v5980_v12 = vor.u32 %v7709_v58, %v5979_v56  ;;  %v6716_v14 = vor.u32 %v7893_v4, %v6715_v62  ;;  %v8420_v4 = vld [vmem:[#allocation2 + $0x18] sm:$0xff] }
  0x74   :  { %v262_v40 = vsel %vm255_vm1, %v258_v35, %v261_v32  ;;  %v483_v57 = vsel %vm476_vm2, %v479_v45, %v482_v46  ;;  %v7957_v6 = vld [vmem:[#allocation6 + $0xddc] sm:$0xf0] }
  0x75   :  { %v263_v44 = vsel %vm253_vm3, nan, %v262_v40  ;;  %3745 = vmatpush.bf16.msra.mxu1 %v5500_v49  ;;  %v7227_v7 = vld [vmem:[#allocation6 + $0xfc0] sm:$0xf]  ;;  %v484_v9 = vsel %vm253_vm3, nan, %v483_v57  ;;  %v6972_v19 = vor.u32 %v7957_v6, %v6971_v5  ;;  %3772 = vmatpush.bf16.msra.mxu3 %v5980_v12  ;;  %v277_v12 = vperm.slane %v8418_v60, 0 }
  0x76   :  { %266 = vperm.xlu0 %8106, %v263_v44   ;;  %v8021_v8 = vld [vmem:[#allocation6 + $0xfdc] sm:$0xf0]  ;;  %3733 = vmatpush.bf16.msra.mxu0 %v5212_v61  ;;  %v8414_v44 = vld [vmem:[#allocation2] sm:$0xff] }
  0x77   :  { %v6427_v15 = vld [vmem:[#allocation6 + $0x980] sm:$0xf]  ;;  %v7228_v20 = vor.u32 %v8021_v8, %v7227_v7  ;;  %3804 = vmatpush.bf16.msrb.mxu2 %v6972_v19  ;;  %v273_v5 = vperm.slane %v8414_v44, 0 }
  0x78   :  { %v7821_v18 = vld [vmem:[#allocation6 + $0x99c] sm:$0xf0] }
  0x79   :  { %v6683_v16 = vld [vmem:[#allocation6 + $0xb80] sm:$0xf]  ;;  %3746 = vmatpush.bf16.msra.mxu1 %v5468_v3  ;;  %v6428_v26 = vor.u32 %v7821_v18, %v6427_v15  ;;  %3817 = vmatpush.bf16.msrb.mxu3 %v7228_v20  ;;  %v274_v3 = vperm.slane %v8414_v44, 4  ;;  %v535_v15 = vperm.slane %v8414_v44, 2  ;;  %v536_v18 = vperm.slane %v8414_v44, 6 }
  0x7a   :  { %v7885_v21 = vld [vmem:[#allocation6 + $0xb9c] sm:$0xf0]  ;;  %3778 = vmatpush.bf16.msrb.mxu0 %v6460_v13  ;;  %v278_v13 = vperm.slane %v8418_v60, 4 }
  0x7b   :  { %v6939_v22 = vld [vmem:[#allocation6 + $0xd80] sm:$0xf]  ;;  %v6684_v27 = vor.u32 %v7885_v21, %v6683_v16  ;;  %v279_v21 = vperm.slane %v8420_v4, 0 }
  0x7c   :  { %v7949_v24 = vld [vmem:[#allocation6 + $0xd9c] sm:$0xf0] }
  0x7d   :  { %v7195_v25 = vld [vmem:[#allocation6 + $0xf80] sm:$0xf]  ;;  %3791 = vmatpush.bf16.msrb.mxu1 %v6716_v14  ;;  %v6940_v30 = vor.u32 %v7949_v24, %v6939_v22  ;;  %v280_v22 = vperm.slane %v8420_v4, 4 }
  0x7e   :  { %487 = vperm.xlu0 %8106, %v484_v9   ;;  %v8013_v1 = vld [vmem:[#allocation6 + $0xf9c] sm:$0xf0]  ;;  %3779 = vmatpush.bf16.msrb.mxu0 %v6428_v26 }
  0x7f   :  { %v6395_v28 = vld [vmem:[#allocation6 + $0x940] sm:$0xf]  ;;  %v7196_v0 = vor.u32 %v8013_v1, %v7195_v25  ;;  %3805 = vmatpush.bf16.msrb.mxu2 %v6940_v30 }
  0x80   :  { %v7813_v29 = vld [vmem:[#allocation6 + $0x95c] sm:$0xf0] }
  0x81   :  { %v6651_v31 = vld [vmem:[#allocation6 + $0xb40] sm:$0xf]  ;;  %3792 = vmatpush.bf16.msrb.mxu1 %v6684_v27  ;;  %v6396_v35 = vor.u32 %v7813_v29, %v6395_v28  ;;  %3818 = vmatpush.bf16.msrb.mxu3 %v7196_v0  ;;  %v8434_v27 = vperm.slane %v273_v5, 0  ;;  %v539_v28 = vperm.slane %v8418_v60, 2  ;;  %v540_v29 = vperm.slane %v8418_v60, 6 }
  0x82   :  { %v7877_v32 = vld [vmem:[#allocation6 + $0xb5c] sm:$0xf0] }
  0x83   :  { %v6907_v33 = vld [vmem:[#allocation6 + $0xd40] sm:$0xf]  ;;  %v6652_v36 = vor.u32 %v7877_v32, %v6651_v31  ;;  %3780 = vmatpush.bf16.msrb.mxu0 %v6396_v35  ;;  %v8438_v31 = vperm.slane %v274_v3, 0  ;;  %v541_v32 = vperm.slane %v8420_v4, 2 }
  0x84   :  { %v7941_v10 = vld [vmem:[#allocation6 + $0xd5c] sm:$0xf0] }
  0x85   :  { %v7163_v34 = vld [vmem:[#allocation6 + $0xf40] sm:$0xf]  ;;  %v6908_v37 = vor.u32 %v7941_v10, %v6907_v33  ;;  %3793 = vmatpush.bf16.msrb.mxu1 %v6652_v36  ;;  %v542_v33 = vperm.slane %v8420_v4, 6 }
  0x86   :  { %v8005_v11 = vld [vmem:[#allocation6 + $0xf5c] sm:$0xf0]  ;;  %8109 = vset.pattern.permute.xlu0 %v8257_v17 }
  0x87   :  { %v7164_v38 = vor.u32 %v8005_v11, %v7163_v34  ;;  %3806 = vmatpush.bf16.msrb.mxu2 %v6908_v37  ;;  %v6363_v39 = vld [vmem:[#allocation6 + $0x900] sm:$0xf]  ;;  %v551_v34 = vperm.slane %v535_v15, 2  ;;  %v552_v11 = vperm.slane %v536_v18, 2  ;;  %v8452_v15 = vperm.slane %v278_v13, 0 }
  0x88   :  { %v7805_v23 = vld [vmem:[#allocation6 + $0x91c] sm:$0xf0]  ;;  %v8454_v18 = vperm.slane %v279_v21, 0 }
  0x89   :  { %3819 = vmatpush.bf16.msrb.mxu3 %v7164_v38  ;;  %v6619_v40 = vld [vmem:[#allocation6 + $0xb00] sm:$0xf]  ;;  %v6364_v48 = vor.u32 %v7805_v23, %v6363_v39  ;;  %v555_v23 = vperm.slane %v539_v28, 2 }
  0x8a   :  { %v7869_v41 = vld [vmem:[#allocation6 + $0xb1c] sm:$0xf0] }
  0x8b   :  { %v6875_v42 = vld [vmem:[#allocation6 + $0xd00] sm:$0xf]  ;;  %v6620_v49 = vor.u32 %v7869_v41, %v6619_v40  ;;  %3781 = vmatpush.bf16.msrb.mxu0 %v6364_v48  ;;  %v556_v40 = vperm.slane %v540_v29, 2 }
  0x8c   :  { %v7933_v43 = vld [vmem:[#allocation6 + $0xd1c] sm:$0xf0] }
  0x8d   :  { %v7131_v45 = vld [vmem:[#allocation6 + $0xf00] sm:$0xf]  ;;  %v6876_v63 = vor.u32 %v7933_v43, %v6875_v42  ;;  %3794 = vmatpush.bf16.msrb.mxu1 %v6620_v49 }
  0x8e   :  { %v7997_v46 = vld [vmem:[#allocation6 + $0xf1c] sm:$0xf0] }
  0x8f   :  { %v6331_v47 = vld [vmem:[#allocation6 + $0x8c0] sm:$0xf]  ;;  %v7132_v50 = vor.u32 %v7997_v46, %v7131_v45  ;;  %3807 = vmatpush.bf16.msrb.mxu2 %v6876_v63 }
  0x90   :  { %v7797_v17 = vld [vmem:[#allocation6 + $0x8dc] sm:$0xf0] }
  0x91   :  { %v6587_v51 = vld [vmem:[#allocation6 + $0xac0] sm:$0xf]  ;;  %v6332_v56 = vor.u32 %v7797_v17, %v6331_v47  ;;  %3820 = vmatpush.bf16.msrb.mxu3 %v7132_v50 }
  0x92   :  { %v7861_v52 = vld [vmem:[#allocation6 + $0xadc] sm:$0xf0] }
  0x93   :  { %v6843_v53 = vld [vmem:[#allocation6 + $0xcc0] sm:$0xf]  ;;  %v6588_v57 = vor.u32 %v7861_v52, %v6587_v51  ;;  %3782 = vmatpush.bf16.msrb.mxu0 %v6332_v56  ;;  %v557_v56 = vperm.slane %v541_v32, 2 }
  0x94   :  { %v7925_v54 = vld [vmem:[#allocation6 + $0xcdc] sm:$0xf0] }
  0x95   :  { %v7099_v55 = vld [vmem:[#allocation6 + $0xec0] sm:$0xf]  ;;  %v6844_v61 = vor.u32 %v7925_v54, %v6843_v53  ;;  %3795 = vmatpush.bf16.msrb.mxu1 %v6588_v57  ;;  %v558_v57 = vperm.slane %v542_v33, 2 }
  0x96   :  { %v7989_v58 = vld [vmem:[#allocation6 + $0xedc] sm:$0xf0] }
  0x97   :  { %v8416_v59 = vld [vmem:[#allocation2 + $0x8] sm:$0xff]  ;;  %v7100_v62 = vor.u32 %v7989_v58, %v7099_v55  ;;  %3808 = vmatpush.bf16.msrb.mxu2 %v6844_v61 }
  0x98   :  { %v6299_v6 = vld [vmem:[#allocation6 + $0x880] sm:$0xf]  ;;  %v275_v9 = vperm.slane %v8416_v59, 0  ;;  %v276_v2 = vperm.slane %v8416_v59, 4  ;;  %v537_v19 = vperm.slane %v8416_v59, 2  ;;  %v538_v20 = vperm.slane %v8416_v59, 6 }
  0x99   :  { %v7789_v7 = vld [vmem:[#allocation6 + $0x89c] sm:$0xf0]  ;;  %3821 = vmatpush.bf16.msrb.mxu3 %v7100_v62  ;;  %v492_v28 = vperm.slane %v8416_v59, 1  ;;  %v493_v29 = vperm.slane %v8416_v59, 5 }
  0x9a   :  { %v6555_v8 = vld [vmem:[#allocation6 + $0xa80] sm:$0xf]  ;;  %v6300_v24 = vor.u32 %v7789_v7, %v6299_v6  ;;  %v553_v35 = vperm.slane %v537_v19, 2  ;;  %v554_v36 = vperm.slane %v538_v20, 2  ;;  %v291_v3 = vperm.slane %v275_v9, 0 }
  0x9b   :  { %v7853_v14 = vld [vmem:[#allocation6 + $0xa9c] sm:$0xf0]  ;;  %v292_v6 = vperm.slane %v276_v2, 0 }
  0x9c   :  { %v6811_v16 = vld [vmem:[#allocation6 + $0xc80] sm:$0xf]  ;;  %v6556_v25 = vor.u32 %v7853_v14, %v6555_v8  ;;  %3783 = vmatpush.bf16.msrb.mxu0 %v6300_v24  ;;  %v8448_v14 = vperm.slane %v277_v12, 0  ;;  %v8466_v24 = vld [vmem:[#allocation4] sm:$0xff]  ;;  %v8470_v12 = vperm.slane %v280_v22, 0 }
  0x9d   :  { %v7917_v1 = vld [vmem:[#allocation6 + $0xc9c] sm:$0xf0]  ;;  %v306_v22 = vperm.slane %v8466_v24, 0  ;;  %v309_v32 = vperm.slane %v8466_v24, 3  ;;  %v310_v33 = vperm.slane %v8466_v24, 4 }
  0x9e   :  { %v7067_v26 = vld [vmem:[#allocation6 + $0xe80] sm:$0xf]  ;;  %v6812_v30 = vor.u32 %v7917_v1, %v6811_v16  ;;  %3796 = vmatpush.bf16.msrb.mxu1 %v6556_v25  ;;  %v490_v1 = vperm.slane %v8414_v44, 1 }
  0x9f   :  { %v7981_v0 = vld [vmem:[#allocation6 + $0xe9c] sm:$0xf0] }
  0xa0   :  { %v7068_v10 = vor.u32 %v7981_v0, %v7067_v26  ;;  %3809 = vmatpush.bf16.msrb.mxu2 %v6812_v30  ;;  %v6267_v37 = vld [vmem:[#allocation6 + $0x840] sm:$0xf]  ;;  %v491_v26 = vperm.slane %v8414_v44, 5  ;;  %v307_v30 = vperm.slane %v8466_v24, 1  ;;  %v308_v0 = vperm.slane %v8466_v24, 2 }
  0xa1   :  { %v7781_v38 = vld [vmem:[#allocation6 + $0x85c] sm:$0xf0] }
  0xa2   :  { %3822 = vmatpush.bf16.msrb.mxu3 %v7068_v10  ;;  %v6523_v39 = vld [vmem:[#allocation6 + $0xa40] sm:$0xf]  ;;  %v6268_v47 = vor.u32 %v7781_v38, %v6267_v37  ;;  %v311_v10 = vperm.slane %v8466_v24, 5  ;;  %v495_v37 = vperm.slane %v8418_v60, 5  ;;  %v496_v38 = vperm.slane %v8420_v4, 1 }
  0xa3   :  { %v7845_v41 = vld [vmem:[#allocation6 + $0xa5c] sm:$0xf0] }
  0xa4   :  { %v6779_v42 = vld [vmem:[#allocation6 + $0xc40] sm:$0xf]  ;;  %v6524_v48 = vor.u32 %v7845_v41, %v6523_v39  ;;  %3784 = vmatpush.bf16.msrb.mxu0 %v6268_v47  ;;  %v497_v39 = vperm.slane %v8420_v4, 5  ;;  %v508_v41 = vperm.slane %v492_v28, 1  ;;  %v583_v47 = vperm.slane %v8416_v59, 7 }
  0xa5   :  { %v7909_v43 = vld [vmem:[#allocation6 + $0xc5c] sm:$0xf0] }
  0xa6   :  { %v7035_v45 = vld [vmem:[#allocation6 + $0xe40] sm:$0xf]  ;;  %v6780_v51 = vor.u32 %v7909_v43, %v6779_v42  ;;  %3797 = vmatpush.bf16.msrb.mxu1 %v6524_v48  ;;  %v509_v42 = vperm.slane %v493_v29, 1  ;;  %v580_v43 = vperm.slane %v8414_v44, 3  ;;  %v584_v48 = vperm.slane %v8418_v60, 3 }
  0xa7   :  { %v7973_v46 = vld [vmem:[#allocation6 + $0xe5c] sm:$0xf0] }
  0xa8   :  { %v6235_v49 = vld [vmem:[#allocation6 + $0x800] sm:$0xf]  ;;  %v7036_v52 = vor.u32 %v7973_v46, %v7035_v45  ;;  %3810 = vmatpush.bf16.msrb.mxu2 %v6780_v51  ;;  %v581_v45 = vperm.slane %v8414_v44, 7  ;;  %v582_v46 = vperm.slane %v8416_v59, 3  ;;  %v511_v59 = vperm.slane %v495_v37, 1 }
  0xa9   :  { %v7773_v63 = vld [vmem:[#allocation6 + $0x81c] sm:$0xf0]  ;;  %v8522_v37 = vld [vmem:[#allocation6 + $0x1e0] sm:$0xf0] }
  0xaa   :  { %v6491_v50 = vld [vmem:[#allocation6 + $0xa00] sm:$0xf]  ;;  %v6236_v58 = vor.u32 %v7773_v63, %v6235_v49  ;;  %3823 = vmatpush.bf16.msrb.mxu3 %v7036_v52  ;;  %v585_v49 = vperm.slane %v8418_v60, 7  ;;  %v586_v63 = vperm.slane %v8420_v4, 3 }
  0xab   :  { %v7837_v53 = vld [vmem:[#allocation6 + $0xa1c] sm:$0xf0] }
  0xac   :  { %v6747_v54 = vld [vmem:[#allocation6 + $0xc00] sm:$0xf]  ;;  %v6492_v61 = vor.u32 %v7837_v53, %v6491_v50  ;;  %3785 = vmatpush.bf16.msrb.mxu0 %v6236_v58  ;;  %v587_v50 = vperm.slane %v8420_v4, 7  ;;  %v599_v58 = vperm.slane %v583_v47, 3  ;;  %v8512_v4 = vperm.slane %v585_v49, 3 }
  0xad   :  { %v7901_v55 = vld [vmem:[#allocation6 + $0xc1c] sm:$0xf0] }
  0xae   :  { %v7003_v62 = vld [vmem:[#allocation6 + $0xe00] sm:$0xf]  ;;  %v6748_v7 = vor.u32 %v7901_v55, %v6747_v54  ;;  %3798 = vmatpush.bf16.msrb.mxu1 %v6492_v61  ;;  %v512_v54 = vperm.slane %v496_v38, 1  ;;  %v513_v55 = vperm.slane %v497_v39, 1  ;;  %v8510_v61 = vperm.slane %v584_v48, 3 }
  0xaf   :  { %v7965_v5 = vld [vmem:[#allocation6 + $0xe1c] sm:$0xf0]  ;;  %v8524_v38 = vld [vmem:[#allocation6 + $0x3c4] sm:$0xf] }
  0xb0   :  { %v7004_v8 = vor.u32 %v7965_v5, %v7003_v62  ;;  %3811 = vmatpush.bf16.msrb.mxu2 %v6748_v7  ;;  %v8516_v62 = vperm.slane %v587_v50, 3  ;;  %v8526_v39 = vld [vmem:[#allocation6 + $0x3e0] sm:$0xf0] }
  0xb1   :  { %v533_v17 = vpop.permute.xlu1 %532  ;;  %v5696_v47 = vor.u32 %v8524_v38, %v8526_v39 }
  0xb2   :  { %v8456_v19 = vmul.f32 %v551_v34, %v533_v17  ;;  %v8458_v9 = vmul.f32 %v552_v11, %v533_v17  ;;  %v8460_v20 = vmul.f32 %v553_v35, %v533_v17  ;;  %v8462_v2 = vmul.f32 %v554_v36, %v533_v17  ;;  %3824 = vmatpush.bf16.msrb.mxu3 %v7004_v8 }
  0xb3   :  { %v8464_v16 = vmul.f32 %v555_v23, %v533_v17  ;;  %v8472_v13 = vmul.f32 %v556_v40, %v533_v17  ;;  %v8474_v21 = vmul.f32 %v557_v56, %v533_v17  ;;  %v8476_v25 = vmul.f32 %v558_v57, %v533_v17 }
  0xb4   :  { %v312_v34 = vperm.slane %v8466_v24, 6  ;;  %v313_v11 = vperm.slane %v8466_v24, 7  ;;  %v494_v36 = vperm.slane %v8418_v60, 1  ;;  %v506_v23 = vperm.slane %v490_v1, 1  ;;  %v8520_v1 = vld [vmem:[#allocation6 + $0x1c4] sm:$0xf] }
  0xb5   :  { %v507_v40 = vperm.slane %v491_v26, 1  ;;  %v596_v56 = vperm.slane %v580_v43, 3  ;;  %v597_v60 = vperm.slane %v581_v45, 3  ;;  %v598_v57 = vperm.slane %v582_v46, 3  ;;  %v7689_v24 = vld [vmem:[#allocation6 + $0x584] sm:$0xf] }
  0xb6   :  { %v510_v53 = vperm.slane %v494_v36, 1  ;;  %v5440_v46 = vor.u32 %v8520_v1, %v8522_v37  ;;  %v7561_v1 = vld [vmem:[#allocation6 + $0x184] sm:$0xf] }
  0xe8   :  { %v8490_v35 = vpop.permute.xlu0 %266 }
  0xe9   :  { %v297_v17 = vmul.f32 %v8434_v27, %v8490_v35  ;;  %v298_v51 = vmul.f32 %v8438_v31, %v8490_v35  ;;  %v299_v44 = vmul.f32 %v291_v3, %v8490_v35  ;;  %v300_v52 = vmul.f32 %v292_v6, %v8490_v35  ;;  %v8518_v31 = vpop.permute.xlu1 %577 }
  0xea   :  { %v8514_v27 = vperm.slane %v586_v63, 3  ;;  %v604_v43 = vmul.f32 %v596_v56, %v8518_v31  ;;  %v608_v39 = vmul.f32 %v8510_v61, %v8518_v31 }
  0xeb   :  { %v322_v5 = vadd.f32 %v306_v22, %v297_v17  ;;  %v323_v3 = vadd.f32 %v307_v30, %v298_v51  ;;  %v324_v6 = vadd.f32 %v308_v0, %v299_v44  ;;  %v325_v7 = vadd.f32 %v309_v32, %v300_v52 }
  0xec   :  { %v605_v22 = vmul.f32 %v597_v60, %v8518_v31  ;;  %v606_v30 = vmul.f32 %v598_v57, %v8518_v31  ;;  %v607_v0 = vmul.f32 %v599_v58, %v8518_v31  ;;  %v7697_v57 = vld [vmem:[#allocation6 + $0x5c4] sm:$0xf] }
  0xed   :  { %v5949_v58 = vld [vmem:[#allocation6 + $0x5e0] sm:$0xf0] }
  0xf0   :  { %v488_v8 = vpop.permute.xlu0 %487 }
  0xf1   :  { %v514_v26 = vmul.f32 %v506_v23, %v488_v8  ;;  %v515_v28 = vmul.f32 %v507_v40, %v488_v8  ;;  %v516_v29 = vmul.f32 %v508_v41, %v488_v8  ;;  %v517_v36 = vmul.f32 %v509_v42, %v488_v8 }
  0xf2   :  { %v301_v41 = vmul.f32 %v8448_v14, %v8490_v35  ;;  %v302_v42 = vmul.f32 %v8452_v15, %v8490_v35  ;;  %v303_v14 = vmul.f32 %v8454_v18, %v8490_v35  ;;  %v304_v15 = vmul.f32 %v8470_v12, %v8490_v35  ;;  %v7761_v18 = vld [vmem:[#allocation6 + $0x7c4] sm:$0xf] }
  0xf3   :  { %v522_v32 = vadd.f32 %v514_v26, %v322_v5  ;;  %v523_v45 = vadd.f32 %v515_v28, %v323_v3  ;;  %v524_v23 = vadd.f32 %v516_v29, %v324_v6  ;;  %v525_v40 = vadd.f32 %v517_v36, %v325_v7  ;;  %v5405_v26 = vld [vmem:[#allocation6 + $0x1a0] sm:$0xf0] }
  0xf4   :  { %v518_v17 = vmul.f32 %v510_v53, %v488_v8  ;;  %v519_v51 = vmul.f32 %v511_v59, %v488_v8  ;;  %v6205_v53 = vld [vmem:[#allocation6 + $0x7e0] sm:$0xf0]  ;;  %v328_v59 = vadd.f32 %v312_v34, %v303_v14  ;;  %v329_v6 = vadd.f32 %v313_v11, %v304_v15 }
  0xf5   :  { %v567_v48 = vadd.f32 %v8456_v19, %v522_v32  ;;  %v568_v49 = vadd.f32 %v8458_v9, %v523_v45  ;;  %v569_v63 = vadd.f32 %v8460_v20, %v524_v23  ;;  %v570_v50 = vadd.f32 %v8462_v2, %v525_v40  ;;  %v7625_v28 = vld [vmem:[#allocation6 + $0x384] sm:$0xf] }
  0xf6   :  { %v326_v19 = vadd.f32 %v310_v33, %v301_v41  ;;  %v327_v9 = vadd.f32 %v311_v10, %v302_v42  ;;  %v520_v20 = vmul.f32 %v512_v54, %v488_v8  ;;  %v521_v2 = vmul.f32 %v513_v55, %v488_v8  ;;  %v5661_v29 = vld [vmem:[#allocation6 + $0x3a0] sm:$0xf0] }
  0xf7   :  { %v612_v44 = vadd.f32 %v604_v43, %v567_v48  ;;  %v613_v52 = vadd.f32 %v605_v22, %v568_v49  ;;  %v614_v56 = vadd.f32 %v606_v30, %v569_v63  ;;  %v615_v60 = vadd.f32 %v607_v0, %v570_v50  ;;  %v5917_v11 = vld [vmem:[#allocation6 + $0x5a0] sm:$0xf0] }
  0xf8   :  { %v526_v33 = vadd.f32 %v518_v17, %v326_v19  ;;  %v527_v7 = vadd.f32 %v519_v51, %v327_v9  ;;  %v528_v36 = vadd.f32 %v520_v20, %v328_v59  ;;  %v529_v37 = vadd.f32 %v521_v2, %v329_v6  ;;  %v7753_v30 = vld [vmem:[#allocation6 + $0x784] sm:$0xf] }
  0xf9   :  { %v620_v5 = vmax.f32 %v612_v44, 0.0  ;;  %v621_v3 = vmax.f32 %v613_v52, 0.0  ;;  %v622_v12 = vmax.f32 %v614_v56, 0.0  ;;  %v623_v35 = vmax.f32 %v615_v60, 0.0  ;;  %v6173_v0 = vld [vmem:[#allocation6 + $0x7a0] sm:$0xf0] }
  0xfa   :  { %v5952_v34 = vor.u32 %v7697_v57, %v5949_v58  ;;  %v6208_v38 = vor.u32 %v7761_v18, %v6205_v53  ;;  %v609_v43 = vmul.f32 %v8512_v4, %v8518_v31  ;;  %v610_v22 = vmul.f32 %v8514_v27, %v8518_v31  ;;  %v7553_v23 = vld [vmem:[#allocation6 + $0x144] sm:$0xf] }
  0xfb   :  { %v8556_v10 = vpack.c.bf16 %v620_v5, %v620_v5  ;;  %v8558_v54 = vpack.c.bf16 %v621_v3, %v621_v3  ;;  %v8560_v55 = vpack.c.bf16 %v622_v12, %v622_v12  ;;  %v8562_v8 = vpack.c.bf16 %v623_v35, %v623_v35  ;;  %v5373_v41 = vld [vmem:[#allocation6 + $0x160] sm:$0xf0] }
  0xfc   :  { %v611_v32 = vmul.f32 %v8516_v62, %v8518_v31  ;;  %v5408_v61 = vor.u32 %v7561_v1, %v5405_v26  ;;  %v5664_v45 = vor.u32 %v7625_v28, %v5661_v29  ;;  %v571_v4 = vadd.f32 %v8464_v16, %v526_v33  ;;  %v7617_v42 = vld [vmem:[#allocation6 + $0x344] sm:$0xf] }
  0xfd   :  { %3734 = vmatmul.bf16.vlgmr.msra.gmra.mxu0 %v8556_v10  ;;  %3747 = vmatmul.bf16.vlgmr.msra.gmra.mxu1 %v8558_v54  ;;  %v572_v27 = vadd.f32 %v8472_v13, %v527_v7  ;;  %v5920_v40 = vor.u32 %v7689_v24, %v5917_v11  ;;  %v5629_v48 = vld [vmem:[#allocation6 + $0x360] sm:$0xf0]  ;;  %v573_v49 = vadd.f32 %v8474_v21, %v528_v36 }
  0xfe   :  { %3760 = vmatmul.bf16.vlgmr.msra.gmra.mxu2 %v8560_v55  ;;  %3773 = vmatmul.bf16.vlgmr.msra.gmra.mxu3 %v8562_v8  ;;  %v574_v62 = vadd.f32 %v8476_v25, %v529_v37  ;;  %v6176_v31 = vor.u32 %v7753_v30, %v6173_v0  ;;  %v7681_v63 = vld [vmem:[#allocation6 + $0x544] sm:$0xf]  ;;  %v5376_v16 = vor.u32 %v7553_v23, %v5373_v41 }
  0xff   :  { %3830 = vmatpush.bf16.msra.mxu0 %v5440_v46  ;;  %3843 = vmatpush.bf16.msra.mxu1 %v5696_v47  ;;  %v5885_v50 = vld [vmem:[#allocation6 + $0x560] sm:$0xf0]  ;;  %v5632_v17 = vor.u32 %v7617_v42, %v5629_v48  ;;  %v616_v13 = vadd.f32 %v608_v39, %v571_v4  ;;  %v617_v46 = vadd.f32 %v609_v43, %v572_v27 }
 0x100   :  { %3856 = vmatpush.bf16.msra.mxu2 %v5952_v34  ;;  %3869 = vmatpush.bf16.msra.mxu3 %v6208_v38  ;;  %v7745_v14 = vld [vmem:[#allocation6 + $0x744] sm:$0xf]  ;;  %v5888_v47 = vor.u32 %v7681_v63, %v5885_v50  ;;  %v618_v52 = vadd.f32 %v610_v22, %v573_v49  ;;  %v619_v21 = vadd.f32 %v611_v32, %v574_v62 }
 0x101   :  { %v6141_v15 = vld [vmem:[#allocation6 + $0x760] sm:$0xf0]  ;;  %v624_v18 = vmax.f32 %v616_v13, 0.0  ;;  %v625_v5 = vmax.f32 %v617_v46, 0.0 }
 0x102   :  { %v7545_v51 = vld [vmem:[#allocation6 + $0x104] sm:$0xf]  ;;  %v6144_v25 = vor.u32 %v7745_v14, %v6141_v15  ;;  %v626_v59 = vmax.f32 %v618_v52, 0.0  ;;  %v627_v6 = vmax.f32 %v619_v21, 0.0 }
 0x103   :  { %3831 = vmatpush.bf16.msra.mxu0 %v5408_v61  ;;  %3844 = vmatpush.bf16.msra.mxu1 %v5664_v45  ;;  %v5341_v44 = vld [vmem:[#allocation6 + $0x120] sm:$0xf0]  ;;  %v8580_v34 = vpack.c.bf16 %v624_v18, %v624_v18  ;;  %v8582_v38 = vpack.c.bf16 %v625_v5, %v625_v5 }
 0x104   :  { %3857 = vmatpush.bf16.msra.mxu2 %v5920_v40  ;;  %3870 = vmatpush.bf16.msra.mxu3 %v6176_v31  ;;  %v7609_v56 = vld [vmem:[#allocation6 + $0x304] sm:$0xf]  ;;  %v5344_v3 = vor.u32 %v7545_v51, %v5341_v44  ;;  %v8584_v43 = vpack.c.bf16 %v626_v59, %v626_v59  ;;  %v8586_v22 = vpack.c.bf16 %v627_v6, %v627_v6 }
 0x105   :  { %v5597_v60 = vld [vmem:[#allocation6 + $0x320] sm:$0xf0] }
 0x106   :  { %v7673_v19 = vld [vmem:[#allocation6 + $0x504] sm:$0xf]  ;;  %v5600_v12 = vor.u32 %v7609_v56, %v5597_v60 }
 0x107   :  { %v5853_v9 = vld [vmem:[#allocation6 + $0x520] sm:$0xf0]  ;;  %3832 = vmatpush.bf16.msra.mxu0 %v5376_v16  ;;  %3845 = vmatpush.bf16.msra.mxu1 %v5632_v17 }
 0x108   :  { %v7737_v20 = vld [vmem:[#allocation6 + $0x704] sm:$0xf]  ;;  %3858 = vmatpush.bf16.msra.mxu2 %v5888_v47  ;;  %3871 = vmatpush.bf16.msra.mxu3 %v6144_v25  ;;  %v5856_v33 = vor.u32 %v7673_v19, %v5853_v9 }
 0x109   :  { %v6109_v2 = vld [vmem:[#allocation6 + $0x720] sm:$0xf0] }
 0x10a   :  { %v7537_v57 = vld [vmem:[#allocation6 + $0xc4] sm:$0xf]  ;;  %v6112_v7 = vor.u32 %v7737_v20, %v6109_v2 }
 0x10b   :  { %v5309_v58 = vld [vmem:[#allocation6 + $0xe0] sm:$0xf0]  ;;  %3833 = vmatpush.bf16.msra.mxu0 %v5344_v3  ;;  %3846 = vmatpush.bf16.msra.mxu1 %v5600_v12 }
 0x10c   :  { %v7601_v35 = vld [vmem:[#allocation6 + $0x2c4] sm:$0xf]  ;;  %v5312_v36 = vor.u32 %v7537_v57, %v5309_v58  ;;  %3859 = vmatpush.bf16.msra.mxu2 %v5856_v33  ;;  %3872 = vmatpush.bf16.msra.mxu3 %v6112_v7 }
 0x10d   :  { %v5565_v53 = vld [vmem:[#allocation6 + $0x2e0] sm:$0xf0]  ;;  %3786 = vmatmul.bf16.vlgmr.msrb.gmra.mxu0 %v8580_v34  ;;  %3799 = vmatmul.bf16.vlgmr.msrb.gmra.mxu1 %v8582_v38 }
 0x10e   :  { %v7665_v1 = vld [vmem:[#allocation6 + $0x4c4] sm:$0xf]  ;;  %v5568_v37 = vor.u32 %v7601_v35, %v5565_v53  ;;  %3812 = vmatmul.bf16.vlgmr.msrb.gmra.mxu2 %v8584_v43  ;;  %3825 = vmatmul.bf16.vlgmr.msrb.gmra.mxu3 %v8586_v22 }
 0x10f   :  { %v5821_v26 = vld [vmem:[#allocation6 + $0x4e0] sm:$0xf0]  ;;  %3834 = vmatpush.bf16.msra.mxu0 %v5312_v36 }
 0x110   :  { %v7729_v28 = vld [vmem:[#allocation6 + $0x6c4] sm:$0xf]  ;;  %v5824_v24 = vor.u32 %v7665_v1, %v5821_v26  ;;  %3847 = vmatpush.bf16.msra.mxu1 %v5568_v37 }
 0x111   :  { %v6077_v29 = vld [vmem:[#allocation6 + $0x6e0] sm:$0xf0] }
 0x112   :  { %v7529_v11 = vld [vmem:[#allocation6 + $0x84] sm:$0xf]  ;;  %v6080_v30 = vor.u32 %v7729_v28, %v6077_v29  ;;  %3860 = vmatpush.bf16.msra.mxu2 %v5824_v24 }
 0x113   :  { %v5277_v39 = vld [vmem:[#allocation6 + $0xa0] sm:$0xf0] }
 0x114   :  { %v7593_v0 = vld [vmem:[#allocation6 + $0x284] sm:$0xf]  ;;  %v5280_v27 = vor.u32 %v7529_v11, %v5277_v39  ;;  %3873 = vmatpush.bf16.msra.mxu3 %v6080_v30 }
 0x115   :  { %v5533_v32 = vld [vmem:[#allocation6 + $0x2a0] sm:$0xf0] }
 0x116   :  { %v7657_v61 = vld [vmem:[#allocation6 + $0x484] sm:$0xf]  ;;  %v5536_v40 = vor.u32 %v7593_v0, %v5533_v32  ;;  %3835 = vmatpush.bf16.msra.mxu0 %v5280_v27 }
 0x117   :  { %v5789_v45 = vld [vmem:[#allocation6 + $0x4a0] sm:$0xf0] }
 0x118   :  { %v7721_v23 = vld [vmem:[#allocation6 + $0x684] sm:$0xf]  ;;  %v5792_v48 = vor.u32 %v7657_v61, %v5789_v45  ;;  %3848 = vmatpush.bf16.msra.mxu1 %v5536_v40 }
 0x119   :  { %v6045_v4 = vld [vmem:[#allocation6 + $0x6a0] sm:$0xf0] }
 0x11a   :  { %v7521_v41 = vld [vmem:[#allocation6 + $0x44] sm:$0xf]  ;;  %v6048_v49 = vor.u32 %v7721_v23, %v6045_v4  ;;  %3861 = vmatpush.bf16.msra.mxu2 %v5792_v48 }
 0x11b   :  { %v5245_v42 = vld [vmem:[#allocation6 + $0x60] sm:$0xf0] }
 0x11c   :  { %v7585_v62 = vld [vmem:[#allocation6 + $0x244] sm:$0xf]  ;;  %v5248_v17 = vor.u32 %v7521_v41, %v5245_v42  ;;  %3874 = vmatpush.bf16.msra.mxu3 %v6048_v49 }
 0x11d   :  { %v5501_v31 = vld [vmem:[#allocation6 + $0x260] sm:$0xf0] }
 0x11e   :  { %v7649_v63 = vld [vmem:[#allocation6 + $0x444] sm:$0xf]  ;;  %v5504_v13 = vor.u32 %v7585_v62, %v5501_v31  ;;  %3836 = vmatpush.bf16.msra.mxu0 %v5248_v17 }
 0x11f   :  { %v5757_v50 = vld [vmem:[#allocation6 + $0x460] sm:$0xf0] }
 0x120   :  { %v7713_v14 = vld [vmem:[#allocation6 + $0x644] sm:$0xf]  ;;  %v5760_v44 = vor.u32 %v7649_v63, %v5757_v50  ;;  %3849 = vmatpush.bf16.msra.mxu1 %v5504_v13 }
 0x121   :  { %v6013_v15 = vld [vmem:[#allocation6 + $0x660] sm:$0xf0] }
 0x122   :  { %v7513_v16 = vld [vmem:[#allocation6 + $0x4] sm:$0xf]  ;;  %v6016_v52 = vor.u32 %v7713_v14, %v6013_v15  ;;  %3862 = vmatpush.bf16.msra.mxu2 %v5760_v44 }
 0x123   :  { %v5213_v46 = vld [vmem:[#allocation6 + $0x20] sm:$0xf0] }
 0x124   :  { %v7577_v47 = vld [vmem:[#allocation6 + $0x204] sm:$0xf]  ;;  %v5216_v58 = vor.u32 %v7513_v16, %v5213_v46  ;;  %3875 = vmatpush.bf16.msra.mxu3 %v6016_v52 }
 0x125   :  { %v5469_v51 = vld [vmem:[#allocation6 + $0x220] sm:$0xf0] }
 0x126   :  { %v7641_v21 = vld [vmem:[#allocation6 + $0x404] sm:$0xf]  ;;  %v5472_v18 = vor.u32 %v7577_v47, %v5469_v51  ;;  %3837 = vmatpush.bf16.msra.mxu0 %v5216_v58 }
 0x127   :  { %v5725_v25 = vld [vmem:[#allocation6 + $0x420] sm:$0xf0] }
 0x128   :  { %v7705_v56 = vld [vmem:[#allocation6 + $0x604] sm:$0xf]  ;;  %v5728_v35 = vor.u32 %v7641_v21, %v5725_v25  ;;  %3850 = vmatpush.bf16.msra.mxu1 %v5472_v18 }
 0x129   :  { %v5981_v60 = vld [vmem:[#allocation6 + $0x620] sm:$0xf0]  ;;  %3838 = vmatmul.bf16.vlgmr.msra.gmra.mxu0 %v8556_v10 }
 0x12a   :  { %v7825_v19 = vld [vmem:[#allocation6 + $0x9c4] sm:$0xf]  ;;  %v5984_v53 = vor.u32 %v7705_v56, %v5981_v60  ;;  %3863 = vmatpush.bf16.msra.mxu2 %v5728_v35 }
 0x12b   :  { %v6461_v9 = vld [vmem:[#allocation6 + $0x9e0] sm:$0xf0]  ;;  %3851 = vmatmul.bf16.vlgmr.msra.gmra.mxu1 %v8558_v54 }
 0x12c   :  { %v7889_v20 = vld [vmem:[#allocation6 + $0xbc4] sm:$0xf]  ;;  %v6464_v59 = vor.u32 %v7825_v19, %v6461_v9  ;;  %3876 = vmatpush.bf16.msra.mxu3 %v5984_v53 }
 0x12d   :  { %v6717_v2 = vld [vmem:[#allocation6 + $0xbe0] sm:$0xf0]  ;;  %3864 = vmatmul.bf16.vlgmr.msra.gmra.mxu2 %v8560_v55 }
 0x12e   :  { %v7953_v57 = vld [vmem:[#allocation6 + $0xdc4] sm:$0xf]  ;;  %v6720_v6 = vor.u32 %v7889_v20, %v6717_v2  ;;  %3882 = vmatpush.bf16.msrb.mxu0 %v6464_v59 }
 0x12f   :  { %v6973_v5 = vld [vmem:[#allocation6 + $0xde0] sm:$0xf0]  ;;  %3877 = vmatmul.bf16.vlgmr.msra.gmra.mxu3 %v8562_v8 }
 0x130   :  { %v8017_v3 = vld [vmem:[#allocation6 + $0xfc4] sm:$0xf]  ;;  %v6976_v1 = vor.u32 %v7953_v57, %v6973_v5  ;;  %3895 = vmatpush.bf16.msrb.mxu1 %v6720_v6 }
 0x131   :  { %v7229_v12 = vld [vmem:[#allocation6 + $0xfe0] sm:$0xf0] }
 0x132   :  { %v7817_v33 = vld [vmem:[#allocation6 + $0x984] sm:$0xf]  ;;  %v7232_v26 = vor.u32 %v8017_v3, %v7229_v12  ;;  %3908 = vmatpush.bf16.msrb.mxu2 %v6976_v1 }
 0x133   :  { %v6429_v7 = vld [vmem:[#allocation6 + $0x9a0] sm:$0xf0] }
 0x134   :  { %v7881_v28 = vld [vmem:[#allocation6 + $0xb84] sm:$0xf]  ;;  %v6432_v39 = vor.u32 %v7817_v33, %v6429_v7  ;;  %3921 = vmatpush.bf16.msrb.mxu3 %v7232_v26 }
 0x135   :  { %v6685_v29 = vld [vmem:[#allocation6 + $0xba0] sm:$0xf0] }
 0x136   :  { %v7945_v36 = vld [vmem:[#allocation6 + $0xd84] sm:$0xf]  ;;  %v6688_v30 = vor.u32 %v7881_v28, %v6685_v29  ;;  %3883 = vmatpush.bf16.msrb.mxu0 %v6432_v39 }
 0x137   :  { %v6941_v37 = vld [vmem:[#allocation6 + $0xda0] sm:$0xf0] }
 0x138   :  { %v8009_v24 = vld [vmem:[#allocation6 + $0xf84] sm:$0xf]  ;;  %v6944_v61 = vor.u32 %v7945_v36, %v6941_v37  ;;  %3896 = vmatpush.bf16.msrb.mxu1 %v6688_v30 }
 0x139   :  { %v7197_v11 = vld [vmem:[#allocation6 + $0xfa0] sm:$0xf0] }
 0x13a   :  { %v7809_v0 = vld [vmem:[#allocation6 + $0x944] sm:$0xf]  ;;  %v7200_v45 = vor.u32 %v8009_v24, %v7197_v11  ;;  %3909 = vmatpush.bf16.msrb.mxu2 %v6944_v61 }
 0x13b   :  { %v6397_v32 = vld [vmem:[#allocation6 + $0x960] sm:$0xf0] }
 0x13c   :  { %v7873_v23 = vld [vmem:[#allocation6 + $0xb44] sm:$0xf]  ;;  %v6400_v48 = vor.u32 %v7809_v0, %v6397_v32  ;;  %3922 = vmatpush.bf16.msrb.mxu3 %v7200_v45 }
 0x13d   :  { %v6653_v4 = vld [vmem:[#allocation6 + $0xb60] sm:$0xf0] }
 0x13e   :  { %v7937_v27 = vld [vmem:[#allocation6 + $0xd44] sm:$0xf]  ;;  %v6656_v49 = vor.u32 %v7873_v23, %v6653_v4  ;;  %3884 = vmatpush.bf16.msrb.mxu0 %v6400_v48 }
 0x13f   :  { %v6909_v40 = vld [vmem:[#allocation6 + $0xd60] sm:$0xf0] }
 0x140   :  { %v8001_v41 = vld [vmem:[#allocation6 + $0xf44] sm:$0xf]  ;;  %v6912_v63 = vor.u32 %v7937_v27, %v6909_v40  ;;  %3897 = vmatpush.bf16.msrb.mxu1 %v6656_v49 }
 0x141   :  { %v7165_v42 = vld [vmem:[#allocation6 + $0xf60] sm:$0xf0] }
 0x142   :  { %v7801_v62 = vld [vmem:[#allocation6 + $0x904] sm:$0xf]  ;;  %v7168_v50 = vor.u32 %v8001_v41, %v7165_v42  ;;  %3910 = vmatpush.bf16.msrb.mxu2 %v6912_v63  ;;  %v5443_v63 = vld [vmem:[#allocation6 + $0x1c8] sm:$0xf] }
 0x143   :  { %v6365_v31 = vld [vmem:[#allocation6 + $0x920] sm:$0xf0] }
 0x144   :  { %v7865_v14 = vld [vmem:[#allocation6 + $0xb04] sm:$0xf]  ;;  %v6368_v47 = vor.u32 %v7801_v62, %v6365_v31  ;;  %3923 = vmatpush.bf16.msrb.mxu3 %v7168_v50  ;;  %v7574_v50 = vld [vmem:[#allocation6 + $0x1e4] sm:$0xf0] }
 0x145   :  { %v6621_v15 = vld [vmem:[#allocation6 + $0xb20] sm:$0xf0] }
 0x146   :  { %v7929_v16 = vld [vmem:[#allocation6 + $0xd04] sm:$0xf]  ;;  %v6624_v51 = vor.u32 %v7865_v14, %v6621_v15  ;;  %3885 = vmatpush.bf16.msrb.mxu0 %v6368_v47  ;;  %v5699_v14 = vld [vmem:[#allocation6 + $0x3c8] sm:$0xf] }
 0x147   :  { %v6877_v17 = vld [vmem:[#allocation6 + $0xd20] sm:$0xf0]  ;;  %v7638_v15 = vld [vmem:[#allocation6 + $0x3e4] sm:$0xf0] }
 0x148   :  { %v7993_v13 = vld [vmem:[#allocation6 + $0xf04] sm:$0xf]  ;;  %v6880_v21 = vor.u32 %v7929_v16, %v6877_v17  ;;  %3898 = vmatpush.bf16.msrb.mxu1 %v6624_v51  ;;  %v5955_v16 = vld [vmem:[#allocation6 + $0x5c8] sm:$0xf] }
 0x149   :  { %v7133_v46 = vld [vmem:[#allocation6 + $0xf20] sm:$0xf0]  ;;  %v6211_v47 = vld [vmem:[#allocation6 + $0x7c8] sm:$0xf] }
 0x14a   :  { %v7793_v44 = vld [vmem:[#allocation6 + $0x8c4] sm:$0xf]  ;;  %v7136_v25 = vor.u32 %v7993_v13, %v7133_v46  ;;  %3911 = vmatpush.bf16.msrb.mxu2 %v6880_v21  ;;  %v7702_v46 = vld [vmem:[#allocation6 + $0x5e4] sm:$0xf0]  ;;  %v5444_v21 = vor.u32 %v7574_v50, %v5443_v63 }
 0x14b   :  { %v6333_v52 = vld [vmem:[#allocation6 + $0x8e0] sm:$0xf0]  ;;  %v7766_v51 = vld [vmem:[#allocation6 + $0x7e4] sm:$0xf0] }
 0x14c   :  { %v7857_v56 = vld [vmem:[#allocation6 + $0xac4] sm:$0xf]  ;;  %v6336_v57 = vor.u32 %v7793_v44, %v6333_v52  ;;  %3924 = vmatpush.bf16.msrb.mxu3 %v7136_v25  ;;  %v5700_v25 = vor.u32 %v7638_v15, %v5699_v14  ;;  %v5827_v63 = vld [vmem:[#allocation6 + $0x4c8] sm:$0xf] }
 0x14d   :  { %v6589_v60 = vld [vmem:[#allocation6 + $0xae0] sm:$0xf0]  ;;  %v7670_v50 = vld [vmem:[#allocation6 + $0x4e4] sm:$0xf0] }
 0x14e   :  { %v7921_v19 = vld [vmem:[#allocation6 + $0xcc4] sm:$0xf]  ;;  %v6592_v58 = vor.u32 %v7857_v56, %v6589_v60  ;;  %3886 = vmatpush.bf16.msrb.mxu0 %v6336_v57  ;;  %v5411_v56 = vld [vmem:[#allocation6 + $0x188] sm:$0xf] }
 0x14f   :  { %v6845_v9 = vld [vmem:[#allocation6 + $0xce0] sm:$0xf0]  ;;  %v7566_v60 = vld [vmem:[#allocation6 + $0x1a4] sm:$0xf0] }
 0x150   :  { %v7985_v20 = vld [vmem:[#allocation6 + $0xec4] sm:$0xf]  ;;  %v6848_v3 = vor.u32 %v7921_v19, %v6845_v9  ;;  %3899 = vmatpush.bf16.msrb.mxu1 %v6592_v58  ;;  %v5956_v19 = vor.u32 %v7702_v46, %v5955_v16  ;;  %v6212_v9 = vor.u32 %v7766_v51, %v6211_v47  ;;  %v5923_v57 = vld [vmem:[#allocation6 + $0x588] sm:$0xf]  ;;  %v5828_v47 = vor.u32 %v7670_v50, %v5827_v63 }
 0x151   :  { %v7101_v2 = vld [vmem:[#allocation6 + $0xee0] sm:$0xf0]  ;;  %v7694_v58 = vld [vmem:[#allocation6 + $0x5a4] sm:$0xf0] }
 0x152   :  { %v7785_v18 = vld [vmem:[#allocation6 + $0x884] sm:$0xf]  ;;  %v7104_v12 = vor.u32 %v7985_v20, %v7101_v2  ;;  %3912 = vmatpush.bf16.msrb.mxu2 %v6848_v3  ;;  %v5667_v20 = vld [vmem:[#allocation6 + $0x388] sm:$0xf]  ;;  %v5412_v3 = vor.u32 %v7566_v60, %v5411_v56 }
 0x153   :  { %v6301_v5 = vld [vmem:[#allocation6 + $0x8a0] sm:$0xf0]  ;;  %v7630_v2 = vld [vmem:[#allocation6 + $0x3a4] sm:$0xf0] }
 0x154   :  { %v7849_v35 = vld [vmem:[#allocation6 + $0xa84] sm:$0xf]  ;;  %v6304_v1 = vor.u32 %v7785_v18, %v6301_v5  ;;  %3925 = vmatpush.bf16.msrb.mxu3 %v7104_v12  ;;  %v6179_v18 = vld [vmem:[#allocation6 + $0x788] sm:$0xf]  ;;  %v5668_v12 = vor.u32 %v7630_v2, %v5667_v20 }
 0x155   :  { %v6557_v53 = vld [vmem:[#allocation6 + $0xaa0] sm:$0xf0]  ;;  %v7758_v5 = vld [vmem:[#allocation6 + $0x7a4] sm:$0xf0] }
 0x156   :  { %v7913_v59 = vld [vmem:[#allocation6 + $0xc84] sm:$0xf]  ;;  %v6560_v26 = vor.u32 %v7849_v35, %v6557_v53  ;;  %3887 = vmatpush.bf16.msrb.mxu0 %v6304_v1  ;;  %v5379_v35 = vld [vmem:[#allocation6 + $0x148] sm:$0xf] }
 0x157   :  { %v6813_v6 = vld [vmem:[#allocation6 + $0xca0] sm:$0xf0]  ;;  %v7558_v53 = vld [vmem:[#allocation6 + $0x164] sm:$0xf0] }
 0x158   :  { %v7977_v33 = vld [vmem:[#allocation6 + $0xe84] sm:$0xf]  ;;  %v6816_v36 = vor.u32 %v7913_v59, %v6813_v6  ;;  %3900 = vmatpush.bf16.msrb.mxu1 %v6560_v26  ;;  %v5924_v59 = vor.u32 %v7694_v58, %v5923_v57  ;;  %v6180_v6 = vor.u32 %v7758_v5, %v6179_v18  ;;  %v5891_v1 = vld [vmem:[#allocation6 + $0x548] sm:$0xf] }
 0x159   :  { %v7069_v7 = vld [vmem:[#allocation6 + $0xea0] sm:$0xf0]  ;;  %v7686_v26 = vld [vmem:[#allocation6 + $0x564] sm:$0xf0] }
 0x15a   :  { %v7777_v28 = vld [vmem:[#allocation6 + $0x844] sm:$0xf]  ;;  %v7072_v37 = vor.u32 %v7977_v33, %v7069_v7  ;;  %3913 = vmatpush.bf16.msrb.mxu2 %v6816_v36  ;;  %v5635_v33 = vld [vmem:[#allocation6 + $0x348] sm:$0xf]  ;;  %v5380_v36 = vor.u32 %v7558_v53, %v5379_v35 }
 0x15b   :  { %v6269_v29 = vld [vmem:[#allocation6 + $0x860] sm:$0xf0]  ;;  %v7622_v7 = vld [vmem:[#allocation6 + $0x364] sm:$0xf0] }
 0x15c   :  { %v7841_v24 = vld [vmem:[#allocation6 + $0xa44] sm:$0xf]  ;;  %v6272_v45 = vor.u32 %v7777_v28, %v6269_v29  ;;  %3926 = vmatpush.bf16.msrb.mxu3 %v7072_v37  ;;  %v6147_v28 = vld [vmem:[#allocation6 + $0x748] sm:$0xf]  ;;  %v5636_v37 = vor.u32 %v7622_v7, %v5635_v33 }
 0x15d   :  { %v6525_v11 = vld [vmem:[#allocation6 + $0xa60] sm:$0xf0]  ;;  %v7750_v29 = vld [vmem:[#allocation6 + $0x764] sm:$0xf0] }
 0x15e   :  { %v7905_v39 = vld [vmem:[#allocation6 + $0xc44] sm:$0xf]  ;;  %v6528_v23 = vor.u32 %v7841_v24, %v6525_v11  ;;  %3888 = vmatpush.bf16.msrb.mxu0 %v6272_v45  ;;  %v5347_v24 = vld [vmem:[#allocation6 + $0x108] sm:$0xf] }
 0x15f   :  { %v6781_v30 = vld [vmem:[#allocation6 + $0xc60] sm:$0xf0]  ;;  %v7550_v11 = vld [vmem:[#allocation6 + $0x124] sm:$0xf0] }
 0x160   :  { %v7969_v0 = vld [vmem:[#allocation6 + $0xe44] sm:$0xf]  ;;  %v6784_v41 = vor.u32 %v7905_v39, %v6781_v30  ;;  %3901 = vmatpush.bf16.msrb.mxu1 %v6528_v23  ;;  %v5892_v39 = vor.u32 %v7686_v26, %v5891_v1  ;;  %v6148_v30 = vor.u32 %v7750_v29, %v6147_v28  ;;  %v7678_v45 = vld [vmem:[#allocation6 + $0x524] sm:$0xf0] }
 0x161   :  { %v7037_v32 = vld [vmem:[#allocation6 + $0xe60] sm:$0xf0]  ;;  %v6115_v23 = vld [vmem:[#allocation6 + $0x708] sm:$0xf] }
 0x162   :  { %v7769_v61 = vld [vmem:[#allocation6 + $0x804] sm:$0xf]  ;;  %v7040_v42 = vor.u32 %v7969_v0, %v7037_v32  ;;  %3914 = vmatpush.bf16.msrb.mxu2 %v6784_v41  ;;  %v5603_v0 = vld [vmem:[#allocation6 + $0x308] sm:$0xf] }
 0x163   :  { %v6237_v4 = vld [vmem:[#allocation6 + $0x820] sm:$0xf0]  ;;  %v7614_v32 = vld [vmem:[#allocation6 + $0x324] sm:$0xf0] }
 0x164   :  { %v7833_v27 = vld [vmem:[#allocation6 + $0xa04] sm:$0xf]  ;;  %v6240_v17 = vor.u32 %v7769_v61, %v6237_v4  ;;  %3927 = vmatpush.bf16.msrb.mxu3 %v7040_v42  ;;  %v5859_v61 = vld [vmem:[#allocation6 + $0x508] sm:$0xf] }
 0x165   :  { %v6493_v40 = vld [vmem:[#allocation6 + $0xa20] sm:$0xf0]  ;;  %v7742_v4 = vld [vmem:[#allocation6 + $0x724] sm:$0xf0] }
 0x166   :  { %v7897_v48 = vld [vmem:[#allocation6 + $0xc04] sm:$0xf]  ;;  %v6496_v13 = vor.u32 %v7833_v27, %v6493_v40  ;;  %3889 = vmatpush.bf16.msrb.mxu0 %v6240_v17  ;;  %v5348_v27 = vor.u32 %v7550_v11, %v5347_v24  ;;  %v5604_v40 = vor.u32 %v7614_v32, %v5603_v0  ;;  %v5315_v41 = vld [vmem:[#allocation6 + $0xc8] sm:$0xf] }
 0x167   :  { %v6749_v49 = vld [vmem:[#allocation6 + $0xc20] sm:$0xf0]  ;;  %v7542_v42 = vld [vmem:[#allocation6 + $0xe4] sm:$0xf0] }
 0x168   :  { %v7961_v62 = vld [vmem:[#allocation6 + $0xe04] sm:$0xf]  ;;  %v6752_v44 = vor.u32 %v7897_v48, %v6749_v49  ;;  %3902 = vmatpush.bf16.msrb.mxu1 %v6496_v13  ;;  %v5860_v48 = vor.u32 %v7678_v45, %v5859_v61  ;;  %v6116_v49 = vor.u32 %v7742_v4, %v6115_v23  ;;  %v6083_v14 = vld [vmem:[#allocation6 + $0x6c8] sm:$0xf]  ;;  %v5316_v16 = vor.u32 %v7542_v42, %v5315_v41 }
 0x169   :  { %v7005_v31 = vld [vmem:[#allocation6 + $0xe20] sm:$0xf0]  ;;  %3890 = vmatmul.bf16.vlgmr.msrb.gmra.mxu0 %v8580_v34  ;;  %v7734_v15 = vld [vmem:[#allocation6 + $0x6e4] sm:$0xf0] }
 0x16a   :  { %v7008_v52 = vor.u32 %v7961_v62, %v7005_v31  ;;  %3915 = vmatpush.bf16.msrb.mxu2 %v6752_v44  ;;  %3934 = vmatpush.bf16.msra.mxu0 %v5444_v21  ;;  %v5571_v62 = vld [vmem:[#allocation6 + $0x2c8] sm:$0xf]  ;;  %v6084_v51 = vor.u32 %v7734_v15, %v6083_v14 }
 0x16b   :  { %3903 = vmatmul.bf16.vlgmr.msrb.gmra.mxu1 %v8582_v38  ;;  %v7606_v31 = vld [vmem:[#allocation6 + $0x2e4] sm:$0xf0] }
 0x16c   :  { %3928 = vmatpush.bf16.msrb.mxu3 %v7008_v52  ;;  %3947 = vmatpush.bf16.msra.mxu1 %v5700_v25  ;;  %v5572_v17 = vor.u32 %v7606_v31, %v5571_v62  ;;  %v5283_v13 = vld [vmem:[#allocation6 + $0x88] sm:$0xf] }
 0x16d   :  { %3916 = vmatmul.bf16.vlgmr.msrb.gmra.mxu2 %v8584_v43  ;;  %v7534_v46 = vld [vmem:[#allocation6 + $0xa4] sm:$0xf0] }
 0x16e   :  { %3960 = vmatpush.bf16.msra.mxu2 %v5956_v19  ;;  %3935 = vmatpush.bf16.msra.mxu0 %v5412_v3  ;;  %v5539_v44 = vld [vmem:[#allocation6 + $0x288] sm:$0xf]  ;;  %v5284_v19 = vor.u32 %v7534_v46, %v5283_v13 }
 0x16f   :  { %3929 = vmatmul.bf16.vlgmr.msrb.gmra.mxu3 %v8586_v22  ;;  %v7598_v52 = vld [vmem:[#allocation6 + $0x2a4] sm:$0xf0] }
 0x170   :  { %3973 = vmatpush.bf16.msra.mxu3 %v6212_v9  ;;  %3948 = vmatpush.bf16.msra.mxu1 %v5668_v12  ;;  %v5795_v21 = vld [vmem:[#allocation6 + $0x488] sm:$0xf]  ;;  %v5540_v9 = vor.u32 %v7598_v52, %v5539_v44 }
 0x171   :  { %v7662_v25 = vld [vmem:[#allocation6 + $0x4a4] sm:$0xf0] }
 0x172   :  { %3961 = vmatpush.bf16.msra.mxu2 %v5924_v59  ;;  %3936 = vmatpush.bf16.msra.mxu0 %v5380_v36  ;;  %v6051_v56 = vld [vmem:[#allocation6 + $0x688] sm:$0xf]  ;;  %v5796_v57 = vor.u32 %v7662_v25, %v5795_v21 }
 0x173   :  { %v7726_v60 = vld [vmem:[#allocation6 + $0x6a4] sm:$0xf0] }
 0x174   :  { %3974 = vmatpush.bf16.msra.mxu3 %v6180_v6  ;;  %3949 = vmatpush.bf16.msra.mxu1 %v5636_v37  ;;  %v5251_v20 = vld [vmem:[#allocation6 + $0x48] sm:$0xf]  ;;  %v6052_v58 = vor.u32 %v7726_v60, %v6051_v56 }
 0x175   :  { %v7526_v2 = vld [vmem:[#allocation6 + $0x64] sm:$0xf0] }
 0x176   :  { %3962 = vmatpush.bf16.msra.mxu2 %v5892_v39  ;;  %3937 = vmatpush.bf16.msra.mxu0 %v5348_v27  ;;  %v5507_v18 = vld [vmem:[#allocation6 + $0x248] sm:$0xf]  ;;  %v5252_v6 = vor.u32 %v7526_v2, %v5251_v20 }
 0x177   :  { %v7590_v5 = vld [vmem:[#allocation6 + $0x264] sm:$0xf0] }
 0x178   :  { %3975 = vmatpush.bf16.msra.mxu3 %v6148_v30  ;;  %3950 = vmatpush.bf16.msra.mxu1 %v5604_v40  ;;  %v5763_v3 = vld [vmem:[#allocation6 + $0x448] sm:$0xf]  ;;  %v5508_v33 = vor.u32 %v7590_v5, %v5507_v18 }
 0x179   :  { %v7654_v12 = vld [vmem:[#allocation6 + $0x464] sm:$0xf0] }
 0x17a   :  { %3963 = vmatpush.bf16.msra.mxu2 %v5860_v48  ;;  %3938 = vmatpush.bf16.msra.mxu0 %v5316_v16  ;;  %v6019_v35 = vld [vmem:[#allocation6 + $0x648] sm:$0xf]  ;;  %v5764_v28 = vor.u32 %v7654_v12, %v5763_v3 }
 0x17b   :  { %v7718_v53 = vld [vmem:[#allocation6 + $0x664] sm:$0xf0] }
 0x17c   :  { %3976 = vmatpush.bf16.msra.mxu3 %v6116_v49  ;;  %3951 = vmatpush.bf16.msra.mxu1 %v5572_v17  ;;  %v5219_v59 = vld [vmem:[#allocation6 + $0x8] sm:$0xf]  ;;  %v6020_v29 = vor.u32 %v7718_v53, %v6019_v35 }
 0x17d   :  { %v7518_v7 = vld [vmem:[#allocation6 + $0x24] sm:$0xf0] }
 0x17e   :  { %3964 = vmatpush.bf16.msra.mxu2 %v5828_v47  ;;  %3939 = vmatpush.bf16.msra.mxu0 %v5284_v19  ;;  %v5475_v1 = vld [vmem:[#allocation6 + $0x208] sm:$0xf]  ;;  %v5220_v45 = vor.u32 %v7518_v7, %v5219_v59 }
 0x17f   :  { %v7582_v26 = vld [vmem:[#allocation6 + $0x224] sm:$0xf0] }
 0x180   :  { %3977 = vmatpush.bf16.msra.mxu3 %v6084_v51  ;;  %3952 = vmatpush.bf16.msra.mxu1 %v5540_v9  ;;  %v5731_v36 = vld [vmem:[#allocation6 + $0x408] sm:$0xf]  ;;  %v5476_v23 = vor.u32 %v7582_v26, %v5475_v1 }
 0x181   :  { %v7646_v37 = vld [vmem:[#allocation6 + $0x424] sm:$0xf0] }
 0x182   :  { %3965 = vmatpush.bf16.msra.mxu2 %v5796_v57  ;;  %v5987_v24 = vld [vmem:[#allocation6 + $0x608] sm:$0xf]  ;;  %3940 = vmatpush.bf16.msra.mxu0 %v5252_v6  ;;  %v5732_v41 = vor.u32 %v7646_v37, %v5731_v36 }
 0x183   :  { %v7710_v11 = vld [vmem:[#allocation6 + $0x624] sm:$0xf0] }
 0x184   :  { %3978 = vmatpush.bf16.msra.mxu3 %v6052_v58  ;;  %v6467_v39 = vld [vmem:[#allocation6 + $0x9c8] sm:$0xf]  ;;  %3953 = vmatpush.bf16.msra.mxu1 %v5508_v33  ;;  %v5988_v42 = vor.u32 %v7710_v11, %v5987_v24 }
 0x185   :  { %v7830_v30 = vld [vmem:[#allocation6 + $0x9e4] sm:$0xf0] }
 0x186   :  { %v6723_v0 = vld [vmem:[#allocation6 + $0xbc8] sm:$0xf]  ;;  %3966 = vmatpush.bf16.msra.mxu2 %v5764_v28  ;;  %v6468_v48 = vor.u32 %v7830_v30, %v6467_v39  ;;  %3941 = vmatpush.bf16.msra.mxu0 %v5220_v45 }
 0x187   :  { %v7894_v32 = vld [vmem:[#allocation6 + $0xbe4] sm:$0xf0] }
 0x188   :  { %v6979_v61 = vld [vmem:[#allocation6 + $0xdc8] sm:$0xf]  ;;  %3979 = vmatpush.bf16.msra.mxu3 %v6020_v29  ;;  %v6724_v49 = vor.u32 %v7894_v32, %v6723_v0  ;;  %3954 = vmatpush.bf16.msra.mxu1 %v5476_v23 }
 0x189   :  { %v7958_v4 = vld [vmem:[#allocation6 + $0xde4] sm:$0xf0]  ;;  %3942 = vmatmul.bf16.vlgmr.msra.gmra.mxu0 %v8556_v10 }
 0x18a   :  { %v7235_v27 = vld [vmem:[#allocation6 + $0xfc8] sm:$0xf]  ;;  %v6980_v63 = vor.u32 %v7958_v4, %v6979_v61  ;;  %3967 = vmatpush.bf16.msra.mxu2 %v5732_v41  ;;  %3986 = vmatpush.bf16.msrb.mxu0 %v6468_v48 }
 0x18b   :  { %v8022_v40 = vld [vmem:[#allocation6 + $0xfe4] sm:$0xf0]  ;;  %3955 = vmatmul.bf16.vlgmr.msra.gmra.mxu1 %v8558_v54 }
 0x18c   :  { %v6435_v62 = vld [vmem:[#allocation6 + $0x988] sm:$0xf]  ;;  %v7236_v50 = vor.u32 %v8022_v40, %v7235_v27  ;;  %3980 = vmatpush.bf16.msra.mxu3 %v5988_v42  ;;  %3999 = vmatpush.bf16.msrb.mxu1 %v6724_v49 }
 0x18d   :  { %v7822_v31 = vld [vmem:[#allocation6 + $0x9a4] sm:$0xf0]  ;;  %3968 = vmatmul.bf16.vlgmr.msra.gmra.mxu2 %v8560_v55 }
 0x18e   :  { %v6691_v14 = vld [vmem:[#allocation6 + $0xb88] sm:$0xf]  ;;  %v6436_v47 = vor.u32 %v7822_v31, %v6435_v62  ;;  %4012 = vmatpush.bf16.msrb.mxu2 %v6980_v63 }
 0x18f   :  { %v7886_v15 = vld [vmem:[#allocation6 + $0xba4] sm:$0xf0]  ;;  %3981 = vmatmul.bf16.vlgmr.msra.gmra.mxu3 %v8562_v8 }
 0x190   :  { %v6947_v16 = vld [vmem:[#allocation6 + $0xd88] sm:$0xf]  ;;  %v6692_v51 = vor.u32 %v7886_v15, %v6691_v14  ;;  %4025 = vmatpush.bf16.msrb.mxu3 %v7236_v50  ;;  %3987 = vmatpush.bf16.msrb.mxu0 %v6436_v47 }
 0x191   :  { %v7950_v17 = vld [vmem:[#allocation6 + $0xda4] sm:$0xf0] }
 0x192   :  { %v7203_v13 = vld [vmem:[#allocation6 + $0xf88] sm:$0xf]  ;;  %v6948_v21 = vor.u32 %v7950_v17, %v6947_v16  ;;  %4000 = vmatpush.bf16.msrb.mxu1 %v6692_v51 }
 0x193   :  { %v8014_v46 = vld [vmem:[#allocation6 + $0xfa4] sm:$0xf0] }
 0x194   :  { %v6403_v44 = vld [vmem:[#allocation6 + $0x948] sm:$0xf]  ;;  %v7204_v25 = vor.u32 %v8014_v46, %v7203_v13  ;;  %4013 = vmatpush.bf16.msrb.mxu2 %v6948_v21 }
 0x195   :  { %v7814_v52 = vld [vmem:[#allocation6 + $0x964] sm:$0xf0] }
 0x196   :  { %v6659_v56 = vld [vmem:[#allocation6 + $0xb48] sm:$0xf]  ;;  %v6404_v57 = vor.u32 %v7814_v52, %v6403_v44  ;;  %4026 = vmatpush.bf16.msrb.mxu3 %v7204_v25 }
 0x197   :  { %v7878_v60 = vld [vmem:[#allocation6 + $0xb64] sm:$0xf0] }
 0x198   :  { %v6915_v19 = vld [vmem:[#allocation6 + $0xd48] sm:$0xf]  ;;  %v6660_v58 = vor.u32 %v7878_v60, %v6659_v56  ;;  %3988 = vmatpush.bf16.msrb.mxu0 %v6404_v57 }
 0x199   :  { %v7942_v9 = vld [vmem:[#allocation6 + $0xd64] sm:$0xf0] }
 0x19a   :  { %v7171_v20 = vld [vmem:[#allocation6 + $0xf48] sm:$0xf]  ;;  %v6916_v3 = vor.u32 %v7942_v9, %v6915_v19  ;;  %4001 = vmatpush.bf16.msrb.mxu1 %v6660_v58 }
 0x19b   :  { %v8006_v2 = vld [vmem:[#allocation6 + $0xf64] sm:$0xf0] }
 0x19c   :  { %v6371_v18 = vld [vmem:[#allocation6 + $0x908] sm:$0xf]  ;;  %v7172_v12 = vor.u32 %v8006_v2, %v7171_v20  ;;  %4014 = vmatpush.bf16.msrb.mxu2 %v6916_v3  ;;  %v7570_v3 = vld [vmem:[#allocation6 + $0x1cc] sm:$0xf] }
 0x19d   :  { %v7806_v5 = vld [vmem:[#allocation6 + $0x924] sm:$0xf0] }
 0x19e   :  { %v6627_v35 = vld [vmem:[#allocation6 + $0xb08] sm:$0xf]  ;;  %v6372_v1 = vor.u32 %v7806_v5, %v6371_v18  ;;  %4027 = vmatpush.bf16.msrb.mxu3 %v7172_v12  ;;  %v5445_v12 = vld [vmem:[#allocation6 + $0x1e8] sm:$0xf0] }
 0x19f   :  { %v7870_v53 = vld [vmem:[#allocation6 + $0xb24] sm:$0xf0] }
 0x1a0   :  { %v6883_v59 = vld [vmem:[#allocation6 + $0xd08] sm:$0xf]  ;;  %v6628_v26 = vor.u32 %v7870_v53, %v6627_v35  ;;  %3989 = vmatpush.bf16.msrb.mxu0 %v6372_v1  ;;  %v7634_v35 = vld [vmem:[#allocation6 + $0x3cc] sm:$0xf] }
 0x1a1   :  { %v7934_v6 = vld [vmem:[#allocation6 + $0xd24] sm:$0xf0]  ;;  %v5701_v53 = vld [vmem:[#allocation6 + $0x3e8] sm:$0xf0] }
 0x1a2   :  { %v7139_v33 = vld [vmem:[#allocation6 + $0xf08] sm:$0xf]  ;;  %v6884_v36 = vor.u32 %v7934_v6, %v6883_v59  ;;  %4002 = vmatpush.bf16.msrb.mxu1 %v6628_v26  ;;  %v7698_v59 = vld [vmem:[#allocation6 + $0x5cc] sm:$0xf] }
 0x1a3   :  { %v7998_v7 = vld [vmem:[#allocation6 + $0xf24] sm:$0xf0]  ;;  %v7762_v1 = vld [vmem:[#allocation6 + $0x7cc] sm:$0xf] }
 0x1a4   :  { %v6339_v28 = vld [vmem:[#allocation6 + $0x8c8] sm:$0xf]  ;;  %v7140_v37 = vor.u32 %v7998_v7, %v7139_v33  ;;  %4015 = vmatpush.bf16.msrb.mxu2 %v6884_v36  ;;  %v5957_v7 = vld [vmem:[#allocation6 + $0x5e8] sm:$0xf0]  ;;  %v5448_v36 = vor.u32 %v7570_v3, %v5445_v12 }
 0x1a5   :  { %v7798_v29 = vld [vmem:[#allocation6 + $0x8e4] sm:$0xf0]  ;;  %v6213_v26 = vld [vmem:[#allocation6 + $0x7e8] sm:$0xf0] }
 0x1a6   :  { %v6595_v24 = vld [vmem:[#allocation6 + $0xac8] sm:$0xf]  ;;  %v6340_v61 = vor.u32 %v7798_v29, %v6339_v28  ;;  %4028 = vmatpush.bf16.msrb.mxu3 %v7140_v37  ;;  %v5704_v37 = vor.u32 %v7634_v35, %v5701_v53  ;;  %v7538_v3 = vld [vmem:[#allocation6 + $0xcc] sm:$0xf] }
 0x1a7   :  { %v7862_v11 = vld [vmem:[#allocation6 + $0xae4] sm:$0xf0]  ;;  %v5317_v12 = vld [vmem:[#allocation6 + $0xe8] sm:$0xf0] }
 0x1a8   :  { %v6851_v39 = vld [vmem:[#allocation6 + $0xcc8] sm:$0xf]  ;;  %v6596_v45 = vor.u32 %v7862_v11, %v6595_v24  ;;  %3990 = vmatpush.bf16.msrb.mxu0 %v6340_v61  ;;  %v7562_v24 = vld [vmem:[#allocation6 + $0x18c] sm:$0xf] }
 0x1a9   :  { %v7926_v30 = vld [vmem:[#allocation6 + $0xce4] sm:$0xf0]  ;;  %v5413_v11 = vld [vmem:[#allocation6 + $0x1a8] sm:$0xf0] }
 0x1aa   :  { %v7107_v0 = vld [vmem:[#allocation6 + $0xec8] sm:$0xf]  ;;  %v6852_v27 = vor.u32 %v7926_v30, %v6851_v39  ;;  %4003 = vmatpush.bf16.msrb.mxu1 %v6596_v45  ;;  %v7626_v39 = vld [vmem:[#allocation6 + $0x38c] sm:$0xf]  ;;  %v5960_v30 = vor.u32 %v7698_v59, %v5957_v7  ;;  %v8604_v45 = vld [vmem:[#allocation7] sm:$0xff]  ;;  %v3761_v7 = vpop.f32.mrf.mxu2 }
 0x1ab   :  { %v7990_v32 = vld [vmem:[#allocation6 + $0xee4] sm:$0xf0]  ;;  %v7690_v61 = vld [vmem:[#allocation6 + $0x58c] sm:$0xf] }
 0x1ac   :  { %v6307_v23 = vld [vmem:[#allocation6 + $0x888] sm:$0xf]  ;;  %v7108_v40 = vor.u32 %v7990_v32, %v7107_v0  ;;  %4016 = vmatpush.bf16.msrb.mxu2 %v6852_v27  ;;  %v6216_v0 = vor.u32 %v7762_v1, %v6213_v26  ;;  %v5669_v32 = vld [vmem:[#allocation6 + $0x3a8] sm:$0xf0]  ;;  %v3774_v1 = vpop.f32.mrf.mxu3 }
 0x1ad   :  { %v7790_v4 = vld [vmem:[#allocation6 + $0x8a4] sm:$0xf0]  ;;  %v6181_v27 = vld [vmem:[#allocation6 + $0x7a8] sm:$0xf0] }
 0x1ae   :  { %v6563_v41 = vld [vmem:[#allocation6 + $0xa88] sm:$0xf]  ;;  %v6308_v63 = vor.u32 %v7790_v4, %v6307_v23  ;;  %4029 = vmatpush.bf16.msrb.mxu3 %v7108_v40  ;;  %v5925_v23 = vld [vmem:[#allocation6 + $0x5a8] sm:$0xf0]  ;;  %v5416_v40 = vor.u32 %v7562_v24, %v5413_v11  ;;  %v5320_v11 = vor.u32 %v7538_v3, %v5317_v12 }
 0x1af   :  { %v7854_v42 = vld [vmem:[#allocation6 + $0xaa4] sm:$0xf0]  ;;  %v7754_v4 = vld [vmem:[#allocation6 + $0x78c] sm:$0xf] }
 0x1b0   :  { %v6819_v48 = vld [vmem:[#allocation6 + $0xc88] sm:$0xf]  ;;  %v6564_v50 = vor.u32 %v7854_v42, %v6563_v41  ;;  %3991 = vmatpush.bf16.msrb.mxu0 %v6308_v63  ;;  %v5672_v41 = vor.u32 %v7626_v39, %v5669_v32  ;;  %v7554_v42 = vld [vmem:[#allocation6 + $0x14c] sm:$0xf] }
 0x1b1   :  { %v7918_v49 = vld [vmem:[#allocation6 + $0xca4] sm:$0xf0]  ;;  %v7618_v63 = vld [vmem:[#allocation6 + $0x34c] sm:$0xf] }
 0x1b2   :  { %v7075_v62 = vld [vmem:[#allocation6 + $0xe88] sm:$0xf]  ;;  %v6820_v16 = vor.u32 %v7918_v49, %v6819_v48  ;;  %4004 = vmatpush.bf16.msrb.mxu1 %v6564_v50  ;;  %v5381_v48 = vld [vmem:[#allocation6 + $0x168] sm:$0xf0]  ;;  %v1150_v49 = vperm.slane %v8604_v45, 0 }
 0x1b3   :  { %v7982_v31 = vld [vmem:[#allocation6 + $0xea4] sm:$0xf0]  ;;  %v5637_v50 = vld [vmem:[#allocation6 + $0x368] sm:$0xf0] }
 0x1b4   :  { %v6275_v14 = vld [vmem:[#allocation6 + $0x848] sm:$0xf]  ;;  %v7076_v17 = vor.u32 %v7982_v31, %v7075_v62  ;;  %4017 = vmatpush.bf16.msrb.mxu2 %v6820_v16  ;;  %v5928_v62 = vor.u32 %v7690_v61, %v5925_v23  ;;  %v6184_v31 = vor.u32 %v7754_v4, %v6181_v27  ;;  %v7746_v16 = vld [vmem:[#allocation6 + $0x74c] sm:$0xf] }
 0x1b5   :  { %v7782_v15 = vld [vmem:[#allocation6 + $0x864] sm:$0xf0]  ;;  %v7602_v59 = vld [vmem:[#allocation6 + $0x2cc] sm:$0xf] }
 0x1b6   :  { %v6531_v13 = vld [vmem:[#allocation6 + $0xa48] sm:$0xf]  ;;  %v6276_v25 = vor.u32 %v7782_v15, %v6275_v14  ;;  %4030 = vmatpush.bf16.msrb.mxu3 %v7076_v17  ;;  %v7682_v14 = vld [vmem:[#allocation6 + $0x54c] sm:$0xf] }
 0x1b7   :  { %v7846_v46 = vld [vmem:[#allocation6 + $0xa64] sm:$0xf0]  ;;  %v5893_v15 = vld [vmem:[#allocation6 + $0x568] sm:$0xf0] }
 0x1b8   :  { %v6787_v47 = vld [vmem:[#allocation6 + $0xc48] sm:$0xf]  ;;  %v6532_v56 = vor.u32 %v7846_v46, %v6531_v13  ;;  %3992 = vmatpush.bf16.msrb.mxu0 %v6276_v25  ;;  %v6149_v17 = vld [vmem:[#allocation6 + $0x768] sm:$0xf0]  ;;  %v3735_v13 = vpop.f32.mrf.mxu0  ;;  %v3748_v46 = vpop.f32.mrf.mxu1  ;;  %v5896_v25 = vor.u32 %v7682_v14, %v5893_v15 }
 0x1b9   :  { %v7910_v51 = vld [vmem:[#allocation6 + $0xc64] sm:$0xf0]  ;;  %v5829_v26 = vld [vmem:[#allocation6 + $0x4e8] sm:$0xf0] }
 0x1ba   :  { %v7043_v44 = vld [vmem:[#allocation6 + $0xe48] sm:$0xf]  ;;  %v6788_v20 = vor.u32 %v7910_v51, %v6787_v47  ;;  %4005 = vmatpush.bf16.msrb.mxu1 %v6532_v56  ;;  %v5384_v47 = vor.u32 %v7554_v42, %v5381_v48  ;;  %v5640_v51 = vor.u32 %v7618_v63, %v5637_v50  ;;  %v6152_v56 = vor.u32 %v7746_v16, %v6149_v17  ;;  %v7594_v4 = vld [vmem:[#allocation6 + $0x28c] sm:$0xf] }
 0x1bb   :  { %v7974_v52 = vld [vmem:[#allocation6 + $0xe64] sm:$0xf0]  ;;  %v5541_v27 = vld [vmem:[#allocation6 + $0x2a8] sm:$0xf0] }
 0x1bc   :  { %v6243_v21 = vld [vmem:[#allocation6 + $0x808] sm:$0xf]  ;;  %v7044_v2 = vor.u32 %v7974_v52, %v7043_v44  ;;  %4018 = vmatpush.bf16.msrb.mxu2 %v6788_v20  ;;  %v3736_v44 = vadd.f32 %v3735_v13, %v1150_v49  ;;  %v7546_v52 = vld [vmem:[#allocation6 + $0x10c] sm:$0xf]  ;;  %v3763_v13 = vpop.f32.mrf.mxu2 }
 0x1bd   :  { %v7774_v60 = vld [vmem:[#allocation6 + $0x824] sm:$0xf0]  ;;  %v7722_v42 = vld [vmem:[#allocation6 + $0x68c] sm:$0xf] }
 0x1be   :  { %v6499_v19 = vld [vmem:[#allocation6 + $0xa08] sm:$0xf]  ;;  %v6244_v6 = vor.u32 %v7774_v60, %v6243_v21  ;;  %4031 = vmatpush.bf16.msrb.mxu3 %v7044_v2  ;;  %v5349_v21 = vld [vmem:[#allocation6 + $0x128] sm:$0xf0]  ;;  %v3749_v20 = vadd.f32 %v3748_v46, %v3736_v44  ;;  %v3776_v46 = vpop.f32.mrf.mxu3 }
 0x1bf   :  { %v7838_v9 = vld [vmem:[#allocation6 + $0xa24] sm:$0xf0]  ;;  %v7610_v60 = vld [vmem:[#allocation6 + $0x30c] sm:$0xf] }
 0x1c0   :  { %v6755_v57 = vld [vmem:[#allocation6 + $0xc08] sm:$0xf]  ;;  %v6500_v33 = vor.u32 %v7838_v9, %v6499_v19  ;;  %3993 = vmatpush.bf16.msrb.mxu0 %v6244_v6  ;;  %v5605_v19 = vld [vmem:[#allocation6 + $0x328] sm:$0xf0]  ;;  %v3750_v24 = vpop.f32.mrf.mxu1 }
 0x1c1   :  { %v7902_v58 = vld [vmem:[#allocation6 + $0xc24] sm:$0xf0]  ;;  %v7674_v9 = vld [vmem:[#allocation6 + $0x50c] sm:$0xf] }
 0x1c2   :  { %v7011_v18 = vld [vmem:[#allocation6 + $0xe08] sm:$0xf]  ;;  %v6756_v28 = vor.u32 %v7902_v58, %v6755_v57  ;;  %4006 = vmatpush.bf16.msrb.mxu1 %v6500_v33  ;;  %v5861_v2 = vld [vmem:[#allocation6 + $0x528] sm:$0xf0] }
 0x1c3   :  { %v7966_v5 = vld [vmem:[#allocation6 + $0xe24] sm:$0xf0]  ;;  %3994 = vmatmul.bf16.vlgmr.msrb.gmra.mxu0 %v8580_v34  ;;  %v7738_v57 = vld [vmem:[#allocation6 + $0x70c] sm:$0xf]  ;;  %v5864_v35 = vor.u32 %v7674_v9, %v5861_v2 }
 0x1c4   :  { %v7012_v29 = vor.u32 %v7966_v5, %v7011_v18  ;;  %4019 = vmatpush.bf16.msrb.mxu2 %v6756_v28  ;;  %4038 = vmatpush.bf16.msra.mxu0 %v5448_v36  ;;  %v6117_v58 = vld [vmem:[#allocation6 + $0x728] sm:$0xf0]  ;;  %v5352_v18 = vor.u32 %v7546_v52, %v5349_v21  ;;  %v5608_v5 = vor.u32 %v7610_v60, %v5605_v19 }
 0x1c5   :  { %4007 = vmatmul.bf16.vlgmr.msrb.gmra.mxu1 %v8582_v38  ;;  %v6120_v53 = vor.u32 %v7738_v57, %v6117_v58  ;;  %v5573_v6 = vld [vmem:[#allocation6 + $0x2e8] sm:$0xf0]  ;;  %v3762_v36 = vadd.f32 %v3761_v7, %v3749_v20 }
 0x1c6   :  { %4032 = vmatpush.bf16.msrb.mxu3 %v7012_v29  ;;  %4051 = vmatpush.bf16.msra.mxu1 %v5704_v37  ;;  %v7666_v33 = vld [vmem:[#allocation6 + $0x4cc] sm:$0xf]  ;;  %v3737_v37 = vpop.f32.mrf.mxu0  ;;  %v5576_v39 = vor.u32 %v7602_v59, %v5573_v6 }
 0x1c7   :  { %4020 = vmatmul.bf16.vlgmr.msrb.gmra.mxu2 %v8584_v43  ;;  %v7730_v28 = vld [vmem:[#allocation6 + $0x6cc] sm:$0xf]  ;;  %v3775_v32 = vadd.f32 %v3774_v1, %v3762_v36  ;;  %v5832_v61 = vor.u32 %v7666_v33, %v5829_v26 }
 0x1c8   :  { %4064 = vmatpush.bf16.msra.mxu2 %v5960_v30  ;;  %4039 = vmatpush.bf16.msra.mxu0 %v5416_v40  ;;  %v6085_v29 = vld [vmem:[#allocation6 + $0x6e8] sm:$0xf0]  ;;  %v3800_v21 = vpop.f32.mrf.mxu1 }
 0x1c9   :  { %4033 = vmatmul.bf16.vlgmr.msrb.gmra.mxu3 %v8586_v22  ;;  %v7530_v30 = vld [vmem:[#allocation6 + $0x8c] sm:$0xf]  ;;  %v6088_v23 = vor.u32 %v7730_v28, %v6085_v29 }
 0x1ca   :  { %4077 = vmatpush.bf16.msra.mxu3 %v6216_v0  ;;  %4052 = vmatpush.bf16.msra.mxu1 %v5672_v41  ;;  %v5285_v0 = vld [vmem:[#allocation6 + $0xa8] sm:$0xf0] }
 0x1cb   :  { %v7658_v40 = vld [vmem:[#allocation6 + $0x48c] sm:$0xf]  ;;  %v5288_v49 = vor.u32 %v7530_v30, %v5285_v0  ;;  %v3813_v30 = vpop.f32.mrf.mxu2  ;;  %v3826_v0 = vpop.f32.mrf.mxu3 }
 0x1cc   :  { %4065 = vmatpush.bf16.msra.mxu2 %v5928_v62  ;;  %4040 = vmatpush.bf16.msra.mxu0 %v5384_v47  ;;  %v5797_v41 = vld [vmem:[#allocation6 + $0x4a8] sm:$0xf0]  ;;  %v5544_v62 = vor.u32 %v7594_v4, %v5541_v27 }
 0x1cd   :  { %v6053_v48 = vld [vmem:[#allocation6 + $0x6a8] sm:$0xf0]  ;;  %v5800_v50 = vor.u32 %v7658_v40, %v5797_v41 }
 0x1ce   :  { %4078 = vmatpush.bf16.msra.mxu3 %v6184_v31  ;;  %4053 = vmatpush.bf16.msra.mxu1 %v5640_v51  ;;  %v7522_v31 = vld [vmem:[#allocation6 + $0x4c] sm:$0xf]  ;;  %v6056_v14 = vor.u32 %v7722_v42, %v6053_v48  ;;  %v3787_v52 = vpop.f32.mrf.mxu0 }
 0x1cf   :  { %v5253_v63 = vld [vmem:[#allocation6 + $0x68] sm:$0xf0]  ;;  %v3788_v19 = vadd.f32 %v3787_v52, %v3775_v32 }
 0x1d0   :  { %4066 = vmatpush.bf16.msra.mxu2 %v5896_v25  ;;  %4041 = vmatpush.bf16.msra.mxu0 %v5352_v18  ;;  %v7586_v15 = vld [vmem:[#allocation6 + $0x24c] sm:$0xf]  ;;  %v3802_v41 = vpop.f32.mrf.mxu1 }
 0x1d1   :  { %v5509_v16 = vld [vmem:[#allocation6 + $0x268] sm:$0xf0]  ;;  %v3801_v12 = vadd.f32 %v3800_v21, %v3788_v19 }
 0x1d2   :  { %4079 = vmatpush.bf16.msra.mxu3 %v6152_v56  ;;  %4054 = vmatpush.bf16.msra.mxu1 %v5608_v5  ;;  %v7650_v17 = vld [vmem:[#allocation6 + $0x44c] sm:$0xf]  ;;  %v5256_v56 = vor.u32 %v7522_v31, %v5253_v63  ;;  %v5512_v60 = vor.u32 %v7586_v15, %v5509_v16 }
 0x1d3   :  { %v5765_v47 = vld [vmem:[#allocation6 + $0x468] sm:$0xf0]  ;;  %v3814_v27 = vadd.f32 %v3813_v30, %v3801_v12  ;;  %v3815_v19 = vpop.f32.mrf.mxu2 }
 0x1d4   :  { %4067 = vmatpush.bf16.msra.mxu2 %v5864_v35  ;;  %4042 = vmatpush.bf16.msra.mxu0 %v5320_v11  ;;  %v7714_v51 = vld [vmem:[#allocation6 + $0x64c] sm:$0xf]  ;;  %v5768_v57 = vor.u32 %v7650_v17, %v5765_v47 }
 0x1d5   :  { %v6021_v44 = vld [vmem:[#allocation6 + $0x668] sm:$0xf0] }
 0x1d6   :  { %4080 = vmatpush.bf16.msra.mxu3 %v6120_v53  ;;  %4055 = vmatpush.bf16.msra.mxu1 %v5576_v39  ;;  %v7514_v25 = vld [vmem:[#allocation6 + $0xc] sm:$0xf]  ;;  %v6024_v58 = vor.u32 %v7714_v51, %v6021_v44  ;;  %v3789_v40 = vpop.f32.mrf.mxu0 }
 0x1d7   :  { %v5221_v9 = vld [vmem:[#allocation6 + $0x28] sm:$0xf0] }
 0x1d8   :  { %4068 = vmatpush.bf16.msra.mxu2 %v5832_v61  ;;  %4043 = vmatpush.bf16.msra.mxu0 %v5288_v49  ;;  %v7578_v20 = vld [vmem:[#allocation6 + $0x20c] sm:$0xf]  ;;  %v5224_v1 = vor.u32 %v7514_v25, %v5221_v9  ;;  %v3828_v9 = vpop.f32.mrf.mxu3 }
 0x1d9   :  { %v5477_v2 = vld [vmem:[#allocation6 + $0x228] sm:$0xf0] }
 0x1da   :  { %4081 = vmatpush.bf16.msra.mxu3 %v6088_v23  ;;  %4056 = vmatpush.bf16.msra.mxu1 %v5544_v62  ;;  %v7642_v18 = vld [vmem:[#allocation6 + $0x40c] sm:$0xf]  ;;  %v5480_v26 = vor.u32 %v7578_v20, %v5477_v2  ;;  %v1151_v20 = vperm.slane %v8604_v45, 1 }
 0x1db   :  { %v5733_v5 = vld [vmem:[#allocation6 + $0x428] sm:$0xf0] }
 0x1dc   :  { %4069 = vmatpush.bf16.msra.mxu2 %v5800_v50  ;;  %v7706_v3 = vld [vmem:[#allocation6 + $0x60c] sm:$0xf]  ;;  %4044 = vmatpush.bf16.msra.mxu0 %v5256_v56  ;;  %v5736_v37 = vor.u32 %v7642_v18, %v5733_v5  ;;  %v8611_v50 = vadd.f32 %v3826_v0, %v3814_v27 }
 0x1dd   :  { %v5989_v35 = vld [vmem:[#allocation6 + $0x628] sm:$0xf0] }
 0x1de   :  { %4082 = vmatpush.bf16.msra.mxu3 %v6056_v14  ;;  %v7826_v53 = vld [vmem:[#allocation6 + $0x9cc] sm:$0xf]  ;;  %4057 = vmatpush.bf16.msra.mxu1 %v5512_v60  ;;  %v5992_v24 = vor.u32 %v7706_v3, %v5989_v35 }
 0x1df   :  { %v6469_v59 = vld [vmem:[#allocation6 + $0x9e8] sm:$0xf0] }
 0x1e0   :  { %v7890_v6 = vld [vmem:[#allocation6 + $0xbcc] sm:$0xf]  ;;  %4070 = vmatpush.bf16.msra.mxu2 %v5768_v57  ;;  %v6472_v11 = vor.u32 %v7826_v53, %v6469_v59  ;;  %4045 = vmatpush.bf16.msra.mxu0 %v5224_v1 }
 0x1e1   :  { %v6725_v33 = vld [vmem:[#allocation6 + $0xbe8] sm:$0xf0] }
 0x1e2   :  { %v7954_v7 = vld [vmem:[#allocation6 + $0xdcc] sm:$0xf]  ;;  %4083 = vmatpush.bf16.msra.mxu3 %v6024_v58  ;;  %v6728_v39 = vor.u32 %v7890_v6, %v6725_v33  ;;  %4058 = vmatpush.bf16.msra.mxu1 %v5480_v26  ;;  %v3839_v6 = vpop.f32.mrf.mxu0  ;;  %v3852_v33 = vpop.f32.mrf.mxu1 }
 0x1e3   :  { %v6981_v28 = vld [vmem:[#allocation6 + $0xde8] sm:$0xf0]  ;;  %4046 = vmatmul.bf16.vlgmr.msra.gmra.mxu0 %v8556_v10 }
 0x1e4   :  { %v8018_v29 = vld [vmem:[#allocation6 + $0xfcc] sm:$0xf]  ;;  %v6984_v23 = vor.u32 %v7954_v7, %v6981_v28  ;;  %4071 = vmatpush.bf16.msra.mxu2 %v5736_v37  ;;  %4090 = vmatpush.bf16.msrb.mxu0 %v6472_v11  ;;  %v3840_v7 = vadd.f32 %v3839_v6, %v1151_v20 }
 0x1e5   :  { %v7237_v36 = vld [vmem:[#allocation6 + $0xfe8] sm:$0xf0]  ;;  %4059 = vmatmul.bf16.vlgmr.msra.gmra.mxu1 %v8558_v54 }
 0x1e6   :  { %v7818_v32 = vld [vmem:[#allocation6 + $0x98c] sm:$0xf]  ;;  %v7240_v4 = vor.u32 %v8018_v29, %v7237_v36  ;;  %4084 = vmatpush.bf16.msra.mxu3 %v5992_v24  ;;  %4103 = vmatpush.bf16.msrb.mxu1 %v6728_v39  ;;  %v3853_v30 = vadd.f32 %v3852_v33, %v3840_v7 }
 0x1e7   :  { %v6437_v61 = vld [vmem:[#allocation6 + $0x9a8] sm:$0xf0]  ;;  %4072 = vmatmul.bf16.vlgmr.msra.gmra.mxu2 %v8560_v55 }
 0x1e8   :  { %v7882_v42 = vld [vmem:[#allocation6 + $0xb8c] sm:$0xf]  ;;  %v6440_v14 = vor.u32 %v7818_v32, %v6437_v61  ;;  %4116 = vmatpush.bf16.msrb.mxu2 %v6984_v23 }
 0x1e9   :  { %v6693_v48 = vld [vmem:[#allocation6 + $0xba8] sm:$0xf0]  ;;  %4085 = vmatmul.bf16.vlgmr.msra.gmra.mxu3 %v8562_v8 }
 0x1ea   :  { %v7946_v49 = vld [vmem:[#allocation6 + $0xd8c] sm:$0xf]  ;;  %v6696_v15 = vor.u32 %v7882_v42, %v6693_v48  ;;  %4129 = vmatpush.bf16.msrb.mxu3 %v7240_v4  ;;  %4091 = vmatpush.bf16.msrb.mxu0 %v6440_v14 }
 0x1eb   :  { %v6949_v62 = vld [vmem:[#allocation6 + $0xda8] sm:$0xf0] }
 0x1ec   :  { %v8010_v31 = vld [vmem:[#allocation6 + $0xf8c] sm:$0xf]  ;;  %v6952_v13 = vor.u32 %v7946_v49, %v6949_v62  ;;  %4104 = vmatpush.bf16.msrb.mxu1 %v6696_v15 }
 0x1ed   :  { %v7205_v63 = vld [vmem:[#allocation6 + $0xfa8] sm:$0xf0] }
 0x1ee   :  { %v7810_v16 = vld [vmem:[#allocation6 + $0x94c] sm:$0xf]  ;;  %v7208_v46 = vor.u32 %v8010_v31, %v7205_v63  ;;  %4117 = vmatpush.bf16.msrb.mxu2 %v6952_v13  ;;  %v3865_v31 = vpop.f32.mrf.mxu2  ;;  %v3878_v63 = vpop.f32.mrf.mxu3 }
 0x1ef   :  { %v6405_v17 = vld [vmem:[#allocation6 + $0x968] sm:$0xf0]  ;;  %v3841_v13 = vpop.f32.mrf.mxu0 }
 0x1f0   :  { %v7874_v47 = vld [vmem:[#allocation6 + $0xb4c] sm:$0xf]  ;;  %v6408_v56 = vor.u32 %v7810_v16, %v6405_v17  ;;  %4130 = vmatpush.bf16.msrb.mxu3 %v7208_v46  ;;  %v3866_v17 = vadd.f32 %v3865_v31, %v3853_v30  ;;  %v3854_v46 = vpop.f32.mrf.mxu1  ;;  %v7631_v31 = vld [vmem:[#allocation6 + $0x3ac] sm:$0xf0] }
 0x1f1   :  { %v6661_v51 = vld [vmem:[#allocation6 + $0xb68] sm:$0xf0]  ;;  %v5387_v46 = vld [vmem:[#allocation6 + $0x150] sm:$0xf] }
 0x1f2   :  { %v7938_v44 = vld [vmem:[#allocation6 + $0xd4c] sm:$0xf]  ;;  %v6664_v60 = vor.u32 %v7874_v47, %v6661_v51  ;;  %4092 = vmatpush.bf16.msrb.mxu0 %v6408_v56 }
 0x1f3   :  { %v6917_v52 = vld [vmem:[#allocation6 + $0xd68] sm:$0xf0] }
 0x1f4   :  { %v8002_v21 = vld [vmem:[#allocation6 + $0xf4c] sm:$0xf]  ;;  %v6920_v58 = vor.u32 %v7938_v44, %v6917_v52  ;;  %4105 = vmatpush.bf16.msrb.mxu1 %v6664_v60 }
 0x1f5   :  { %v7173_v25 = vld [vmem:[#allocation6 + $0xf68] sm:$0xf0] }
 0x1f6   :  { %v7802_v2 = vld [vmem:[#allocation6 + $0x90c] sm:$0xf]  ;;  %v7176_v18 = vor.u32 %v8002_v21, %v7173_v25  ;;  %4118 = vmatpush.bf16.msrb.mxu2 %v6920_v58  ;;  %v8618_v21 = vadd.f32 %v3878_v63, %v3866_v17  ;;  %v5931_v63 = vld [vmem:[#allocation6 + $0x590] sm:$0xf] }
 0x1f7   :  { %v6373_v57 = vld [vmem:[#allocation6 + $0x928] sm:$0xf0] }
 0x1f8   :  { %v7866_v5 = vld [vmem:[#allocation6 + $0xb0c] sm:$0xf]  ;;  %v6376_v1 = vor.u32 %v7802_v2, %v6373_v57  ;;  %4131 = vmatpush.bf16.msrb.mxu3 %v7176_v18 }
 0x1f9   :  { %v6629_v3 = vld [vmem:[#allocation6 + $0xb28] sm:$0xf0] }
 0x1fa   :  { %v7930_v12 = vld [vmem:[#allocation6 + $0xd0c] sm:$0xf]  ;;  %v6632_v26 = vor.u32 %v7866_v5, %v6629_v3  ;;  %4093 = vmatpush.bf16.msrb.mxu0 %v6376_v1  ;;  %v3867_v1 = vpop.f32.mrf.mxu2 }
 0x1fb   :  { %v6885_v35 = vld [vmem:[#allocation6 + $0xd28] sm:$0xf0] }
 0x1fc   :  { %v7994_v53 = vld [vmem:[#allocation6 + $0xf0c] sm:$0xf]  ;;  %v6888_v36 = vor.u32 %v7930_v12, %v6885_v35  ;;  %4106 = vmatpush.bf16.msrb.mxu1 %v6632_v26  ;;  %v3880_v26 = vpop.f32.mrf.mxu3 }
 0x1fd   :  { %v7141_v59 = vld [vmem:[#allocation6 + $0xf28] sm:$0xf0] }
 0x1fe   :  { %v7794_v28 = vld [vmem:[#allocation6 + $0x8cc] sm:$0xf]  ;;  %v7144_v37 = vor.u32 %v7994_v53, %v7141_v59  ;;  %4119 = vmatpush.bf16.msrb.mxu2 %v6888_v36  ;;  %v7575_v36 = vld [vmem:[#allocation6 + $0x1ec] sm:$0xf0] }
 0x1ff   :  { %v6341_v29 = vld [vmem:[#allocation6 + $0x8e8] sm:$0xf0] }
 0x200   :  { %v7858_v24 = vld [vmem:[#allocation6 + $0xacc] sm:$0xf]  ;;  %v6344_v23 = vor.u32 %v7794_v28, %v6341_v29  ;;  %4132 = vmatpush.bf16.msrb.mxu3 %v7144_v37  ;;  %v5451_v29 = vld [vmem:[#allocation6 + $0x1d0] sm:$0xf] }
 0x201   :  { %v6597_v11 = vld [vmem:[#allocation6 + $0xae8] sm:$0xf0]  ;;  %v5707_v37 = vld [vmem:[#allocation6 + $0x3d0] sm:$0xf] }
 0x202   :  { %v7922_v39 = vld [vmem:[#allocation6 + $0xccc] sm:$0xf]  ;;  %v6600_v4 = vor.u32 %v7858_v24, %v6597_v11  ;;  %4094 = vmatpush.bf16.msrb.mxu0 %v6344_v23  ;;  %v7639_v24 = vld [vmem:[#allocation6 + $0x3ec] sm:$0xf0] }
 0x203   :  { %v6853_v0 = vld [vmem:[#allocation6 + $0xce8] sm:$0xf0]  ;;  %v5963_v11 = vld [vmem:[#allocation6 + $0x5d0] sm:$0xf] }
 0x204   :  { %v7986_v32 = vld [vmem:[#allocation6 + $0xecc] sm:$0xf]  ;;  %v6856_v41 = vor.u32 %v7922_v39, %v6853_v0  ;;  %4107 = vmatpush.bf16.msrb.mxu1 %v6600_v4  ;;  %v7703_v0 = vld [vmem:[#allocation6 + $0x5ec] sm:$0xf0] }
 0x205   :  { %v7109_v61 = vld [vmem:[#allocation6 + $0xee8] sm:$0xf0] }
 0x206   :  { %v7786_v27 = vld [vmem:[#allocation6 + $0x88c] sm:$0xf]  ;;  %v7112_v42 = vor.u32 %v7986_v32, %v7109_v61  ;;  %4120 = vmatpush.bf16.msrb.mxu2 %v6856_v41  ;;  %v6219_v32 = vld [vmem:[#allocation6 + $0x7d0] sm:$0xf] }
 0x207   :  { %v6309_v40 = vld [vmem:[#allocation6 + $0x8a8] sm:$0xf0]  ;;  %v7767_v61 = vld [vmem:[#allocation6 + $0x7ec] sm:$0xf0] }
 0x208   :  { %v7850_v48 = vld [vmem:[#allocation6 + $0xa8c] sm:$0xf]  ;;  %v6312_v47 = vor.u32 %v7786_v27, %v6309_v40  ;;  %4133 = vmatpush.bf16.msrb.mxu3 %v7112_v42  ;;  %v5452_v27 = vor.u32 %v7575_v36, %v5451_v29  ;;  %v5708_v40 = vor.u32 %v7639_v24, %v5707_v37  ;;  %v5419_v41 = vld [vmem:[#allocation6 + $0x190] sm:$0xf] }
 0x209   :  { %v6565_v49 = vld [vmem:[#allocation6 + $0xaa8] sm:$0xf0]  ;;  %v7567_v42 = vld [vmem:[#allocation6 + $0x1ac] sm:$0xf0] }
 0x20a   :  { %v7914_v62 = vld [vmem:[#allocation6 + $0xc8c] sm:$0xf]  ;;  %v6568_v51 = vor.u32 %v7850_v48, %v6565_v49  ;;  %4095 = vmatpush.bf16.msrb.mxu0 %v6312_v47  ;;  %v5964_v48 = vor.u32 %v7703_v0, %v5963_v11  ;;  %v6220_v49 = vor.u32 %v7767_v61, %v6219_v32  ;;  %v5420_v17 = vor.u32 %v7567_v42, %v5419_v41  ;;  %v7559_v47 = vld [vmem:[#allocation6 + $0x16c] sm:$0xf0] }
 0x20b   :  { %v6821_v14 = vld [vmem:[#allocation6 + $0xca8] sm:$0xf0]  ;;  %v5323_v29 = vld [vmem:[#allocation6 + $0xd0] sm:$0xf] }
 0x20c   :  { %v7978_v15 = vld [vmem:[#allocation6 + $0xe8c] sm:$0xf]  ;;  %v6824_v25 = vor.u32 %v7914_v62, %v6821_v14  ;;  %4108 = vmatpush.bf16.msrb.mxu1 %v6568_v51  ;;  %v5675_v62 = vld [vmem:[#allocation6 + $0x390] sm:$0xf] }
 0x20d   :  { %v7077_v16 = vld [vmem:[#allocation6 + $0xea8] sm:$0xf0]  ;;  %v7695_v14 = vld [vmem:[#allocation6 + $0x5ac] sm:$0xf0]  ;;  %v5676_v13 = vor.u32 %v7631_v31, %v5675_v62  ;;  %v3917_v31 = vpop.f32.mrf.mxu2 }
 0x20e   :  { %v7778_v44 = vld [vmem:[#allocation6 + $0x84c] sm:$0xf]  ;;  %v7080_v56 = vor.u32 %v7978_v15, %v7077_v16  ;;  %4121 = vmatpush.bf16.msrb.mxu2 %v6824_v25  ;;  %v6187_v15 = vld [vmem:[#allocation6 + $0x790] sm:$0xf]  ;;  %v5932_v51 = vor.u32 %v7695_v14, %v5931_v63  ;;  %v3930_v63 = vpop.f32.mrf.mxu3 }
 0x20f   :  { %v6277_v52 = vld [vmem:[#allocation6 + $0x868] sm:$0xf0]  ;;  %v7759_v16 = vld [vmem:[#allocation6 + $0x7ac] sm:$0xf0] }
 0x210   :  { %v7842_v60 = vld [vmem:[#allocation6 + $0xa4c] sm:$0xf]  ;;  %v6280_v18 = vor.u32 %v7778_v44, %v6277_v52  ;;  %4134 = vmatpush.bf16.msrb.mxu3 %v7080_v56  ;;  %v6188_v44 = vor.u32 %v7759_v16, %v6187_v15  ;;  %v5643_v52 = vld [vmem:[#allocation6 + $0x350] sm:$0xf] }
 0x211   :  { %v6533_v19 = vld [vmem:[#allocation6 + $0xa68] sm:$0xf0]  ;;  %v7623_v25 = vld [vmem:[#allocation6 + $0x36c] sm:$0xf0] }
 0x212   :  { %v7906_v9 = vld [vmem:[#allocation6 + $0xc4c] sm:$0xf]  ;;  %v6536_v5 = vor.u32 %v7842_v60, %v6533_v19  ;;  %4096 = vmatpush.bf16.msrb.mxu0 %v6280_v18  ;;  %v5899_v56 = vld [vmem:[#allocation6 + $0x550] sm:$0xf] }
 0x213   :  { %v6789_v20 = vld [vmem:[#allocation6 + $0xc68] sm:$0xf0]  ;;  %v7687_v60 = vld [vmem:[#allocation6 + $0x56c] sm:$0xf0] }
 0x214   :  { %v7970_v2 = vld [vmem:[#allocation6 + $0xe4c] sm:$0xf]  ;;  %v6792_v53 = vor.u32 %v7906_v9, %v6789_v20  ;;  %4109 = vmatpush.bf16.msrb.mxu1 %v6536_v5  ;;  %v6155_v19 = vld [vmem:[#allocation6 + $0x750] sm:$0xf]  ;;  %v5388_v20 = vor.u32 %v7559_v47, %v5387_v46  ;;  %v5900_v18 = vor.u32 %v7687_v60, %v5899_v56 }
 0x215   :  { %v7045_v57 = vld [vmem:[#allocation6 + $0xe68] sm:$0xf0]  ;;  %v7751_v9 = vld [vmem:[#allocation6 + $0x76c] sm:$0xf0] }
 0x216   :  { %v7770_v58 = vld [vmem:[#allocation6 + $0x80c] sm:$0xf]  ;;  %v7048_v59 = vor.u32 %v7970_v2, %v7045_v57  ;;  %4122 = vmatpush.bf16.msrb.mxu2 %v6792_v53  ;;  %v5644_v2 = vor.u32 %v7623_v25, %v5643_v52  ;;  %v5355_v57 = vld [vmem:[#allocation6 + $0x110] sm:$0xf]  ;;  %v6156_v5 = vor.u32 %v7751_v9, %v6155_v19 }
 0x217   :  { %v6245_v3 = vld [vmem:[#allocation6 + $0x828] sm:$0xf0]  ;;  %v7679_v53 = vld [vmem:[#allocation6 + $0x52c] sm:$0xf0] }
 0x218   :  { %v7834_v12 = vld [vmem:[#allocation6 + $0xa0c] sm:$0xf]  ;;  %v6248_v39 = vor.u32 %v7770_v58, %v6245_v3  ;;  %4135 = vmatpush.bf16.msrb.mxu3 %v7048_v59  ;;  %v7551_v58 = vld [vmem:[#allocation6 + $0x12c] sm:$0xf0] }
 0x219   :  { %v6501_v35 = vld [vmem:[#allocation6 + $0xa28] sm:$0xf0]  ;;  %v5611_v3 = vld [vmem:[#allocation6 + $0x310] sm:$0xf]  ;;  %v5356_v26 = vor.u32 %v7551_v58, %v5355_v57 }
 0x21a   :  { %v7898_v6 = vld [vmem:[#allocation6 + $0xc0c] sm:$0xf]  ;;  %v6504_v30 = vor.u32 %v7834_v12, %v6501_v35  ;;  %4097 = vmatpush.bf16.msrb.mxu0 %v6248_v39  ;;  %v7615_v12 = vld [vmem:[#allocation6 + $0x32c] sm:$0xf0] }
 0x21b   :  { %v6757_v33 = vld [vmem:[#allocation6 + $0xc28] sm:$0xf0]  ;;  %v5867_v35 = vld [vmem:[#allocation6 + $0x510] sm:$0xf] }
 0x21c   :  { %v7962_v7 = vld [vmem:[#allocation6 + $0xe0c] sm:$0xf]  ;;  %v6760_v23 = vor.u32 %v7898_v6, %v6757_v33  ;;  %4110 = vmatpush.bf16.msrb.mxu1 %v6504_v30  ;;  %v6123_v59 = vld [vmem:[#allocation6 + $0x710] sm:$0xf]  ;;  %v3891_v33 = vpop.f32.mrf.mxu0  ;;  %v5868_v37 = vor.u32 %v7679_v53, %v5867_v35 }
 0x21d   :  { %v7013_v28 = vld [vmem:[#allocation6 + $0xe28] sm:$0xf0]  ;;  %4098 = vmatmul.bf16.vlgmr.msrb.gmra.mxu0 %v8580_v34  ;;  %v7743_v6 = vld [vmem:[#allocation6 + $0x72c] sm:$0xf0]  ;;  %v3892_v1 = vadd.f32 %v3891_v33, %v8618_v21 }
 0x21e   :  { %v7016_v4 = vor.u32 %v7962_v7, %v7013_v28  ;;  %4123 = vmatpush.bf16.msrb.mxu2 %v6760_v23  ;;  %4142 = vmatpush.bf16.msra.mxu0 %v5452_v27  ;;  %v3904_v7 = vpop.f32.mrf.mxu1  ;;  %v5612_v28 = vor.u32 %v7615_v12, %v5611_v3  ;;  %v7543_v36 = vld [vmem:[#allocation6 + $0xec] sm:$0xf0]  ;;  %v6124_v24 = vor.u32 %v7743_v6, %v6123_v59 }
 0x21f   :  { %4111 = vmatmul.bf16.vlgmr.msrb.gmra.mxu1 %v8582_v38  ;;  %v5579_v11 = vld [vmem:[#allocation6 + $0x2d0] sm:$0xf]  ;;  %v3905_v0 = vadd.f32 %v3904_v7, %v3892_v1 }
 0x220   :  { %4136 = vmatpush.bf16.msrb.mxu3 %v7016_v4  ;;  %4155 = vmatpush.bf16.msra.mxu1 %v5708_v40  ;;  %v7607_v39 = vld [vmem:[#allocation6 + $0x2ec] sm:$0xf0]  ;;  %v5324_v4 = vor.u32 %v7543_v36, %v5323_v29 }
 0x221   :  { %4124 = vmatmul.bf16.vlgmr.msrb.gmra.mxu2 %v8584_v43  ;;  %v5835_v30 = vld [vmem:[#allocation6 + $0x4d0] sm:$0xf]  ;;  %v5580_v27 = vor.u32 %v7607_v39, %v5579_v11 }
 0x222   :  { %4168 = vmatpush.bf16.msra.mxu2 %v5964_v48  ;;  %4143 = vmatpush.bf16.msra.mxu0 %v5420_v17  ;;  %v7671_v32 = vld [vmem:[#allocation6 + $0x4ec] sm:$0xf0]  ;;  %v3918_v17 = vadd.f32 %v3917_v31, %v3905_v0 }
 0x223   :  { %4137 = vmatmul.bf16.vlgmr.msrb.gmra.mxu3 %v8586_v22  ;;  %v6091_v61 = vld [vmem:[#allocation6 + $0x6d0] sm:$0xf]  ;;  %v5836_v41 = vor.u32 %v7671_v32, %v5835_v30 }
 0x224   :  { %4181 = vmatpush.bf16.msra.mxu3 %v6220_v49  ;;  %4156 = vmatpush.bf16.msra.mxu1 %v5676_v13  ;;  %v7735_v23 = vld [vmem:[#allocation6 + $0x6ec] sm:$0xf0]  ;;  %v3893_v13 = vpop.f32.mrf.mxu0  ;;  %v8625_v25 = vadd.f32 %v3930_v63, %v3918_v17 }
 0x225   :  { %v5291_v21 = vld [vmem:[#allocation6 + $0x90] sm:$0xf]  ;;  %v6092_v42 = vor.u32 %v7735_v23, %v6091_v61 }
 0x226   :  { %4169 = vmatpush.bf16.msra.mxu2 %v5932_v51  ;;  %4144 = vmatpush.bf16.msra.mxu0 %v5388_v20  ;;  %v7535_v40 = vld [vmem:[#allocation6 + $0xac] sm:$0xf0]  ;;  %v3906_v46 = vpop.f32.mrf.mxu1 }
 0x227   :  { %v5547_v48 = vld [vmem:[#allocation6 + $0x290] sm:$0xf]  ;;  %v5292_v47 = vor.u32 %v7535_v40, %v5291_v21 }
 0x228   :  { %4182 = vmatpush.bf16.msra.mxu3 %v6188_v44  ;;  %4157 = vmatpush.bf16.msra.mxu1 %v5644_v2  ;;  %v7599_v49 = vld [vmem:[#allocation6 + $0x2ac] sm:$0xf0] }
 0x229   :  { %v5803_v62 = vld [vmem:[#allocation6 + $0x490] sm:$0xf]  ;;  %v5548_v51 = vor.u32 %v7599_v49, %v5547_v48 }
 0x22a   :  { %4170 = vmatpush.bf16.msra.mxu2 %v5900_v18  ;;  %4145 = vmatpush.bf16.msra.mxu0 %v5356_v26  ;;  %v7663_v14 = vld [vmem:[#allocation6 + $0x4ac] sm:$0xf0]  ;;  %v3919_v26 = vpop.f32.mrf.mxu2 }
 0x22b   :  { %v6059_v15 = vld [vmem:[#allocation6 + $0x690] sm:$0xf]  ;;  %v5804_v56 = vor.u32 %v7663_v14, %v5803_v62 }
 0x22c   :  { %4183 = vmatpush.bf16.msra.mxu3 %v6156_v5  ;;  %4158 = vmatpush.bf16.msra.mxu1 %v5612_v28  ;;  %v7727_v16 = vld [vmem:[#allocation6 + $0x6ac] sm:$0xf0]  ;;  %v3932_v28 = vpop.f32.mrf.mxu3 }
 0x22d   :  { %v5259_v44 = vld [vmem:[#allocation6 + $0x50] sm:$0xf]  ;;  %v6060_v60 = vor.u32 %v7727_v16, %v6059_v15 }
 0x22e   :  { %4171 = vmatpush.bf16.msra.mxu2 %v5868_v37  ;;  %4146 = vmatpush.bf16.msra.mxu0 %v5324_v4  ;;  %v7527_v52 = vld [vmem:[#allocation6 + $0x6c] sm:$0xf0]  ;;  %v3956_v26 = vpop.f32.mrf.mxu1 }
 0x22f   :  { %v5515_v19 = vld [vmem:[#allocation6 + $0x250] sm:$0xf]  ;;  %v5260_v5 = vor.u32 %v7527_v52, %v5259_v44 }
 0x230   :  { %4184 = vmatpush.bf16.msra.mxu3 %v6124_v24  ;;  %4159 = vmatpush.bf16.msra.mxu1 %v5580_v27  ;;  %v7591_v9 = vld [vmem:[#allocation6 + $0x26c] sm:$0xf0] }
 0x231   :  { %v5771_v20 = vld [vmem:[#allocation6 + $0x450] sm:$0xf]  ;;  %v5516_v3 = vor.u32 %v7591_v9, %v5515_v19 }
 0x232   :  { %4172 = vmatpush.bf16.msra.mxu2 %v5836_v41  ;;  %v7655_v2 = vld [vmem:[#allocation6 + $0x46c] sm:$0xf0]  ;;  %4147 = vmatpush.bf16.msra.mxu0 %v5292_v47 }
 0x233   :  { %v6027_v57 = vld [vmem:[#allocation6 + $0x650] sm:$0xf]  ;;  %v5772_v59 = vor.u32 %v7655_v2, %v5771_v20 }
 0x234   :  { %4185 = vmatpush.bf16.msra.mxu3 %v6092_v42  ;;  %v7719_v58 = vld [vmem:[#allocation6 + $0x66c] sm:$0xf0]  ;;  %4160 = vmatpush.bf16.msra.mxu1 %v5548_v51 }
 0x235   :  { %v5227_v18 = vld [vmem:[#allocation6 + $0x10] sm:$0xf]  ;;  %v6028_v6 = vor.u32 %v7719_v58, %v6027_v57  ;;  %v1152_v58 = vperm.slane %v8604_v45, 2 }
 0x236   :  { %v7519_v12 = vld [vmem:[#allocation6 + $0x2c] sm:$0xf0]  ;;  %4173 = vmatpush.bf16.msra.mxu2 %v5804_v56  ;;  %4148 = vmatpush.bf16.msra.mxu0 %v5260_v5 }
 0x237   :  { %v5483_v35 = vld [vmem:[#allocation6 + $0x210] sm:$0xf]  ;;  %v5228_v30 = vor.u32 %v7519_v12, %v5227_v18 }
 0x238   :  { %v7583_v53 = vld [vmem:[#allocation6 + $0x22c] sm:$0xf0]  ;;  %4186 = vmatpush.bf16.msra.mxu3 %v6060_v60  ;;  %4161 = vmatpush.bf16.msra.mxu1 %v5516_v3 }
 0x239   :  { %v5739_v33 = vld [vmem:[#allocation6 + $0x410] sm:$0xf]  ;;  %v5484_v0 = vor.u32 %v7583_v53, %v5483_v35 }
 0x23a   :  { %v7647_v7 = vld [vmem:[#allocation6 + $0x42c] sm:$0xf0]  ;;  %4174 = vmatpush.bf16.msra.mxu2 %v5772_v59  ;;  %4149 = vmatpush.bf16.msra.mxu0 %v5228_v30 }
 0x23b   :  { %v5995_v1 = vld [vmem:[#allocation6 + $0x610] sm:$0xf]  ;;  %v5740_v4 = vor.u32 %v7647_v7, %v5739_v33 }
 0x23c   :  { %v7711_v29 = vld [vmem:[#allocation6 + $0x62c] sm:$0xf0]  ;;  %4187 = vmatpush.bf16.msra.mxu3 %v6028_v6  ;;  %4162 = vmatpush.bf16.msra.mxu1 %v5484_v0 }
 0x23d   :  { %v6475_v36 = vld [vmem:[#allocation6 + $0x9d0] sm:$0xf]  ;;  %v5996_v27 = vor.u32 %v7711_v29, %v5995_v1  ;;  %4150 = vmatmul.bf16.vlgmr.msra.gmra.mxu0 %v8556_v10  ;;  %v3943_v1 = vpop.f32.mrf.mxu0 }
 0x23e   :  { %v7831_v37 = vld [vmem:[#allocation6 + $0x9ec] sm:$0xf0]  ;;  %4175 = vmatpush.bf16.msra.mxu2 %v5740_v4  ;;  %v3944_v28 = vadd.f32 %v3943_v1, %v1152_v58 }
 0x23f   :  { %v6731_v24 = vld [vmem:[#allocation6 + $0xbd0] sm:$0xf]  ;;  %v6476_v21 = vor.u32 %v7831_v37, %v6475_v36  ;;  %4163 = vmatmul.bf16.vlgmr.msra.gmra.mxu1 %v8558_v54 }
 0x240   :  { %v7895_v11 = vld [vmem:[#allocation6 + $0xbec] sm:$0xf0]  ;;  %4188 = vmatpush.bf16.msra.mxu3 %v5996_v27 }
 0x241   :  { %v6987_v39 = vld [vmem:[#allocation6 + $0xdd0] sm:$0xf]  ;;  %v6732_v40 = vor.u32 %v7895_v11, %v6731_v24  ;;  %4194 = vmatpush.bf16.msrb.mxu0 %v6476_v21  ;;  %4176 = vmatmul.bf16.vlgmr.msra.gmra.mxu2 %v8560_v55 }
 0x242   :  { %v7959_v32 = vld [vmem:[#allocation6 + $0xdec] sm:$0xf0] }
 0x243   :  { %v7243_v61 = vld [vmem:[#allocation6 + $0xfd0] sm:$0xf]  ;;  %v6988_v48 = vor.u32 %v7959_v32, %v6987_v39  ;;  %4207 = vmatpush.bf16.msrb.mxu1 %v6732_v40  ;;  %4189 = vmatmul.bf16.vlgmr.msra.gmra.mxu3 %v8562_v8  ;;  %v3957_v32 = vadd.f32 %v3956_v26, %v3944_v28 }
 0x244   :  { %v8023_v23 = vld [vmem:[#allocation6 + $0xfec] sm:$0xf0] }
 0x245   :  { %v6443_v41 = vld [vmem:[#allocation6 + $0x990] sm:$0xf]  ;;  %v7244_v49 = vor.u32 %v8023_v23, %v7243_v61  ;;  %4220 = vmatpush.bf16.msrb.mxu2 %v6988_v48 }
 0x246   :  { %v7823_v42 = vld [vmem:[#allocation6 + $0x9ac] sm:$0xf0] }
 0x247   :  { %v6699_v62 = vld [vmem:[#allocation6 + $0xb90] sm:$0xf]  ;;  %v6444_v17 = vor.u32 %v7823_v42, %v6443_v41  ;;  %4233 = vmatpush.bf16.msrb.mxu3 %v7244_v49 }
 0x248   :  { %v7887_v31 = vld [vmem:[#allocation6 + $0xbac] sm:$0xf0] }
 0x249   :  { %v6955_v63 = vld [vmem:[#allocation6 + $0xd90] sm:$0xf]  ;;  %v6700_v13 = vor.u32 %v7887_v31, %v6699_v62  ;;  %4195 = vmatpush.bf16.msrb.mxu0 %v6444_v17 }
 0x24a   :  { %v7951_v14 = vld [vmem:[#allocation6 + $0xdac] sm:$0xf0] }
 0x24b   :  { %v7211_v15 = vld [vmem:[#allocation6 + $0xf90] sm:$0xf]  ;;  %v6956_v51 = vor.u32 %v7951_v14, %v6955_v63  ;;  %4208 = vmatpush.bf16.msrb.mxu1 %v6700_v13  ;;  %v3969_v63 = vpop.f32.mrf.mxu2  ;;  %v3982_v14 = vpop.f32.mrf.mxu3 }
 0x24c   :  { %v8015_v16 = vld [vmem:[#allocation6 + $0xfac] sm:$0xf0]  ;;  %v3970_v13 = vadd.f32 %v3969_v63, %v3957_v32  ;;  %v5677_v63 = vld [vmem:[#allocation6 + $0x3b0] sm:$0xf0] }
 0x24d   :  { %v6411_v46 = vld [vmem:[#allocation6 + $0x950] sm:$0xf]  ;;  %v7212_v44 = vor.u32 %v8015_v16, %v7211_v15  ;;  %4221 = vmatpush.bf16.msrb.mxu2 %v6956_v51 }
 0x24e   :  { %v7815_v47 = vld [vmem:[#allocation6 + $0x96c] sm:$0xf0] }
 0x24f   :  { %v6667_v52 = vld [vmem:[#allocation6 + $0xb50] sm:$0xf]  ;;  %v6412_v2 = vor.u32 %v7815_v47, %v6411_v46  ;;  %4234 = vmatpush.bf16.msrb.mxu3 %v7212_v44  ;;  %v3945_v46 = vpop.f32.mrf.mxu0  ;;  %v3958_v47 = vpop.f32.mrf.mxu1 }
 0x250   :  { %v7879_v56 = vld [vmem:[#allocation6 + $0xb6c] sm:$0xf0]  ;;  %v7555_v47 = vld [vmem:[#allocation6 + $0x154] sm:$0xf] }
 0x251   :  { %v6923_v60 = vld [vmem:[#allocation6 + $0xd50] sm:$0xf]  ;;  %v6668_v57 = vor.u32 %v7879_v56, %v6667_v52  ;;  %4196 = vmatpush.bf16.msrb.mxu0 %v6412_v2 }
 0x252   :  { %v7943_v19 = vld [vmem:[#allocation6 + $0xd6c] sm:$0xf0] }
 0x253   :  { %v7179_v9 = vld [vmem:[#allocation6 + $0xf50] sm:$0xf]  ;;  %v6924_v3 = vor.u32 %v7943_v19, %v6923_v60  ;;  %4209 = vmatpush.bf16.msrb.mxu1 %v6668_v57  ;;  %v8632_v60 = vadd.f32 %v3982_v14, %v3970_v13  ;;  %v7691_v14 = vld [vmem:[#allocation6 + $0x594] sm:$0xf] }
 0x254   :  { %v8007_v20 = vld [vmem:[#allocation6 + $0xf6c] sm:$0xf0] }
 0x255   :  { %v6379_v18 = vld [vmem:[#allocation6 + $0x910] sm:$0xf]  ;;  %v7180_v12 = vor.u32 %v8007_v20, %v7179_v9  ;;  %4222 = vmatpush.bf16.msrb.mxu2 %v6924_v3 }
 0x256   :  { %v7807_v5 = vld [vmem:[#allocation6 + $0x92c] sm:$0xf0] }
 0x257   :  { %v6635_v35 = vld [vmem:[#allocation6 + $0xb10] sm:$0xf]  ;;  %v6380_v29 = vor.u32 %v7807_v5, %v6379_v18  ;;  %4235 = vmatpush.bf16.msrb.mxu3 %v7180_v12 }
 0x258   :  { %v7871_v53 = vld [vmem:[#allocation6 + $0xb2c] sm:$0xf0] }
 0x259   :  { %v6891_v59 = vld [vmem:[#allocation6 + $0xd10] sm:$0xf]  ;;  %v6636_v36 = vor.u32 %v7871_v53, %v6635_v35  ;;  %4197 = vmatpush.bf16.msrb.mxu0 %v6380_v29  ;;  %v3971_v29 = vpop.f32.mrf.mxu2 }
 0x25a   :  { %v7935_v6 = vld [vmem:[#allocation6 + $0xd2c] sm:$0xf0] }
 0x25b   :  { %v7147_v33 = vld [vmem:[#allocation6 + $0xf10] sm:$0xf]  ;;  %v6892_v24 = vor.u32 %v7935_v6, %v6891_v59  ;;  %4210 = vmatpush.bf16.msrb.mxu1 %v6636_v36  ;;  %v3984_v36 = vpop.f32.mrf.mxu3 }
 0x25c   :  { %v7999_v7 = vld [vmem:[#allocation6 + $0xf2c] sm:$0xf0] }
 0x25d   :  { %v6347_v45 = vld [vmem:[#allocation6 + $0x8d0] sm:$0xf]  ;;  %v7148_v11 = vor.u32 %v7999_v7, %v7147_v33  ;;  %4223 = vmatpush.bf16.msrb.mxu2 %v6892_v24  ;;  %v5453_v24 = vld [vmem:[#allocation6 + $0x1f0] sm:$0xf0] }
 0x25e   :  { %v7799_v37 = vld [vmem:[#allocation6 + $0x8ec] sm:$0xf0] }
 0x25f   :  { %v6603_v39 = vld [vmem:[#allocation6 + $0xad0] sm:$0xf]  ;;  %v6348_v27 = vor.u32 %v7799_v37, %v6347_v45  ;;  %4236 = vmatpush.bf16.msrb.mxu3 %v7148_v11  ;;  %v7571_v37 = vld [vmem:[#allocation6 + $0x1d4] sm:$0xf] }
 0x260   :  { %v7863_v30 = vld [vmem:[#allocation6 + $0xaec] sm:$0xf0]  ;;  %v7635_v11 = vld [vmem:[#allocation6 + $0x3d4] sm:$0xf] }
 0x261   :  { %v6859_v0 = vld [vmem:[#allocation6 + $0xcd0] sm:$0xf]  ;;  %v6604_v21 = vor.u32 %v7863_v30, %v6603_v39  ;;  %4198 = vmatpush.bf16.msrb.mxu0 %v6348_v27  ;;  %v5709_v39 = vld [vmem:[#allocation6 + $0x3f0] sm:$0xf0] }
 0x262   :  { %v7927_v61 = vld [vmem:[#allocation6 + $0xcec] sm:$0xf0]  ;;  %v7699_v30 = vld [vmem:[#allocation6 + $0x5d4] sm:$0xf] }
 0x263   :  { %v7115_v23 = vld [vmem:[#allocation6 + $0xed0] sm:$0xf]  ;;  %v6860_v42 = vor.u32 %v7927_v61, %v6859_v0  ;;  %4211 = vmatpush.bf16.msrb.mxu1 %v6604_v21  ;;  %v5965_v61 = vld [vmem:[#allocation6 + $0x5f0] sm:$0xf0] }
 0x264   :  { %v7991_v4 = vld [vmem:[#allocation6 + $0xeec] sm:$0xf0] }
 0x265   :  { %v6315_v40 = vld [vmem:[#allocation6 + $0x890] sm:$0xf]  ;;  %v7116_v48 = vor.u32 %v7991_v4, %v7115_v23  ;;  %4224 = vmatpush.bf16.msrb.mxu2 %v6860_v42  ;;  %v7763_v23 = vld [vmem:[#allocation6 + $0x7d4] sm:$0xf] }
 0x266   :  { %v7791_v41 = vld [vmem:[#allocation6 + $0x8ac] sm:$0xf0]  ;;  %v6221_v4 = vld [vmem:[#allocation6 + $0x7f0] sm:$0xf0] }
 0x267   :  { %v6571_v49 = vld [vmem:[#allocation6 + $0xa90] sm:$0xf]  ;;  %v6316_v51 = vor.u32 %v7791_v41, %v6315_v40  ;;  %4237 = vmatpush.bf16.msrb.mxu3 %v7116_v48  ;;  %v5456_v40 = vor.u32 %v7571_v37, %v5453_v24  ;;  %v5712_v41 = vor.u32 %v7635_v11, %v5709_v39  ;;  %v7563_v42 = vld [vmem:[#allocation6 + $0x194] sm:$0xf] }
 0x268   :  { %v7855_v62 = vld [vmem:[#allocation6 + $0xaac] sm:$0xf0]  ;;  %v5421_v48 = vld [vmem:[#allocation6 + $0x1b0] sm:$0xf0] }
 0x269   :  { %v6827_v31 = vld [vmem:[#allocation6 + $0xc90] sm:$0xf]  ;;  %v6572_v44 = vor.u32 %v7855_v62, %v6571_v49  ;;  %4199 = vmatpush.bf16.msrb.mxu0 %v6316_v51  ;;  %v5968_v49 = vor.u32 %v7699_v30, %v5965_v61  ;;  %v6224_v62 = vor.u32 %v7763_v23, %v6221_v4  ;;  %v5424_v13 = vor.u32 %v7563_v42, %v5421_v48  ;;  %v5389_v51 = vld [vmem:[#allocation6 + $0x170] sm:$0xf0] }
 0x26a   :  { %v7919_v15 = vld [vmem:[#allocation6 + $0xcac] sm:$0xf0]  ;;  %v7539_v37 = vld [vmem:[#allocation6 + $0xd4] sm:$0xf] }
 0x26b   :  { %v7083_v16 = vld [vmem:[#allocation6 + $0xe90] sm:$0xf]  ;;  %v6828_v19 = vor.u32 %v7919_v15, %v6827_v31  ;;  %4212 = vmatpush.bf16.msrb.mxu1 %v6572_v44  ;;  %v7627_v31 = vld [vmem:[#allocation6 + $0x394] sm:$0xf] }
 0x26c   :  { %v7983_v17 = vld [vmem:[#allocation6 + $0xeac] sm:$0xf0]  ;;  %v5933_v15 = vld [vmem:[#allocation6 + $0x5b0] sm:$0xf0]  ;;  %v5680_v46 = vor.u32 %v7627_v31, %v5677_v63  ;;  %v4021_v63 = vpop.f32.mrf.mxu2 }
 0x26d   :  { %v6283_v52 = vld [vmem:[#allocation6 + $0x850] sm:$0xf]  ;;  %v7084_v9 = vor.u32 %v7983_v17, %v7083_v16  ;;  %4225 = vmatpush.bf16.msrb.mxu2 %v6828_v19  ;;  %v7755_v16 = vld [vmem:[#allocation6 + $0x794] sm:$0xf]  ;;  %v5936_v44 = vor.u32 %v7691_v14, %v5933_v15  ;;  %v4034_v14 = vpop.f32.mrf.mxu3 }
 0x26e   :  { %v7783_v56 = vld [vmem:[#allocation6 + $0x86c] sm:$0xf0]  ;;  %v6189_v17 = vld [vmem:[#allocation6 + $0x7b0] sm:$0xf0] }
 0x26f   :  { %v6539_v20 = vld [vmem:[#allocation6 + $0xa50] sm:$0xf]  ;;  %v6284_v12 = vor.u32 %v7783_v56, %v6283_v52  ;;  %4238 = vmatpush.bf16.msrb.mxu3 %v7084_v9  ;;  %v6192_v52 = vor.u32 %v7755_v16, %v6189_v17  ;;  %v7619_v56 = vld [vmem:[#allocation6 + $0x354] sm:$0xf] }
 0x270   :  { %v7847_v2 = vld [vmem:[#allocation6 + $0xa6c] sm:$0xf0]  ;;  %v5645_v19 = vld [vmem:[#allocation6 + $0x370] sm:$0xf0] }
 0x271   :  { %v6795_v57 = vld [vmem:[#allocation6 + $0xc50] sm:$0xf]  ;;  %v6540_v35 = vor.u32 %v7847_v2, %v6539_v20  ;;  %4200 = vmatpush.bf16.msrb.mxu0 %v6284_v12  ;;  %v7683_v9 = vld [vmem:[#allocation6 + $0x554] sm:$0xf] }
 0x272   :  { %v7911_v58 = vld [vmem:[#allocation6 + $0xc6c] sm:$0xf0]  ;;  %v5901_v20 = vld [vmem:[#allocation6 + $0x570] sm:$0xf0] }
 0x273   :  { %v7051_v18 = vld [vmem:[#allocation6 + $0xe50] sm:$0xf]  ;;  %v6796_v33 = vor.u32 %v7911_v58, %v6795_v57  ;;  %4213 = vmatpush.bf16.msrb.mxu1 %v6540_v35  ;;  %v7747_v2 = vld [vmem:[#allocation6 + $0x754] sm:$0xf]  ;;  %v5392_v58 = vor.u32 %v7555_v47, %v5389_v51  ;;  %v5904_v12 = vor.u32 %v7683_v9, %v5901_v20 }
 0x274   :  { %v7975_v5 = vld [vmem:[#allocation6 + $0xe6c] sm:$0xf0]  ;;  %v6157_v57 = vld [vmem:[#allocation6 + $0x770] sm:$0xf0] }
 0x275   :  { %v6251_v3 = vld [vmem:[#allocation6 + $0x810] sm:$0xf]  ;;  %v7052_v7 = vor.u32 %v7975_v5, %v7051_v18  ;;  %4226 = vmatpush.bf16.msrb.mxu2 %v6796_v33  ;;  %v5648_v18 = vor.u32 %v7619_v56, %v5645_v19  ;;  %v7547_v5 = vld [vmem:[#allocation6 + $0x114] sm:$0xf]  ;;  %v6160_v35 = vor.u32 %v7747_v2, %v6157_v57 }
 0x276   :  { %v7775_v53 = vld [vmem:[#allocation6 + $0x82c] sm:$0xf0]  ;;  %v5869_v33 = vld [vmem:[#allocation6 + $0x530] sm:$0xf0] }
 0x277   :  { %v6507_v59 = vld [vmem:[#allocation6 + $0xa10] sm:$0xf]  ;;  %v6252_v0 = vor.u32 %v7775_v53, %v6251_v3  ;;  %4239 = vmatpush.bf16.msrb.mxu3 %v7052_v7  ;;  %v5357_v3 = vld [vmem:[#allocation6 + $0x130] sm:$0xf0] }
 0x278   :  { %v7839_v6 = vld [vmem:[#allocation6 + $0xa2c] sm:$0xf0]  ;;  %v7611_v53 = vld [vmem:[#allocation6 + $0x314] sm:$0xf]  ;;  %v5360_v36 = vor.u32 %v7547_v5, %v5357_v3 }
 0x279   :  { %v6763_v1 = vld [vmem:[#allocation6 + $0xc10] sm:$0xf]  ;;  %v6508_v32 = vor.u32 %v7839_v6, %v6507_v59  ;;  %4201 = vmatpush.bf16.msrb.mxu0 %v6252_v0  ;;  %v5613_v59 = vld [vmem:[#allocation6 + $0x330] sm:$0xf0] }
 0x27a   :  { %v7903_v26 = vld [vmem:[#allocation6 + $0xc2c] sm:$0xf0]  ;;  %v7675_v6 = vld [vmem:[#allocation6 + $0x514] sm:$0xf] }
 0x27b   :  { %v7019_v28 = vld [vmem:[#allocation6 + $0xe10] sm:$0xf]  ;;  %v6764_v27 = vor.u32 %v7903_v26, %v6763_v1  ;;  %4214 = vmatpush.bf16.msrb.mxu1 %v6508_v32  ;;  %v7739_v7 = vld [vmem:[#allocation6 + $0x714] sm:$0xf]  ;;  %v3995_v26 = vpop.f32.mrf.mxu0  ;;  %v5872_v11 = vor.u32 %v7675_v6, %v5869_v33 }
 0x27c   :  { %v7967_v45 = vld [vmem:[#allocation6 + $0xe2c] sm:$0xf0]  ;;  %4202 = vmatmul.bf16.vlgmr.msrb.gmra.mxu0 %v8580_v34  ;;  %v6125_v1 = vld [vmem:[#allocation6 + $0x730] sm:$0xf0]  ;;  %v3996_v29 = vadd.f32 %v3995_v26, %v8632_v60 }
 0x27d   :  { %v7020_v21 = vor.u32 %v7967_v45, %v7019_v28  ;;  %4227 = vmatpush.bf16.msrb.mxu2 %v6764_v27  ;;  %4246 = vmatpush.bf16.msra.mxu0 %v5456_v40  ;;  %v4008_v28 = vpop.f32.mrf.mxu1  ;;  %v5616_v45 = vor.u32 %v7611_v53, %v5613_v59  ;;  %v5325_v24 = vld [vmem:[#allocation6 + $0xf0] sm:$0xf0]  ;;  %v6128_v39 = vor.u32 %v7739_v7, %v6125_v1 }
 0x27e   :  { %4215 = vmatmul.bf16.vlgmr.msrb.gmra.mxu1 %v8582_v38  ;;  %v7603_v30 = vld [vmem:[#allocation6 + $0x2d4] sm:$0xf]  ;;  %v4009_v61 = vadd.f32 %v4008_v28, %v3996_v29 }
 0x27f   :  { %4240 = vmatpush.bf16.msrb.mxu3 %v7020_v21  ;;  %4259 = vmatpush.bf16.msra.mxu1 %v5712_v41  ;;  %v5581_v0 = vld [vmem:[#allocation6 + $0x2f0] sm:$0xf0]  ;;  %v5328_v21 = vor.u32 %v7539_v37, %v5325_v24 }
 0x280   :  { %4228 = vmatmul.bf16.vlgmr.msrb.gmra.mxu2 %v8584_v43  ;;  %v7667_v32 = vld [vmem:[#allocation6 + $0x4d4] sm:$0xf]  ;;  %v5584_v40 = vor.u32 %v7603_v30, %v5581_v0 }
 0x281   :  { %4272 = vmatpush.bf16.msra.mxu2 %v5968_v49  ;;  %4247 = vmatpush.bf16.msra.mxu0 %v5424_v13  ;;  %v5837_v23 = vld [vmem:[#allocation6 + $0x4f0] sm:$0xf0]  ;;  %v4022_v13 = vadd.f32 %v4021_v63, %v4009_v61 }
 0x282   :  { %4241 = vmatmul.bf16.vlgmr.msrb.gmra.mxu3 %v8586_v22  ;;  %v7731_v4 = vld [vmem:[#allocation6 + $0x6d4] sm:$0xf]  ;;  %v5840_v42 = vor.u32 %v7667_v32, %v5837_v23 }
 0x283   :  { %4285 = vmatpush.bf16.msra.mxu3 %v6224_v62  ;;  %4260 = vmatpush.bf16.msra.mxu1 %v5680_v46  ;;  %v6093_v27 = vld [vmem:[#allocation6 + $0x6f0] sm:$0xf0]  ;;  %v3997_v46 = vpop.f32.mrf.mxu0  ;;  %v8639_v19 = vadd.f32 %v4034_v14, %v4022_v13 }
 0x284   :  { %v7531_v60 = vld [vmem:[#allocation6 + $0x94] sm:$0xf]  ;;  %v6096_v48 = vor.u32 %v7731_v4, %v6093_v27 }
 0x285   :  { %4273 = vmatpush.bf16.msra.mxu2 %v5936_v44  ;;  %4248 = vmatpush.bf16.msra.mxu0 %v5392_v58  ;;  %v5293_v41 = vld [vmem:[#allocation6 + $0xb0] sm:$0xf0]  ;;  %v4010_v47 = vpop.f32.mrf.mxu1 }
 0x286   :  { %v7595_v49 = vld [vmem:[#allocation6 + $0x294] sm:$0xf]  ;;  %v5296_v51 = vor.u32 %v7531_v60, %v5293_v41 }
 0x287   :  { %4286 = vmatpush.bf16.msra.mxu3 %v6192_v52  ;;  %4261 = vmatpush.bf16.msra.mxu1 %v5648_v18  ;;  %v5549_v62 = vld [vmem:[#allocation6 + $0x2b0] sm:$0xf0] }
 0x288   :  { %v7659_v31 = vld [vmem:[#allocation6 + $0x494] sm:$0xf]  ;;  %v5552_v44 = vor.u32 %v7595_v49, %v5549_v62 }
 0x289   :  { %4274 = vmatpush.bf16.msra.mxu2 %v5904_v12  ;;  %4249 = vmatpush.bf16.msra.mxu0 %v5360_v36  ;;  %v5805_v15 = vld [vmem:[#allocation6 + $0x4b0] sm:$0xf0]  ;;  %v4023_v36 = vpop.f32.mrf.mxu2 }
 0x28a   :  { %v7723_v16 = vld [vmem:[#allocation6 + $0x694] sm:$0xf]  ;;  %v5808_v9 = vor.u32 %v7659_v31, %v5805_v15 }
 0x28b   :  { %4287 = vmatpush.bf16.msra.mxu3 %v6160_v35  ;;  %4262 = vmatpush.bf16.msra.mxu1 %v5616_v45  ;;  %v6061_v17 = vld [vmem:[#allocation6 + $0x6b0] sm:$0xf0]  ;;  %v4036_v45 = vpop.f32.mrf.mxu3  ;;  %v4047_v36 = vpop.f32.mrf.mxu0 }
 0x28c   :  { %v7523_v52 = vld [vmem:[#allocation6 + $0x54] sm:$0xf]  ;;  %v6064_v20 = vor.u32 %v7723_v16, %v6061_v17 }
 0x28d   :  { %4275 = vmatpush.bf16.msra.mxu2 %v5872_v11  ;;  %4250 = vmatpush.bf16.msra.mxu0 %v5328_v21  ;;  %v5261_v56 = vld [vmem:[#allocation6 + $0x70] sm:$0xf0]  ;;  %v4060_v45 = vpop.f32.mrf.mxu1 }
 0x28e   :  { %v7587_v2 = vld [vmem:[#allocation6 + $0x254] sm:$0xf]  ;;  %v5264_v35 = vor.u32 %v7523_v52, %v5261_v56 }
 0x28f   :  { %4288 = vmatpush.bf16.msra.mxu3 %v6128_v39  ;;  %4263 = vmatpush.bf16.msra.mxu1 %v5584_v40  ;;  %v5517_v57 = vld [vmem:[#allocation6 + $0x270] sm:$0xf0] }
 0x290   :  { %v7651_v58 = vld [vmem:[#allocation6 + $0x454] sm:$0xf]  ;;  %v5520_v53 = vor.u32 %v7587_v2, %v5517_v57 }
 0x291   :  { %4276 = vmatpush.bf16.msra.mxu2 %v5840_v42  ;;  %v5773_v18 = vld [vmem:[#allocation6 + $0x470] sm:$0xf0]  ;;  %4251 = vmatpush.bf16.msra.mxu0 %v5296_v51 }
 0x292   :  { %v7715_v5 = vld [vmem:[#allocation6 + $0x654] sm:$0xf]  ;;  %v5776_v7 = vor.u32 %v7651_v58, %v5773_v18 }
 0x293   :  { %4289 = vmatpush.bf16.msra.mxu3 %v6096_v48  ;;  %v6029_v3 = vld [vmem:[#allocation6 + $0x670] sm:$0xf0]  ;;  %4264 = vmatpush.bf16.msra.mxu1 %v5552_v44 }
 0x294   :  { %v7515_v12 = vld [vmem:[#allocation6 + $0x14] sm:$0xf]  ;;  %v6032_v1 = vor.u32 %v7715_v5, %v6029_v3  ;;  %v8645_v3 = vld [vmem:[#allocation7] sm:$0xff] }
 0x295   :  { %v5229_v59 = vld [vmem:[#allocation6 + $0x30] sm:$0xf0]  ;;  %4277 = vmatpush.bf16.msra.mxu2 %v5808_v9  ;;  %4252 = vmatpush.bf16.msra.mxu0 %v5264_v35 }
 0x296   :  { %v7579_v6 = vld [vmem:[#allocation6 + $0x214] sm:$0xf]  ;;  %v5232_v32 = vor.u32 %v7515_v12, %v5229_v59  ;;  %v1153_v12 = vperm.slane %v8645_v3, 3 }
 0x297   :  { %v5485_v33 = vld [vmem:[#allocation6 + $0x230] sm:$0xf0]  ;;  %4290 = vmatpush.bf16.msra.mxu3 %v6064_v20  ;;  %4265 = vmatpush.bf16.msra.mxu1 %v5520_v53 }
 0x298   :  { %v7643_v26 = vld [vmem:[#allocation6 + $0x414] sm:$0xf]  ;;  %v5488_v61 = vor.u32 %v7579_v6, %v5485_v33 }
 0x299   :  { %v5741_v28 = vld [vmem:[#allocation6 + $0x430] sm:$0xf0]  ;;  %4278 = vmatpush.bf16.msra.mxu2 %v5776_v7  ;;  %4253 = vmatpush.bf16.msra.mxu0 %v5232_v32 }
 0x29a   :  { %v7707_v29 = vld [vmem:[#allocation6 + $0x614] sm:$0xf]  ;;  %v5744_v21 = vor.u32 %v7643_v26, %v5741_v28 }
 0x29b   :  { %v5997_v37 = vld [vmem:[#allocation6 + $0x630] sm:$0xf0]  ;;  %4291 = vmatpush.bf16.msra.mxu3 %v6032_v1  ;;  %4266 = vmatpush.bf16.msra.mxu1 %v5488_v61 }
 0x29c   :  { %v7827_v24 = vld [vmem:[#allocation6 + $0x9d4] sm:$0xf]  ;;  %v6000_v40 = vor.u32 %v7707_v29, %v5997_v37  ;;  %4254 = vmatmul.bf16.vlgmr.msra.gmra.mxu0 %v8556_v10  ;;  %v4048_v37 = vadd.f32 %v4047_v36, %v1153_v12 }
 0x29d   :  { %v6477_v11 = vld [vmem:[#allocation6 + $0x9f0] sm:$0xf0]  ;;  %4279 = vmatpush.bf16.msra.mxu2 %v5744_v21 }
 0x29e   :  { %v7891_v39 = vld [vmem:[#allocation6 + $0xbd4] sm:$0xf]  ;;  %v6480_v60 = vor.u32 %v7827_v24, %v6477_v11  ;;  %4267 = vmatmul.bf16.vlgmr.msra.gmra.mxu1 %v8558_v54 }
 0x29f   :  { %v6733_v30 = vld [vmem:[#allocation6 + $0xbf0] sm:$0xf0]  ;;  %4292 = vmatpush.bf16.msra.mxu3 %v6000_v40 }
 0x2a0   :  { %v7955_v0 = vld [vmem:[#allocation6 + $0xdd4] sm:$0xf]  ;;  %v6736_v41 = vor.u32 %v7891_v39, %v6733_v30  ;;  %4298 = vmatpush.bf16.msrb.mxu0 %v6480_v60  ;;  %4280 = vmatmul.bf16.vlgmr.msra.gmra.mxu2 %v8560_v55 }
 0x2a1   :  { %v6989_v23 = vld [vmem:[#allocation6 + $0xdf0] sm:$0xf0] }
 0x2a2   :  { %v8019_v4 = vld [vmem:[#allocation6 + $0xfd4] sm:$0xf]  ;;  %v6992_v49 = vor.u32 %v7955_v0, %v6989_v23  ;;  %4311 = vmatpush.bf16.msrb.mxu1 %v6736_v41  ;;  %4293 = vmatmul.bf16.vlgmr.msra.gmra.mxu3 %v8562_v8 }
 0x2a3   :  { %v7245_v27 = vld [vmem:[#allocation6 + $0xff0] sm:$0xf0] }
 0x2a4   :  { %v7819_v42 = vld [vmem:[#allocation6 + $0x994] sm:$0xf]  ;;  %v7248_v62 = vor.u32 %v8019_v4, %v7245_v27  ;;  %4324 = vmatpush.bf16.msrb.mxu2 %v6992_v49  ;;  %v4061_v27 = vadd.f32 %v4060_v45, %v4048_v37 }
 0x2a5   :  { %v6445_v48 = vld [vmem:[#allocation6 + $0x9b0] sm:$0xf0] }
 0x2a6   :  { %v7883_v31 = vld [vmem:[#allocation6 + $0xb94] sm:$0xf]  ;;  %v6448_v13 = vor.u32 %v7819_v42, %v6445_v48  ;;  %4337 = vmatpush.bf16.msrb.mxu3 %v7248_v62 }
 0x2a7   :  { %v6701_v63 = vld [vmem:[#allocation6 + $0xbb0] sm:$0xf0] }
 0x2a8   :  { %v7947_v14 = vld [vmem:[#allocation6 + $0xd94] sm:$0xf]  ;;  %v6704_v46 = vor.u32 %v7883_v31, %v6701_v63  ;;  %4299 = vmatpush.bf16.msrb.mxu0 %v6448_v13 }
 0x2a9   :  { %v6957_v15 = vld [vmem:[#allocation6 + $0xdb0] sm:$0xf0] }
 0x2aa   :  { %v8011_v16 = vld [vmem:[#allocation6 + $0xf94] sm:$0xf]  ;;  %v6960_v44 = vor.u32 %v7947_v14, %v6957_v15  ;;  %4312 = vmatpush.bf16.msrb.mxu1 %v6704_v46 }
 0x2ab   :  { %v7213_v17 = vld [vmem:[#allocation6 + $0xfb0] sm:$0xf0] }
 0x2ac   :  { %v7811_v47 = vld [vmem:[#allocation6 + $0x954] sm:$0xf]  ;;  %v7216_v52 = vor.u32 %v8011_v16, %v7213_v17  ;;  %4325 = vmatpush.bf16.msrb.mxu2 %v6960_v44  ;;  %v4073_v16 = vpop.f32.mrf.mxu2  ;;  %v4086_v17 = vpop.f32.mrf.mxu3 }
 0x2ad   :  { %v6413_v51 = vld [vmem:[#allocation6 + $0x970] sm:$0xf0]  ;;  %v4049_v44 = vpop.f32.mrf.mxu0 }
 0x2ae   :  { %v7875_v56 = vld [vmem:[#allocation6 + $0xb54] sm:$0xf]  ;;  %v6416_v18 = vor.u32 %v7811_v47, %v6413_v51  ;;  %4338 = vmatpush.bf16.msrb.mxu3 %v7216_v52  ;;  %v4074_v51 = vadd.f32 %v4073_v16, %v4061_v27  ;;  %v4062_v52 = vpop.f32.mrf.mxu1  ;;  %v5971_v27 = vld [vmem:[#allocation6 + $0x5d8] sm:$0xf] }
 0x2af   :  { %v6669_v9 = vld [vmem:[#allocation6 + $0xb70] sm:$0xf0]  ;;  %v7760_v44 = vld [vmem:[#allocation6 + $0x7b4] sm:$0xf0] }
 0x2b0   :  { %v7939_v20 = vld [vmem:[#allocation6 + $0xd54] sm:$0xf]  ;;  %v6672_v5 = vor.u32 %v7875_v56, %v6669_v9  ;;  %4300 = vmatpush.bf16.msrb.mxu0 %v6416_v18 }
 0x2b1   :  { %v6925_v2 = vld [vmem:[#allocation6 + $0xd70] sm:$0xf0] }
 0x2b2   :  { %v8003_v57 = vld [vmem:[#allocation6 + $0xf54] sm:$0xf]  ;;  %v6928_v59 = vor.u32 %v7939_v20, %v6925_v2  ;;  %4313 = vmatpush.bf16.msrb.mxu1 %v6672_v5 }
 0x2b3   :  { %v7181_v58 = vld [vmem:[#allocation6 + $0xf70] sm:$0xf0] }
 0x2b4   :  { %v7803_v35 = vld [vmem:[#allocation6 + $0x914] sm:$0xf]  ;;  %v7184_v6 = vor.u32 %v8003_v57, %v7181_v58  ;;  %4326 = vmatpush.bf16.msrb.mxu2 %v6928_v59  ;;  %v8648_v57 = vadd.f32 %v4086_v17, %v4074_v51  ;;  %v5683_v17 = vld [vmem:[#allocation6 + $0x398] sm:$0xf] }
 0x2b5   :  { %v6381_v53 = vld [vmem:[#allocation6 + $0x930] sm:$0xf0]  ;;  %v6195_v51 = vld [vmem:[#allocation6 + $0x798] sm:$0xf] }
 0x2b6   :  { %v7867_v33 = vld [vmem:[#allocation6 + $0xb14] sm:$0xf]  ;;  %v6384_v24 = vor.u32 %v7803_v35, %v6381_v53  ;;  %4339 = vmatpush.bf16.msrb.mxu3 %v7184_v6 }
 0x2b7   :  { %v6637_v7 = vld [vmem:[#allocation6 + $0xb30] sm:$0xf0] }
 0x2b8   :  { %v7931_v1 = vld [vmem:[#allocation6 + $0xd14] sm:$0xf]  ;;  %v6640_v11 = vor.u32 %v7867_v33, %v6637_v7  ;;  %4301 = vmatpush.bf16.msrb.mxu0 %v6384_v24 }
 0x2b9   :  { %v6893_v26 = vld [vmem:[#allocation6 + $0xd30] sm:$0xf0] }
 0x2ba   :  { %v7995_v28 = vld [vmem:[#allocation6 + $0xf14] sm:$0xf]  ;;  %v6896_v0 = vor.u32 %v7931_v1, %v6893_v26  ;;  %4314 = vmatpush.bf16.msrb.mxu1 %v6640_v11 }
 0x2bb   :  { %v7149_v29 = vld [vmem:[#allocation6 + $0xf30] sm:$0xf0] }
 0x2bc   :  { %v7795_v39 = vld [vmem:[#allocation6 + $0x8d4] sm:$0xf]  ;;  %v7152_v32 = vor.u32 %v7995_v28, %v7149_v29  ;;  %4327 = vmatpush.bf16.msrb.mxu2 %v6896_v0 }
 0x2bd   :  { %v6349_v30 = vld [vmem:[#allocation6 + $0x8f0] sm:$0xf0] }
 0x2be   :  { %v7859_v61 = vld [vmem:[#allocation6 + $0xad4] sm:$0xf]  ;;  %v6352_v41 = vor.u32 %v7795_v39, %v6349_v30  ;;  %4340 = vmatpush.bf16.msrb.mxu3 %v7152_v32  ;;  %v4075_v39 = vpop.f32.mrf.mxu2  ;;  %v4088_v30 = vpop.f32.mrf.mxu3  ;;  %v5459_v32 = vld [vmem:[#allocation6 + $0x1d8] sm:$0xf] }
 0x2bf   :  { %v6605_v23 = vld [vmem:[#allocation6 + $0xaf0] sm:$0xf0]  ;;  %v4099_v39 = vpop.f32.mrf.mxu0  ;;  %v4112_v30 = vpop.f32.mrf.mxu1 }
 0x2c0   :  { %v7923_v4 = vld [vmem:[#allocation6 + $0xcd4] sm:$0xf]  ;;  %v6608_v42 = vor.u32 %v7859_v61, %v6605_v23  ;;  %4302 = vmatpush.bf16.msrb.mxu0 %v6352_v41  ;;  %v7576_v61 = vld [vmem:[#allocation6 + $0x1f4] sm:$0xf0] }
 0x2c1   :  { %v6861_v21 = vld [vmem:[#allocation6 + $0xcf0] sm:$0xf0]  ;;  %v5715_v23 = vld [vmem:[#allocation6 + $0x3d8] sm:$0xf] }
 0x2c2   :  { %v7987_v40 = vld [vmem:[#allocation6 + $0xed4] sm:$0xf]  ;;  %v6864_v62 = vor.u32 %v7923_v4, %v6861_v21  ;;  %4315 = vmatpush.bf16.msrb.mxu1 %v6608_v42  ;;  %v7640_v4 = vld [vmem:[#allocation6 + $0x3f4] sm:$0xf0] }
 0x2c3   :  { %v7117_v60 = vld [vmem:[#allocation6 + $0xef0] sm:$0xf0]  ;;  %v6227_v41 = vld [vmem:[#allocation6 + $0x7d8] sm:$0xf] }
 0x2c4   :  { %v7787_v48 = vld [vmem:[#allocation6 + $0x894] sm:$0xf]  ;;  %v7120_v31 = vor.u32 %v7987_v40, %v7117_v60  ;;  %4328 = vmatpush.bf16.msrb.mxu2 %v6864_v62  ;;  %v7704_v60 = vld [vmem:[#allocation6 + $0x5f4] sm:$0xf0]  ;;  %v5460_v62 = vor.u32 %v7576_v61, %v5459_v32 }
 0x2c5   :  { %v6317_v49 = vld [vmem:[#allocation6 + $0x8b0] sm:$0xf0]  ;;  %v7768_v42 = vld [vmem:[#allocation6 + $0x7f4] sm:$0xf0] }
 0x2c6   :  { %v7851_v63 = vld [vmem:[#allocation6 + $0xa94] sm:$0xf]  ;;  %v6320_v56 = vor.u32 %v7787_v48, %v6317_v49  ;;  %4341 = vmatpush.bf16.msrb.mxu3 %v7120_v31  ;;  %v5716_v31 = vor.u32 %v7640_v4, %v5715_v23  ;;  %v6228_v16 = vor.u32 %v7768_v42, %v6227_v41  ;;  %v5331_v23 = vld [vmem:[#allocation6 + $0xd8] sm:$0xf] }
 0x2c7   :  { %v6573_v14 = vld [vmem:[#allocation6 + $0xab0] sm:$0xf0]  ;;  %v7544_v4 = vld [vmem:[#allocation6 + $0xf4] sm:$0xf0] }
 0x2c8   :  { %v7915_v15 = vld [vmem:[#allocation6 + $0xc94] sm:$0xf]  ;;  %v6576_v9 = vor.u32 %v7851_v63, %v6573_v14  ;;  %4303 = vmatpush.bf16.msrb.mxu0 %v6320_v56  ;;  %v5427_v63 = vld [vmem:[#allocation6 + $0x198] sm:$0xf] }
 0x2c9   :  { %v6829_v13 = vld [vmem:[#allocation6 + $0xcb0] sm:$0xf0]  ;;  %v7568_v14 = vld [vmem:[#allocation6 + $0x1b4] sm:$0xf0] }
 0x2ca   :  { %v7979_v46 = vld [vmem:[#allocation6 + $0xe94] sm:$0xf]  ;;  %v6832_v58 = vor.u32 %v7915_v15, %v6829_v13  ;;  %4316 = vmatpush.bf16.msrb.mxu1 %v6576_v9  ;;  %v5972_v15 = vor.u32 %v7704_v60, %v5971_v27  ;;  %v7632_v13 = vld [vmem:[#allocation6 + $0x3b4] sm:$0xf0]  ;;  %v5428_v52 = vor.u32 %v7568_v14, %v5427_v63 }
 0x2cb   :  { %v7085_v47 = vld [vmem:[#allocation6 + $0xeb0] sm:$0xf0]  ;;  %v5684_v56 = vor.u32 %v7632_v13, %v5683_v17  ;;  %v5395_v9 = vld [vmem:[#allocation6 + $0x158] sm:$0xf] }
 0x2cc   :  { %v7779_v20 = vld [vmem:[#allocation6 + $0x854] sm:$0xf]  ;;  %v7088_v18 = vor.u32 %v7979_v46, %v7085_v47  ;;  %4329 = vmatpush.bf16.msrb.mxu2 %v6832_v58  ;;  %v5939_v46 = vld [vmem:[#allocation6 + $0x598] sm:$0xf]  ;;  %v6196_v58 = vor.u32 %v7760_v44, %v6195_v51  ;;  %v4138_v51 = vpop.f32.mrf.mxu3 }
 0x2cd   :  { %v6285_v2 = vld [vmem:[#allocation6 + $0x870] sm:$0xf0]  ;;  %v7696_v47 = vld [vmem:[#allocation6 + $0x5b4] sm:$0xf0] }
 0x2ce   :  { %v7843_v5 = vld [vmem:[#allocation6 + $0xa54] sm:$0xf]  ;;  %v6288_v7 = vor.u32 %v7779_v20, %v6285_v2  ;;  %4342 = vmatpush.bf16.msrb.mxu3 %v7088_v18  ;;  %v7560_v20 = vld [vmem:[#allocation6 + $0x174] sm:$0xf0]  ;;  %v5940_v2 = vor.u32 %v7696_v47, %v5939_v46  ;;  %v4125_v47 = vpop.f32.mrf.mxu2 }
 0x2cf   :  { %v6541_v12 = vld [vmem:[#allocation6 + $0xa70] sm:$0xf0]  ;;  %v5651_v18 = vld [vmem:[#allocation6 + $0x358] sm:$0xf] }
 0x2d0   :  { %v7907_v35 = vld [vmem:[#allocation6 + $0xc54] sm:$0xf]  ;;  %v6544_v1 = vor.u32 %v7843_v5, %v6541_v12  ;;  %4304 = vmatpush.bf16.msrb.mxu0 %v6288_v7  ;;  %v7624_v5 = vld [vmem:[#allocation6 + $0x374] sm:$0xf0] }
 0x2d1   :  { %v6797_v53 = vld [vmem:[#allocation6 + $0xc70] sm:$0xf0]  ;;  %v5907_v12 = vld [vmem:[#allocation6 + $0x558] sm:$0xf] }
 0x2d2   :  { %v7971_v59 = vld [vmem:[#allocation6 + $0xe54] sm:$0xf]  ;;  %v6800_v36 = vor.u32 %v7907_v35, %v6797_v53  ;;  %4317 = vmatpush.bf16.msrb.mxu1 %v6544_v1  ;;  %v7688_v35 = vld [vmem:[#allocation6 + $0x574] sm:$0xf0] }
 0x2d3   :  { %v7053_v6 = vld [vmem:[#allocation6 + $0xe70] sm:$0xf0]  ;;  %v6163_v53 = vld [vmem:[#allocation6 + $0x758] sm:$0xf] }
 0x2d4   :  { %v7771_v33 = vld [vmem:[#allocation6 + $0x814] sm:$0xf]  ;;  %v7056_v45 = vor.u32 %v7971_v59, %v7053_v6  ;;  %4330 = vmatpush.bf16.msrb.mxu2 %v6800_v36  ;;  %v7752_v59 = vld [vmem:[#allocation6 + $0x774] sm:$0xf0]  ;;  %v5396_v6 = vor.u32 %v7560_v20, %v5395_v9  ;;  %v4101_v20 = vpop.f32.mrf.mxu0 }
 0x2d5   :  { %v6253_v26 = vld [vmem:[#allocation6 + $0x830] sm:$0xf0]  ;;  %v5363_v7 = vld [vmem:[#allocation6 + $0x118] sm:$0xf] }
 0x2d6   :  { %v7835_v28 = vld [vmem:[#allocation6 + $0xa14] sm:$0xf]  ;;  %v6256_v21 = vor.u32 %v7771_v33, %v6253_v26  ;;  %4343 = vmatpush.bf16.msrb.mxu3 %v7056_v45  ;;  %v5652_v33 = vor.u32 %v7624_v5, %v5651_v18  ;;  %v7552_v1 = vld [vmem:[#allocation6 + $0x134] sm:$0xf0]  ;;  %v5908_v26 = vor.u32 %v7688_v35, %v5907_v12 }
 0x2d7   :  { %v6509_v29 = vld [vmem:[#allocation6 + $0xa30] sm:$0xf0]  ;;  %v7616_v36 = vld [vmem:[#allocation6 + $0x334] sm:$0xf0]  ;;  %v5364_v32 = vor.u32 %v7552_v1, %v5363_v7 }
 0x2d8   :  { %v7899_v37 = vld [vmem:[#allocation6 + $0xc14] sm:$0xf]  ;;  %v6512_v40 = vor.u32 %v7835_v28, %v6509_v29  ;;  %4305 = vmatpush.bf16.msrb.mxu0 %v6256_v21  ;;  %v6164_v28 = vor.u32 %v7752_v59, %v6163_v53  ;;  %v5619_v29 = vld [vmem:[#allocation6 + $0x318] sm:$0xf] }
 0x2d9   :  { %v6765_v24 = vld [vmem:[#allocation6 + $0xc30] sm:$0xf0]  ;;  %v5875_v45 = vld [vmem:[#allocation6 + $0x518] sm:$0xf]  ;;  %v5620_v61 = vor.u32 %v7616_v36, %v5619_v29 }
 0x2da   :  { %v7963_v11 = vld [vmem:[#allocation6 + $0xe14] sm:$0xf]  ;;  %v6768_v48 = vor.u32 %v7899_v37, %v6765_v24  ;;  %4318 = vmatpush.bf16.msrb.mxu1 %v6512_v40  ;;  %v7680_v37 = vld [vmem:[#allocation6 + $0x534] sm:$0xf0] }
 0x2db   :  { %v7021_v0 = vld [vmem:[#allocation6 + $0xe30] sm:$0xf0]  ;;  %4306 = vmatmul.bf16.vlgmr.msrb.gmra.mxu0 %v8580_v34  ;;  %v6131_v24 = vld [vmem:[#allocation6 + $0x718] sm:$0xf]  ;;  %v5876_v27 = vor.u32 %v7680_v37, %v5875_v45 }
 0x2dc   :  { %v7024_v49 = vor.u32 %v7963_v11, %v7021_v0  ;;  %4331 = vmatpush.bf16.msrb.mxu2 %v6768_v48  ;;  %4350 = vmatpush.bf16.msra.mxu0 %v5460_v62  ;;  %v7744_v11 = vld [vmem:[#allocation6 + $0x734] sm:$0xf0]  ;;  %v4100_v0 = vadd.f32 %v4099_v39, %v8648_v57 }
 0x2dd   :  { %4319 = vmatmul.bf16.vlgmr.msrb.gmra.mxu1 %v8582_v38  ;;  %v6132_v21 = vor.u32 %v7744_v11, %v6131_v24  ;;  %v5587_v40 = vld [vmem:[#allocation6 + $0x2d8] sm:$0xf] }
 0x2de   :  { %4344 = vmatpush.bf16.msrb.mxu3 %v7024_v49  ;;  %4363 = vmatpush.bf16.msra.mxu1 %v5716_v31  ;;  %v7608_v60 = vld [vmem:[#allocation6 + $0x2f4] sm:$0xf0]  ;;  %v4113_v42 = vadd.f32 %v4112_v30, %v4100_v0  ;;  %v5332_v31 = vor.u32 %v7544_v4, %v5331_v23  ;;  %v4127_v23 = vpop.f32.mrf.mxu2  ;;  %v4140_v4 = vpop.f32.mrf.mxu3 }
 0x2df   :  { %4332 = vmatmul.bf16.vlgmr.msrb.gmra.mxu2 %v8584_v43  ;;  %v5843_v41 = vld [vmem:[#allocation6 + $0x4d8] sm:$0xf]  ;;  %v5588_v63 = vor.u32 %v7608_v60, %v5587_v40  ;;  %v4151_v4 = vpop.f32.mrf.mxu0 }
 0x2e0   :  { %4376 = vmatpush.bf16.msra.mxu2 %v5972_v15  ;;  %4351 = vmatpush.bf16.msra.mxu0 %v5428_v52  ;;  %v7672_v48 = vld [vmem:[#allocation6 + $0x4f4] sm:$0xf0]  ;;  %v4126_v9 = vadd.f32 %v4125_v47, %v4113_v42 }
 0x2e1   :  { %4345 = vmatmul.bf16.vlgmr.msrb.gmra.mxu3 %v8586_v22  ;;  %v6099_v49 = vld [vmem:[#allocation6 + $0x6d8] sm:$0xf]  ;;  %v5844_v15 = vor.u32 %v7672_v48, %v5843_v41 }
 0x2e2   :  { %4389 = vmatpush.bf16.msra.mxu3 %v6228_v16  ;;  %4364 = vmatpush.bf16.msra.mxu1 %v5684_v56  ;;  %v7736_v62 = vld [vmem:[#allocation6 + $0x6f4] sm:$0xf0]  ;;  %v8655_v35 = vadd.f32 %v4138_v51, %v4126_v9 }
 0x2e3   :  { %v5299_v57 = vld [vmem:[#allocation6 + $0x98] sm:$0xf]  ;;  %v6100_v16 = vor.u32 %v7736_v62, %v6099_v49 }
 0x2e4   :  { %4377 = vmatpush.bf16.msra.mxu2 %v5940_v2  ;;  %4352 = vmatpush.bf16.msra.mxu0 %v5396_v6  ;;  %v7536_v14 = vld [vmem:[#allocation6 + $0xb4] sm:$0xf0]  ;;  %v4114_v2 = vpop.f32.mrf.mxu1 }
 0x2e5   :  { %v5555_v17 = vld [vmem:[#allocation6 + $0x298] sm:$0xf] }
 0x2e6   :  { %4390 = vmatpush.bf16.msra.mxu3 %v6196_v58  ;;  %4365 = vmatpush.bf16.msra.mxu1 %v5652_v33  ;;  %v7600_v13 = vld [vmem:[#allocation6 + $0x2b4] sm:$0xf0]  ;;  %v5300_v58 = vor.u32 %v7536_v14, %v5299_v57 }
 0x2e7   :  { %v5811_v46 = vld [vmem:[#allocation6 + $0x498] sm:$0xf]  ;;  %v5556_v18 = vor.u32 %v7600_v13, %v5555_v17 }
 0x2e8   :  { %4378 = vmatpush.bf16.msra.mxu2 %v5908_v26  ;;  %4353 = vmatpush.bf16.msra.mxu0 %v5364_v32  ;;  %v7664_v44 = vld [vmem:[#allocation6 + $0x4b4] sm:$0xf0] }
 0x2e9   :  { %v6067_v52 = vld [vmem:[#allocation6 + $0x698] sm:$0xf]  ;;  %v5812_v53 = vor.u32 %v7664_v44, %v5811_v46 }
 0x2ea   :  { %4391 = vmatpush.bf16.msra.mxu3 %v6164_v28  ;;  %4366 = vmatpush.bf16.msra.mxu1 %v5620_v61  ;;  %v7728_v56 = vld [vmem:[#allocation6 + $0x6b4] sm:$0xf0] }
 0x2eb   :  { %v5267_v5 = vld [vmem:[#allocation6 + $0x58] sm:$0xf]  ;;  %v6068_v59 = vor.u32 %v7728_v56, %v6067_v52 }
 0x2ec   :  { %4379 = vmatpush.bf16.msra.mxu2 %v5876_v27  ;;  %4354 = vmatpush.bf16.msra.mxu0 %v5332_v31  ;;  %v7528_v12 = vld [vmem:[#allocation6 + $0x74] sm:$0xf0] }
 0x2ed   :  { %v5523_v6 = vld [vmem:[#allocation6 + $0x258] sm:$0xf]  ;;  %v5268_v36 = vor.u32 %v7528_v12, %v5267_v5 }
 0x2ee   :  { %4392 = vmatpush.bf16.msra.mxu3 %v6132_v21  ;;  %4367 = vmatpush.bf16.msra.mxu1 %v5588_v63  ;;  %v7592_v33 = vld [vmem:[#allocation6 + $0x274] sm:$0xf0] }
 0x2ef   :  { %v5779_v7 = vld [vmem:[#allocation6 + $0x458] sm:$0xf]  ;;  %v5524_v45 = vor.u32 %v7592_v33, %v5523_v6 }
 0x2f0   :  { %4380 = vmatpush.bf16.msra.mxu2 %v5844_v15  ;;  %v7656_v1 = vld [vmem:[#allocation6 + $0x474] sm:$0xf0]  ;;  %4355 = vmatpush.bf16.msra.mxu0 %v5300_v58 }
 0x2f1   :  { %v6035_v26 = vld [vmem:[#allocation6 + $0x658] sm:$0xf]  ;;  %v5780_v39 = vor.u32 %v7656_v1, %v5779_v7 }
 0x2f2   :  { %4393 = vmatpush.bf16.msra.mxu3 %v6100_v16  ;;  %v7720_v28 = vld [vmem:[#allocation6 + $0x674] sm:$0xf0]  ;;  %4368 = vmatpush.bf16.msra.mxu1 %v5556_v18 }
 0x2f3   :  { %v5235_v29 = vld [vmem:[#allocation6 + $0x18] sm:$0xf]  ;;  %v6036_v30 = vor.u32 %v7720_v28, %v6035_v26 }
 0x2f4   :  { %v7520_v37 = vld [vmem:[#allocation6 + $0x34] sm:$0xf0]  ;;  %4381 = vmatpush.bf16.msra.mxu2 %v5812_v53  ;;  %4356 = vmatpush.bf16.msra.mxu0 %v5268_v36  ;;  %v1154_v36 = vperm.slane %v8645_v3, 4 }
 0x2f5   :  { %v5491_v24 = vld [vmem:[#allocation6 + $0x218] sm:$0xf]  ;;  %v5236_v48 = vor.u32 %v7520_v37, %v5235_v29 }
 0x2f6   :  { %v7584_v11 = vld [vmem:[#allocation6 + $0x234] sm:$0xf0]  ;;  %4394 = vmatpush.bf16.msra.mxu3 %v6068_v59  ;;  %4369 = vmatpush.bf16.msra.mxu1 %v5524_v45 }
 0x2f7   :  { %v5747_v0 = vld [vmem:[#allocation6 + $0x418] sm:$0xf]  ;;  %v5492_v49 = vor.u32 %v7584_v11, %v5491_v24 }
 0x2f8   :  { %v7648_v32 = vld [vmem:[#allocation6 + $0x434] sm:$0xf0]  ;;  %4382 = vmatpush.bf16.msra.mxu2 %v5780_v39  ;;  %4357 = vmatpush.bf16.msra.mxu0 %v5236_v48 }
 0x2f9   :  { %v6003_v61 = vld [vmem:[#allocation6 + $0x618] sm:$0xf]  ;;  %v5748_v57 = vor.u32 %v7648_v32, %v5747_v0 }
 0x2fa   :  { %v7712_v27 = vld [vmem:[#allocation6 + $0x634] sm:$0xf0]  ;;  %4395 = vmatpush.bf16.msra.mxu3 %v6036_v30  ;;  %4370 = vmatpush.bf16.msra.mxu1 %v5492_v49 }
 0x2fb   :  { %v6483_v21 = vld [vmem:[#allocation6 + $0x9d8] sm:$0xf]  ;;  %v6004_v14 = vor.u32 %v7712_v27, %v6003_v61  ;;  %4358 = vmatmul.bf16.vlgmr.msra.gmra.mxu0 %v8556_v10  ;;  %v4164_v27 = vpop.f32.mrf.mxu1 }
 0x2fc   :  { %v7832_v40 = vld [vmem:[#allocation6 + $0x9f4] sm:$0xf0]  ;;  %4383 = vmatpush.bf16.msra.mxu2 %v5748_v57 }
 0x2fd   :  { %v6739_v60 = vld [vmem:[#allocation6 + $0xbd8] sm:$0xf]  ;;  %v6484_v15 = vor.u32 %v7832_v40, %v6483_v21  ;;  %4371 = vmatmul.bf16.vlgmr.msra.gmra.mxu1 %v8558_v54  ;;  %v4152_v21 = vadd.f32 %v4151_v4, %v1154_v36 }
 0x2fe   :  { %v7896_v41 = vld [vmem:[#allocation6 + $0xbf4] sm:$0xf0]  ;;  %4396 = vmatpush.bf16.msra.mxu3 %v6004_v14 }
 0x2ff   :  { %v6995_v42 = vld [vmem:[#allocation6 + $0xdd8] sm:$0xf]  ;;  %v6740_v16 = vor.u32 %v7896_v41, %v6739_v60  ;;  %4402 = vmatpush.bf16.msrb.mxu0 %v6484_v15  ;;  %4384 = vmatmul.bf16.vlgmr.msra.gmra.mxu2 %v8560_v55 }
 0x300   :  { %v7960_v62 = vld [vmem:[#allocation6 + $0xdf4] sm:$0xf0] }
 0x301   :  { %v7251_v31 = vld [vmem:[#allocation6 + $0xfd8] sm:$0xf]  ;;  %v6996_v46 = vor.u32 %v7960_v62, %v6995_v42  ;;  %4415 = vmatpush.bf16.msrb.mxu1 %v6740_v16  ;;  %4397 = vmatmul.bf16.vlgmr.msra.gmra.mxu3 %v8562_v8 }
 0x302   :  { %v8024_v63 = vld [vmem:[#allocation6 + $0xff4] sm:$0xf0] }
 0x303   :  { %v6451_v17 = vld [vmem:[#allocation6 + $0x998] sm:$0xf]  ;;  %v7252_v47 = vor.u32 %v8024_v63, %v7251_v31  ;;  %4428 = vmatpush.bf16.msrb.mxu2 %v6996_v46  ;;  %v4165_v63 = vadd.f32 %v4164_v27, %v4152_v21 }
 0x304   :  { %v7824_v13 = vld [vmem:[#allocation6 + $0x9b4] sm:$0xf0] }
 0x305   :  { %v6707_v51 = vld [vmem:[#allocation6 + $0xb98] sm:$0xf]  ;;  %v6452_v2 = vor.u32 %v7824_v13, %v6451_v17  ;;  %4441 = vmatpush.bf16.msrb.mxu3 %v7252_v47 }
 0x306   :  { %v7888_v44 = vld [vmem:[#allocation6 + $0xbb4] sm:$0xf0] }
 0x307   :  { %v6963_v52 = vld [vmem:[#allocation6 + $0xd98] sm:$0xf]  ;;  %v6708_v58 = vor.u32 %v7888_v44, %v6707_v51  ;;  %4403 = vmatpush.bf16.msrb.mxu0 %v6452_v2 }
 0x308   :  { %v7952_v56 = vld [vmem:[#allocation6 + $0xdb4] sm:$0xf0] }
 0x309   :  { %v7219_v9 = vld [vmem:[#allocation6 + $0xf98] sm:$0xf]  ;;  %v6964_v12 = vor.u32 %v7952_v56, %v6963_v52  ;;  %4416 = vmatpush.bf16.msrb.mxu1 %v6708_v58 }
 0x30a   :  { %v8016_v20 = vld [vmem:[#allocation6 + $0xfb4] sm:$0xf0] }
 0x30b   :  { %v6419_v18 = vld [vmem:[#allocation6 + $0x958] sm:$0xf]  ;;  %v7220_v53 = vor.u32 %v8016_v20, %v7219_v9  ;;  %4429 = vmatpush.bf16.msrb.mxu2 %v6964_v12  ;;  %v4177_v9 = vpop.f32.mrf.mxu2  ;;  %v4190_v20 = vpop.f32.mrf.mxu3 }
 0x30c   :  { %v7816_v5 = vld [vmem:[#allocation6 + $0x974] sm:$0xf0]  ;;  %v4153_v12 = vpop.f32.mrf.mxu0 }
 0x30d   :  { %v6675_v59 = vld [vmem:[#allocation6 + $0xb58] sm:$0xf]  ;;  %v6420_v28 = vor.u32 %v7816_v5, %v6419_v18  ;;  %4442 = vmatpush.bf16.msrb.mxu3 %v7220_v53  ;;  %v4178_v5 = vadd.f32 %v4177_v9, %v4165_v63  ;;  %v4166_v53 = vpop.f32.mrf.mxu1  ;;  %v7700_v63 = vld [vmem:[#allocation6 + $0x5dc] sm:$0xf] }
 0x30e   :  { %v7880_v6 = vld [vmem:[#allocation6 + $0xb74] sm:$0xf0]  ;;  %v6197_v12 = vld [vmem:[#allocation6 + $0x7b8] sm:$0xf0] }
 0x30f   :  { %v6931_v33 = vld [vmem:[#allocation6 + $0xd58] sm:$0xf]  ;;  %v6676_v29 = vor.u32 %v7880_v6, %v6675_v59  ;;  %4404 = vmatpush.bf16.msrb.mxu0 %v6420_v28 }
 0x310   :  { %v7944_v7 = vld [vmem:[#allocation6 + $0xd74] sm:$0xf0] }
 0x311   :  { %v7187_v1 = vld [vmem:[#allocation6 + $0xf58] sm:$0xf]  ;;  %v6932_v24 = vor.u32 %v7944_v7, %v6931_v33  ;;  %4417 = vmatpush.bf16.msrb.mxu1 %v6676_v29 }
 0x312   :  { %v8008_v26 = vld [vmem:[#allocation6 + $0xf74] sm:$0xf0] }
 0x313   :  { %v6387_v45 = vld [vmem:[#allocation6 + $0x918] sm:$0xf]  ;;  %v7188_v11 = vor.u32 %v8008_v26, %v7187_v1  ;;  %4430 = vmatpush.bf16.msrb.mxu2 %v6932_v24  ;;  %v8662_v1 = vadd.f32 %v4190_v20, %v4178_v5  ;;  %v7628_v20 = vld [vmem:[#allocation6 + $0x39c] sm:$0xf] }
 0x314   :  { %v7808_v37 = vld [vmem:[#allocation6 + $0x934] sm:$0xf0]  ;;  %v7756_v5 = vld [vmem:[#allocation6 + $0x79c] sm:$0xf] }
 0x315   :  { %v6643_v39 = vld [vmem:[#allocation6 + $0xb18] sm:$0xf]  ;;  %v6388_v40 = vor.u32 %v7808_v37, %v6387_v45  ;;  %4443 = vmatpush.bf16.msrb.mxu3 %v7188_v11 }
 0x316   :  { %v7872_v30 = vld [vmem:[#allocation6 + $0xb34] sm:$0xf0] }
 0x317   :  { %v6899_v0 = vld [vmem:[#allocation6 + $0xd18] sm:$0xf]  ;;  %v6644_v60 = vor.u32 %v7872_v30, %v6643_v39  ;;  %4405 = vmatpush.bf16.msrb.mxu0 %v6388_v40 }
 0x318   :  { %v7936_v32 = vld [vmem:[#allocation6 + $0xd34] sm:$0xf0] }
 0x319   :  { %v7155_v61 = vld [vmem:[#allocation6 + $0xf18] sm:$0xf]  ;;  %v6900_v42 = vor.u32 %v7936_v32, %v6899_v0  ;;  %4418 = vmatpush.bf16.msrb.mxu1 %v6644_v60 }
 0x31a   :  { %v8000_v23 = vld [vmem:[#allocation6 + $0xf34] sm:$0xf0] }
 0x31b   :  { %v6355_v3 = vld [vmem:[#allocation6 + $0x8d8] sm:$0xf]  ;;  %v7156_v48 = vor.u32 %v8000_v23, %v7155_v61  ;;  %4431 = vmatpush.bf16.msrb.mxu2 %v6900_v42 }
 0x31c   :  { %v7800_v41 = vld [vmem:[#allocation6 + $0x8f4] sm:$0xf0] }
 0x31d   :  { %v6611_v49 = vld [vmem:[#allocation6 + $0xad8] sm:$0xf]  ;;  %v6356_v16 = vor.u32 %v7800_v41, %v6355_v3  ;;  %4444 = vmatpush.bf16.msrb.mxu3 %v7156_v48  ;;  %v4179_v3 = vpop.f32.mrf.mxu2  ;;  %v4192_v41 = vpop.f32.mrf.mxu3  ;;  %v7572_v48 = vld [vmem:[#allocation6 + $0x1dc] sm:$0xf] }
 0x31e   :  { %v7864_v62 = vld [vmem:[#allocation6 + $0xaf4] sm:$0xf0]  ;;  %v4203_v3 = vpop.f32.mrf.mxu0  ;;  %v4216_v41 = vpop.f32.mrf.mxu1 }
 0x31f   :  { %v6867_v31 = vld [vmem:[#allocation6 + $0xcd8] sm:$0xf]  ;;  %v6612_v17 = vor.u32 %v7864_v62, %v6611_v49  ;;  %4406 = vmatpush.bf16.msrb.mxu0 %v6356_v16  ;;  %v5461_v49 = vld [vmem:[#allocation6 + $0x1f8] sm:$0xf0] }
 0x320   :  { %v7928_v57 = vld [vmem:[#allocation6 + $0xcf4] sm:$0xf0]  ;;  %v7636_v62 = vld [vmem:[#allocation6 + $0x3dc] sm:$0xf] }
 0x321   :  { %v7123_v14 = vld [vmem:[#allocation6 + $0xed8] sm:$0xf]  ;;  %v6868_v47 = vor.u32 %v7928_v57, %v6867_v31  ;;  %4419 = vmatpush.bf16.msrb.mxu1 %v6612_v17  ;;  %v5717_v31 = vld [vmem:[#allocation6 + $0x3f8] sm:$0xf0] }
 0x322   :  { %v7992_v15 = vld [vmem:[#allocation6 + $0xef4] sm:$0xf0]  ;;  %v7764_v16 = vld [vmem:[#allocation6 + $0x7dc] sm:$0xf] }
 0x323   :  { %v6323_v13 = vld [vmem:[#allocation6 + $0x898] sm:$0xf]  ;;  %v7124_v51 = vor.u32 %v7992_v15, %v7123_v14  ;;  %4432 = vmatpush.bf16.msrb.mxu2 %v6868_v47  ;;  %v5973_v15 = vld [vmem:[#allocation6 + $0x5f8] sm:$0xf0]  ;;  %v5464_v47 = vor.u32 %v7572_v48, %v5461_v49 }
 0x324   :  { %v7792_v46 = vld [vmem:[#allocation6 + $0x8b4] sm:$0xf0]  ;;  %v6229_v17 = vld [vmem:[#allocation6 + $0x7f8] sm:$0xf0] }
 0x325   :  { %v6579_v44 = vld [vmem:[#allocation6 + $0xa98] sm:$0xf]  ;;  %v6324_v59 = vor.u32 %v7792_v46, %v6323_v13  ;;  %4445 = vmatpush.bf16.msrb.mxu3 %v7124_v51  ;;  %v5720_v51 = vor.u32 %v7636_v62, %v5717_v31  ;;  %v6232_v9 = vor.u32 %v7764_v16, %v6229_v17  ;;  %v7540_v62 = vld [vmem:[#allocation6 + $0xdc] sm:$0xf] }
 0x326   :  { %v7856_v52 = vld [vmem:[#allocation6 + $0xab4] sm:$0xf0]  ;;  %v5333_v31 = vld [vmem:[#allocation6 + $0xf8] sm:$0xf0] }
 0x327   :  { %v6835_v56 = vld [vmem:[#allocation6 + $0xc98] sm:$0xf]  ;;  %v6580_v6 = vor.u32 %v7856_v52, %v6579_v44  ;;  %4407 = vmatpush.bf16.msrb.mxu0 %v6324_v59  ;;  %v7564_v44 = vld [vmem:[#allocation6 + $0x19c] sm:$0xf] }
 0x328   :  { %v7920_v2 = vld [vmem:[#allocation6 + $0xcb4] sm:$0xf0]  ;;  %v5429_v52 = vld [vmem:[#allocation6 + $0x1b8] sm:$0xf0] }
 0x329   :  { %v7091_v58 = vld [vmem:[#allocation6 + $0xe98] sm:$0xf]  ;;  %v6836_v26 = vor.u32 %v7920_v2, %v6835_v56  ;;  %4420 = vmatpush.bf16.msrb.mxu1 %v6580_v6  ;;  %v5976_v56 = vor.u32 %v7700_v63, %v5973_v15  ;;  %v5685_v2 = vld [vmem:[#allocation6 + $0x3b8] sm:$0xf0]  ;;  %v5432_v53 = vor.u32 %v7564_v44, %v5429_v52 }
 0x32a   :  { %v7984_v18 = vld [vmem:[#allocation6 + $0xeb4] sm:$0xf0]  ;;  %v5688_v59 = vor.u32 %v7628_v20, %v5685_v2  ;;  %v7556_v6 = vld [vmem:[#allocation6 + $0x15c] sm:$0xf] }
 0x32b   :  { %v6291_v33 = vld [vmem:[#allocation6 + $0x858] sm:$0xf]  ;;  %v7092_v28 = vor.u32 %v7984_v18, %v7091_v58  ;;  %4433 = vmatpush.bf16.msrb.mxu2 %v6836_v26  ;;  %v7692_v58 = vld [vmem:[#allocation6 + $0x59c] sm:$0xf]  ;;  %v6200_v26 = vor.u32 %v7756_v5, %v6197_v12  ;;  %v4242_v5 = vpop.f32.mrf.mxu3 }
 0x32c   :  { %v7784_v7 = vld [vmem:[#allocation6 + $0x874] sm:$0xf0]  ;;  %v5941_v18 = vld [vmem:[#allocation6 + $0x5b8] sm:$0xf0] }
 0x32d   :  { %v6547_v29 = vld [vmem:[#allocation6 + $0xa58] sm:$0xf]  ;;  %v6292_v30 = vor.u32 %v7784_v7, %v6291_v33  ;;  %4446 = vmatpush.bf16.msrb.mxu3 %v7092_v28  ;;  %v5397_v33 = vld [vmem:[#allocation6 + $0x178] sm:$0xf0]  ;;  %v5944_v7 = vor.u32 %v7692_v58, %v5941_v18  ;;  %v4229_v18 = vpop.f32.mrf.mxu2 }
 0x32e   :  { %v7848_v36 = vld [vmem:[#allocation6 + $0xa74] sm:$0xf0]  ;;  %v7620_v28 = vld [vmem:[#allocation6 + $0x35c] sm:$0xf] }
 0x32f   :  { %v6803_v45 = vld [vmem:[#allocation6 + $0xc58] sm:$0xf]  ;;  %v6548_v0 = vor.u32 %v7848_v36, %v6547_v29  ;;  %4408 = vmatpush.bf16.msrb.mxu0 %v6292_v30  ;;  %v5653_v29 = vld [vmem:[#allocation6 + $0x378] sm:$0xf0] }
 0x330   :  { %v7912_v37 = vld [vmem:[#allocation6 + $0xc74] sm:$0xf0]  ;;  %v7684_v36 = vld [vmem:[#allocation6 + $0x55c] sm:$0xf] }
 0x331   :  { %v7059_v24 = vld [vmem:[#allocation6 + $0xe58] sm:$0xf]  ;;  %v6804_v4 = vor.u32 %v7912_v37, %v6803_v45  ;;  %4421 = vmatpush.bf16.msrb.mxu1 %v6548_v0  ;;  %v5909_v45 = vld [vmem:[#allocation6 + $0x578] sm:$0xf0] }
 0x332   :  { %v7976_v11 = vld [vmem:[#allocation6 + $0xe74] sm:$0xf0]  ;;  %v7748_v37 = vld [vmem:[#allocation6 + $0x75c] sm:$0xf] }
 0x333   :  { %v6259_v39 = vld [vmem:[#allocation6 + $0x818] sm:$0xf]  ;;  %v7060_v27 = vor.u32 %v7976_v11, %v7059_v24  ;;  %4434 = vmatpush.bf16.msrb.mxu2 %v6804_v4  ;;  %v6165_v24 = vld [vmem:[#allocation6 + $0x778] sm:$0xf0]  ;;  %v5400_v11 = vor.u32 %v7556_v6, %v5397_v33  ;;  %v4205_v33 = vpop.f32.mrf.mxu0 }
 0x334   :  { %v7776_v32 = vld [vmem:[#allocation6 + $0x834] sm:$0xf0]  ;;  %v7548_v30 = vld [vmem:[#allocation6 + $0x11c] sm:$0xf] }
 0x335   :  { %v6515_v61 = vld [vmem:[#allocation6 + $0xa18] sm:$0xf]  ;;  %v6260_v57 = vor.u32 %v7776_v32, %v6259_v39  ;;  %4447 = vmatpush.bf16.msrb.mxu3 %v7060_v27  ;;  %v5656_v39 = vor.u32 %v7620_v28, %v5653_v29  ;;  %v5365_v0 = vld [vmem:[#allocation6 + $0x138] sm:$0xf0]  ;;  %v5912_v32 = vor.u32 %v7684_v36, %v5909_v45 }
 0x336   :  { %v7840_v23 = vld [vmem:[#allocation6 + $0xa34] sm:$0xf0]  ;;  %v5621_v4 = vld [vmem:[#allocation6 + $0x338] sm:$0xf0]  ;;  %v5368_v48 = vor.u32 %v7548_v30, %v5365_v0 }
 0x337   :  { %v6771_v21 = vld [vmem:[#allocation6 + $0xc18] sm:$0xf]  ;;  %v6516_v14 = vor.u32 %v7840_v23, %v6515_v61  ;;  %4409 = vmatpush.bf16.msrb.mxu0 %v6260_v57  ;;  %v6168_v61 = vor.u32 %v7748_v37, %v6165_v24  ;;  %v7612_v23 = vld [vmem:[#allocation6 + $0x31c] sm:$0xf] }
 0x338   :  { %v7904_v40 = vld [vmem:[#allocation6 + $0xc34] sm:$0xf0]  ;;  %v7676_v27 = vld [vmem:[#allocation6 + $0x51c] sm:$0xf]  ;;  %v5624_v49 = vor.u32 %v7612_v23, %v5621_v4 }
 0x339   :  { %v7027_v60 = vld [vmem:[#allocation6 + $0xe18] sm:$0xf]  ;;  %v6772_v13 = vor.u32 %v7904_v40, %v6771_v21  ;;  %4422 = vmatpush.bf16.msrb.mxu1 %v6516_v14  ;;  %v5877_v21 = vld [vmem:[#allocation6 + $0x538] sm:$0xf0] }
 0x33a   :  { %v7968_v42 = vld [vmem:[#allocation6 + $0xe34] sm:$0xf0]  ;;  %4410 = vmatmul.bf16.vlgmr.msrb.gmra.mxu0 %v8580_v34  ;;  %v7740_v40 = vld [vmem:[#allocation6 + $0x71c] sm:$0xf]  ;;  %v5880_v63 = vor.u32 %v7676_v27, %v5877_v21 }
 0x33b   :  { %v7028_v46 = vor.u32 %v7968_v42, %v7027_v60  ;;  %4435 = vmatpush.bf16.msrb.mxu2 %v6772_v13  ;;  %4454 = vmatpush.bf16.msra.mxu0 %v5464_v47  ;;  %v6133_v60 = vld [vmem:[#allocation6 + $0x738] sm:$0xf0]  ;;  %v4204_v42 = vadd.f32 %v4203_v3, %v8662_v1 }
 0x33c   :  { %4423 = vmatmul.bf16.vlgmr.msrb.gmra.mxu1 %v8582_v38  ;;  %v6136_v57 = vor.u32 %v7740_v40, %v6133_v60  ;;  %v7604_v14 = vld [vmem:[#allocation6 + $0x2dc] sm:$0xf] }
 0x33d   :  { %4448 = vmatpush.bf16.msrb.mxu3 %v7028_v46  ;;  %4467 = vmatpush.bf16.msra.mxu1 %v5720_v51  ;;  %v5589_v15 = vld [vmem:[#allocation6 + $0x2f8] sm:$0xf0]  ;;  %v4217_v17 = vadd.f32 %v4216_v41, %v4204_v42  ;;  %v5336_v51 = vor.u32 %v7540_v62, %v5333_v31  ;;  %v4231_v62 = vpop.f32.mrf.mxu2  ;;  %v4244_v31 = vpop.f32.mrf.mxu3 }
 0x33e   :  { %4436 = vmatmul.bf16.vlgmr.msrb.gmra.mxu2 %v8584_v43  ;;  %v7668_v16 = vld [vmem:[#allocation6 + $0x4dc] sm:$0xf]  ;;  %v5592_v44 = vor.u32 %v7604_v14, %v5589_v15 }
 0x33f   :  { %4480 = vmatpush.bf16.msra.mxu2 %v5976_v56  ;;  %4455 = vmatpush.bf16.msra.mxu0 %v5432_v53  ;;  %v5845_v13 = vld [vmem:[#allocation6 + $0x4f8] sm:$0xf0]  ;;  %v4230_v6 = vadd.f32 %v4229_v18, %v4217_v17 }
 0x340   :  { %4449 = vmatmul.bf16.vlgmr.msrb.gmra.mxu3 %v8586_v22  ;;  %v7732_v46 = vld [vmem:[#allocation6 + $0x6dc] sm:$0xf]  ;;  %v5848_v56 = vor.u32 %v7668_v16, %v5845_v13 }
 0x341   :  { %4493 = vmatpush.bf16.msra.mxu3 %v6232_v9  ;;  %4468 = vmatpush.bf16.msra.mxu1 %v5688_v59  ;;  %v6101_v47 = vld [vmem:[#allocation6 + $0x6f8] sm:$0xf0]  ;;  %v8669_v45 = vadd.f32 %v4242_v5, %v4230_v6 }
 0x342   :  { %v7532_v1 = vld [vmem:[#allocation6 + $0x9c] sm:$0xf]  ;;  %v6104_v9 = vor.u32 %v7732_v46, %v6101_v47 }
 0x343   :  { %4481 = vmatpush.bf16.msra.mxu2 %v5944_v7  ;;  %4456 = vmatpush.bf16.msra.mxu0 %v5400_v11  ;;  %v5301_v52 = vld [vmem:[#allocation6 + $0xb8] sm:$0xf0]  ;;  %v4218_v7 = vpop.f32.mrf.mxu1 }
 0x344   :  { %v7596_v20 = vld [vmem:[#allocation6 + $0x29c] sm:$0xf] }
 0x345   :  { %4494 = vmatpush.bf16.msra.mxu3 %v6200_v26  ;;  %4469 = vmatpush.bf16.msra.mxu1 %v5656_v39  ;;  %v5557_v2 = vld [vmem:[#allocation6 + $0x2b8] sm:$0xf0]  ;;  %v5304_v26 = vor.u32 %v7532_v1, %v5301_v52 }
 0x346   :  { %v7660_v58 = vld [vmem:[#allocation6 + $0x49c] sm:$0xf]  ;;  %v5560_v28 = vor.u32 %v7596_v20, %v5557_v2 }
 0x347   :  { %4482 = vmatpush.bf16.msra.mxu2 %v5912_v32  ;;  %4457 = vmatpush.bf16.msra.mxu0 %v5368_v48  ;;  %v5813_v12 = vld [vmem:[#allocation6 + $0x4b8] sm:$0xf0] }
 0x348   :  { %v7724_v53 = vld [vmem:[#allocation6 + $0x69c] sm:$0xf]  ;;  %v5816_v37 = vor.u32 %v7660_v58, %v5813_v12 }
 0x349   :  { %4495 = vmatpush.bf16.msra.mxu3 %v6168_v61  ;;  %4470 = vmatpush.bf16.msra.mxu1 %v5624_v49  ;;  %v6069_v59 = vld [vmem:[#allocation6 + $0x6b8] sm:$0xf0] }
 0x34a   :  { %v7524_v29 = vld [vmem:[#allocation6 + $0x5c] sm:$0xf]  ;;  %v6072_v24 = vor.u32 %v7724_v53, %v6069_v59 }
 0x34b   :  { %4483 = vmatpush.bf16.msra.mxu2 %v5880_v63  ;;  %4458 = vmatpush.bf16.msra.mxu0 %v5336_v51  ;;  %v5269_v36 = vld [vmem:[#allocation6 + $0x78] sm:$0xf0] }
 0x34c   :  { %v7588_v11 = vld [vmem:[#allocation6 + $0x25c] sm:$0xf]  ;;  %v5272_v4 = vor.u32 %v7524_v29, %v5269_v36 }
 0x34d   :  { %4496 = vmatpush.bf16.msra.mxu3 %v6136_v57  ;;  %4471 = vmatpush.bf16.msra.mxu1 %v5592_v44  ;;  %v5525_v39 = vld [vmem:[#allocation6 + $0x278] sm:$0xf0] }
 0x34e   :  { %v7652_v30 = vld [vmem:[#allocation6 + $0x45c] sm:$0xf]  ;;  %v5528_v27 = vor.u32 %v7588_v11, %v5525_v39 }
 0x34f   :  { %4484 = vmatpush.bf16.msra.mxu2 %v5848_v56  ;;  %v5781_v0 = vld [vmem:[#allocation6 + $0x478] sm:$0xf0]  ;;  %4459 = vmatpush.bf16.msra.mxu0 %v5304_v26 }
 0x350   :  { %v7716_v32 = vld [vmem:[#allocation6 + $0x65c] sm:$0xf]  ;;  %v5784_v3 = vor.u32 %v7652_v30, %v5781_v0 }
 0x351   :  { %4497 = vmatpush.bf16.msra.mxu3 %v6104_v9  ;;  %v6037_v61 = vld [vmem:[#allocation6 + $0x678] sm:$0xf0]  ;;  %4472 = vmatpush.bf16.msra.mxu1 %v5560_v28 }
 0x352   :  { %v7516_v23 = vld [vmem:[#allocation6 + $0x1c] sm:$0xf]  ;;  %v6040_v41 = vor.u32 %v7716_v32, %v6037_v61 }
 0x353   :  { %v5237_v21 = vld [vmem:[#allocation6 + $0x38] sm:$0xf0]  ;;  %4485 = vmatpush.bf16.msra.mxu2 %v5816_v37  ;;  %4460 = vmatpush.bf16.msra.mxu0 %v5272_v4 }
 0x354   :  { %v7580_v40 = vld [vmem:[#allocation6 + $0x21c] sm:$0xf]  ;;  %v5240_v13 = vor.u32 %v7516_v23, %v5237_v21 }
 0x355   :  { %v5493_v60 = vld [vmem:[#allocation6 + $0x238] sm:$0xf0]  ;;  %4498 = vmatpush.bf16.msra.mxu3 %v6072_v24  ;;  %4473 = vmatpush.bf16.msra.mxu1 %v5528_v27 }
 0x356   :  { %v7644_v42 = vld [vmem:[#allocation6 + $0x41c] sm:$0xf]  ;;  %v5496_v46 = vor.u32 %v7580_v40, %v5493_v60 }
 0x357   :  { %v5749_v48 = vld [vmem:[#allocation6 + $0x438] sm:$0xf0]  ;;  %4486 = vmatpush.bf16.msra.mxu2 %v5784_v3  ;;  %4461 = vmatpush.bf16.msra.mxu0 %v5240_v13 }
 0x358   :  { %v7708_v49 = vld [vmem:[#allocation6 + $0x61c] sm:$0xf]  ;;  %v5752_v1 = vor.u32 %v7644_v42, %v5749_v48  ;;  %v8675_v48 = vpop.f32.mrf.mxu0 }
 0x359   :  { %v6005_v63 = vld [vmem:[#allocation6 + $0x638] sm:$0xf0]  ;;  %4499 = vmatpush.bf16.msra.mxu3 %v6040_v41  ;;  %4474 = vmatpush.bf16.msra.mxu1 %v5496_v46 }
 0x35a   :  { %v7828_v57 = vld [vmem:[#allocation6 + $0x9dc] sm:$0xf]  ;;  %v6008_v52 = vor.u32 %v7708_v49, %v6005_v63  ;;  %4462 = vmatmul.bf16.vlgmr.msra.gmra.mxu0 %v8556_v10 }
 0x35b   :  { %v6485_v14 = vld [vmem:[#allocation6 + $0x9f8] sm:$0xf0]  ;;  %4487 = vmatpush.bf16.msra.mxu2 %v5752_v1 }
 0x35c   :  { %v7892_v15 = vld [vmem:[#allocation6 + $0xbdc] sm:$0xf]  ;;  %v6488_v56 = vor.u32 %v7828_v57, %v6485_v14  ;;  %4475 = vmatmul.bf16.vlgmr.msra.gmra.mxu1 %v8558_v54 }
 0x35d   :  { %v6741_v16 = vld [vmem:[#allocation6 + $0xbf8] sm:$0xf0]  ;;  %4500 = vmatpush.bf16.msra.mxu3 %v6008_v52 }
 0x35e   :  { %v7956_v17 = vld [vmem:[#allocation6 + $0xddc] sm:$0xf]  ;;  %v6744_v9 = vor.u32 %v7892_v15, %v6741_v16  ;;  %4506 = vmatpush.bf16.msrb.mxu0 %v6488_v56  ;;  %4488 = vmatmul.bf16.vlgmr.msra.gmra.mxu2 %v8560_v55  ;;  %v8677_v55 = vpop.f32.mrf.mxu1 }
 0x35f   :  { %v6997_v47 = vld [vmem:[#allocation6 + $0xdf8] sm:$0xf0] }
 0x360   :  { %v8020_v51 = vld [vmem:[#allocation6 + $0xfdc] sm:$0xf]  ;;  %v7000_v58 = vor.u32 %v7956_v17, %v6997_v47  ;;  %4519 = vmatpush.bf16.msrb.mxu1 %v6744_v9  ;;  %4501 = vmatmul.bf16.vlgmr.msra.gmra.mxu3 %v8562_v8 }
 0x361   :  { %v7253_v44 = vld [vmem:[#allocation6 + $0xff8] sm:$0xf0] }
 0x362   :  { %v7820_v20 = vld [vmem:[#allocation6 + $0x99c] sm:$0xf]  ;;  %v7256_v18 = vor.u32 %v8020_v51, %v7253_v44  ;;  %4532 = vmatpush.bf16.msrb.mxu2 %v7000_v58  ;;  %v8679_v58 = vpop.f32.mrf.mxu2 }
 0x363   :  { %v6453_v2 = vld [vmem:[#allocation6 + $0x9b8] sm:$0xf0] }
 0x364   :  { %v7884_v5 = vld [vmem:[#allocation6 + $0xb9c] sm:$0xf]  ;;  %v6456_v7 = vor.u32 %v7820_v20, %v6453_v2  ;;  %4545 = vmatpush.bf16.msrb.mxu3 %v7256_v18  ;;  %v8681_v18 = vpop.f32.mrf.mxu3 }
 0x365   :  { %v6709_v12 = vld [vmem:[#allocation6 + $0xbb8] sm:$0xf0] }
 0x366   :  { %v7948_v53 = vld [vmem:[#allocation6 + $0xd9c] sm:$0xf]  ;;  %v6712_v26 = vor.u32 %v7884_v5, %v6709_v12  ;;  %4507 = vmatpush.bf16.msrb.mxu0 %v6456_v7 }
 0x367   :  { %v6965_v59 = vld [vmem:[#allocation6 + $0xdb8] sm:$0xf0] }
 0x368   :  { %v8012_v6 = vld [vmem:[#allocation6 + $0xf9c] sm:$0xf]  ;;  %v6968_v36 = vor.u32 %v7948_v53, %v6965_v59  ;;  %4520 = vmatpush.bf16.msrb.mxu1 %v6712_v26  ;;  %v4257_v59 = vpop.f32.mrf.mxu0 }
 0x369   :  { %v7221_v33 = vld [vmem:[#allocation6 + $0xfb8] sm:$0xf0] }
 0x36a   :  { %v7812_v28 = vld [vmem:[#allocation6 + $0x95c] sm:$0xf]  ;;  %v7224_v37 = vor.u32 %v8012_v6, %v7221_v33  ;;  %4533 = vmatpush.bf16.msrb.mxu2 %v6968_v36  ;;  %v4270_v6 = vpop.f32.mrf.mxu1 }
 0x36b   :  { %v6421_v29 = vld [vmem:[#allocation6 + $0x978] sm:$0xf0] }
 0x36c   :  { %v7876_v24 = vld [vmem:[#allocation6 + $0xb5c] sm:$0xf]  ;;  %v6424_v61 = vor.u32 %v7812_v28, %v6421_v29  ;;  %4546 = vmatpush.bf16.msrb.mxu3 %v7224_v37 }
 0x36d   :  { %v6677_v11 = vld [vmem:[#allocation6 + $0xb78] sm:$0xf0] }
 0x36e   :  { %v7940_v39 = vld [vmem:[#allocation6 + $0xd5c] sm:$0xf]  ;;  %v6680_v23 = vor.u32 %v7876_v24, %v6677_v11  ;;  %4508 = vmatpush.bf16.msrb.mxu0 %v6424_v61 }
 0x36f   :  { %v6933_v30 = vld [vmem:[#allocation6 + $0xd78] sm:$0xf0] }
 0x370   :  { %v8004_v0 = vld [vmem:[#allocation6 + $0xf5c] sm:$0xf]  ;;  %v6936_v21 = vor.u32 %v7940_v39, %v6933_v30  ;;  %4521 = vmatpush.bf16.msrb.mxu1 %v6680_v23 }
 0x371   :  { %v7189_v32 = vld [vmem:[#allocation6 + $0xf78] sm:$0xf0] }
 0x372   :  { %v7804_v4 = vld [vmem:[#allocation6 + $0x91c] sm:$0xf]  ;;  %v7192_v40 = vor.u32 %v8004_v0, %v7189_v32  ;;  %4534 = vmatpush.bf16.msrb.mxu2 %v6936_v21 }
 0x373   :  { %v6389_v27 = vld [vmem:[#allocation6 + $0x938] sm:$0xf0] }
 0x374   :  { %v7868_v10 = vld [vmem:[#allocation6 + $0xb1c] sm:$0xf]  ;;  %v6392_v8 = vor.u32 %v7804_v4, %v6389_v27  ;;  %4547 = vmatpush.bf16.msrb.mxu3 %v7192_v40 }
 0x375   :  { %v6645_v60 = vld [vmem:[#allocation6 + $0xb38] sm:$0xf0] }
 0x376   :  { %v7932_v54 = vld [vmem:[#allocation6 + $0xd1c] sm:$0xf]  ;;  %v6648_v49 = vor.u32 %v7868_v10, %v6645_v60  ;;  %4509 = vmatpush.bf16.msrb.mxu0 %v6392_v8 }
 0x377   :  { %v6901_v3 = vld [vmem:[#allocation6 + $0xd38] sm:$0xf0] }
 0x378   :  { %v7996_v41 = vld [vmem:[#allocation6 + $0xf1c] sm:$0xf]  ;;  %v6904_v63 = vor.u32 %v7932_v54, %v6901_v3  ;;  %4522 = vmatpush.bf16.msrb.mxu1 %v6648_v49  ;;  %v4283_v54 = vpop.f32.mrf.mxu2  ;;  %v4296_v3 = vpop.f32.mrf.mxu3 }
 0x379   :  { %v7157_v42 = vld [vmem:[#allocation6 + $0xf38] sm:$0xf0] }
 0x37a   :  { %v7796_v62 = vld [vmem:[#allocation6 + $0x8dc] sm:$0xf]  ;;  %v7160_v57 = vor.u32 %v7996_v41, %v7157_v42  ;;  %4535 = vmatpush.bf16.msrb.mxu2 %v6904_v63 }
 0x37b   :  { %v6357_v31 = vld [vmem:[#allocation6 + $0x8f8] sm:$0xf0] }
 0x37c   :  { %v7860_v14 = vld [vmem:[#allocation6 + $0xadc] sm:$0xf]  ;;  %v6360_v47 = vor.u32 %v7796_v62, %v6357_v31  ;;  %4548 = vmatpush.bf16.msrb.mxu3 %v7160_v57  ;;  %v8032_v57 = vld [vmem:[%s8913_s5 + $0x38] sm:$0xff] }
 0x37d   :  { %v6613_v15 = vld [vmem:[#allocation6 + $0xaf8] sm:$0xf0] }
 0x37e   :  { %v7924_v16 = vld [vmem:[#allocation6 + $0xcdc] sm:$0xf]  ;;  %v6616_v51 = vor.u32 %v7860_v14, %v6613_v15  ;;  %4510 = vmatpush.bf16.msrb.mxu0 %v6360_v47  ;;  %v8040_v14 = vld [vmem:[%s8913_s5 + $0x78] sm:$0xff]  ;;  %v8055_v47 = vld [vmem:[%s8913_s5 + $0xf0] sm:$0xff] }
 0x37f   :  { %v6869_v17 = vld [vmem:[#allocation6 + $0xcf8] sm:$0xf0]  ;;  %v8048_v15 = vld [vmem:[%s8913_s5 + $0xb8] sm:$0xff] }
 0x380   :  { %v7988_v13 = vld [vmem:[#allocation6 + $0xedc] sm:$0xf]  ;;  %v6872_v52 = vor.u32 %v7924_v16, %v6869_v17  ;;  %4523 = vmatpush.bf16.msrb.mxu1 %v6616_v51  ;;  %v8056_v16 = vld [vmem:[%s8913_s5 + $0xf8] sm:$0xff]  ;;  %v8031_v17 = vld [vmem:[%s8913_s5 + $0x30] sm:$0xff]  ;;  %v8753_v59 = vpop.f32.mrf.mxu3 }
 0x381   :  { %v7125_v46 = vld [vmem:[#allocation6 + $0xef8] sm:$0xf0]  ;;  %v8030_v51 = vld [vmem:[%s8913_s5 + $0x28] sm:$0xff] }
 0x382   :  { %v7788_v44 = vld [vmem:[#allocation6 + $0x89c] sm:$0xf]  ;;  %v7128_v56 = vor.u32 %v7988_v13, %v7125_v46  ;;  %4536 = vmatpush.bf16.msrb.mxu2 %v6872_v52  ;;  %v8039_v13 = vld [vmem:[%s8913_s5 + $0x70] sm:$0xff] }
 0x383   :  { %v6325_v1 = vld [vmem:[#allocation6 + $0x8b8] sm:$0xf0]  ;;  %v8047_v46 = vld [vmem:[%s8913_s5 + $0xb0] sm:$0xff] }
 0x384   :  { %v7852_v9 = vld [vmem:[#allocation6 + $0xa9c] sm:$0xf]  ;;  %v6328_v33 = vor.u32 %v7788_v44, %v6325_v1  ;;  %4549 = vmatpush.bf16.msrb.mxu3 %v7128_v56  ;;  %v8038_v44 = vld [vmem:[%s8913_s5 + $0x68] sm:$0xff] }
 0x385   :  { %v6581_v20 = vld [vmem:[#allocation6 + $0xab8] sm:$0xf0] }
 0x386   :  { %v7916_v2 = vld [vmem:[#allocation6 + $0xc9c] sm:$0xf]  ;;  %v6584_v7 = vor.u32 %v7852_v9, %v6581_v20  ;;  %4511 = vmatpush.bf16.msrb.mxu0 %v6328_v33  ;;  %v8028_v20 = vld [vmem:[%s8913_s5 + $0x18] sm:$0xff] }
 0x387   :  { %v6837_v5 = vld [vmem:[#allocation6 + $0xcb8] sm:$0xf0] }
 0x388   :  { %v7980_v12 = vld [vmem:[#allocation6 + $0xe9c] sm:$0xf]  ;;  %v6840_v29 = vor.u32 %v7916_v2, %v6837_v5  ;;  %4524 = vmatpush.bf16.msrb.mxu1 %v6584_v7  ;;  %v8036_v2 = vld [vmem:[%s8913_s5 + $0x58] sm:$0xff]  ;;  %v8027_v7 = vld [vmem:[%s8913_s5 + $0x10] sm:$0xff] }
 0x389   :  { %v7093_v53 = vld [vmem:[#allocation6 + $0xeb8] sm:$0xf0]  ;;  %v8044_v5 = vld [vmem:[%s8913_s5 + $0x98] sm:$0xff] }
 0x38a   :  { %v7780_v26 = vld [vmem:[#allocation6 + $0x85c] sm:$0xf]  ;;  %v7096_v36 = vor.u32 %v7980_v12, %v7093_v53  ;;  %4537 = vmatpush.bf16.msrb.mxu2 %v6840_v29  ;;  %v8052_v12 = vld [vmem:[%s8913_s5 + $0xd8] sm:$0xff]  ;;  %v8751_v53 = vpop.f32.mrf.mxu2  ;;  %v8051_v29 = vld [vmem:[%s8913_s5 + $0xd0] sm:$0xff] }
 0x38b   :  { %v6293_v28 = vld [vmem:[#allocation6 + $0x878] sm:$0xf0] }
 0x38c   :  { %v7844_v37 = vld [vmem:[#allocation6 + $0xa5c] sm:$0xf]  ;;  %v6296_v32 = vor.u32 %v7780_v26, %v6293_v28  ;;  %4550 = vmatpush.bf16.msrb.mxu3 %v7096_v36  ;;  %v8035_v26 = vld [vmem:[%s8913_s5 + $0x50] sm:$0xff]  ;;  %v8026_v36 = vld [vmem:[%s8913_s5 + $0x8] sm:$0xff] }
 0x38d   :  { %v6549_v24 = vld [vmem:[#allocation6 + $0xa78] sm:$0xf0]  ;;  %v8043_v28 = vld [vmem:[%s8913_s5 + $0x90] sm:$0xff] }
 0x38e   :  { %v7908_v11 = vld [vmem:[#allocation6 + $0xc5c] sm:$0xf]  ;;  %v6552_v61 = vor.u32 %v7844_v37, %v6549_v24  ;;  %4512 = vmatpush.bf16.msrb.mxu0 %v6296_v32  ;;  %v8034_v37 = vld [vmem:[%s8913_s5 + $0x48] sm:$0xff] }
 0x38f   :  { %v6805_v39 = vld [vmem:[#allocation6 + $0xc78] sm:$0xf0]  ;;  %v8042_v24 = vld [vmem:[%s8913_s5 + $0x88] sm:$0xff] }
 0x390   :  { %v7972_v30 = vld [vmem:[#allocation6 + $0xe5c] sm:$0xf]  ;;  %v6808_v27 = vor.u32 %v7908_v11, %v6805_v39  ;;  %4525 = vmatpush.bf16.msrb.mxu1 %v6552_v61  ;;  %v8050_v11 = vld [vmem:[%s8913_s5 + $0xc8] sm:$0xff]  ;;  %v4558_v61 = vmax.f32 %v8611_v50, 0.0  ;;  %v4561_v50 = vmax.f32 %v8655_v35, 0.0 }
 0x391   :  { %v7061_v0 = vld [vmem:[#allocation6 + $0xe78] sm:$0xf0] }
 0x392   :  { %v7772_v23 = vld [vmem:[#allocation6 + $0x81c] sm:$0xf]  ;;  %v7064_v21 = vor.u32 %v7972_v30, %v7061_v0  ;;  %4538 = vmatpush.bf16.msrb.mxu2 %v6808_v27  ;;  %v4335_v39 = vpop.f32.mrf.mxu2  ;;  %v4348_v30 = vpop.f32.mrf.mxu3  ;;  %v4566_v54 = vpack.c.bf16 %v4558_v61, %v4558_v61 }
 0x393   :  { %v6261_v4 = vld [vmem:[#allocation6 + $0x838] sm:$0xf0] }
 0x394   :  { %v7836_v40 = vld [vmem:[#allocation6 + $0xa1c] sm:$0xf]  ;;  %v6264_v49 = vor.u32 %v7772_v23, %v6261_v4  ;;  %4551 = vmatpush.bf16.msrb.mxu3 %v7064_v21  ;;  %v4559_v23 = vmax.f32 %v8625_v25, 0.0  ;;  %v8787_v4 = vld [vmem:[#allocation7] sm:$0xff]  ;;  %v8064_v25 = vld [vmem:[%s8913_s5 + $0x138] sm:$0xff] }
 0x395   :  { %v6517_v10 = vld [vmem:[#allocation6 + $0xa38] sm:$0xf0]  ;;  %v1155_v27 = vperm.slane %v8787_v4, 5 }
 0x396   :  { %v7900_v60 = vld [vmem:[#allocation6 + $0xc1c] sm:$0xf]  ;;  %v6520_v62 = vor.u32 %v7836_v40, %v6517_v10  ;;  %4513 = vmatpush.bf16.msrb.mxu0 %v6264_v49  ;;  %v4560_v10 = vmax.f32 %v8639_v19, 0.0  ;;  %v4567_v3 = vpack.c.bf16 %v4559_v23, %v4559_v23  ;;  %v8080_v19 = vld [vmem:[%s8913_s5 + $0x1b8] sm:$0xff]  ;;  %v8071_v49 = vld [vmem:[%s8913_s5 + $0x170] sm:$0xff] }
 0x397   :  { %v6773_v41 = vld [vmem:[#allocation6 + $0xc38] sm:$0xf0] }
 0x398   :  { %v7964_v42 = vld [vmem:[#allocation6 + $0xe1c] sm:$0xf]  ;;  %v6776_v31 = vor.u32 %v7900_v60, %v6773_v41  ;;  %4526 = vmatpush.bf16.msrb.mxu1 %v6520_v62  ;;  %v8072_v60 = vld [vmem:[%s8913_s5 + $0x178] sm:$0xff]  ;;  %v4256_v41 = vadd.f32 %v8675_v48, %v1155_v27  ;;  %v4568_v35 = vpack.c.bf16 %v4560_v10, %v4560_v10  ;;  %v8079_v62 = vld [vmem:[%s8913_s5 + $0x1b0] sm:$0xff] }
 0x399   :  { %v7029_v8 = vld [vmem:[#allocation6 + $0xe38] sm:$0xf0]  ;;  %4514 = vmatmul.bf16.vlgmr.msrb.gmra.mxu0 %v8580_v34  ;;  %v8046_v34 = vld [vmem:[%s8913_s5 + $0xa8] sm:$0xff] }
 0x39a   :  { %v7032_v63 = vor.u32 %v7964_v42, %v7029_v8  ;;  %4539 = vmatpush.bf16.msrb.mxu2 %v6776_v31  ;;  %5090 = vmatpush.bf16.msra.mxu0 %v8032_v57  ;;  %v8029_v1 = vld [vmem:[%s8913_s5 + $0x20] sm:$0xff]  ;;  %v4569_v42 = vpack.c.bf16 %v4561_v50, %v4561_v50  ;;  %v8063_v8 = vld [vmem:[%s8913_s5 + $0x130] sm:$0xff]  ;;  %v4269_v48 = vadd.f32 %v8677_v55, %v4256_v41  ;;  %v8062_v31 = vld [vmem:[%s8913_s5 + $0x128] sm:$0xff] }
 0x39b   :  { %4527 = vmatmul.bf16.vlgmr.msrb.gmra.mxu1 %v8582_v38  ;;  %v8054_v38 = vld [vmem:[%s8913_s5 + $0xe8] sm:$0xff]  ;;  %v8037_v52 = vld [vmem:[%s8913_s5 + $0x60] sm:$0xff]  ;;  %v8088_v50 = vld [vmem:[%s8913_s5 + $0x1f8] sm:$0xff] }
 0x39c   :  { %4552 = vmatpush.bf16.msrb.mxu3 %v7032_v63  ;;  %5103 = vmatpush.bf16.msra.mxu1 %v8040_v14  ;;  %v8045_v56 = vld [vmem:[%s8913_s5 + $0xa0] sm:$0xff]  ;;  %v8070_v63 = vld [vmem:[%s8913_s5 + $0x168] sm:$0xff]  ;;  %v4282_v57 = vadd.f32 %v8679_v58, %v4269_v48 }
 0x39d   :  { %4540 = vmatmul.bf16.vlgmr.msrb.gmra.mxu2 %v8584_v43  ;;  %v8723_v43 = vpop.f32.mrf.mxu0  ;;  %v8053_v9 = vld [vmem:[%s8913_s5 + $0xe0] sm:$0xff]  ;;  %v8078_v55 = vld [vmem:[%s8913_s5 + $0x1a8] sm:$0xff] }
 0x39e   :  { %5116 = vmatpush.bf16.msra.mxu2 %v8048_v15  ;;  %5091 = vmatpush.bf16.msra.mxu0 %v8031_v17  ;;  %v8025_v0 = vld [vmem:[%s8913_s5] sm:$0xff] }
 0x39f   :  { %4553 = vmatmul.bf16.vlgmr.msrb.gmra.mxu3 %v8586_v22  ;;  %v8725_v22 = vpop.f32.mrf.mxu1  ;;  %v8033_v32 = vld [vmem:[%s8913_s5 + $0x40] sm:$0xff] }
 0x3a0   :  { %5129 = vmatpush.bf16.msra.mxu3 %v8056_v16  ;;  %5104 = vmatpush.bf16.msra.mxu1 %v8039_v13  ;;  %v8041_v21 = vld [vmem:[%s8913_s5 + $0x80] sm:$0xff]  ;;  %v4295_v13 = vadd.f32 %v8681_v18, %v4282_v57 }
 0x3a1   :  { %v8049_v40 = vld [vmem:[%s8913_s5 + $0xc0] sm:$0xff] }
 0x3a2   :  { %5117 = vmatpush.bf16.msra.mxu2 %v8047_v46  ;;  %5092 = vmatpush.bf16.msra.mxu0 %v8030_v51  ;;  %v8061_v16 = vld [vmem:[%s8913_s5 + $0x120] sm:$0xff]  ;;  %v4308_v58 = vadd.f32 %v8723_v43, %v4295_v13  ;;  %v8068_v51 = vld [vmem:[%s8913_s5 + $0x158] sm:$0xff]  ;;  %v1157_v13 = vperm.slane %v8787_v4, 7 }
 0x3a3   :  { %v8069_v17 = vld [vmem:[%s8913_s5 + $0x160] sm:$0xff] }
 0x3a4   :  { %5130 = vmatpush.bf16.msra.mxu3 %v8055_v47  ;;  %5105 = vmatpush.bf16.msra.mxu1 %v8038_v44  ;;  %v8077_v46 = vld [vmem:[%s8913_s5 + $0x1a0] sm:$0xff]  ;;  %v8060_v47 = vld [vmem:[%s8913_s5 + $0x118] sm:$0xff]  ;;  %v4385_v44 = vpop.f32.mrf.mxu2  ;;  %v4321_v18 = vadd.f32 %v8725_v22, %v4308_v58  ;;  %v8075_v22 = vld [vmem:[%s8913_s5 + $0x190] sm:$0xff] }
 0x3a5   :  { %v4309_v6 = vpop.f32.mrf.mxu0 }
 0x3a6   :  { %5118 = vmatpush.bf16.msra.mxu2 %v8046_v34  ;;  %5093 = vmatpush.bf16.msra.mxu0 %v8029_v1  ;;  %v4398_v34 = vpop.f32.mrf.mxu3  ;;  %v8076_v1 = vld [vmem:[%s8913_s5 + $0x198] sm:$0xff] }
 0x3a7   :  { %v4322_v33 = vpop.f32.mrf.mxu1 }
 0x3a8   :  { %5131 = vmatpush.bf16.msra.mxu3 %v8054_v38  ;;  %5106 = vmatpush.bf16.msra.mxu1 %v8037_v52  ;;  %v8059_v52 = vld [vmem:[%s8913_s5 + $0x110] sm:$0xff]  ;;  %v8074_v33 = vld [vmem:[%s8913_s5 + $0x188] sm:$0xff] }
 0x3aa   :  { %5119 = vmatpush.bf16.msra.mxu2 %v8045_v56  ;;  %5094 = vmatpush.bf16.msra.mxu0 %v8028_v20  ;;  %v8067_v56 = vld [vmem:[%s8913_s5 + $0x150] sm:$0xff]  ;;  %v8058_v20 = vld [vmem:[%s8913_s5 + $0x108] sm:$0xff] }
 0x3ac   :  { %5132 = vmatpush.bf16.msra.mxu3 %v8053_v9  ;;  %5107 = vmatpush.bf16.msra.mxu1 %v8036_v2  ;;  %v4334_v9 = vadd.f32 %v8751_v53, %v4321_v18  ;;  %v8066_v2 = vld [vmem:[%s8913_s5 + $0x148] sm:$0xff]  ;;  %v1156_v53 = vperm.slane %v8787_v4, 6  ;;  %v8110_v4 = vld [vmem:[#allocation9] ss:$0 sm:$0xff] }
 0x3ad   :  { %v4359_v14 = vpop.f32.mrf.mxu0 }
 0x3ae   :  { %5120 = vmatpush.bf16.msra.mxu2 %v8044_v5  ;;  %5095 = vmatpush.bf16.msra.mxu0 %v8027_v7  ;;  %v4347_v5 = vadd.f32 %v8753_v59, %v4334_v9  ;;  %v4400_v6 = vpop.f32.mrf.mxu3  ;;  %v8057_v7 = vld [vmem:[%s8913_s5 + $0x100] sm:$0xff]  ;;  %v4562_v59 = vmax.f32 %v8669_v45, 0.0 }
 0x3af   :  { %v4372_v15 = vpop.f32.mrf.mxu1 }
 0x3b0   :  { %5133 = vmatpush.bf16.msra.mxu3 %v8052_v12  ;;  %5108 = vmatpush.bf16.msra.mxu1 %v8035_v26  ;;  %v4387_v12 = vpop.f32.mrf.mxu2  ;;  %v8065_v26 = vld [vmem:[%s8913_s5 + $0x140] sm:$0xff] }
 0x3b2   :  { %5121 = vmatpush.bf16.msra.mxu2 %v8043_v28  ;;  %5096 = vmatpush.bf16.msra.mxu0 %v8026_v36  ;;  %v4563_v28 = vmax.f32 %v4347_v5, 0.0  ;;  %v8073_v36 = vld [vmem:[%s8913_s5 + $0x180] sm:$0xff] }
 0x3b4   :  { %5134 = vmatpush.bf16.msra.mxu3 %v8051_v29  ;;  %5109 = vmatpush.bf16.msra.mxu1 %v8034_v37  ;;  %v4360_v29 = vadd.f32 %v4359_v14, %v1156_v53  ;;  %v4570_v37 = vpack.c.bf16 %v4562_v59, %v4562_v59 }
 0x3b5   :  { %v4361_v38 = vpop.f32.mrf.mxu0 }
 0x3b6   :  { %5122 = vmatpush.bf16.msra.mxu2 %v8042_v24  ;;  %5097 = vmatpush.bf16.msra.mxu0 %v8025_v0  ;;  %v4571_v24 = vpack.c.bf16 %v4563_v28, %v4563_v28 }
 0x3b7   :  { %v4374_v43 = vpop.f32.mrf.mxu1 }
 0x3b8   :  { %5135 = vmatpush.bf16.msra.mxu3 %v8050_v11  ;;  %5110 = vmatpush.bf16.msra.mxu1 %v8033_v32  ;;  %v4373_v11 = vadd.f32 %v4372_v15, %v4360_v29 }
 0x3b9   :  { %5098 = vmatmul.bf16.vlgmr.msra.gmra.mxu0 %v4566_v54  ;;  %v8087_v54 = vld [vmem:[%s8913_s5 + $0x1f0] sm:$0xff] }
 0x3ba   :  { %5123 = vmatpush.bf16.msra.mxu2 %v8041_v21  ;;  %5142 = vmatpush.bf16.msrb.mxu0 %v8064_v25  ;;  %v4386_v39 = vadd.f32 %v4385_v44, %v4373_v11 }
 0x3bb   :  { %5111 = vmatmul.bf16.vlgmr.msra.gmra.mxu1 %v4567_v3 }
 0x3bc   :  { %5136 = vmatpush.bf16.msra.mxu3 %v8049_v40  ;;  %5155 = vmatpush.bf16.msrb.mxu1 %v8072_v60  ;;  %v4399_v30 = vadd.f32 %v4398_v34, %v4386_v39 }
 0x3bd   :  { %5124 = vmatmul.bf16.vlgmr.msra.gmra.mxu2 %v4568_v35  ;;  %v4411_v0 = vpop.f32.mrf.mxu0  ;;  %v8086_v35 = vld [vmem:[%s8913_s5 + $0x1e8] sm:$0xff] }
 0x3be   :  { %5168 = vmatpush.bf16.msrb.mxu2 %v8080_v19  ;;  %5143 = vmatpush.bf16.msrb.mxu0 %v8063_v8  ;;  %v4412_v45 = vadd.f32 %v4411_v0, %v4399_v30  ;;  %v8084_v8 = vld [vmem:[%s8913_s5 + $0x1d8] sm:$0xff] }
 0x3bf   :  { %5137 = vmatmul.bf16.vlgmr.msra.gmra.mxu3 %v4569_v42  ;;  %v4424_v32 = vpop.f32.mrf.mxu1  ;;  %v8085_v42 = vld [vmem:[%s8913_s5 + $0x1e0] sm:$0xff] }
 0x3c0   :  { %5156 = vmatpush.bf16.msrb.mxu1 %v8071_v49  ;;  %v4425_v61 = vadd.f32 %v4424_v32, %v4412_v45  ;;  %5181 = vmatpush.bf16.msrb.mxu3 %v8088_v50 }
 0x3c1   :  { %v4437_v23 = vpop.f32.mrf.mxu2 }
 0x3c2   :  { %5169 = vmatpush.bf16.msrb.mxu2 %v8079_v62  ;;  %5144 = vmatpush.bf16.msrb.mxu0 %v8062_v31  ;;  %v4438_v21 = vadd.f32 %v4437_v23, %v4425_v61  ;;  %v8083_v62 = vld [vmem:[%s8913_s5 + $0x1d0] sm:$0xff]  ;;  %v8082_v31 = vld [vmem:[%s8913_s5 + $0x1c8] sm:$0xff] }
 0x3c3   :  { %v4450_v27 = vpop.f32.mrf.mxu3 }
 0x3c4   :  { %5157 = vmatpush.bf16.msrb.mxu1 %v8070_v63  ;;  %v4451_v25 = vadd.f32 %v4450_v27, %v4438_v21  ;;  %5182 = vmatpush.bf16.msrb.mxu3 %v8087_v54 }
 0x3c5   :  { %v4413_v40 = vpop.f32.mrf.mxu0 }
 0x3c6   :  { %5170 = vmatpush.bf16.msrb.mxu2 %v8078_v55  ;;  %5145 = vmatpush.bf16.msrb.mxu0 %v8061_v16  ;;  %v4564_v60 = vmax.f32 %v4451_v25, 0.0  ;;  %v8081_v55 = vld [vmem:[%s8913_s5 + $0x1c0] sm:$0xff] }
 0x3c7   :  { %v4426_v10 = vpop.f32.mrf.mxu1 }
 0x3c8   :  { %5158 = vmatpush.bf16.msrb.mxu1 %v8069_v17  ;;  %v4572_v3 = vpack.c.bf16 %v4564_v60, %v4564_v60  ;;  %5183 = vmatpush.bf16.msrb.mxu3 %v8086_v35 }
 0x3c9   :  { %v4439_v41 = vpop.f32.mrf.mxu2 }
 0x3ca   :  { %5171 = vmatpush.bf16.msrb.mxu2 %v8077_v46  ;;  %5146 = vmatpush.bf16.msrb.mxu0 %v8060_v47 }
 0x3cb   :  { %v4452_v19 = vpop.f32.mrf.mxu3 }
 0x3cc   :  { %5159 = vmatpush.bf16.msrb.mxu1 %v8068_v51  ;;  %5184 = vmatpush.bf16.msrb.mxu3 %v8085_v42 }
 0x3ce   :  { %5172 = vmatpush.bf16.msrb.mxu2 %v8076_v1  ;;  %5147 = vmatpush.bf16.msrb.mxu0 %v8059_v52 }
 0x3d0   :  { %5160 = vmatpush.bf16.msrb.mxu1 %v8067_v56  ;;  %5185 = vmatpush.bf16.msrb.mxu3 %v8084_v8 }
 0x3d2   :  { %5173 = vmatpush.bf16.msrb.mxu2 %v8075_v22  ;;  %5148 = vmatpush.bf16.msrb.mxu0 %v8058_v20 }
 0x3d4   :  { %5161 = vmatpush.bf16.msrb.mxu1 %v8066_v2  ;;  %5186 = vmatpush.bf16.msrb.mxu3 %v8083_v62 }
 0x3d6   :  { %5174 = vmatpush.bf16.msrb.mxu2 %v8074_v33  ;;  %5149 = vmatpush.bf16.msrb.mxu0 %v8057_v7 }
 0x3d7   :  { %v4463_v49 = vpop.f32.mrf.mxu0 }
 0x3d8   :  { %5162 = vmatpush.bf16.msrb.mxu1 %v8065_v26  ;;  %5187 = vmatpush.bf16.msrb.mxu3 %v8082_v31  ;;  %v4464_v58 = vadd.f32 %v4463_v49, %v1157_v13 }
 0x3d9   :  { %5150 = vmatmul.bf16.vlgmr.msrb.gmra.mxu0 %v4570_v37  ;;  %v4476_v48 = vpop.f32.mrf.mxu1 }
 0x3da   :  { %5175 = vmatpush.bf16.msrb.mxu2 %v8073_v36  ;;  %v4477_v46 = vadd.f32 %v4476_v48, %v4464_v58 }
 0x3db   :  { %5163 = vmatmul.bf16.vlgmr.msrb.gmra.mxu1 %v4571_v24 }
 0x3dc   :  { %5188 = vmatpush.bf16.msrb.mxu3 %v8081_v55 }
 0x3dd   :  { %5176 = vmatmul.bf16.vlgmr.msrb.gmra.mxu2 %v4572_v3 }
 0x3df   :  { %v4465_v14 = vpop.f32.mrf.mxu0 }
 0x3e1   :  { %v4489_v63 = vpop.f32.mrf.mxu2  ;;  %v4478_v15 = vpop.f32.mrf.mxu1 }
 0x3e2   :  { %v4490_v47 = vadd.f32 %v4489_v63, %v4477_v46 }
 0x3e3   :  { %v4502_v57 = vpop.f32.mrf.mxu3 }
 0x3e4   :  { %v4503_v51 = vadd.f32 %v4502_v57, %v4490_v47 }
 0x3e9   :  { %v4491_v16 = vpop.f32.mrf.mxu2 }
 0x3eb   :  { %v4504_v17 = vpop.f32.mrf.mxu3 }
 0x416   :  { %v4515_v44 = vpop.f32.mrf.mxu0 }
 0x417   :  { %v4516_v18 = vadd.f32 %v4515_v44, %v4503_v51 }
 0x418   :  { %v4528_v34 = vpop.f32.mrf.mxu1 }
 0x419   :  { %v4529_v38 = vadd.f32 %v4528_v34, %v4516_v18 }
 0x41e   :  { %v4517_v56 = vpop.f32.mrf.mxu0 }
 0x420   :  { %v4541_v43 = vpop.f32.mrf.mxu2  ;;  %v4530_v9 = vpop.f32.mrf.mxu1 }
 0x421   :  { %v4542_v52 = vadd.f32 %v4541_v43, %v4529_v38 }
 0x422   :  { %v4554_v1 = vpop.f32.mrf.mxu3 }
 0x423   :  { %v4555_v22 = vadd.f32 %v4554_v1, %v4542_v52 }
 0x425   :  { %v4565_v20 = vmax.f32 %v4555_v22, 0.0 }
 0x427   :  { %v4573_v2 = vpack.c.bf16 %v4565_v20, %v4565_v20 }
 0x428   :  { %v4543_v5 = vpop.f32.mrf.mxu2 }
 0x429   :  { %5189 = vmatmul.bf16.vlgmr.msrb.gmra.mxu3 %v4573_v2 }
 0x42a   :  { %v4556_v12 = vpop.f32.mrf.mxu3 }
 0x436   :  { %v5099_v6 = vpop.f32.mrf.mxu0 }
 0x437   :  { %v5100_v33 = vadd.f32 %v8110_v4, %v5099_v6 }
 0x438   :  { %v5112_v53 = vpop.f32.mrf.mxu1 }
 0x439   :  { %v5113_v7 = vadd.f32 %v5112_v53, %v5100_v33 }
 0x43e   :  { %v5101_v29 = vpop.f32.mrf.mxu0 }
 0x440   :  { %v5125_v26 = vpop.f32.mrf.mxu2  ;;  %v5114_v36 = vpop.f32.mrf.mxu1 }
 0x441   :  { %v5126_v28 = vadd.f32 %v5125_v26, %v5113_v7 }
 0x442   :  { %v5138_v59 = vpop.f32.mrf.mxu3 }
 0x443   :  { %v5139_v37 = vadd.f32 %v5138_v59, %v5126_v28 }
 0x448   :  { %v5127_v24 = vpop.f32.mrf.mxu2 }
 0x44a   :  { %v5140_v11 = vpop.f32.mrf.mxu3 }
 0x456   :  { %v5151_v39 = vpop.f32.mrf.mxu0 }
 0x457   :  { %v5152_v0 = vadd.f32 %v5151_v39, %v5139_v37 }
 0x458   :  { %v5164_v30 = vpop.f32.mrf.mxu1 }
 0x459   :  { %v5165_v32 = vadd.f32 %v5164_v30, %v5152_v0 }
 0x45e   :  { %v5153_v45 = vpop.f32.mrf.mxu0 }
 0x460   :  { %v5166_v61 = vpop.f32.mrf.mxu1  ;;  %v5177_v23 = vpop.f32.mrf.mxu2 }
 0x461   :  { %v5178_v21 = vadd.f32 %v5177_v23, %v5165_v32 }
 0x468   :  { %v5179_v27 = vpop.f32.mrf.mxu2 }
 0x4ac   :  { %v5190_v40 = vpop.f32.mrf.mxu3 }
 0x4ad   :  { %v5191_v10 = vadd.f32 %v5190_v40, %v5178_v21 }
 0x4af   :  { %5195 = vst.msk [vmem:[%s8915_s7] sm:$0xff] %vm5194_vm6, %v5191_v10 }
 0x4b4   :  { %v5192_v50 = vpop.f32.mrf.mxu3 }
 0x4b5   :  { %5200 = vsyncpa [#allocation3], 1 }
 0x4b6   :  { %5201 = vsyncpa [#allocation5], 1 }
 0x4b7   :  { %5202 = vsyncpa [#allocation8], 1 }

// kernel: tpu_custom_call.1
= control target key start
LH: loop header
LB: loop body
LE: loop exit
PB: predicated region body
PF: predicated region fallthrough
CT: control target
= control target key end

     0   :  { %12 = vsyncpa [#allocation3], 0  ;;  %s8908_s0 = inlined_call_operand.vmem [shape: f32[8,3], index: 0, kind: input, shape index: {}]   ;;  %s8909_s1 = inlined_call_operand.hbm [shape: f32[4,1024], index: 1, kind: input, shape index: {}]   ;;  %s8910_s2 = inlined_call_operand.hbm [shape: f32[1,1024], index: 2, kind: input, shape index: {}]   ;;  %s8911_s3 = inlined_call_operand.hbm [shape: bf16[1024,1024], index: 3, kind: input, shape index: {}]   ;;  %s8912_s4 = inlined_call_operand.hbm [shape: f32[1,1024], index: 4, kind: input, shape index: {}]   ;;  %s8913_s5 = inlined_call_operand.vmem [shape: bf16[1024,3], index: 5, kind: input, shape index: {}]   ;;  %s8914_s6 = inlined_call_operand.hbm [shape: f32[1,3], index: 6, kind: input, shape index: {}]   ;;  %s8915_s7 = inlined_call_operand.vmem [shape: f32[8,3], index: 7, kind: output, shape index: {}]  }
   0x1   :  { %13 = vsyncpa [#allocation5], 0  ;;  %s33_s26 = sshll.u32 %s8910_s2, 4  ;;  %s34_s26 = int_to_ptr.hbm [resolvable:$true] %s33_s26 }
   0x2   :  { %14 = vsyncpa [#allocation8], 0  ;;  %s8241_s27 = smov [#allocation4]   ;;  %s57_s8 = sshll.u32 %s8912_s4, 4  ;;  %s58_s8 = int_to_ptr.hbm [resolvable:$true] %s57_s8 }
   0x3   :  { %s35_s28 = sshll.u32 %s8241_s27, 4  ;;  %s8242_s9 = smov [#allocation7]   ;;  %s36_s28 = int_to_ptr.vmem [resolvable:$true] %s35_s28 }
   0x4   :  { %38 = dma.hbm_to_vmem [thread:$0]  %s34_s26, 128, %s36_s28, [#allocation5]  }
   0x5   :  { %s59_s10 = sshll.u32 %s8242_s9, 4  ;;  %s22_s13 = sshll.u32 %s8909_s1, 4  ;;  %s60_s10 = int_to_ptr.vmem [resolvable:$true] %s59_s10  ;;  %s23_s13 = int_to_ptr.hbm [resolvable:$true] %s22_s13 }
   0x6   :  { %62 = dma.hbm_to_vmem [thread:$0]  %s58_s8, 128, %s60_s10, [#allocation8]  }
   0x7   :  { %s43_s15 = sshll.u32 %s8911_s3, 4  ;;  %s8243_s16 = smov [#allocation2]   ;;  %s44_s15 = int_to_ptr.hbm [resolvable:$true] %s43_s15 }
   0x8   :  { %s24_s17 = sshll.u32 %s8243_s16, 4  ;;  %s8244_s4 = smov [#allocation6]   ;;  %s25_s17 = int_to_ptr.vmem [resolvable:$true] %s24_s17 }
   0x9   :  { %27 = dma.hbm_to_vmem [thread:$0]  %s23_s13, 512, %s25_s17, [#allocation3]  }
   0xa   :  { %s45_s18 = sshll.u32 %s8244_s4, 4  ;;  %s8245_s19 = smov 512   ;;  %s46_s18 = int_to_ptr.vmem [resolvable:$true] %s45_s18 }
   0xb   :  { %s8246_s20 = smov 32   ;;  %s70_s22 = sshll.u32 %s8914_s6, 4  ;;  %s71_s22 = int_to_ptr.hbm [resolvable:$true] %s70_s22 }
   0xc   :  { %51 = dma.hbm_to_vmem [thread:$0]  %s44_s15, 65536, %s46_s18, [#allocation5], %s8245_s19, %s8245_s19, %s8246_s20  }
   0xd   :  { %s8247_s23 = smov [#allocation9]  }
   0xe   :  { %s72_s24 = sshll.u32 %s8247_s23, 4  ;;  %s73_s24 = int_to_ptr.vmem [resolvable:$true] %s72_s24 }
   0xf   :  { %75 = dma.hbm_to_vmem [thread:$0]  %s71_s22, 16, %s73_s24, [#allocation8]  }
  0x10   :  { %8235 = dma.done.wait [#allocation3], 512  }
  0x11   :  { %8236 = vsyncadd [#allocation3], 4294966784 }
  0x12   :  { %8237 = dma.done.wait [#allocation5], 65664  }
  0x13   :  { %8238 = vsyncadd [#allocation5], 4294901632 }
  0x14   :  { %8239 = dma.done.wait [#allocation8], 144  }
  0x15   :  { %8240 = vsyncadd [#allocation8], 4294967152  ;;  %v8248_v0 = vmov 0   ;;  %v8317_v1 = vld [vmem:[%s8908_s0] sm:$0xff]  ;;  %v8249_v13 = vmov 683565275  }
  0x16   :  { %8106 = vset.pattern.permute.xlu0 %v8248_v0  ;;  %v113_v2 = vand.u32 2139095040, %v8317_v1  ;;  %v110_v3 = vand.u32 2147483647, %v8317_v1  ;;  %v8250_v15 = vmov 2475754826   ;;  %vm112_vm12 = vcmp.lt.s32.totalorder %v8317_v1, 0 }
  0x17   :  { %v8251_v17 = vmov 2131351028   ;;  %v8252_v19 = vmov 2102212464   ;;  %v8253_v21 = vmov 920167782  }
  0x18   :  { %v114_v4 = vshrl.u32 %v113_v2, 23  ;;  %v117_v6 = vand.u32 8388607, %v110_v3  ;;  %v8254_v28 = vmov 1326507024  }
  0x19   :  { %vm8368_vm14 = vcmp.le.f32.partialorder %v110_v3, 0.7853982 }
  0x1a   :  { %v5203_v5 = vadd.s32 4294967169, %v114_v4  ;;  %v118_v8 = vor.u32 8388608, %v117_v6 }
  0x1c   :  { %v120_v7 = vadd.s32 1, %v5203_v5  ;;  %v8325_v23 = vshll.u32 %v118_v8, 8 }
  0x1e   :  { %vm121_vm0 = vcmp.gt.s32.totalorder %v120_v7, 0  ;;  %v159_v40 = vand.u32 65535, %v8325_v23  ;;  %v160_v41 = vshrl.u32 %v8325_v23, 16 }
  0x1f   :  { %v122_v9 = vsel %vm121_vm0, %v120_v7, 0 }
  0x20   :  { %v124_v10 = vand.u32 31, %v122_v9  ;;  %v8323_v11 = vshrl.u32 %v122_v9, 5 }
  0x22   :  { %v125_v12 = vsub.s32 32, %v124_v10  ;;  %v127_v14 = vshll.u32 %v8249_v13, %v124_v10  ;;  %v130_v16 = vshll.u32 %v8250_v15, %v124_v10  ;;  %v133_v18 = vshll.u32 %v8251_v17, %v124_v10 }
  0x23   :  { %v136_v20 = vshll.u32 %v8252_v19, %v124_v10  ;;  %v139_v22 = vshll.u32 %v8253_v21, %v124_v10  ;;  %vm142_vm1 = vcmp.lt.s32.totalorder %v8323_v11, 1  ;;  %vm144_vm2 = vcmp.lt.s32.totalorder %v8323_v11, 3 }
  0x24   :  { %v128_v24 = vshrl.u32 %v8250_v15, %v125_v12  ;;  %v131_v25 = vshrl.u32 %v8251_v17, %v125_v12  ;;  %v134_v26 = vshrl.u32 %v8252_v19, %v125_v12  ;;  %v137_v27 = vshrl.u32 %v8253_v21, %v125_v12 }
  0x25   :  { %v140_v29 = vshrl.u32 %v8254_v28, %v125_v12  ;;  %vm145_vm3 = vcmp.lt.s32.totalorder %v8323_v11, 4  ;;  %vm143_vm4 = vcmp.lt.s32.totalorder %v8323_v11, 2  ;;  %v126_v52 = vshrl.u32 %v8249_v13, %v125_v12 }
  0x26   :  { %v129_v30 = vor.u32 %v128_v24, %v127_v14  ;;  %v132_v31 = vor.u32 %v131_v25, %v130_v16  ;;  %v135_v32 = vor.u32 %v134_v26, %v133_v18  ;;  %v138_v33 = vor.u32 %v137_v27, %v136_v20 }
  0x27   :  { %v141_v34 = vor.u32 %v140_v29, %v139_v22 }
  0x28   :  { %v150_v35 = vsel %vm142_vm1, %v129_v30, %v132_v31  ;;  %v151_v36 = vsel %vm145_vm3, %v138_v33, 920167782  ;;  %v154_v37 = vsel %vm142_vm1, %v132_v31, %v135_v32  ;;  %v147_v59 = vsel %vm145_vm3, %v135_v32, 2102212464 }
  0x29   :  { %v152_v38 = vsel %vm144_vm2, %v135_v32, %v151_v36  ;;  %v155_v39 = vsel %vm145_vm3, %v141_v34, 1326507024  ;;  %v146_v2 = vsel %vm142_vm1, %v126_v52, %v129_v30  ;;  %v148_v6 = vsel %vm144_vm2, %v132_v31, %v147_v59 }
  0x2a   :  { %v153_v42 = vsel %vm143_vm4, %v150_v35, %v152_v38  ;;  %v156_v43 = vsel %vm144_vm2, %v138_v33, %v155_v39  ;;  %v149_v20 = vsel %vm143_vm4, %v146_v2, %v148_v6  ;;  %v8255_v33 = vmov 5.0  }
  0x2b   :  { %v157_v44 = vsel %vm143_vm4, %v154_v37, %v156_v43  ;;  %v183_v45 = vand.u32 65535, %v153_v42  ;;  %v184_v46 = vshrl.u32 %v153_v42, 16  ;;  %v203_v26 = vmul.u32 %v8325_v23, %v149_v20  ;;  %v5403_v20 = vld [vmem:[#allocation6 + $0x180] sm:$0xf] }
  0x2c   :  { %v161_v47 = vand.u32 65535, %v157_v44  ;;  %v162_v48 = vshrl.u32 %v157_v44, 16  ;;  %8111 = vrcp.f32 %v8255_v33  ;;  %v5371_v33 = vld [vmem:[#allocation6 + $0x140] sm:$0xf]  ;;  %vm253_vm3 = vweird.f32 %v8317_v1 }
  0x2d   :  { %v185_v49 = vmul.u32 %v183_v45, %v159_v40  ;;  %v186_v50 = vmul.u32 %v184_v46, %v159_v40  ;;  %v187_v51 = vmul.u32 %v183_v45, %v160_v41  ;;  %v188_v56 = vmul.u32 %v184_v46, %v160_v41 }
  0x2e   :  { %v163_v53 = vmul.u32 %v161_v47, %v159_v40  ;;  %v164_v54 = vmul.u32 %v162_v48, %v159_v40  ;;  %v165_v55 = vmul.u32 %v161_v47, %v160_v41  ;;  %v166_v60 = vmul.u32 %v162_v48, %v160_v41 }
  0x2f   :  { %v189_v57 = vshll.u32 %v186_v50, 16  ;;  %v191_v58 = vshll.u32 %v187_v51, 16  ;;  %v190_v8 = vshrl.u32 %v186_v50, 16  ;;  %v192_v15 = vshrl.u32 %v187_v51, 16 }
  0x30   :  { %v167_v61 = vshll.u32 %v164_v54, 16  ;;  %v169_v62 = vshll.u32 %v165_v55, 16  ;;  %v168_v10 = vshrl.u32 %v164_v54, 16  ;;  %v170_v17 = vshrl.u32 %v165_v55, 16 }
  0x31   :  { %vm193_vm5 = vc.u32 %v185_v49, %v189_v57  ;;  %v195_v63 = vadd.s32 %v189_v57, %v185_v49  ;;  %v8256_v55 = vmov 1   ;;  %v7677_v57 = vld [vmem:[#allocation6 + $0x51c] sm:$0xf0] }
  0x32   :  { %vm171_vm6 = vc.u32 %v163_v53, %v167_v61  ;;  %v173_v4 = vadd.s32 %v167_v61, %v163_v53  ;;  %v194_v5 = vsel %vm193_vm5, 1, %v8248_v0  ;;  %v8112_v36 = vpop.eup %8111  ;;  %8107 = vset.pattern.permute.xlu1 %v8256_v55  ;;  %v5851_v55 = vld [vmem:[#allocation6 + $0x500] sm:$0xf] }
  0x33   :  { %v172_v7 = vsel %vm171_vm6, 1, %v8248_v0  ;;  %v196_v9 = vadd.s32 %v194_v5, %v188_v56  ;;  %vm197_vm7 = vc.u32 %v195_v63, %v191_v58  ;;  %v199_v22 = vadd.s32 %v195_v63, %v191_v58  ;;  %v7573_v5 = vld [vmem:[#allocation6 + $0x1dc] sm:$0xf0] }
  0x34   :  { %v174_v12 = vadd.s32 %v172_v7, %v166_v60  ;;  %vm175_vm8 = vc.u32 %v173_v4, %v169_v62  ;;  %v198_v13 = vsel %vm197_vm7, 1, %v8248_v0  ;;  %v98_v38 = vmul.f32 5.0, %v8112_v36  ;;  %v5435_v4 = vld [vmem:[#allocation6 + $0x1c0] sm:$0xf] }
  0x35   :  { %v176_v14 = vsel %vm175_vm8, 1, %v8248_v0  ;;  %v200_v16 = vadd.s32 %v198_v13, %v196_v9  ;;  %vm102_vm13 = vweird.f32 %v8112_v36  ;;  %v5436_v6 = vor.u32 %v7573_v5, %v5435_v4  ;;  %v5691_v7 = vld [vmem:[#allocation6 + $0x3c0] sm:$0xf] }
  0x36   :  { %v178_v18 = vadd.s32 %v176_v14, %v174_v12  ;;  %v99_v40 = vsub.f32 1.0, %v98_v38  ;;  %v5947_v9 = vld [vmem:[#allocation6 + $0x5c0] sm:$0xf]  ;;  %vm5194_vm6 = vcmask 23552  }
  0x37   :  { %v201_v19 = vadd.s32 %v200_v16, %v190_v8  ;;  %v7637_v8 = vld [vmem:[#allocation6 + $0x3dc] sm:$0xf0]  ;;  %3726 = vmatpush.bf16.msra.mxu0 %v5436_v6 }
  0x38   :  { %v179_v21 = vadd.s32 %v178_v18, %v168_v10  ;;  %v100_v45 = vmul.f32 %v8112_v36, %v99_v40  ;;  %v5692_v12 = vor.u32 %v7637_v8, %v5691_v7  ;;  %v7701_v13 = vld [vmem:[#allocation6 + $0x5dc] sm:$0xf0] }
  0x39   :  { %v202_v24 = vadd.s32 %v201_v19, %v192_v15  ;;  %v6203_v14 = vld [vmem:[#allocation6 + $0x7c0] sm:$0xf]  ;;  %v5948_v18 = vor.u32 %v7701_v13, %v5947_v9 }
  0x3a   :  { %v180_v25 = vadd.s32 %v179_v21, %v170_v17  ;;  %v101_v48 = vadd.f32 %v8112_v36, %v100_v45  ;;  %v7765_v15 = vld [vmem:[#allocation6 + $0x7dc] sm:$0xf0]  ;;  %v8257_v17 = vmov 2   ;;  %3739 = vmatpush.bf16.msra.mxu1 %v5692_v12 }
  0x3b   :  { %v206_v27 = vadd.s32 1, %v202_v24  ;;  %v6204_v19 = vor.u32 %v7765_v15, %v6203_v14  ;;  %v7565_v21 = vld [vmem:[#allocation6 + $0x19c] sm:$0xf0]  ;;  %3752 = vmatpush.bf16.msra.mxu2 %v5948_v18 }
  0x3c   :  { %vm205_vm9 = vc.u32 %v180_v25, %v199_v22  ;;  %v204_v39 = vadd.s32 %v199_v22, %v180_v25  ;;  %v103_v52 = vsel %vm102_vm13, %v8112_v36, %v101_v48  ;;  %v5659_v22 = vld [vmem:[#allocation6 + $0x380] sm:$0xf] }
  0x3d   :  { %v207_v28 = vsel %vm205_vm9, %v206_v27, %v202_v24  ;;  %v104_v56 = vmul.f32 %v103_v52, %v8317_v1  ;;  %v5404_v24 = vor.u32 %v7565_v21, %v5403_v20  ;;  %v7629_v25 = vld [vmem:[#allocation6 + $0x39c] sm:$0xf0]  ;;  %3765 = vmatpush.bf16.msra.mxu3 %v6204_v19 }
  0x3e   :  { %v208_v29 = vadd.s32 %v207_v28, %v203_v26  ;;  %v5915_v26 = vld [vmem:[#allocation6 + $0x580] sm:$0xf] }
  0x3f   :  { %532 = vperm.xlu1 %8107, %v104_v56   ;;  %v7693_v27 = vld [vmem:[#allocation6 + $0x59c] sm:$0xf0]  ;;  %3727 = vmatpush.bf16.msra.mxu0 %v5404_v24 }
  0x40   :  { %v209_v30 = vadd.s32 536870912, %v208_v29  ;;  %v5627_v38 = vld [vmem:[#allocation6 + $0x340] sm:$0xf] }
  0x41   :  { %v7685_v40 = vld [vmem:[#allocation6 + $0x55c] sm:$0xf0] }
  0x42   :  { %v210_v0 = vshrl.u32 %v209_v30, 30  ;;  %v5660_v30 = vor.u32 %v7629_v25, %v5659_v22  ;;  %v7749_v45 = vld [vmem:[#allocation6 + $0x75c] sm:$0xf0] }
  0x43   :  { %v5307_v4 = vld [vmem:[#allocation6 + $0xc0] sm:$0xf] }
  0x44   :  { %v211_v31 = vshll.u32 %v210_v0, 30  ;;  %v234_v44 = vsub.s32 4, %v210_v0  ;;  %3740 = vmatpush.bf16.msra.mxu1 %v5660_v30  ;;  %v7541_v5 = vld [vmem:[#allocation6 + $0xdc] sm:$0xf0] }
  0x45   :  { %v7605_v7 = vld [vmem:[#allocation6 + $0x2dc] sm:$0xf0]  ;;  %v5308_v14 = vor.u32 %v7541_v5, %v5307_v4 }
  0x46   :  { %v212_v32 = vsub.s32 %v208_v29, %v211_v31  ;;  %v235_v51 = vsel %vm112_vm12, %v234_v44, %v210_v0  ;;  %v5916_v0 = vor.u32 %v7693_v27, %v5915_v26  ;;  %v6171_v31 = vld [vmem:[#allocation6 + $0x780] sm:$0xf] }
  0x47   :  { %v237_v59 = vsel %vm8368_vm14, 0, %v235_v51  ;;  %8108 = vset.pattern.permute.xlu1 %v8257_v17  ;;  %v6139_v44 = vld [vmem:[#allocation6 + $0x740] sm:$0xf] }
  0x48   :  { %vm213_vm10 = vcmp.lt.s32.totalorder %v212_v32, 0  ;;  %v214_v34 = vsub.s32 0, %v212_v32  ;;  %v474_v60 = vadd.s32 3, %v237_v59  ;;  %v8374_v63 = vand.u32 3, %v237_v59  ;;  %577 = vperm.xlu1 %8108, %v8317_v1   ;;  %3753 = vmatpush.bf16.msra.mxu2 %v5916_v0  ;;  %v7613_v51 = vld [vmem:[#allocation6 + $0x31c] sm:$0xf0] }
  0x49   :  { %v6140_v48 = vor.u32 %v7749_v45, %v6139_v44  ;;  %v7741_v59 = vld [vmem:[#allocation6 + $0x71c] sm:$0xf0] }
  0x4a   :  { %v215_v11 = vsel %vm213_vm10, %v214_v34, %v212_v32  ;;  %v8376_v2 = vand.u32 3, %v474_v60  ;;  %v7557_v34 = vld [vmem:[#allocation6 + $0x15c] sm:$0xf0]  ;;  %vm259_vm15 = vcmp.eq.s32.totalorder %v8374_v63, 2  ;;  %vm256_vm0 = vcmp.eq.s32.totalorder %v8374_v63, 0 }
  0x4b   :  { %v216_v35 = vclz %v215_v11  ;;  %vm255_vm1 = vcmp.lt.s32.totalorder %v8374_v63, 2  ;;  %v5819_v8 = vld [vmem:[#allocation6 + $0x4c0] sm:$0xf] }
  0x4c   :  { %v7669_v9 = vld [vmem:[#allocation6 + $0x4dc] sm:$0xf0]  ;;  %vm476_vm2 = vcmp.lt.s32.totalorder %v8376_v2, 2  ;;  %vm477_vm4 = vcmp.eq.s32.totalorder %v8376_v2, 0  ;;  %vm480_vm5 = vcmp.eq.s32.totalorder %v8376_v2, 2 }
  0x4d   :  { %v5204_v37 = vadd.s32 4294967294, %v216_v35  ;;  %v6075_v15 = vld [vmem:[#allocation6 + $0x6c0] sm:$0xf]  ;;  %v5820_v25 = vor.u32 %v7669_v9, %v5819_v8 }
  0x4e   :  { %v7733_v18 = vld [vmem:[#allocation6 + $0x6dc] sm:$0xf0] }
  0x4f   :  { %vm5205_vm11 = vcmp.lt.s32.totalorder %v5204_v37, 0  ;;  %v5275_v20 = vld [vmem:[#allocation6 + $0x80] sm:$0xf]  ;;  %v6076_v26 = vor.u32 %v7733_v18, %v6075_v15 }
  0x50   :  { %v219_v23 = vsel %vm5205_vm11, 0, %v5204_v37  ;;  %v5372_v37 = vor.u32 %v7557_v34, %v5371_v33  ;;  %v5531_v21 = vld [vmem:[#allocation6 + $0x280] sm:$0xf] }
  0x51   :  { %v220_v41 = vsub.s32 32, %v219_v23  ;;  %v221_v42 = vshll.u32 %v212_v32, %v219_v23  ;;  %v224_v43 = vsub.s32 4294967266, %v219_v23  ;;  %v7757_v32 = vld [vmem:[#allocation6 + $0x79c] sm:$0xf0] }
  0x52   :  { %v6172_v36 = vor.u32 %v7757_v32, %v6171_v31  ;;  %v5883_v23 = vld [vmem:[#allocation6 + $0x540] sm:$0xf]  ;;  %3728 = vmatpush.bf16.msra.mxu0 %v5372_v37 }
  0x53   :  { %v222_v46 = vshrl.u32 %v204_v39, %v220_v41  ;;  %v225_v47 = vadd.s32 127, %v224_v43  ;;  %v7621_v39 = vld [vmem:[#allocation6 + $0x35c] sm:$0xf0] }
  0x54   :  { %3766 = vmatpush.bf16.msra.mxu3 %v6172_v36  ;;  %v5628_v43 = vor.u32 %v7621_v39, %v5627_v38  ;;  %v7597_v27 = vld [vmem:[#allocation6 + $0x29c] sm:$0xf0] }
  0x55   :  { %v223_v49 = vor.u32 %v222_v46, %v221_v42  ;;  %v226_v50 = vshll.u32 %v225_v47, 23  ;;  %v5339_v46 = vld [vmem:[#allocation6 + $0x100] sm:$0xf]  ;;  %v5884_v47 = vor.u32 %v7685_v40, %v5883_v23 }
  0x56   :  { %3741 = vmatpush.bf16.msra.mxu1 %v5628_v43  ;;  %v6043_v30 = vld [vmem:[#allocation6 + $0x680] sm:$0xf] }
  0x57   :  { %v227_v53 = vor.u32 4788187, %v226_v50  ;;  %v230_v54 = vcvt.s32.f32 %v223_v49  ;;  %v7549_v49 = vld [vmem:[#allocation6 + $0x11c] sm:$0xf0]  ;;  %3754 = vmatpush.bf16.msra.mxu2 %v5884_v47 }
  0x58   :  { %v5595_v50 = vld [vmem:[#allocation6 + $0x300] sm:$0xf]  ;;  %3767 = vmatpush.bf16.msra.mxu3 %v6140_v48 }
  0x59   :  { %v228_v58 = vand.u32 2147483647, %v227_v53  ;;  %v5596_v56 = vor.u32 %v7613_v51, %v5595_v50  ;;  %v7725_v0 = vld [vmem:[#allocation6 + $0x69c] sm:$0xf0] }
  0x5a   :  { %v5243_v34 = vld [vmem:[#allocation6 + $0x40] sm:$0xf]  ;;  %v6044_v37 = vor.u32 %v7725_v0, %v6043_v30 }
  0x5b   :  { %v231_v61 = vmul.f32 %v230_v54, %v228_v58  ;;  %v5340_v54 = vor.u32 %v7549_v49, %v5339_v46  ;;  %v6107_v58 = vld [vmem:[#allocation6 + $0x700] sm:$0xf]  ;;  %3742 = vmatpush.bf16.msra.mxu1 %v5596_v56 }
  0x5c   :  { %v6108_v6 = vor.u32 %v7741_v59, %v6107_v58  ;;  %v5499_v38 = vld [vmem:[#allocation6 + $0x240] sm:$0xf] }
  0x5d   :  { %v232_v62 = vxor.u32 2147483648, %v231_v61  ;;  %3729 = vmatpush.bf16.msra.mxu0 %v5340_v54  ;;  %v7589_v39 = vld [vmem:[#allocation6 + $0x25c] sm:$0xf0] }
  0x5e   :  { %3768 = vmatpush.bf16.msra.mxu3 %v6108_v6  ;;  %v5755_v23 = vld [vmem:[#allocation6 + $0x440] sm:$0xf]  ;;  %v5500_v49 = vor.u32 %v7589_v39, %v5499_v38 }
  0x5f   :  { %v233_v3 = vsel %vm112_vm12, %v232_v62, %v231_v61  ;;  %v5852_v62 = vor.u32 %v7677_v57, %v5851_v55  ;;  %v7717_v43 = vld [vmem:[#allocation6 + $0x65c] sm:$0xf0] }
  0x60   :  { %v8383_v10 = vsel %vm8368_vm14, %v8317_v1, %v233_v3  ;;  %v5563_v3 = vld [vmem:[#allocation6 + $0x2c0] sm:$0xf] }
  0x61   :  { %v238_v16 = vmul.f32 %v8383_v10, %v8383_v10  ;;  %v5564_v19 = vor.u32 %v7605_v7, %v5563_v3  ;;  %3755 = vmatpush.bf16.msra.mxu2 %v5852_v62  ;;  %3730 = vmatpush.bf16.msra.mxu0 %v5308_v14  ;;  %v5211_v48 = vld [vmem:[#allocation6] sm:$0xf] }
  0x62   :  { %3769 = vmatpush.bf16.msra.mxu3 %v6076_v26  ;;  %v7517_v63 = vld [vmem:[#allocation6 + $0x1c] sm:$0xf0] }
  0x63   :  { %v239_v28 = vmul.f32 -0.001358992, %v238_v16  ;;  %v246_v29 = vmul.f32 -0.00019511016, %v238_v16  ;;  %3743 = vmatpush.bf16.msra.mxu1 %v5564_v19  ;;  %v5467_v50 = vld [vmem:[#allocation6 + $0x200] sm:$0xf] }
  0x64   :  { %v7581_v51 = vld [vmem:[#allocation6 + $0x21c] sm:$0xf0] }
  0x65   :  { %v240_v11 = vadd.f32 0.041655596, %v239_v28  ;;  %v247_v35 = vadd.f32 0.008332121, %v246_v29  ;;  %v5787_v28 = vld [vmem:[#allocation6 + $0x480] sm:$0xf]  ;;  %3756 = vmatpush.bf16.msra.mxu2 %v5820_v25  ;;  %v5468_v3 = vor.u32 %v7581_v51, %v5467_v50 }
  0x66   :  { %v7661_v29 = vld [vmem:[#allocation6 + $0x49c] sm:$0xf0]  ;;  %3770 = vmatpush.bf16.msra.mxu3 %v6044_v37 }
  0x67   :  { %v241_v41 = vmul.f32 %v240_v11, %v238_v16  ;;  %v248_v42 = vmul.f32 %v247_v35, %v238_v16  ;;  %v7525_v11 = vld [vmem:[#allocation6 + $0x5c] sm:$0xf0]  ;;  %v5788_v36 = vor.u32 %v7661_v29, %v5787_v28 }
  0x68   :  { %v5244_v47 = vor.u32 %v7525_v11, %v5243_v34  ;;  %v5723_v54 = vld [vmem:[#allocation6 + $0x400] sm:$0xf] }
  0x69   :  { %v242_v52 = vadd.f32 -0.4999988, %v241_v41  ;;  %v249_v53 = vadd.f32 -0.16666654, %v248_v42  ;;  %v7653_v41 = vld [vmem:[#allocation6 + $0x45c] sm:$0xf0]  ;;  %3757 = vmatpush.bf16.msra.mxu2 %v5788_v36 }
  0x6a   :  { %v6011_v42 = vld [vmem:[#allocation6 + $0x640] sm:$0xf] }
  0x6b   :  { %v243_v60 = vmul.f32 %v242_v52, %v238_v16  ;;  %v250_v61 = vmul.f32 %v249_v53, %v238_v16  ;;  %v7533_v16 = vld [vmem:[#allocation6 + $0x9c] sm:$0xf0]  ;;  %v5756_v52 = vor.u32 %v7653_v41, %v5755_v23  ;;  %v6012_v53 = vor.u32 %v7717_v43, %v6011_v42 }
  0x6c   :  { %v5276_v33 = vor.u32 %v7533_v16, %v5275_v20  ;;  %v7645_v55 = vld [vmem:[#allocation6 + $0x41c] sm:$0xf0] }
  0x6d   :  { %v244_v12 = vadd.f32 1.0, %v243_v60  ;;  %v251_v13 = vadd.f32 1.0, %v250_v61  ;;  %v5979_v56 = vld [vmem:[#allocation6 + $0x600] sm:$0xf]  ;;  %v5212_v61 = vor.u32 %v7517_v63, %v5211_v48  ;;  %3758 = vmatpush.bf16.msra.mxu2 %v5756_v52  ;;  %3771 = vmatpush.bf16.msra.mxu3 %v6012_v53  ;;  %v5724_v2 = vor.u32 %v7645_v55, %v5723_v54 }
  0x6e   :  { %3731 = vmatpush.bf16.msra.mxu0 %v5276_v33  ;;  %v7709_v58 = vld [vmem:[#allocation6 + $0x61c] sm:$0xf0] }
  0x6f   :  { %v252_v22 = vmul.f32 %v251_v13, %v8383_v10  ;;  %v260_v24 = vxor.u32 2147483648, %v244_v12  ;;  %v5532_v10 = vor.u32 %v7597_v27, %v5531_v21  ;;  %v6459_v59 = vld [vmem:[#allocation6 + $0x9c0] sm:$0xf] }
  0x70   :  { %v7829_v60 = vld [vmem:[#allocation6 + $0x9dc] sm:$0xf0] }
  0x71   :  { %v257_v31 = vxor.u32 2147483648, %v252_v22  ;;  %v261_v32 = vsel %vm259_vm15, %v260_v24, %v252_v22  ;;  %v482_v46 = vsel %vm480_vm5, %v260_v24, %v252_v22  ;;  %3744 = vmatpush.bf16.msra.mxu1 %v5532_v10  ;;  %v6715_v62 = vld [vmem:[#allocation6 + $0xbc0] sm:$0xf]  ;;  %v6460_v13 = vor.u32 %v7829_v60, %v6459_v59  ;;  %3759 = vmatpush.bf16.msra.mxu2 %v5724_v2  ;;  %v8418_v60 = vld [vmem:[#allocation2 + $0x10] sm:$0xff] }
  0x72   :  { %3732 = vmatpush.bf16.msra.mxu0 %v5244_v47  ;;  %v7893_v4 = vld [vmem:[#allocation6 + $0xbdc] sm:$0xf0] }
  0x73   :  { %v258_v35 = vsel %vm256_vm0, %v244_v12, %v257_v31  ;;  %v479_v45 = vsel %vm477_vm4, %v244_v12, %v257_v31  ;;  %v6971_v5 = vld [vmem:[#allocation6 + $0xdc0] sm:$0xf]  ;;  %v5980_v12 = vor.u32 %v7709_v58, %v5979_v56  ;;  %v6716_v14 = vor.u32 %v7893_v4, %v6715_v62  ;;  %v8420_v4 = vld [vmem:[#allocation2 + $0x18] sm:$0xff] }
  0x74   :  { %v262_v40 = vsel %vm255_vm1, %v258_v35, %v261_v32  ;;  %v483_v57 = vsel %vm476_vm2, %v479_v45, %v482_v46  ;;  %v7957_v6 = vld [vmem:[#allocation6 + $0xddc] sm:$0xf0] }
  0x75   :  { %v263_v44 = vsel %vm253_vm3, nan, %v262_v40  ;;  %3745 = vmatpush.bf16.msra.mxu1 %v5500_v49  ;;  %v7227_v7 = vld [vmem:[#allocation6 + $0xfc0] sm:$0xf]  ;;  %v484_v9 = vsel %vm253_vm3, nan, %v483_v57  ;;  %v6972_v19 = vor.u32 %v7957_v6, %v6971_v5  ;;  %3772 = vmatpush.bf16.msra.mxu3 %v5980_v12  ;;  %v277_v12 = vperm.slane %v8418_v60, 0 }
  0x76   :  { %266 = vperm.xlu0 %8106, %v263_v44   ;;  %v8021_v8 = vld [vmem:[#allocation6 + $0xfdc] sm:$0xf0]  ;;  %3733 = vmatpush.bf16.msra.mxu0 %v5212_v61  ;;  %v8414_v44 = vld [vmem:[#allocation2] sm:$0xff] }
  0x77   :  { %v6427_v15 = vld [vmem:[#allocation6 + $0x980] sm:$0xf]  ;;  %v7228_v20 = vor.u32 %v8021_v8, %v7227_v7  ;;  %3804 = vmatpush.bf16.msrb.mxu2 %v6972_v19  ;;  %v273_v5 = vperm.slane %v8414_v44, 0 }
  0x78   :  { %v7821_v18 = vld [vmem:[#allocation6 + $0x99c] sm:$0xf0] }
  0x79   :  { %v6683_v16 = vld [vmem:[#allocation6 + $0xb80] sm:$0xf]  ;;  %3746 = vmatpush.bf16.msra.mxu1 %v5468_v3  ;;  %v6428_v26 = vor.u32 %v7821_v18, %v6427_v15  ;;  %3817 = vmatpush.bf16.msrb.mxu3 %v7228_v20  ;;  %v274_v3 = vperm.slane %v8414_v44, 4  ;;  %v535_v15 = vperm.slane %v8414_v44, 2  ;;  %v536_v18 = vperm.slane %v8414_v44, 6 }
  0x7a   :  { %v7885_v21 = vld [vmem:[#allocation6 + $0xb9c] sm:$0xf0]  ;;  %3778 = vmatpush.bf16.msrb.mxu0 %v6460_v13  ;;  %v278_v13 = vperm.slane %v8418_v60, 4 }
  0x7b   :  { %v6939_v22 = vld [vmem:[#allocation6 + $0xd80] sm:$0xf]  ;;  %v6684_v27 = vor.u32 %v7885_v21, %v6683_v16  ;;  %v279_v21 = vperm.slane %v8420_v4, 0 }
  0x7c   :  { %v7949_v24 = vld [vmem:[#allocation6 + $0xd9c] sm:$0xf0] }
  0x7d   :  { %v7195_v25 = vld [vmem:[#allocation6 + $0xf80] sm:$0xf]  ;;  %3791 = vmatpush.bf16.msrb.mxu1 %v6716_v14  ;;  %v6940_v30 = vor.u32 %v7949_v24, %v6939_v22  ;;  %v280_v22 = vperm.slane %v8420_v4, 4 }
  0x7e   :  { %487 = vperm.xlu0 %8106, %v484_v9   ;;  %v8013_v1 = vld [vmem:[#allocation6 + $0xf9c] sm:$0xf0]  ;;  %3779 = vmatpush.bf16.msrb.mxu0 %v6428_v26 }
  0x7f   :  { %v6395_v28 = vld [vmem:[#allocation6 + $0x940] sm:$0xf]  ;;  %v7196_v0 = vor.u32 %v8013_v1, %v7195_v25  ;;  %3805 = vmatpush.bf16.msrb.mxu2 %v6940_v30 }
  0x80   :  { %v7813_v29 = vld [vmem:[#allocation6 + $0x95c] sm:$0xf0] }
  0x81   :  { %v6651_v31 = vld [vmem:[#allocation6 + $0xb40] sm:$0xf]  ;;  %3792 = vmatpush.bf16.msrb.mxu1 %v6684_v27  ;;  %v6396_v35 = vor.u32 %v7813_v29, %v6395_v28  ;;  %3818 = vmatpush.bf16.msrb.mxu3 %v7196_v0  ;;  %v8434_v27 = vperm.slane %v273_v5, 0  ;;  %v539_v28 = vperm.slane %v8418_v60, 2  ;;  %v540_v29 = vperm.slane %v8418_v60, 6 }
  0x82   :  { %v7877_v32 = vld [vmem:[#allocation6 + $0xb5c] sm:$0xf0] }
  0x83   :  { %v6907_v33 = vld [vmem:[#allocation6 + $0xd40] sm:$0xf]  ;;  %v6652_v36 = vor.u32 %v7877_v32, %v6651_v31  ;;  %3780 = vmatpush.bf16.msrb.mxu0 %v6396_v35  ;;  %v8438_v31 = vperm.slane %v274_v3, 0  ;;  %v541_v32 = vperm.slane %v8420_v4, 2 }
  0x84   :  { %v7941_v10 = vld [vmem:[#allocation6 + $0xd5c] sm:$0xf0] }
  0x85   :  { %v7163_v34 = vld [vmem:[#allocation6 + $0xf40] sm:$0xf]  ;;  %v6908_v37 = vor.u32 %v7941_v10, %v6907_v33  ;;  %3793 = vmatpush.bf16.msrb.mxu1 %v6652_v36  ;;  %v542_v33 = vperm.slane %v8420_v4, 6 }
  0x86   :  { %v8005_v11 = vld [vmem:[#allocation6 + $0xf5c] sm:$0xf0]  ;;  %8109 = vset.pattern.permute.xlu0 %v8257_v17 }
  0x87   :  { %v7164_v38 = vor.u32 %v8005_v11, %v7163_v34  ;;  %3806 = vmatpush.bf16.msrb.mxu2 %v6908_v37  ;;  %v6363_v39 = vld [vmem:[#allocation6 + $0x900] sm:$0xf]  ;;  %v551_v34 = vperm.slane %v535_v15, 2  ;;  %v552_v11 = vperm.slane %v536_v18, 2  ;;  %v8452_v15 = vperm.slane %v278_v13, 0 }
  0x88   :  { %v7805_v23 = vld [vmem:[#allocation6 + $0x91c] sm:$0xf0]  ;;  %v8454_v18 = vperm.slane %v279_v21, 0 }
  0x89   :  { %3819 = vmatpush.bf16.msrb.mxu3 %v7164_v38  ;;  %v6619_v40 = vld [vmem:[#allocation6 + $0xb00] sm:$0xf]  ;;  %v6364_v48 = vor.u32 %v7805_v23, %v6363_v39  ;;  %v555_v23 = vperm.slane %v539_v28, 2 }
  0x8a   :  { %v7869_v41 = vld [vmem:[#allocation6 + $0xb1c] sm:$0xf0] }
  0x8b   :  { %v6875_v42 = vld [vmem:[#allocation6 + $0xd00] sm:$0xf]  ;;  %v6620_v49 = vor.u32 %v7869_v41, %v6619_v40  ;;  %3781 = vmatpush.bf16.msrb.mxu0 %v6364_v48  ;;  %v556_v40 = vperm.slane %v540_v29, 2 }
  0x8c   :  { %v7933_v43 = vld [vmem:[#allocation6 + $0xd1c] sm:$0xf0] }
  0x8d   :  { %v7131_v45 = vld [vmem:[#allocation6 + $0xf00] sm:$0xf]  ;;  %v6876_v63 = vor.u32 %v7933_v43, %v6875_v42  ;;  %3794 = vmatpush.bf16.msrb.mxu1 %v6620_v49 }
  0x8e   :  { %v7997_v46 = vld [vmem:[#allocation6 + $0xf1c] sm:$0xf0] }
  0x8f   :  { %v6331_v47 = vld [vmem:[#allocation6 + $0x8c0] sm:$0xf]  ;;  %v7132_v50 = vor.u32 %v7997_v46, %v7131_v45  ;;  %3807 = vmatpush.bf16.msrb.mxu2 %v6876_v63 }
  0x90   :  { %v7797_v17 = vld [vmem:[#allocation6 + $0x8dc] sm:$0xf0] }
  0x91   :  { %v6587_v51 = vld [vmem:[#allocation6 + $0xac0] sm:$0xf]  ;;  %v6332_v56 = vor.u32 %v7797_v17, %v6331_v47  ;;  %3820 = vmatpush.bf16.msrb.mxu3 %v7132_v50 }
  0x92   :  { %v7861_v52 = vld [vmem:[#allocation6 + $0xadc] sm:$0xf0] }
  0x93   :  { %v6843_v53 = vld [vmem:[#allocation6 + $0xcc0] sm:$0xf]  ;;  %v6588_v57 = vor.u32 %v7861_v52, %v6587_v51  ;;  %3782 = vmatpush.bf16.msrb.mxu0 %v6332_v56  ;;  %v557_v56 = vperm.slane %v541_v32, 2 }
  0x94   :  { %v7925_v54 = vld [vmem:[#allocation6 + $0xcdc] sm:$0xf0] }
  0x95   :  { %v7099_v55 = vld [vmem:[#allocation6 + $0xec0] sm:$0xf]  ;;  %v6844_v61 = vor.u32 %v7925_v54, %v6843_v53  ;;  %3795 = vmatpush.bf16.msrb.mxu1 %v6588_v57  ;;  %v558_v57 = vperm.slane %v542_v33, 2 }
  0x96   :  { %v7989_v58 = vld [vmem:[#allocation6 + $0xedc] sm:$0xf0] }
  0x97   :  { %v8416_v59 = vld [vmem:[#allocation2 + $0x8] sm:$0xff]  ;;  %v7100_v62 = vor.u32 %v7989_v58, %v7099_v55  ;;  %3808 = vmatpush.bf16.msrb.mxu2 %v6844_v61 }
  0x98   :  { %v6299_v6 = vld [vmem:[#allocation6 + $0x880] sm:$0xf]  ;;  %v275_v9 = vperm.slane %v8416_v59, 0  ;;  %v276_v2 = vperm.slane %v8416_v59, 4  ;;  %v537_v19 = vperm.slane %v8416_v59, 2  ;;  %v538_v20 = vperm.slane %v8416_v59, 6 }
  0x99   :  { %v7789_v7 = vld [vmem:[#allocation6 + $0x89c] sm:$0xf0]  ;;  %3821 = vmatpush.bf16.msrb.mxu3 %v7100_v62  ;;  %v492_v28 = vperm.slane %v8416_v59, 1  ;;  %v493_v29 = vperm.slane %v8416_v59, 5 }
  0x9a   :  { %v6555_v8 = vld [vmem:[#allocation6 + $0xa80] sm:$0xf]  ;;  %v6300_v24 = vor.u32 %v7789_v7, %v6299_v6  ;;  %v553_v35 = vperm.slane %v537_v19, 2  ;;  %v554_v36 = vperm.slane %v538_v20, 2  ;;  %v291_v3 = vperm.slane %v275_v9, 0 }
  0x9b   :  { %v7853_v14 = vld [vmem:[#allocation6 + $0xa9c] sm:$0xf0]  ;;  %v292_v6 = vperm.slane %v276_v2, 0 }
  0x9c   :  { %v6811_v16 = vld [vmem:[#allocation6 + $0xc80] sm:$0xf]  ;;  %v6556_v25 = vor.u32 %v7853_v14, %v6555_v8  ;;  %3783 = vmatpush.bf16.msrb.mxu0 %v6300_v24  ;;  %v8448_v14 = vperm.slane %v277_v12, 0  ;;  %v8466_v24 = vld [vmem:[#allocation4] sm:$0xff]  ;;  %v8470_v12 = vperm.slane %v280_v22, 0 }
  0x9d   :  { %v7917_v1 = vld [vmem:[#allocation6 + $0xc9c] sm:$0xf0]  ;;  %v306_v22 = vperm.slane %v8466_v24, 0  ;;  %v309_v32 = vperm.slane %v8466_v24, 3  ;;  %v310_v33 = vperm.slane %v8466_v24, 4 }
  0x9e   :  { %v7067_v26 = vld [vmem:[#allocation6 + $0xe80] sm:$0xf]  ;;  %v6812_v30 = vor.u32 %v7917_v1, %v6811_v16  ;;  %3796 = vmatpush.bf16.msrb.mxu1 %v6556_v25  ;;  %v490_v1 = vperm.slane %v8414_v44, 1 }
  0x9f   :  { %v7981_v0 = vld [vmem:[#allocation6 + $0xe9c] sm:$0xf0] }
  0xa0   :  { %v7068_v10 = vor.u32 %v7981_v0, %v7067_v26  ;;  %3809 = vmatpush.bf16.msrb.mxu2 %v6812_v30  ;;  %v6267_v37 = vld [vmem:[#allocation6 + $0x840] sm:$0xf]  ;;  %v491_v26 = vperm.slane %v8414_v44, 5  ;;  %v307_v30 = vperm.slane %v8466_v24, 1  ;;  %v308_v0 = vperm.slane %v8466_v24, 2 }
  0xa1   :  { %v7781_v38 = vld [vmem:[#allocation6 + $0x85c] sm:$0xf0] }
  0xa2   :  { %3822 = vmatpush.bf16.msrb.mxu3 %v7068_v10  ;;  %v6523_v39 = vld [vmem:[#allocation6 + $0xa40] sm:$0xf]  ;;  %v6268_v47 = vor.u32 %v7781_v38, %v6267_v37  ;;  %v311_v10 = vperm.slane %v8466_v24, 5  ;;  %v495_v37 = vperm.slane %v8418_v60, 5  ;;  %v496_v38 = vperm.slane %v8420_v4, 1 }
  0xa3   :  { %v7845_v41 = vld [vmem:[#allocation6 + $0xa5c] sm:$0xf0] }
  0xa4   :  { %v6779_v42 = vld [vmem:[#allocation6 + $0xc40] sm:$0xf]  ;;  %v6524_v48 = vor.u32 %v7845_v41, %v6523_v39  ;;  %3784 = vmatpush.bf16.msrb.mxu0 %v6268_v47  ;;  %v497_v39 = vperm.slane %v8420_v4, 5  ;;  %v508_v41 = vperm.slane %v492_v28, 1  ;;  %v583_v47 = vperm.slane %v8416_v59, 7 }
  0xa5   :  { %v7909_v43 = vld [vmem:[#allocation6 + $0xc5c] sm:$0xf0] }
  0xa6   :  { %v7035_v45 = vld [vmem:[#allocation6 + $0xe40] sm:$0xf]  ;;  %v6780_v51 = vor.u32 %v7909_v43, %v6779_v42  ;;  %3797 = vmatpush.bf16.msrb.mxu1 %v6524_v48  ;;  %v509_v42 = vperm.slane %v493_v29, 1  ;;  %v580_v43 = vperm.slane %v8414_v44, 3  ;;  %v584_v48 = vperm.slane %v8418_v60, 3 }
  0xa7   :  { %v7973_v46 = vld [vmem:[#allocation6 + $0xe5c] sm:$0xf0] }
  0xa8   :  { %v6235_v49 = vld [vmem:[#allocation6 + $0x800] sm:$0xf]  ;;  %v7036_v52 = vor.u32 %v7973_v46, %v7035_v45  ;;  %3810 = vmatpush.bf16.msrb.mxu2 %v6780_v51  ;;  %v581_v45 = vperm.slane %v8414_v44, 7  ;;  %v582_v46 = vperm.slane %v8416_v59, 3  ;;  %v511_v59 = vperm.slane %v495_v37, 1 }
  0xa9   :  { %v7773_v63 = vld [vmem:[#allocation6 + $0x81c] sm:$0xf0]  ;;  %v8522_v37 = vld [vmem:[#allocation6 + $0x1e0] sm:$0xf0] }
  0xaa   :  { %v6491_v50 = vld [vmem:[#allocation6 + $0xa00] sm:$0xf]  ;;  %v6236_v58 = vor.u32 %v7773_v63, %v6235_v49  ;;  %3823 = vmatpush.bf16.msrb.mxu3 %v7036_v52  ;;  %v585_v49 = vperm.slane %v8418_v60, 7  ;;  %v586_v63 = vperm.slane %v8420_v4, 3 }
  0xab   :  { %v7837_v53 = vld [vmem:[#allocation6 + $0xa1c] sm:$0xf0] }
  0xac   :  { %v6747_v54 = vld [vmem:[#allocation6 + $0xc00] sm:$0xf]  ;;  %v6492_v61 = vor.u32 %v7837_v53, %v6491_v50  ;;  %3785 = vmatpush.bf16.msrb.mxu0 %v6236_v58  ;;  %v587_v50 = vperm.slane %v8420_v4, 7  ;;  %v599_v58 = vperm.slane %v583_v47, 3  ;;  %v8512_v4 = vperm.slane %v585_v49, 3 }
  0xad   :  { %v7901_v55 = vld [vmem:[#allocation6 + $0xc1c] sm:$0xf0] }
  0xae   :  { %v7003_v62 = vld [vmem:[#allocation6 + $0xe00] sm:$0xf]  ;;  %v6748_v7 = vor.u32 %v7901_v55, %v6747_v54  ;;  %3798 = vmatpush.bf16.msrb.mxu1 %v6492_v61  ;;  %v512_v54 = vperm.slane %v496_v38, 1  ;;  %v513_v55 = vperm.slane %v497_v39, 1  ;;  %v8510_v61 = vperm.slane %v584_v48, 3 }
  0xaf   :  { %v7965_v5 = vld [vmem:[#allocation6 + $0xe1c] sm:$0xf0]  ;;  %v8524_v38 = vld [vmem:[#allocation6 + $0x3c4] sm:$0xf] }
  0xb0   :  { %v7004_v8 = vor.u32 %v7965_v5, %v7003_v62  ;;  %3811 = vmatpush.bf16.msrb.mxu2 %v6748_v7  ;;  %v8516_v62 = vperm.slane %v587_v50, 3  ;;  %v8526_v39 = vld [vmem:[#allocation6 + $0x3e0] sm:$0xf0] }
  0xb1   :  { %v533_v17 = vpop.permute.xlu1 %532  ;;  %v5696_v47 = vor.u32 %v8524_v38, %v8526_v39 }
  0xb2   :  { %v8456_v19 = vmul.f32 %v551_v34, %v533_v17  ;;  %v8458_v9 = vmul.f32 %v552_v11, %v533_v17  ;;  %v8460_v20 = vmul.f32 %v553_v35, %v533_v17  ;;  %v8462_v2 = vmul.f32 %v554_v36, %v533_v17  ;;  %3824 = vmatpush.bf16.msrb.mxu3 %v7004_v8 }
  0xb3   :  { %v8464_v16 = vmul.f32 %v555_v23, %v533_v17  ;;  %v8472_v13 = vmul.f32 %v556_v40, %v533_v17  ;;  %v8474_v21 = vmul.f32 %v557_v56, %v533_v17  ;;  %v8476_v25 = vmul.f32 %v558_v57, %v533_v17 }
  0xb4   :  { %v312_v34 = vperm.slane %v8466_v24, 6  ;;  %v313_v11 = vperm.slane %v8466_v24, 7  ;;  %v494_v36 = vperm.slane %v8418_v60, 1  ;;  %v506_v23 = vperm.slane %v490_v1, 1  ;;  %v8520_v1 = vld [vmem:[#allocation6 + $0x1c4] sm:$0xf] }
  0xb5   :  { %v507_v40 = vperm.slane %v491_v26, 1  ;;  %v596_v56 = vperm.slane %v580_v43, 3  ;;  %v597_v60 = vperm.slane %v581_v45, 3  ;;  %v598_v57 = vperm.slane %v582_v46, 3  ;;  %v7689_v24 = vld [vmem:[#allocation6 + $0x584] sm:$0xf] }
  0xb6   :  { %v510_v53 = vperm.slane %v494_v36, 1  ;;  %v5440_v46 = vor.u32 %v8520_v1, %v8522_v37  ;;  %v7561_v1 = vld [vmem:[#allocation6 + $0x184] sm:$0xf] }
  0xe8   :  { %v8490_v35 = vpop.permute.xlu0 %266 }
  0xe9   :  { %v297_v17 = vmul.f32 %v8434_v27, %v8490_v35  ;;  %v298_v51 = vmul.f32 %v8438_v31, %v8490_v35  ;;  %v299_v44 = vmul.f32 %v291_v3, %v8490_v35  ;;  %v300_v52 = vmul.f32 %v292_v6, %v8490_v35  ;;  %v8518_v31 = vpop.permute.xlu1 %577 }
  0xea   :  { %v8514_v27 = vperm.slane %v586_v63, 3  ;;  %v604_v43 = vmul.f32 %v596_v56, %v8518_v31  ;;  %v608_v39 = vmul.f32 %v8510_v61, %v8518_v31 }
  0xeb   :  { %v322_v5 = vadd.f32 %v306_v22, %v297_v17  ;;  %v323_v3 = vadd.f32 %v307_v30, %v298_v51  ;;  %v324_v6 = vadd.f32 %v308_v0, %v299_v44  ;;  %v325_v7 = vadd.f32 %v309_v32, %v300_v52 }
  0xec   :  { %v605_v22 = vmul.f32 %v597_v60, %v8518_v31  ;;  %v606_v30 = vmul.f32 %v598_v57, %v8518_v31  ;;  %v607_v0 = vmul.f32 %v599_v58, %v8518_v31  ;;  %v7697_v57 = vld [vmem:[#allocation6 + $0x5c4] sm:$0xf] }
  0xed   :  { %v5949_v58 = vld [vmem:[#allocation6 + $0x5e0] sm:$0xf0] }
  0xf0   :  { %v488_v8 = vpop.permute.xlu0 %487 }
  0xf1   :  { %v514_v26 = vmul.f32 %v506_v23, %v488_v8  ;;  %v515_v28 = vmul.f32 %v507_v40, %v488_v8  ;;  %v516_v29 = vmul.f32 %v508_v41, %v488_v8  ;;  %v517_v36 = vmul.f32 %v509_v42, %v488_v8 }
  0xf2   :  { %v301_v41 = vmul.f32 %v8448_v14, %v8490_v35  ;;  %v302_v42 = vmul.f32 %v8452_v15, %v8490_v35  ;;  %v303_v14 = vmul.f32 %v8454_v18, %v8490_v35  ;;  %v304_v15 = vmul.f32 %v8470_v12, %v8490_v35  ;;  %v7761_v18 = vld [vmem:[#allocation6 + $0x7c4] sm:$0xf] }
  0xf3   :  { %v522_v32 = vadd.f32 %v514_v26, %v322_v5  ;;  %v523_v45 = vadd.f32 %v515_v28, %v323_v3  ;;  %v524_v23 = vadd.f32 %v516_v29, %v324_v6  ;;  %v525_v40 = vadd.f32 %v517_v36, %v325_v7  ;;  %v5405_v26 = vld [vmem:[#allocation6 + $0x1a0] sm:$0xf0] }
  0xf4   :  { %v518_v17 = vmul.f32 %v510_v53, %v488_v8  ;;  %v519_v51 = vmul.f32 %v511_v59, %v488_v8  ;;  %v6205_v53 = vld [vmem:[#allocation6 + $0x7e0] sm:$0xf0]  ;;  %v328_v59 = vadd.f32 %v312_v34, %v303_v14  ;;  %v329_v6 = vadd.f32 %v313_v11, %v304_v15 }
  0xf5   :  { %v567_v48 = vadd.f32 %v8456_v19, %v522_v32  ;;  %v568_v49 = vadd.f32 %v8458_v9, %v523_v45  ;;  %v569_v63 = vadd.f32 %v8460_v20, %v524_v23  ;;  %v570_v50 = vadd.f32 %v8462_v2, %v525_v40  ;;  %v7625_v28 = vld [vmem:[#allocation6 + $0x384] sm:$0xf] }
  0xf6   :  { %v326_v19 = vadd.f32 %v310_v33, %v301_v41  ;;  %v327_v9 = vadd.f32 %v311_v10, %v302_v42  ;;  %v520_v20 = vmul.f32 %v512_v54, %v488_v8  ;;  %v521_v2 = vmul.f32 %v513_v55, %v488_v8  ;;  %v5661_v29 = vld [vmem:[#allocation6 + $0x3a0] sm:$0xf0] }
  0xf7   :  { %v612_v44 = vadd.f32 %v604_v43, %v567_v48  ;;  %v613_v52 = vadd.f32 %v605_v22, %v568_v49  ;;  %v614_v56 = vadd.f32 %v606_v30, %v569_v63  ;;  %v615_v60 = vadd.f32 %v607_v0, %v570_v50  ;;  %v5917_v11 = vld [vmem:[#allocation6 + $0x5a0] sm:$0xf0] }
  0xf8   :  { %v526_v33 = vadd.f32 %v518_v17, %v326_v19  ;;  %v527_v7 = vadd.f32 %v519_v51, %v327_v9  ;;  %v528_v36 = vadd.f32 %v520_v20, %v328_v59  ;;  %v529_v37 = vadd.f32 %v521_v2, %v329_v6  ;;  %v7753_v30 = vld [vmem:[#allocation6 + $0x784] sm:$0xf] }
  0xf9   :  { %v620_v5 = vmax.f32 %v612_v44, 0.0  ;;  %v621_v3 = vmax.f32 %v613_v52, 0.0  ;;  %v622_v12 = vmax.f32 %v614_v56, 0.0  ;;  %v623_v35 = vmax.f32 %v615_v60, 0.0  ;;  %v6173_v0 = vld [vmem:[#allocation6 + $0x7a0] sm:$0xf0] }
  0xfa   :  { %v5952_v34 = vor.u32 %v7697_v57, %v5949_v58  ;;  %v6208_v38 = vor.u32 %v7761_v18, %v6205_v53  ;;  %v609_v43 = vmul.f32 %v8512_v4, %v8518_v31  ;;  %v610_v22 = vmul.f32 %v8514_v27, %v8518_v31  ;;  %v7553_v23 = vld [vmem:[#allocation6 + $0x144] sm:$0xf] }
  0xfb   :  { %v8556_v10 = vpack.c.bf16 %v620_v5, %v620_v5  ;;  %v8558_v54 = vpack.c.bf16 %v621_v3, %v621_v3  ;;  %v8560_v55 = vpack.c.bf16 %v622_v12, %v622_v12  ;;  %v8562_v8 = vpack.c.bf16 %v623_v35, %v623_v35  ;;  %v5373_v41 = vld [vmem:[#allocation6 + $0x160] sm:$0xf0] }
  0xfc   :  { %v611_v32 = vmul.f32 %v8516_v62, %v8518_v31  ;;  %v5408_v61 = vor.u32 %v7561_v1, %v5405_v26  ;;  %v5664_v45 = vor.u32 %v7625_v28, %v5661_v29  ;;  %v571_v4 = vadd.f32 %v8464_v16, %v526_v33  ;;  %v7617_v42 = vld [vmem:[#allocation6 + $0x344] sm:$0xf] }
  0xfd   :  { %3734 = vmatmul.bf16.vlgmr.msra.gmra.mxu0 %v8556_v10  ;;  %3747 = vmatmul.bf16.vlgmr.msra.gmra.mxu1 %v8558_v54  ;;  %v572_v27 = vadd.f32 %v8472_v13, %v527_v7  ;;  %v5920_v40 = vor.u32 %v7689_v24, %v5917_v11  ;;  %v5629_v48 = vld [vmem:[#allocation6 + $0x360] sm:$0xf0]  ;;  %v573_v49 = vadd.f32 %v8474_v21, %v528_v36 }
  0xfe   :  { %3760 = vmatmul.bf16.vlgmr.msra.gmra.mxu2 %v8560_v55  ;;  %3773 = vmatmul.bf16.vlgmr.msra.gmra.mxu3 %v8562_v8  ;;  %v574_v62 = vadd.f32 %v8476_v25, %v529_v37  ;;  %v6176_v31 = vor.u32 %v7753_v30, %v6173_v0  ;;  %v7681_v63 = vld [vmem:[#allocation6 + $0x544] sm:$0xf]  ;;  %v5376_v16 = vor.u32 %v7553_v23, %v5373_v41 }
  0xff   :  { %3830 = vmatpush.bf16.msra.mxu0 %v5440_v46  ;;  %3843 = vmatpush.bf16.msra.mxu1 %v5696_v47  ;;  %v5885_v50 = vld [vmem:[#allocation6 + $0x560] sm:$0xf0]  ;;  %v5632_v17 = vor.u32 %v7617_v42, %v5629_v48  ;;  %v616_v13 = vadd.f32 %v608_v39, %v571_v4  ;;  %v617_v46 = vadd.f32 %v609_v43, %v572_v27 }
 0x100   :  { %3856 = vmatpush.bf16.msra.mxu2 %v5952_v34  ;;  %3869 = vmatpush.bf16.msra.mxu3 %v6208_v38  ;;  %v7745_v14 = vld [vmem:[#allocation6 + $0x744] sm:$0xf]  ;;  %v5888_v47 = vor.u32 %v7681_v63, %v5885_v50  ;;  %v618_v52 = vadd.f32 %v610_v22, %v573_v49  ;;  %v619_v21 = vadd.f32 %v611_v32, %v574_v62 }
 0x101   :  { %v6141_v15 = vld [vmem:[#allocation6 + $0x760] sm:$0xf0]  ;;  %v624_v18 = vmax.f32 %v616_v13, 0.0  ;;  %v625_v5 = vmax.f32 %v617_v46, 0.0 }
 0x102   :  { %v7545_v51 = vld [vmem:[#allocation6 + $0x104] sm:$0xf]  ;;  %v6144_v25 = vor.u32 %v7745_v14, %v6141_v15  ;;  %v626_v59 = vmax.f32 %v618_v52, 0.0  ;;  %v627_v6 = vmax.f32 %v619_v21, 0.0 }
 0x103   :  { %3831 = vmatpush.bf16.msra.mxu0 %v5408_v61  ;;  %3844 = vmatpush.bf16.msra.mxu1 %v5664_v45  ;;  %v5341_v44 = vld [vmem:[#allocation6 + $0x120] sm:$0xf0]  ;;  %v8580_v34 = vpack.c.bf16 %v624_v18, %v624_v18  ;;  %v8582_v38 = vpack.c.bf16 %v625_v5, %v625_v5 }
 0x104   :  { %3857 = vmatpush.bf16.msra.mxu2 %v5920_v40  ;;  %3870 = vmatpush.bf16.msra.mxu3 %v6176_v31  ;;  %v7609_v56 = vld [vmem:[#allocation6 + $0x304] sm:$0xf]  ;;  %v5344_v3 = vor.u32 %v7545_v51, %v5341_v44  ;;  %v8584_v43 = vpack.c.bf16 %v626_v59, %v626_v59  ;;  %v8586_v22 = vpack.c.bf16 %v627_v6, %v627_v6 }
 0x105   :  { %v5597_v60 = vld [vmem:[#allocation6 + $0x320] sm:$0xf0] }
 0x106   :  { %v7673_v19 = vld [vmem:[#allocation6 + $0x504] sm:$0xf]  ;;  %v5600_v12 = vor.u32 %v7609_v56, %v5597_v60 }
 0x107   :  { %v5853_v9 = vld [vmem:[#allocation6 + $0x520] sm:$0xf0]  ;;  %3832 = vmatpush.bf16.msra.mxu0 %v5376_v16  ;;  %3845 = vmatpush.bf16.msra.mxu1 %v5632_v17 }
 0x108   :  { %v7737_v20 = vld [vmem:[#allocation6 + $0x704] sm:$0xf]  ;;  %3858 = vmatpush.bf16.msra.mxu2 %v5888_v47  ;;  %3871 = vmatpush.bf16.msra.mxu3 %v6144_v25  ;;  %v5856_v33 = vor.u32 %v7673_v19, %v5853_v9 }
 0x109   :  { %v6109_v2 = vld [vmem:[#allocation6 + $0x720] sm:$0xf0] }
 0x10a   :  { %v7537_v57 = vld [vmem:[#allocation6 + $0xc4] sm:$0xf]  ;;  %v6112_v7 = vor.u32 %v7737_v20, %v6109_v2 }
 0x10b   :  { %v5309_v58 = vld [vmem:[#allocation6 + $0xe0] sm:$0xf0]  ;;  %3833 = vmatpush.bf16.msra.mxu0 %v5344_v3  ;;  %3846 = vmatpush.bf16.msra.mxu1 %v5600_v12 }
 0x10c   :  { %v7601_v35 = vld [vmem:[#allocation6 + $0x2c4] sm:$0xf]  ;;  %v5312_v36 = vor.u32 %v7537_v57, %v5309_v58  ;;  %3859 = vmatpush.bf16.msra.mxu2 %v5856_v33  ;;  %3872 = vmatpush.bf16.msra.mxu3 %v6112_v7 }
 0x10d   :  { %v5565_v53 = vld [vmem:[#allocation6 + $0x2e0] sm:$0xf0]  ;;  %3786 = vmatmul.bf16.vlgmr.msrb.gmra.mxu0 %v8580_v34  ;;  %3799 = vmatmul.bf16.vlgmr.msrb.gmra.mxu1 %v8582_v38 }
 0x10e   :  { %v7665_v1 = vld [vmem:[#allocation6 + $0x4c4] sm:$0xf]  ;;  %v5568_v37 = vor.u32 %v7601_v35, %v5565_v53  ;;  %3812 = vmatmul.bf16.vlgmr.msrb.gmra.mxu2 %v8584_v43  ;;  %3825 = vmatmul.bf16.vlgmr.msrb.gmra.mxu3 %v8586_v22 }
 0x10f   :  { %v5821_v26 = vld [vmem:[#allocation6 + $0x4e0] sm:$0xf0]  ;;  %3834 = vmatpush.bf16.msra.mxu0 %v5312_v36 }
 0x110   :  { %v7729_v28 = vld [vmem:[#allocation6 + $0x6c4] sm:$0xf]  ;;  %v5824_v24 = vor.u32 %v7665_v1, %v5821_v26  ;;  %3847 = vmatpush.bf16.msra.mxu1 %v5568_v37 }
 0x111   :  { %v6077_v29 = vld [vmem:[#allocation6 + $0x6e0] sm:$0xf0] }
 0x112   :  { %v7529_v11 = vld [vmem:[#allocation6 + $0x84] sm:$0xf]  ;;  %v6080_v30 = vor.u32 %v7729_v28, %v6077_v29  ;;  %3860 = vmatpush.bf16.msra.mxu2 %v5824_v24 }
 0x113   :  { %v5277_v39 = vld [vmem:[#allocation6 + $0xa0] sm:$0xf0] }
 0x114   :  { %v7593_v0 = vld [vmem:[#allocation6 + $0x284] sm:$0xf]  ;;  %v5280_v27 = vor.u32 %v7529_v11, %v5277_v39  ;;  %3873 = vmatpush.bf16.msra.mxu3 %v6080_v30 }
 0x115   :  { %v5533_v32 = vld [vmem:[#allocation6 + $0x2a0] sm:$0xf0] }
 0x116   :  { %v7657_v61 = vld [vmem:[#allocation6 + $0x484] sm:$0xf]  ;;  %v5536_v40 = vor.u32 %v7593_v0, %v5533_v32  ;;  %3835 = vmatpush.bf16.msra.mxu0 %v5280_v27 }
 0x117   :  { %v5789_v45 = vld [vmem:[#allocation6 + $0x4a0] sm:$0xf0] }
 0x118   :  { %v7721_v23 = vld [vmem:[#allocation6 + $0x684] sm:$0xf]  ;;  %v5792_v48 = vor.u32 %v7657_v61, %v5789_v45  ;;  %3848 = vmatpush.bf16.msra.mxu1 %v5536_v40 }
 0x119   :  { %v6045_v4 = vld [vmem:[#allocation6 + $0x6a0] sm:$0xf0] }
 0x11a   :  { %v7521_v41 = vld [vmem:[#allocation6 + $0x44] sm:$0xf]  ;;  %v6048_v49 = vor.u32 %v7721_v23, %v6045_v4  ;;  %3861 = vmatpush.bf16.msra.mxu2 %v5792_v48 }
 0x11b   :  { %v5245_v42 = vld [vmem:[#allocation6 + $0x60] sm:$0xf0] }
 0x11c   :  { %v7585_v62 = vld [vmem:[#allocation6 + $0x244] sm:$0xf]  ;;  %v5248_v17 = vor.u32 %v7521_v41, %v5245_v42  ;;  %3874 = vmatpush.bf16.msra.mxu3 %v6048_v49 }
 0x11d   :  { %v5501_v31 = vld [vmem:[#allocation6 + $0x260] sm:$0xf0] }
 0x11e   :  { %v7649_v63 = vld [vmem:[#allocation6 + $0x444] sm:$0xf]  ;;  %v5504_v13 = vor.u32 %v7585_v62, %v5501_v31  ;;  %3836 = vmatpush.bf16.msra.mxu0 %v5248_v17 }
 0x11f   :  { %v5757_v50 = vld [vmem:[#allocation6 + $0x460] sm:$0xf0] }
 0x120   :  { %v7713_v14 = vld [vmem:[#allocation6 + $0x644] sm:$0xf]  ;;  %v5760_v44 = vor.u32 %v7649_v63, %v5757_v50  ;;  %3849 = vmatpush.bf16.msra.mxu1 %v5504_v13 }
 0x121   :  { %v6013_v15 = vld [vmem:[#allocation6 + $0x660] sm:$0xf0] }
 0x122   :  { %v7513_v16 = vld [vmem:[#allocation6 + $0x4] sm:$0xf]  ;;  %v6016_v52 = vor.u32 %v7713_v14, %v6013_v15  ;;  %3862 = vmatpush.bf16.msra.mxu2 %v5760_v44 }
 0x123   :  { %v5213_v46 = vld [vmem:[#allocation6 + $0x20] sm:$0xf0] }
 0x124   :  { %v7577_v47 = vld [vmem:[#allocation6 + $0x204] sm:$0xf]  ;;  %v5216_v58 = vor.u32 %v7513_v16, %v5213_v46  ;;  %3875 = vmatpush.bf16.msra.mxu3 %v6016_v52 }
 0x125   :  { %v5469_v51 = vld [vmem:[#allocation6 + $0x220] sm:$0xf0] }
 0x126   :  { %v7641_v21 = vld [vmem:[#allocation6 + $0x404] sm:$0xf]  ;;  %v5472_v18 = vor.u32 %v7577_v47, %v5469_v51  ;;  %3837 = vmatpush.bf16.msra.mxu0 %v5216_v58 }
 0x127   :  { %v5725_v25 = vld [vmem:[#allocation6 + $0x420] sm:$0xf0] }
 0x128   :  { %v7705_v56 = vld [vmem:[#allocation6 + $0x604] sm:$0xf]  ;;  %v5728_v35 = vor.u32 %v7641_v21, %v5725_v25  ;;  %3850 = vmatpush.bf16.msra.mxu1 %v5472_v18 }
 0x129   :  { %v5981_v60 = vld [vmem:[#allocation6 + $0x620] sm:$0xf0]  ;;  %3838 = vmatmul.bf16.vlgmr.msra.gmra.mxu0 %v8556_v10 }
 0x12a   :  { %v7825_v19 = vld [vmem:[#allocation6 + $0x9c4] sm:$0xf]  ;;  %v5984_v53 = vor.u32 %v7705_v56, %v5981_v60  ;;  %3863 = vmatpush.bf16.msra.mxu2 %v5728_v35 }
 0x12b   :  { %v6461_v9 = vld [vmem:[#allocation6 + $0x9e0] sm:$0xf0]  ;;  %3851 = vmatmul.bf16.vlgmr.msra.gmra.mxu1 %v8558_v54 }
 0x12c   :  { %v7889_v20 = vld [vmem:[#allocation6 + $0xbc4] sm:$0xf]  ;;  %v6464_v59 = vor.u32 %v7825_v19, %v6461_v9  ;;  %3876 = vmatpush.bf16.msra.mxu3 %v5984_v53 }
 0x12d   :  { %v6717_v2 = vld [vmem:[#allocation6 + $0xbe0] sm:$0xf0]  ;;  %3864 = vmatmul.bf16.vlgmr.msra.gmra.mxu2 %v8560_v55 }
 0x12e   :  { %v7953_v57 = vld [vmem:[#allocation6 + $0xdc4] sm:$0xf]  ;;  %v6720_v6 = vor.u32 %v7889_v20, %v6717_v2  ;;  %3882 = vmatpush.bf16.msrb.mxu0 %v6464_v59 }
 0x12f   :  { %v6973_v5 = vld [vmem:[#allocation6 + $0xde0] sm:$0xf0]  ;;  %3877 = vmatmul.bf16.vlgmr.msra.gmra.mxu3 %v8562_v8 }
 0x130   :  { %v8017_v3 = vld [vmem:[#allocation6 + $0xfc4] sm:$0xf]  ;;  %v6976_v1 = vor.u32 %v7953_v57, %v6973_v5  ;;  %3895 = vmatpush.bf16.msrb.mxu1 %v6720_v6 }
 0x131   :  { %v7229_v12 = vld [vmem:[#allocation6 + $0xfe0] sm:$0xf0] }
 0x132   :  { %v7817_v33 = vld [vmem:[#allocation6 + $0x984] sm:$0xf]  ;;  %v7232_v26 = vor.u32 %v8017_v3, %v7229_v12  ;;  %3908 = vmatpush.bf16.msrb.mxu2 %v6976_v1 }
 0x133   :  { %v6429_v7 = vld [vmem:[#allocation6 + $0x9a0] sm:$0xf0] }
 0x134   :  { %v7881_v28 = vld [vmem:[#allocation6 + $0xb84] sm:$0xf]  ;;  %v6432_v39 = vor.u32 %v7817_v33, %v6429_v7  ;;  %3921 = vmatpush.bf16.msrb.mxu3 %v7232_v26 }
 0x135   :  { %v6685_v29 = vld [vmem:[#allocation6 + $0xba0] sm:$0xf0] }
 0x136   :  { %v7945_v36 = vld [vmem:[#allocation6 + $0xd84] sm:$0xf]  ;;  %v6688_v30 = vor.u32 %v7881_v28, %v6685_v29  ;;  %3883 = vmatpush.bf16.msrb.mxu0 %v6432_v39 }
 0x137   :  { %v6941_v37 = vld [vmem:[#allocation6 + $0xda0] sm:$0xf0] }
 0x138   :  { %v8009_v24 = vld [vmem:[#allocation6 + $0xf84] sm:$0xf]  ;;  %v6944_v61 = vor.u32 %v7945_v36, %v6941_v37  ;;  %3896 = vmatpush.bf16.msrb.mxu1 %v6688_v30 }
 0x139   :  { %v7197_v11 = vld [vmem:[#allocation6 + $0xfa0] sm:$0xf0] }
 0x13a   :  { %v7809_v0 = vld [vmem:[#allocation6 + $0x944] sm:$0xf]  ;;  %v7200_v45 = vor.u32 %v8009_v24, %v7197_v11  ;;  %3909 = vmatpush.bf16.msrb.mxu2 %v6944_v61 }
 0x13b   :  { %v6397_v32 = vld [vmem:[#allocation6 + $0x960] sm:$0xf0] }
 0x13c   :  { %v7873_v23 = vld [vmem:[#allocation6 + $0xb44] sm:$0xf]  ;;  %v6400_v48 = vor.u32 %v7809_v0, %v6397_v32  ;;  %3922 = vmatpush.bf16.msrb.mxu3 %v7200_v45 }
 0x13d   :  { %v6653_v4 = vld [vmem:[#allocation6 + $0xb60] sm:$0xf0] }
 0x13e   :  { %v7937_v27 = vld [vmem:[#allocation6 + $0xd44] sm:$0xf]  ;;  %v6656_v49 = vor.u32 %v7873_v23, %v6653_v4  ;;  %3884 = vmatpush.bf16.msrb.mxu0 %v6400_v48 }
 0x13f   :  { %v6909_v40 = vld [vmem:[#allocation6 + $0xd60] sm:$0xf0] }
 0x140   :  { %v8001_v41 = vld [vmem:[#allocation6 + $0xf44] sm:$0xf]  ;;  %v6912_v63 = vor.u32 %v7937_v27, %v6909_v40  ;;  %3897 = vmatpush.bf16.msrb.mxu1 %v6656_v49 }
 0x141   :  { %v7165_v42 = vld [vmem:[#allocation6 + $0xf60] sm:$0xf0] }
 0x142   :  { %v7801_v62 = vld [vmem:[#allocation6 + $0x904] sm:$0xf]  ;;  %v7168_v50 = vor.u32 %v8001_v41, %v7165_v42  ;;  %3910 = vmatpush.bf16.msrb.mxu2 %v6912_v63  ;;  %v5443_v63 = vld [vmem:[#allocation6 + $0x1c8] sm:$0xf] }
 0x143   :  { %v6365_v31 = vld [vmem:[#allocation6 + $0x920] sm:$0xf0] }
 0x144   :  { %v7865_v14 = vld [vmem:[#allocation6 + $0xb04] sm:$0xf]  ;;  %v6368_v47 = vor.u32 %v7801_v62, %v6365_v31  ;;  %3923 = vmatpush.bf16.msrb.mxu3 %v7168_v50  ;;  %v7574_v50 = vld [vmem:[#allocation6 + $0x1e4] sm:$0xf0] }
 0x145   :  { %v6621_v15 = vld [vmem:[#allocation6 + $0xb20] sm:$0xf0] }
 0x146   :  { %v7929_v16 = vld [vmem:[#allocation6 + $0xd04] sm:$0xf]  ;;  %v6624_v51 = vor.u32 %v7865_v14, %v6621_v15  ;;  %3885 = vmatpush.bf16.msrb.mxu0 %v6368_v47  ;;  %v5699_v14 = vld [vmem:[#allocation6 + $0x3c8] sm:$0xf] }
 0x147   :  { %v6877_v17 = vld [vmem:[#allocation6 + $0xd20] sm:$0xf0]  ;;  %v7638_v15 = vld [vmem:[#allocation6 + $0x3e4] sm:$0xf0] }
 0x148   :  { %v7993_v13 = vld [vmem:[#allocation6 + $0xf04] sm:$0xf]  ;;  %v6880_v21 = vor.u32 %v7929_v16, %v6877_v17  ;;  %3898 = vmatpush.bf16.msrb.mxu1 %v6624_v51  ;;  %v5955_v16 = vld [vmem:[#allocation6 + $0x5c8] sm:$0xf] }
 0x149   :  { %v7133_v46 = vld [vmem:[#allocation6 + $0xf20] sm:$0xf0]  ;;  %v6211_v47 = vld [vmem:[#allocation6 + $0x7c8] sm:$0xf] }
 0x14a   :  { %v7793_v44 = vld [vmem:[#allocation6 + $0x8c4] sm:$0xf]  ;;  %v7136_v25 = vor.u32 %v7993_v13, %v7133_v46  ;;  %3911 = vmatpush.bf16.msrb.mxu2 %v6880_v21  ;;  %v7702_v46 = vld [vmem:[#allocation6 + $0x5e4] sm:$0xf0]  ;;  %v5444_v21 = vor.u32 %v7574_v50, %v5443_v63 }
 0x14b   :  { %v6333_v52 = vld [vmem:[#allocation6 + $0x8e0] sm:$0xf0]  ;;  %v7766_v51 = vld [vmem:[#allocation6 + $0x7e4] sm:$0xf0] }
 0x14c   :  { %v7857_v56 = vld [vmem:[#allocation6 + $0xac4] sm:$0xf]  ;;  %v6336_v57 = vor.u32 %v7793_v44, %v6333_v52  ;;  %3924 = vmatpush.bf16.msrb.mxu3 %v7136_v25  ;;  %v5700_v25 = vor.u32 %v7638_v15, %v5699_v14  ;;  %v5827_v63 = vld [vmem:[#allocation6 + $0x4c8] sm:$0xf] }
 0x14d   :  { %v6589_v60 = vld [vmem:[#allocation6 + $0xae0] sm:$0xf0]  ;;  %v7670_v50 = vld [vmem:[#allocation6 + $0x4e4] sm:$0xf0] }
 0x14e   :  { %v7921_v19 = vld [vmem:[#allocation6 + $0xcc4] sm:$0xf]  ;;  %v6592_v58 = vor.u32 %v7857_v56, %v6589_v60  ;;  %3886 = vmatpush.bf16.msrb.mxu0 %v6336_v57  ;;  %v5411_v56 = vld [vmem:[#allocation6 + $0x188] sm:$0xf] }
 0x14f   :  { %v6845_v9 = vld [vmem:[#allocation6 + $0xce0] sm:$0xf0]  ;;  %v7566_v60 = vld [vmem:[#allocation6 + $0x1a4] sm:$0xf0] }
 0x150   :  { %v7985_v20 = vld [vmem:[#allocation6 + $0xec4] sm:$0xf]  ;;  %v6848_v3 = vor.u32 %v7921_v19, %v6845_v9  ;;  %3899 = vmatpush.bf16.msrb.mxu1 %v6592_v58  ;;  %v5956_v19 = vor.u32 %v7702_v46, %v5955_v16  ;;  %v6212_v9 = vor.u32 %v7766_v51, %v6211_v47  ;;  %v5923_v57 = vld [vmem:[#allocation6 + $0x588] sm:$0xf]  ;;  %v5828_v47 = vor.u32 %v7670_v50, %v5827_v63 }
 0x151   :  { %v7101_v2 = vld [vmem:[#allocation6 + $0xee0] sm:$0xf0]  ;;  %v7694_v58 = vld [vmem:[#allocation6 + $0x5a4] sm:$0xf0] }
 0x152   :  { %v7785_v18 = vld [vmem:[#allocation6 + $0x884] sm:$0xf]  ;;  %v7104_v12 = vor.u32 %v7985_v20, %v7101_v2  ;;  %3912 = vmatpush.bf16.msrb.mxu2 %v6848_v3  ;;  %v5667_v20 = vld [vmem:[#allocation6 + $0x388] sm:$0xf]  ;;  %v5412_v3 = vor.u32 %v7566_v60, %v5411_v56 }
 0x153   :  { %v6301_v5 = vld [vmem:[#allocation6 + $0x8a0] sm:$0xf0]  ;;  %v7630_v2 = vld [vmem:[#allocation6 + $0x3a4] sm:$0xf0] }
 0x154   :  { %v7849_v35 = vld [vmem:[#allocation6 + $0xa84] sm:$0xf]  ;;  %v6304_v1 = vor.u32 %v7785_v18, %v6301_v5  ;;  %3925 = vmatpush.bf16.msrb.mxu3 %v7104_v12  ;;  %v6179_v18 = vld [vmem:[#allocation6 + $0x788] sm:$0xf]  ;;  %v5668_v12 = vor.u32 %v7630_v2, %v5667_v20 }
 0x155   :  { %v6557_v53 = vld [vmem:[#allocation6 + $0xaa0] sm:$0xf0]  ;;  %v7758_v5 = vld [vmem:[#allocation6 + $0x7a4] sm:$0xf0] }
 0x156   :  { %v7913_v59 = vld [vmem:[#allocation6 + $0xc84] sm:$0xf]  ;;  %v6560_v26 = vor.u32 %v7849_v35, %v6557_v53  ;;  %3887 = vmatpush.bf16.msrb.mxu0 %v6304_v1  ;;  %v5379_v35 = vld [vmem:[#allocation6 + $0x148] sm:$0xf] }
 0x157   :  { %v6813_v6 = vld [vmem:[#allocation6 + $0xca0] sm:$0xf0]  ;;  %v7558_v53 = vld [vmem:[#allocation6 + $0x164] sm:$0xf0] }
 0x158   :  { %v7977_v33 = vld [vmem:[#allocation6 + $0xe84] sm:$0xf]  ;;  %v6816_v36 = vor.u32 %v7913_v59, %v6813_v6  ;;  %3900 = vmatpush.bf16.msrb.mxu1 %v6560_v26  ;;  %v5924_v59 = vor.u32 %v7694_v58, %v5923_v57  ;;  %v6180_v6 = vor.u32 %v7758_v5, %v6179_v18  ;;  %v5891_v1 = vld [vmem:[#allocation6 + $0x548] sm:$0xf] }
 0x159   :  { %v7069_v7 = vld [vmem:[#allocation6 + $0xea0] sm:$0xf0]  ;;  %v7686_v26 = vld [vmem:[#allocation6 + $0x564] sm:$0xf0] }
 0x15a   :  { %v7777_v28 = vld [vmem:[#allocation6 + $0x844] sm:$0xf]  ;;  %v7072_v37 = vor.u32 %v7977_v33, %v7069_v7  ;;  %3913 = vmatpush.bf16.msrb.mxu2 %v6816_v36  ;;  %v5635_v33 = vld [vmem:[#allocation6 + $0x348] sm:$0xf]  ;;  %v5380_v36 = vor.u32 %v7558_v53, %v5379_v35 }
 0x15b   :  { %v6269_v29 = vld [vmem:[#allocation6 + $0x860] sm:$0xf0]  ;;  %v7622_v7 = vld [vmem:[#allocation6 + $0x364] sm:$0xf0] }
 0x15c   :  { %v7841_v24 = vld [vmem:[#allocation6 + $0xa44] sm:$0xf]  ;;  %v6272_v45 = vor.u32 %v7777_v28, %v6269_v29  ;;  %3926 = vmatpush.bf16.msrb.mxu3 %v7072_v37  ;;  %v6147_v28 = vld [vmem:[#allocation6 + $0x748] sm:$0xf]  ;;  %v5636_v37 = vor.u32 %v7622_v7, %v5635_v33 }
 0x15d   :  { %v6525_v11 = vld [vmem:[#allocation6 + $0xa60] sm:$0xf0]  ;;  %v7750_v29 = vld [vmem:[#allocation6 + $0x764] sm:$0xf0] }
 0x15e   :  { %v7905_v39 = vld [vmem:[#allocation6 + $0xc44] sm:$0xf]  ;;  %v6528_v23 = vor.u32 %v7841_v24, %v6525_v11  ;;  %3888 = vmatpush.bf16.msrb.mxu0 %v6272_v45  ;;  %v5347_v24 = vld [vmem:[#allocation6 + $0x108] sm:$0xf] }
 0x15f   :  { %v6781_v30 = vld [vmem:[#allocation6 + $0xc60] sm:$0xf0]  ;;  %v7550_v11 = vld [vmem:[#allocation6 + $0x124] sm:$0xf0] }
 0x160   :  { %v7969_v0 = vld [vmem:[#allocation6 + $0xe44] sm:$0xf]  ;;  %v6784_v41 = vor.u32 %v7905_v39, %v6781_v30  ;;  %3901 = vmatpush.bf16.msrb.mxu1 %v6528_v23  ;;  %v5892_v39 = vor.u32 %v7686_v26, %v5891_v1  ;;  %v6148_v30 = vor.u32 %v7750_v29, %v6147_v28  ;;  %v7678_v45 = vld [vmem:[#allocation6 + $0x524] sm:$0xf0] }
 0x161   :  { %v7037_v32 = vld [vmem:[#allocation6 + $0xe60] sm:$0xf0]  ;;  %v6115_v23 = vld [vmem:[#allocation6 + $0x708] sm:$0xf] }
 0x162   :  { %v7769_v61 = vld [vmem:[#allocation6 + $0x804] sm:$0xf]  ;;  %v7040_v42 = vor.u32 %v7969_v0, %v7037_v32  ;;  %3914 = vmatpush.bf16.msrb.mxu2 %v6784_v41  ;;  %v5603_v0 = vld [vmem:[#allocation6 + $0x308] sm:$0xf] }
 0x163   :  { %v6237_v4 = vld [vmem:[#allocation6 + $0x820] sm:$0xf0]  ;;  %v7614_v32 = vld [vmem:[#allocation6 + $0x324] sm:$0xf0] }
 0x164   :  { %v7833_v27 = vld [vmem:[#allocation6 + $0xa04] sm:$0xf]  ;;  %v6240_v17 = vor.u32 %v7769_v61, %v6237_v4  ;;  %3927 = vmatpush.bf16.msrb.mxu3 %v7040_v42  ;;  %v5859_v61 = vld [vmem:[#allocation6 + $0x508] sm:$0xf] }
 0x165   :  { %v6493_v40 = vld [vmem:[#allocation6 + $0xa20] sm:$0xf0]  ;;  %v7742_v4 = vld [vmem:[#allocation6 + $0x724] sm:$0xf0] }
 0x166   :  { %v7897_v48 = vld [vmem:[#allocation6 + $0xc04] sm:$0xf]  ;;  %v6496_v13 = vor.u32 %v7833_v27, %v6493_v40  ;;  %3889 = vmatpush.bf16.msrb.mxu0 %v6240_v17  ;;  %v5348_v27 = vor.u32 %v7550_v11, %v5347_v24  ;;  %v5604_v40 = vor.u32 %v7614_v32, %v5603_v0  ;;  %v5315_v41 = vld [vmem:[#allocation6 + $0xc8] sm:$0xf] }
 0x167   :  { %v6749_v49 = vld [vmem:[#allocation6 + $0xc20] sm:$0xf0]  ;;  %v7542_v42 = vld [vmem:[#allocation6 + $0xe4] sm:$0xf0] }
 0x168   :  { %v7961_v62 = vld [vmem:[#allocation6 + $0xe04] sm:$0xf]  ;;  %v6752_v44 = vor.u32 %v7897_v48, %v6749_v49  ;;  %3902 = vmatpush.bf16.msrb.mxu1 %v6496_v13  ;;  %v5860_v48 = vor.u32 %v7678_v45, %v5859_v61  ;;  %v6116_v49 = vor.u32 %v7742_v4, %v6115_v23  ;;  %v6083_v14 = vld [vmem:[#allocation6 + $0x6c8] sm:$0xf]  ;;  %v5316_v16 = vor.u32 %v7542_v42, %v5315_v41 }
 0x169   :  { %v7005_v31 = vld [vmem:[#allocation6 + $0xe20] sm:$0xf0]  ;;  %3890 = vmatmul.bf16.vlgmr.msrb.gmra.mxu0 %v8580_v34  ;;  %v7734_v15 = vld [vmem:[#allocation6 + $0x6e4] sm:$0xf0] }
 0x16a   :  { %v7008_v52 = vor.u32 %v7961_v62, %v7005_v31  ;;  %3915 = vmatpush.bf16.msrb.mxu2 %v6752_v44  ;;  %3934 = vmatpush.bf16.msra.mxu0 %v5444_v21  ;;  %v5571_v62 = vld [vmem:[#allocation6 + $0x2c8] sm:$0xf]  ;;  %v6084_v51 = vor.u32 %v7734_v15, %v6083_v14 }
 0x16b   :  { %3903 = vmatmul.bf16.vlgmr.msrb.gmra.mxu1 %v8582_v38  ;;  %v7606_v31 = vld [vmem:[#allocation6 + $0x2e4] sm:$0xf0] }
 0x16c   :  { %3928 = vmatpush.bf16.msrb.mxu3 %v7008_v52  ;;  %3947 = vmatpush.bf16.msra.mxu1 %v5700_v25  ;;  %v5572_v17 = vor.u32 %v7606_v31, %v5571_v62  ;;  %v5283_v13 = vld [vmem:[#allocation6 + $0x88] sm:$0xf] }
 0x16d   :  { %3916 = vmatmul.bf16.vlgmr.msrb.gmra.mxu2 %v8584_v43  ;;  %v7534_v46 = vld [vmem:[#allocation6 + $0xa4] sm:$0xf0] }
 0x16e   :  { %3960 = vmatpush.bf16.msra.mxu2 %v5956_v19  ;;  %3935 = vmatpush.bf16.msra.mxu0 %v5412_v3  ;;  %v5539_v44 = vld [vmem:[#allocation6 + $0x288] sm:$0xf]  ;;  %v5284_v19 = vor.u32 %v7534_v46, %v5283_v13 }
 0x16f   :  { %3929 = vmatmul.bf16.vlgmr.msrb.gmra.mxu3 %v8586_v22  ;;  %v7598_v52 = vld [vmem:[#allocation6 + $0x2a4] sm:$0xf0] }
 0x170   :  { %3973 = vmatpush.bf16.msra.mxu3 %v6212_v9  ;;  %3948 = vmatpush.bf16.msra.mxu1 %v5668_v12  ;;  %v5795_v21 = vld [vmem:[#allocation6 + $0x488] sm:$0xf]  ;;  %v5540_v9 = vor.u32 %v7598_v52, %v5539_v44 }
 0x171   :  { %v7662_v25 = vld [vmem:[#allocation6 + $0x4a4] sm:$0xf0] }
 0x172   :  { %3961 = vmatpush.bf16.msra.mxu2 %v5924_v59  ;;  %3936 = vmatpush.bf16.msra.mxu0 %v5380_v36  ;;  %v6051_v56 = vld [vmem:[#allocation6 + $0x688] sm:$0xf]  ;;  %v5796_v57 = vor.u32 %v7662_v25, %v5795_v21 }
 0x173   :  { %v7726_v60 = vld [vmem:[#allocation6 + $0x6a4] sm:$0xf0] }
 0x174   :  { %3974 = vmatpush.bf16.msra.mxu3 %v6180_v6  ;;  %3949 = vmatpush.bf16.msra.mxu1 %v5636_v37  ;;  %v5251_v20 = vld [vmem:[#allocation6 + $0x48] sm:$0xf]  ;;  %v6052_v58 = vor.u32 %v7726_v60, %v6051_v56 }
 0x175   :  { %v7526_v2 = vld [vmem:[#allocation6 + $0x64] sm:$0xf0] }
 0x176   :  { %3962 = vmatpush.bf16.msra.mxu2 %v5892_v39  ;;  %3937 = vmatpush.bf16.msra.mxu0 %v5348_v27  ;;  %v5507_v18 = vld [vmem:[#allocation6 + $0x248] sm:$0xf]  ;;  %v5252_v6 = vor.u32 %v7526_v2, %v5251_v20 }
 0x177   :  { %v7590_v5 = vld [vmem:[#allocation6 + $0x264] sm:$0xf0] }
 0x178   :  { %3975 = vmatpush.bf16.msra.mxu3 %v6148_v30  ;;  %3950 = vmatpush.bf16.msra.mxu1 %v5604_v40  ;;  %v5763_v3 = vld [vmem:[#allocation6 + $0x448] sm:$0xf]  ;;  %v5508_v33 = vor.u32 %v7590_v5, %v5507_v18 }
 0x179   :  { %v7654_v12 = vld [vmem:[#allocation6 + $0x464] sm:$0xf0] }
 0x17a   :  { %3963 = vmatpush.bf16.msra.mxu2 %v5860_v48  ;;  %3938 = vmatpush.bf16.msra.mxu0 %v5316_v16  ;;  %v6019_v35 = vld [vmem:[#allocation6 + $0x648] sm:$0xf]  ;;  %v5764_v28 = vor.u32 %v7654_v12, %v5763_v3 }
 0x17b   :  { %v7718_v53 = vld [vmem:[#allocation6 + $0x664] sm:$0xf0] }
 0x17c   :  { %3976 = vmatpush.bf16.msra.mxu3 %v6116_v49  ;;  %3951 = vmatpush.bf16.msra.mxu1 %v5572_v17  ;;  %v5219_v59 = vld [vmem:[#allocation6 + $0x8] sm:$0xf]  ;;  %v6020_v29 = vor.u32 %v7718_v53, %v6019_v35 }
 0x17d   :  { %v7518_v7 = vld [vmem:[#allocation6 + $0x24] sm:$0xf0] }
 0x17e   :  { %3964 = vmatpush.bf16.msra.mxu2 %v5828_v47  ;;  %3939 = vmatpush.bf16.msra.mxu0 %v5284_v19  ;;  %v5475_v1 = vld [vmem:[#allocation6 + $0x208] sm:$0xf]  ;;  %v5220_v45 = vor.u32 %v7518_v7, %v5219_v59 }
 0x17f   :  { %v7582_v26 = vld [vmem:[#allocation6 + $0x224] sm:$0xf0] }
 0x180   :  { %3977 = vmatpush.bf16.msra.mxu3 %v6084_v51  ;;  %3952 = vmatpush.bf16.msra.mxu1 %v5540_v9  ;;  %v5731_v36 = vld [vmem:[#allocation6 + $0x408] sm:$0xf]  ;;  %v5476_v23 = vor.u32 %v7582_v26, %v5475_v1 }
 0x181   :  { %v7646_v37 = vld [vmem:[#allocation6 + $0x424] sm:$0xf0] }
 0x182   :  { %3965 = vmatpush.bf16.msra.mxu2 %v5796_v57  ;;  %v5987_v24 = vld [vmem:[#allocation6 + $0x608] sm:$0xf]  ;;  %3940 = vmatpush.bf16.msra.mxu0 %v5252_v6  ;;  %v5732_v41 = vor.u32 %v7646_v37, %v5731_v36 }
 0x183   :  { %v7710_v11 = vld [vmem:[#allocation6 + $0x624] sm:$0xf0] }
 0x184   :  { %3978 = vmatpush.bf16.msra.mxu3 %v6052_v58  ;;  %v6467_v39 = vld [vmem:[#allocation6 + $0x9c8] sm:$0xf]  ;;  %3953 = vmatpush.bf16.msra.mxu1 %v5508_v33  ;;  %v5988_v42 = vor.u32 %v7710_v11, %v5987_v24 }
 0x185   :  { %v7830_v30 = vld [vmem:[#allocation6 + $0x9e4] sm:$0xf0] }
 0x186   :  { %v6723_v0 = vld [vmem:[#allocation6 + $0xbc8] sm:$0xf]  ;;  %3966 = vmatpush.bf16.msra.mxu2 %v5764_v28  ;;  %v6468_v48 = vor.u32 %v7830_v30, %v6467_v39  ;;  %3941 = vmatpush.bf16.msra.mxu0 %v5220_v45 }
 0x187   :  { %v7894_v32 = vld [vmem:[#allocation6 + $0xbe4] sm:$0xf0] }
 0x188   :  { %v6979_v61 = vld [vmem:[#allocation6 + $0xdc8] sm:$0xf]  ;;  %3979 = vmatpush.bf16.msra.mxu3 %v6020_v29  ;;  %v6724_v49 = vor.u32 %v7894_v32, %v6723_v0  ;;  %3954 = vmatpush.bf16.msra.mxu1 %v5476_v23 }
 0x189   :  { %v7958_v4 = vld [vmem:[#allocation6 + $0xde4] sm:$0xf0]  ;;  %3942 = vmatmul.bf16.vlgmr.msra.gmra.mxu0 %v8556_v10 }
 0x18a   :  { %v7235_v27 = vld [vmem:[#allocation6 + $0xfc8] sm:$0xf]  ;;  %v6980_v63 = vor.u32 %v7958_v4, %v6979_v61  ;;  %3967 = vmatpush.bf16.msra.mxu2 %v5732_v41  ;;  %3986 = vmatpush.bf16.msrb.mxu0 %v6468_v48 }
 0x18b   :  { %v8022_v40 = vld [vmem:[#allocation6 + $0xfe4] sm:$0xf0]  ;;  %3955 = vmatmul.bf16.vlgmr.msra.gmra.mxu1 %v8558_v54 }
 0x18c   :  { %v6435_v62 = vld [vmem:[#allocation6 + $0x988] sm:$0xf]  ;;  %v7236_v50 = vor.u32 %v8022_v40, %v7235_v27  ;;  %3980 = vmatpush.bf16.msra.mxu3 %v5988_v42  ;;  %3999 = vmatpush.bf16.msrb.mxu1 %v6724_v49 }
 0x18d   :  { %v7822_v31 = vld [vmem:[#allocation6 + $0x9a4] sm:$0xf0]  ;;  %3968 = vmatmul.bf16.vlgmr.msra.gmra.mxu2 %v8560_v55 }
 0x18e   :  { %v6691_v14 = vld [vmem:[#allocation6 + $0xb88] sm:$0xf]  ;;  %v6436_v47 = vor.u32 %v7822_v31, %v6435_v62  ;;  %4012 = vmatpush.bf16.msrb.mxu2 %v6980_v63 }
 0x18f   :  { %v7886_v15 = vld [vmem:[#allocation6 + $0xba4] sm:$0xf0]  ;;  %3981 = vmatmul.bf16.vlgmr.msra.gmra.mxu3 %v8562_v8 }
 0x190   :  { %v6947_v16 = vld [vmem:[#allocation6 + $0xd88] sm:$0xf]  ;;  %v6692_v51 = vor.u32 %v7886_v15, %v6691_v14  ;;  %4025 = vmatpush.bf16.msrb.mxu3 %v7236_v50  ;;  %3987 = vmatpush.bf16.msrb.mxu0 %v6436_v47 }
 0x191   :  { %v7950_v17 = vld [vmem:[#allocation6 + $0xda4] sm:$0xf0] }
 0x192   :  { %v7203_v13 = vld [vmem:[#allocation6 + $0xf88] sm:$0xf]  ;;  %v6948_v21 = vor.u32 %v7950_v17, %v6947_v16  ;;  %4000 = vmatpush.bf16.msrb.mxu1 %v6692_v51 }
 0x193   :  { %v8014_v46 = vld [vmem:[#allocation6 + $0xfa4] sm:$0xf0] }
 0x194   :  { %v6403_v44 = vld [vmem:[#allocation6 + $0x948] sm:$0xf]  ;;  %v7204_v25 = vor.u32 %v8014_v46, %v7203_v13  ;;  %4013 = vmatpush.bf16.msrb.mxu2 %v6948_v21 }
 0x195   :  { %v7814_v52 = vld [vmem:[#allocation6 + $0x964] sm:$0xf0] }
 0x196   :  { %v6659_v56 = vld [vmem:[#allocation6 + $0xb48] sm:$0xf]  ;;  %v6404_v57 = vor.u32 %v7814_v52, %v6403_v44  ;;  %4026 = vmatpush.bf16.msrb.mxu3 %v7204_v25 }
 0x197   :  { %v7878_v60 = vld [vmem:[#allocation6 + $0xb64] sm:$0xf0] }
 0x198   :  { %v6915_v19 = vld [vmem:[#allocation6 + $0xd48] sm:$0xf]  ;;  %v6660_v58 = vor.u32 %v7878_v60, %v6659_v56  ;;  %3988 = vmatpush.bf16.msrb.mxu0 %v6404_v57 }
 0x199   :  { %v7942_v9 = vld [vmem:[#allocation6 + $0xd64] sm:$0xf0] }
 0x19a   :  { %v7171_v20 = vld [vmem:[#allocation6 + $0xf48] sm:$0xf]  ;;  %v6916_v3 = vor.u32 %v7942_v9, %v6915_v19  ;;  %4001 = vmatpush.bf16.msrb.mxu1 %v6660_v58 }
 0x19b   :  { %v8006_v2 = vld [vmem:[#allocation6 + $0xf64] sm:$0xf0] }
 0x19c   :  { %v6371_v18 = vld [vmem:[#allocation6 + $0x908] sm:$0xf]  ;;  %v7172_v12 = vor.u32 %v8006_v2, %v7171_v20  ;;  %4014 = vmatpush.bf16.msrb.mxu2 %v6916_v3  ;;  %v7570_v3 = vld [vmem:[#allocation6 + $0x1cc] sm:$0xf] }
 0x19d   :  { %v7806_v5 = vld [vmem:[#allocation6 + $0x924] sm:$0xf0] }
 0x19e   :  { %v6627_v35 = vld [vmem:[#allocation6 + $0xb08] sm:$0xf]  ;;  %v6372_v1 = vor.u32 %v7806_v5, %v6371_v18  ;;  %4027 = vmatpush.bf16.msrb.mxu3 %v7172_v12  ;;  %v5445_v12 = vld [vmem:[#allocation6 + $0x1e8] sm:$0xf0] }
 0x19f   :  { %v7870_v53 = vld [vmem:[#allocation6 + $0xb24] sm:$0xf0] }
 0x1a0   :  { %v6883_v59 = vld [vmem:[#allocation6 + $0xd08] sm:$0xf]  ;;  %v6628_v26 = vor.u32 %v7870_v53, %v6627_v35  ;;  %3989 = vmatpush.bf16.msrb.mxu0 %v6372_v1  ;;  %v7634_v35 = vld [vmem:[#allocation6 + $0x3cc] sm:$0xf] }
 0x1a1   :  { %v7934_v6 = vld [vmem:[#allocation6 + $0xd24] sm:$0xf0]  ;;  %v5701_v53 = vld [vmem:[#allocation6 + $0x3e8] sm:$0xf0] }
 0x1a2   :  { %v7139_v33 = vld [vmem:[#allocation6 + $0xf08] sm:$0xf]  ;;  %v6884_v36 = vor.u32 %v7934_v6, %v6883_v59  ;;  %4002 = vmatpush.bf16.msrb.mxu1 %v6628_v26  ;;  %v7698_v59 = vld [vmem:[#allocation6 + $0x5cc] sm:$0xf] }
 0x1a3   :  { %v7998_v7 = vld [vmem:[#allocation6 + $0xf24] sm:$0xf0]  ;;  %v7762_v1 = vld [vmem:[#allocation6 + $0x7cc] sm:$0xf] }
 0x1a4   :  { %v6339_v28 = vld [vmem:[#allocation6 + $0x8c8] sm:$0xf]  ;;  %v7140_v37 = vor.u32 %v7998_v7, %v7139_v33  ;;  %4015 = vmatpush.bf16.msrb.mxu2 %v6884_v36  ;;  %v5957_v7 = vld [vmem:[#allocation6 + $0x5e8] sm:$0xf0]  ;;  %v5448_v36 = vor.u32 %v7570_v3, %v5445_v12 }
 0x1a5   :  { %v7798_v29 = vld [vmem:[#allocation6 + $0x8e4] sm:$0xf0]  ;;  %v6213_v26 = vld [vmem:[#allocation6 + $0x7e8] sm:$0xf0] }
 0x1a6   :  { %v6595_v24 = vld [vmem:[#allocation6 + $0xac8] sm:$0xf]  ;;  %v6340_v61 = vor.u32 %v7798_v29, %v6339_v28  ;;  %4028 = vmatpush.bf16.msrb.mxu3 %v7140_v37  ;;  %v5704_v37 = vor.u32 %v7634_v35, %v5701_v53  ;;  %v7538_v3 = vld [vmem:[#allocation6 + $0xcc] sm:$0xf] }
 0x1a7   :  { %v7862_v11 = vld [vmem:[#allocation6 + $0xae4] sm:$0xf0]  ;;  %v5317_v12 = vld [vmem:[#allocation6 + $0xe8] sm:$0xf0] }
 0x1a8   :  { %v6851_v39 = vld [vmem:[#allocation6 + $0xcc8] sm:$0xf]  ;;  %v6596_v45 = vor.u32 %v7862_v11, %v6595_v24  ;;  %3990 = vmatpush.bf16.msrb.mxu0 %v6340_v61  ;;  %v7562_v24 = vld [vmem:[#allocation6 + $0x18c] sm:$0xf] }
 0x1a9   :  { %v7926_v30 = vld [vmem:[#allocation6 + $0xce4] sm:$0xf0]  ;;  %v5413_v11 = vld [vmem:[#allocation6 + $0x1a8] sm:$0xf0] }
 0x1aa   :  { %v7107_v0 = vld [vmem:[#allocation6 + $0xec8] sm:$0xf]  ;;  %v6852_v27 = vor.u32 %v7926_v30, %v6851_v39  ;;  %4003 = vmatpush.bf16.msrb.mxu1 %v6596_v45  ;;  %v7626_v39 = vld [vmem:[#allocation6 + $0x38c] sm:$0xf]  ;;  %v5960_v30 = vor.u32 %v7698_v59, %v5957_v7  ;;  %v8604_v45 = vld [vmem:[#allocation7] sm:$0xff]  ;;  %v3761_v7 = vpop.f32.mrf.mxu2 }
 0x1ab   :  { %v7990_v32 = vld [vmem:[#allocation6 + $0xee4] sm:$0xf0]  ;;  %v7690_v61 = vld [vmem:[#allocation6 + $0x58c] sm:$0xf] }
 0x1ac   :  { %v6307_v23 = vld [vmem:[#allocation6 + $0x888] sm:$0xf]  ;;  %v7108_v40 = vor.u32 %v7990_v32, %v7107_v0  ;;  %4016 = vmatpush.bf16.msrb.mxu2 %v6852_v27  ;;  %v6216_v0 = vor.u32 %v7762_v1, %v6213_v26  ;;  %v5669_v32 = vld [vmem:[#allocation6 + $0x3a8] sm:$0xf0]  ;;  %v3774_v1 = vpop.f32.mrf.mxu3 }
 0x1ad   :  { %v7790_v4 = vld [vmem:[#allocation6 + $0x8a4] sm:$0xf0]  ;;  %v6181_v27 = vld [vmem:[#allocation6 + $0x7a8] sm:$0xf0] }
 0x1ae   :  { %v6563_v41 = vld [vmem:[#allocation6 + $0xa88] sm:$0xf]  ;;  %v6308_v63 = vor.u32 %v7790_v4, %v6307_v23  ;;  %4029 = vmatpush.bf16.msrb.mxu3 %v7108_v40  ;;  %v5925_v23 = vld [vmem:[#allocation6 + $0x5a8] sm:$0xf0]  ;;  %v5416_v40 = vor.u32 %v7562_v24, %v5413_v11  ;;  %v5320_v11 = vor.u32 %v7538_v3, %v5317_v12 }
 0x1af   :  { %v7854_v42 = vld [vmem:[#allocation6 + $0xaa4] sm:$0xf0]  ;;  %v7754_v4 = vld [vmem:[#allocation6 + $0x78c] sm:$0xf] }
 0x1b0   :  { %v6819_v48 = vld [vmem:[#allocation6 + $0xc88] sm:$0xf]  ;;  %v6564_v50 = vor.u32 %v7854_v42, %v6563_v41  ;;  %3991 = vmatpush.bf16.msrb.mxu0 %v6308_v63  ;;  %v5672_v41 = vor.u32 %v7626_v39, %v5669_v32  ;;  %v7554_v42 = vld [vmem:[#allocation6 + $0x14c] sm:$0xf] }
 0x1b1   :  { %v7918_v49 = vld [vmem:[#allocation6 + $0xca4] sm:$0xf0]  ;;  %v7618_v63 = vld [vmem:[#allocation6 + $0x34c] sm:$0xf] }
 0x1b2   :  { %v7075_v62 = vld [vmem:[#allocation6 + $0xe88] sm:$0xf]  ;;  %v6820_v16 = vor.u32 %v7918_v49, %v6819_v48  ;;  %4004 = vmatpush.bf16.msrb.mxu1 %v6564_v50  ;;  %v5381_v48 = vld [vmem:[#allocation6 + $0x168] sm:$0xf0]  ;;  %v1150_v49 = vperm.slane %v8604_v45, 0 }
 0x1b3   :  { %v7982_v31 = vld [vmem:[#allocation6 + $0xea4] sm:$0xf0]  ;;  %v5637_v50 = vld [vmem:[#allocation6 + $0x368] sm:$0xf0] }
 0x1b4   :  { %v6275_v14 = vld [vmem:[#allocation6 + $0x848] sm:$0xf]  ;;  %v7076_v17 = vor.u32 %v7982_v31, %v7075_v62  ;;  %4017 = vmatpush.bf16.msrb.mxu2 %v6820_v16  ;;  %v5928_v62 = vor.u32 %v7690_v61, %v5925_v23  ;;  %v6184_v31 = vor.u32 %v7754_v4, %v6181_v27  ;;  %v7746_v16 = vld [vmem:[#allocation6 + $0x74c] sm:$0xf] }
 0x1b5   :  { %v7782_v15 = vld [vmem:[#allocation6 + $0x864] sm:$0xf0]  ;;  %v7602_v59 = vld [vmem:[#allocation6 + $0x2cc] sm:$0xf] }
 0x1b6   :  { %v6531_v13 = vld [vmem:[#allocation6 + $0xa48] sm:$0xf]  ;;  %v6276_v25 = vor.u32 %v7782_v15, %v6275_v14  ;;  %4030 = vmatpush.bf16.msrb.mxu3 %v7076_v17  ;;  %v7682_v14 = vld [vmem:[#allocation6 + $0x54c] sm:$0xf] }
 0x1b7   :  { %v7846_v46 = vld [vmem:[#allocation6 + $0xa64] sm:$0xf0]  ;;  %v5893_v15 = vld [vmem:[#allocation6 + $0x568] sm:$0xf0] }
 0x1b8   :  { %v6787_v47 = vld [vmem:[#allocation6 + $0xc48] sm:$0xf]  ;;  %v6532_v56 = vor.u32 %v7846_v46, %v6531_v13  ;;  %3992 = vmatpush.bf16.msrb.mxu0 %v6276_v25  ;;  %v6149_v17 = vld [vmem:[#allocation6 + $0x768] sm:$0xf0]  ;;  %v3735_v13 = vpop.f32.mrf.mxu0  ;;  %v3748_v46 = vpop.f32.mrf.mxu1  ;;  %v5896_v25 = vor.u32 %v7682_v14, %v5893_v15 }
 0x1b9   :  { %v7910_v51 = vld [vmem:[#allocation6 + $0xc64] sm:$0xf0]  ;;  %v5829_v26 = vld [vmem:[#allocation6 + $0x4e8] sm:$0xf0] }
 0x1ba   :  { %v7043_v44 = vld [vmem:[#allocation6 + $0xe48] sm:$0xf]  ;;  %v6788_v20 = vor.u32 %v7910_v51, %v6787_v47  ;;  %4005 = vmatpush.bf16.msrb.mxu1 %v6532_v56  ;;  %v5384_v47 = vor.u32 %v7554_v42, %v5381_v48  ;;  %v5640_v51 = vor.u32 %v7618_v63, %v5637_v50  ;;  %v6152_v56 = vor.u32 %v7746_v16, %v6149_v17  ;;  %v7594_v4 = vld [vmem:[#allocation6 + $0x28c] sm:$0xf] }
 0x1bb   :  { %v7974_v52 = vld [vmem:[#allocation6 + $0xe64] sm:$0xf0]  ;;  %v5541_v27 = vld [vmem:[#allocation6 + $0x2a8] sm:$0xf0] }
 0x1bc   :  { %v6243_v21 = vld [vmem:[#allocation6 + $0x808] sm:$0xf]  ;;  %v7044_v2 = vor.u32 %v7974_v52, %v7043_v44  ;;  %4018 = vmatpush.bf16.msrb.mxu2 %v6788_v20  ;;  %v3736_v44 = vadd.f32 %v3735_v13, %v1150_v49  ;;  %v7546_v52 = vld [vmem:[#allocation6 + $0x10c] sm:$0xf]  ;;  %v3763_v13 = vpop.f32.mrf.mxu2 }
 0x1bd   :  { %v7774_v60 = vld [vmem:[#allocation6 + $0x824] sm:$0xf0]  ;;  %v7722_v42 = vld [vmem:[#allocation6 + $0x68c] sm:$0xf] }
 0x1be   :  { %v6499_v19 = vld [vmem:[#allocation6 + $0xa08] sm:$0xf]  ;;  %v6244_v6 = vor.u32 %v7774_v60, %v6243_v21  ;;  %4031 = vmatpush.bf16.msrb.mxu3 %v7044_v2  ;;  %v5349_v21 = vld [vmem:[#allocation6 + $0x128] sm:$0xf0]  ;;  %v3749_v20 = vadd.f32 %v3748_v46, %v3736_v44  ;;  %v3776_v46 = vpop.f32.mrf.mxu3 }
 0x1bf   :  { %v7838_v9 = vld [vmem:[#allocation6 + $0xa24] sm:$0xf0]  ;;  %v7610_v60 = vld [vmem:[#allocation6 + $0x30c] sm:$0xf] }
 0x1c0   :  { %v6755_v57 = vld [vmem:[#allocation6 + $0xc08] sm:$0xf]  ;;  %v6500_v33 = vor.u32 %v7838_v9, %v6499_v19  ;;  %3993 = vmatpush.bf16.msrb.mxu0 %v6244_v6  ;;  %v5605_v19 = vld [vmem:[#allocation6 + $0x328] sm:$0xf0]  ;;  %v3750_v24 = vpop.f32.mrf.mxu1 }
 0x1c1   :  { %v7902_v58 = vld [vmem:[#allocation6 + $0xc24] sm:$0xf0]  ;;  %v7674_v9 = vld [vmem:[#allocation6 + $0x50c] sm:$0xf] }
 0x1c2   :  { %v7011_v18 = vld [vmem:[#allocation6 + $0xe08] sm:$0xf]  ;;  %v6756_v28 = vor.u32 %v7902_v58, %v6755_v57  ;;  %4006 = vmatpush.bf16.msrb.mxu1 %v6500_v33  ;;  %v5861_v2 = vld [vmem:[#allocation6 + $0x528] sm:$0xf0] }
 0x1c3   :  { %v7966_v5 = vld [vmem:[#allocation6 + $0xe24] sm:$0xf0]  ;;  %3994 = vmatmul.bf16.vlgmr.msrb.gmra.mxu0 %v8580_v34  ;;  %v7738_v57 = vld [vmem:[#allocation6 + $0x70c] sm:$0xf]  ;;  %v5864_v35 = vor.u32 %v7674_v9, %v5861_v2 }
 0x1c4   :  { %v7012_v29 = vor.u32 %v7966_v5, %v7011_v18  ;;  %4019 = vmatpush.bf16.msrb.mxu2 %v6756_v28  ;;  %4038 = vmatpush.bf16.msra.mxu0 %v5448_v36  ;;  %v6117_v58 = vld [vmem:[#allocation6 + $0x728] sm:$0xf0]  ;;  %v5352_v18 = vor.u32 %v7546_v52, %v5349_v21  ;;  %v5608_v5 = vor.u32 %v7610_v60, %v5605_v19 }
 0x1c5   :  { %4007 = vmatmul.bf16.vlgmr.msrb.gmra.mxu1 %v8582_v38  ;;  %v6120_v53 = vor.u32 %v7738_v57, %v6117_v58  ;;  %v5573_v6 = vld [vmem:[#allocation6 + $0x2e8] sm:$0xf0]  ;;  %v3762_v36 = vadd.f32 %v3761_v7, %v3749_v20 }
 0x1c6   :  { %4032 = vmatpush.bf16.msrb.mxu3 %v7012_v29  ;;  %4051 = vmatpush.bf16.msra.mxu1 %v5704_v37  ;;  %v7666_v33 = vld [vmem:[#allocation6 + $0x4cc] sm:$0xf]  ;;  %v3737_v37 = vpop.f32.mrf.mxu0  ;;  %v5576_v39 = vor.u32 %v7602_v59, %v5573_v6 }
 0x1c7   :  { %4020 = vmatmul.bf16.vlgmr.msrb.gmra.mxu2 %v8584_v43  ;;  %v7730_v28 = vld [vmem:[#allocation6 + $0x6cc] sm:$0xf]  ;;  %v3775_v32 = vadd.f32 %v3774_v1, %v3762_v36  ;;  %v5832_v61 = vor.u32 %v7666_v33, %v5829_v26 }
 0x1c8   :  { %4064 = vmatpush.bf16.msra.mxu2 %v5960_v30  ;;  %4039 = vmatpush.bf16.msra.mxu0 %v5416_v40  ;;  %v6085_v29 = vld [vmem:[#allocation6 + $0x6e8] sm:$0xf0]  ;;  %v3800_v21 = vpop.f32.mrf.mxu1 }
 0x1c9   :  { %4033 = vmatmul.bf16.vlgmr.msrb.gmra.mxu3 %v8586_v22  ;;  %v7530_v30 = vld [vmem:[#allocation6 + $0x8c] sm:$0xf]  ;;  %v6088_v23 = vor.u32 %v7730_v28, %v6085_v29 }
 0x1ca   :  { %4077 = vmatpush.bf16.msra.mxu3 %v6216_v0  ;;  %4052 = vmatpush.bf16.msra.mxu1 %v5672_v41  ;;  %v5285_v0 = vld [vmem:[#allocation6 + $0xa8] sm:$0xf0] }
 0x1cb   :  { %v7658_v40 = vld [vmem:[#allocation6 + $0x48c] sm:$0xf]  ;;  %v5288_v49 = vor.u32 %v7530_v30, %v5285_v0  ;;  %v3813_v30 = vpop.f32.mrf.mxu2  ;;  %v3826_v0 = vpop.f32.mrf.mxu3 }
 0x1cc   :  { %4065 = vmatpush.bf16.msra.mxu2 %v5928_v62  ;;  %4040 = vmatpush.bf16.msra.mxu0 %v5384_v47  ;;  %v5797_v41 = vld [vmem:[#allocation6 + $0x4a8] sm:$0xf0]  ;;  %v5544_v62 = vor.u32 %v7594_v4, %v5541_v27 }
 0x1cd   :  { %v6053_v48 = vld [vmem:[#allocation6 + $0x6a8] sm:$0xf0]  ;;  %v5800_v50 = vor.u32 %v7658_v40, %v5797_v41 }
 0x1ce   :  { %4078 = vmatpush.bf16.msra.mxu3 %v6184_v31  ;;  %4053 = vmatpush.bf16.msra.mxu1 %v5640_v51  ;;  %v7522_v31 = vld [vmem:[#allocation6 + $0x4c] sm:$0xf]  ;;  %v6056_v14 = vor.u32 %v7722_v42, %v6053_v48  ;;  %v3787_v52 = vpop.f32.mrf.mxu0 }
 0x1cf   :  { %v5253_v63 = vld [vmem:[#allocation6 + $0x68] sm:$0xf0]  ;;  %v3788_v19 = vadd.f32 %v3787_v52, %v3775_v32 }
 0x1d0   :  { %4066 = vmatpush.bf16.msra.mxu2 %v5896_v25  ;;  %4041 = vmatpush.bf16.msra.mxu0 %v5352_v18  ;;  %v7586_v15 = vld [vmem:[#allocation6 + $0x24c] sm:$0xf]  ;;  %v3802_v41 = vpop.f32.mrf.mxu1 }
 0x1d1   :  { %v5509_v16 = vld [vmem:[#allocation6 + $0x268] sm:$0xf0]  ;;  %v3801_v12 = vadd.f32 %v3800_v21, %v3788_v19 }
 0x1d2   :  { %4079 = vmatpush.bf16.msra.mxu3 %v6152_v56  ;;  %4054 = vmatpush.bf16.msra.mxu1 %v5608_v5  ;;  %v7650_v17 = vld [vmem:[#allocation6 + $0x44c] sm:$0xf]  ;;  %v5256_v56 = vor.u32 %v7522_v31, %v5253_v63  ;;  %v5512_v60 = vor.u32 %v7586_v15, %v5509_v16 }
 0x1d3   :  { %v5765_v47 = vld [vmem:[#allocation6 + $0x468] sm:$0xf0]  ;;  %v3814_v27 = vadd.f32 %v3813_v30, %v3801_v12  ;;  %v3815_v19 = vpop.f32.mrf.mxu2 }
 0x1d4   :  { %4067 = vmatpush.bf16.msra.mxu2 %v5864_v35  ;;  %4042 = vmatpush.bf16.msra.mxu0 %v5320_v11  ;;  %v7714_v51 = vld [vmem:[#allocation6 + $0x64c] sm:$0xf]  ;;  %v5768_v57 = vor.u32 %v7650_v17, %v5765_v47 }
 0x1d5   :  { %v6021_v44 = vld [vmem:[#allocation6 + $0x668] sm:$0xf0] }
 0x1d6   :  { %4080 = vmatpush.bf16.msra.mxu3 %v6120_v53  ;;  %4055 = vmatpush.bf16.msra.mxu1 %v5576_v39  ;;  %v7514_v25 = vld [vmem:[#allocation6 + $0xc] sm:$0xf]  ;;  %v6024_v58 = vor.u32 %v7714_v51, %v6021_v44  ;;  %v3789_v40 = vpop.f32.mrf.mxu0 }
 0x1d7   :  { %v5221_v9 = vld [vmem:[#allocation6 + $0x28] sm:$0xf0] }
 0x1d8   :  { %4068 = vmatpush.bf16.msra.mxu2 %v5832_v61  ;;  %4043 = vmatpush.bf16.msra.mxu0 %v5288_v49  ;;  %v7578_v20 = vld [vmem:[#allocation6 + $0x20c] sm:$0xf]  ;;  %v5224_v1 = vor.u32 %v7514_v25, %v5221_v9  ;;  %v3828_v9 = vpop.f32.mrf.mxu3 }
 0x1d9   :  { %v5477_v2 = vld [vmem:[#allocation6 + $0x228] sm:$0xf0] }
 0x1da   :  { %4081 = vmatpush.bf16.msra.mxu3 %v6088_v23  ;;  %4056 = vmatpush.bf16.msra.mxu1 %v5544_v62  ;;  %v7642_v18 = vld [vmem:[#allocation6 + $0x40c] sm:$0xf]  ;;  %v5480_v26 = vor.u32 %v7578_v20, %v5477_v2  ;;  %v1151_v20 = vperm.slane %v8604_v45, 1 }
 0x1db   :  { %v5733_v5 = vld [vmem:[#allocation6 + $0x428] sm:$0xf0] }
 0x1dc   :  { %4069 = vmatpush.bf16.msra.mxu2 %v5800_v50  ;;  %v7706_v3 = vld [vmem:[#allocation6 + $0x60c] sm:$0xf]  ;;  %4044 = vmatpush.bf16.msra.mxu0 %v5256_v56  ;;  %v5736_v37 = vor.u32 %v7642_v18, %v5733_v5  ;;  %v8611_v50 = vadd.f32 %v3826_v0, %v3814_v27 }
 0x1dd   :  { %v5989_v35 = vld [vmem:[#allocation6 + $0x628] sm:$0xf0] }
 0x1de   :  { %4082 = vmatpush.bf16.msra.mxu3 %v6056_v14  ;;  %v7826_v53 = vld [vmem:[#allocation6 + $0x9cc] sm:$0xf]  ;;  %4057 = vmatpush.bf16.msra.mxu1 %v5512_v60  ;;  %v5992_v24 = vor.u32 %v7706_v3, %v5989_v35 }
 0x1df   :  { %v6469_v59 = vld [vmem:[#allocation6 + $0x9e8] sm:$0xf0] }
 0x1e0   :  { %v7890_v6 = vld [vmem:[#allocation6 + $0xbcc] sm:$0xf]  ;;  %4070 = vmatpush.bf16.msra.mxu2 %v5768_v57  ;;  %v6472_v11 = vor.u32 %v7826_v53, %v6469_v59  ;;  %4045 = vmatpush.bf16.msra.mxu0 %v5224_v1 }
 0x1e1   :  { %v6725_v33 = vld [vmem:[#allocation6 + $0xbe8] sm:$0xf0] }
 0x1e2   :  { %v7954_v7 = vld [vmem:[#allocation6 + $0xdcc] sm:$0xf]  ;;  %4083 = vmatpush.bf16.msra.mxu3 %v6024_v58  ;;  %v6728_v39 = vor.u32 %v7890_v6, %v6725_v33  ;;  %4058 = vmatpush.bf16.msra.mxu1 %v5480_v26  ;;  %v3839_v6 = vpop.f32.mrf.mxu0  ;;  %v3852_v33 = vpop.f32.mrf.mxu1 }
 0x1e3   :  { %v6981_v28 = vld [vmem:[#allocation6 + $0xde8] sm:$0xf0]  ;;  %4046 = vmatmul.bf16.vlgmr.msra.gmra.mxu0 %v8556_v10 }
 0x1e4   :  { %v8018_v29 = vld [vmem:[#allocation6 + $0xfcc] sm:$0xf]  ;;  %v6984_v23 = vor.u32 %v7954_v7, %v6981_v28  ;;  %4071 = vmatpush.bf16.msra.mxu2 %v5736_v37  ;;  %4090 = vmatpush.bf16.msrb.mxu0 %v6472_v11  ;;  %v3840_v7 = vadd.f32 %v3839_v6, %v1151_v20 }
 0x1e5   :  { %v7237_v36 = vld [vmem:[#allocation6 + $0xfe8] sm:$0xf0]  ;;  %4059 = vmatmul.bf16.vlgmr.msra.gmra.mxu1 %v8558_v54 }
 0x1e6   :  { %v7818_v32 = vld [vmem:[#allocation6 + $0x98c] sm:$0xf]  ;;  %v7240_v4 = vor.u32 %v8018_v29, %v7237_v36  ;;  %4084 = vmatpush.bf16.msra.mxu3 %v5992_v24  ;;  %4103 = vmatpush.bf16.msrb.mxu1 %v6728_v39  ;;  %v3853_v30 = vadd.f32 %v3852_v33, %v3840_v7 }
 0x1e7   :  { %v6437_v61 = vld [vmem:[#allocation6 + $0x9a8] sm:$0xf0]  ;;  %4072 = vmatmul.bf16.vlgmr.msra.gmra.mxu2 %v8560_v55 }
 0x1e8   :  { %v7882_v42 = vld [vmem:[#allocation6 + $0xb8c] sm:$0xf]  ;;  %v6440_v14 = vor.u32 %v7818_v32, %v6437_v61  ;;  %4116 = vmatpush.bf16.msrb.mxu2 %v6984_v23 }
 0x1e9   :  { %v6693_v48 = vld [vmem:[#allocation6 + $0xba8] sm:$0xf0]  ;;  %4085 = vmatmul.bf16.vlgmr.msra.gmra.mxu3 %v8562_v8 }
 0x1ea   :  { %v7946_v49 = vld [vmem:[#allocation6 + $0xd8c] sm:$0xf]  ;;  %v6696_v15 = vor.u32 %v7882_v42, %v6693_v48  ;;  %4129 = vmatpush.bf16.msrb.mxu3 %v7240_v4  ;;  %4091 = vmatpush.bf16.msrb.mxu0 %v6440_v14 }
 0x1eb   :  { %v6949_v62 = vld [vmem:[#allocation6 + $0xda8] sm:$0xf0] }
 0x1ec   :  { %v8010_v31 = vld [vmem:[#allocation6 + $0xf8c] sm:$0xf]  ;;  %v6952_v13 = vor.u32 %v7946_v49, %v6949_v62  ;;  %4104 = vmatpush.bf16.msrb.mxu1 %v6696_v15 }
 0x1ed   :  { %v7205_v63 = vld [vmem:[#allocation6 + $0xfa8] sm:$0xf0] }
 0x1ee   :  { %v7810_v16 = vld [vmem:[#allocation6 + $0x94c] sm:$0xf]  ;;  %v7208_v46 = vor.u32 %v8010_v31, %v7205_v63  ;;  %4117 = vmatpush.bf16.msrb.mxu2 %v6952_v13  ;;  %v3865_v31 = vpop.f32.mrf.mxu2  ;;  %v3878_v63 = vpop.f32.mrf.mxu3 }
 0x1ef   :  { %v6405_v17 = vld [vmem:[#allocation6 + $0x968] sm:$0xf0]  ;;  %v3841_v13 = vpop.f32.mrf.mxu0 }
 0x1f0   :  { %v7874_v47 = vld [vmem:[#allocation6 + $0xb4c] sm:$0xf]  ;;  %v6408_v56 = vor.u32 %v7810_v16, %v6405_v17  ;;  %4130 = vmatpush.bf16.msrb.mxu3 %v7208_v46  ;;  %v3866_v17 = vadd.f32 %v3865_v31, %v3853_v30  ;;  %v3854_v46 = vpop.f32.mrf.mxu1  ;;  %v7631_v31 = vld [vmem:[#allocation6 + $0x3ac] sm:$0xf0] }
 0x1f1   :  { %v6661_v51 = vld [vmem:[#allocation6 + $0xb68] sm:$0xf0]  ;;  %v5387_v46 = vld [vmem:[#allocation6 + $0x150] sm:$0xf] }
 0x1f2   :  { %v7938_v44 = vld [vmem:[#allocation6 + $0xd4c] sm:$0xf]  ;;  %v6664_v60 = vor.u32 %v7874_v47, %v6661_v51  ;;  %4092 = vmatpush.bf16.msrb.mxu0 %v6408_v56 }
 0x1f3   :  { %v6917_v52 = vld [vmem:[#allocation6 + $0xd68] sm:$0xf0] }
 0x1f4   :  { %v8002_v21 = vld [vmem:[#allocation6 + $0xf4c] sm:$0xf]  ;;  %v6920_v58 = vor.u32 %v7938_v44, %v6917_v52  ;;  %4105 = vmatpush.bf16.msrb.mxu1 %v6664_v60 }
 0x1f5   :  { %v7173_v25 = vld [vmem:[#allocation6 + $0xf68] sm:$0xf0] }
 0x1f6   :  { %v7802_v2 = vld [vmem:[#allocation6 + $0x90c] sm:$0xf]  ;;  %v7176_v18 = vor.u32 %v8002_v21, %v7173_v25  ;;  %4118 = vmatpush.bf16.msrb.mxu2 %v6920_v58  ;;  %v8618_v21 = vadd.f32 %v3878_v63, %v3866_v17  ;;  %v5931_v63 = vld [vmem:[#allocation6 + $0x590] sm:$0xf] }
 0x1f7   :  { %v6373_v57 = vld [vmem:[#allocation6 + $0x928] sm:$0xf0] }
 0x1f8   :  { %v7866_v5 = vld [vmem:[#allocation6 + $0xb0c] sm:$0xf]  ;;  %v6376_v1 = vor.u32 %v7802_v2, %v6373_v57  ;;  %4131 = vmatpush.bf16.msrb.mxu3 %v7176_v18 }
 0x1f9   :  { %v6629_v3 = vld [vmem:[#allocation6 + $0xb28] sm:$0xf0] }
 0x1fa   :  { %v7930_v12 = vld [vmem:[#allocation6 + $0xd0c] sm:$0xf]  ;;  %v6632_v26 = vor.u32 %v7866_v5, %v6629_v3  ;;  %4093 = vmatpush.bf16.msrb.mxu0 %v6376_v1  ;;  %v3867_v1 = vpop.f32.mrf.mxu2 }
 0x1fb   :  { %v6885_v35 = vld [vmem:[#allocation6 + $0xd28] sm:$0xf0] }
 0x1fc   :  { %v7994_v53 = vld [vmem:[#allocation6 + $0xf0c] sm:$0xf]  ;;  %v6888_v36 = vor.u32 %v7930_v12, %v6885_v35  ;;  %4106 = vmatpush.bf16.msrb.mxu1 %v6632_v26  ;;  %v3880_v26 = vpop.f32.mrf.mxu3 }
 0x1fd   :  { %v7141_v59 = vld [vmem:[#allocation6 + $0xf28] sm:$0xf0] }
 0x1fe   :  { %v7794_v28 = vld [vmem:[#allocation6 + $0x8cc] sm:$0xf]  ;;  %v7144_v37 = vor.u32 %v7994_v53, %v7141_v59  ;;  %4119 = vmatpush.bf16.msrb.mxu2 %v6888_v36  ;;  %v7575_v36 = vld [vmem:[#allocation6 + $0x1ec] sm:$0xf0] }
 0x1ff   :  { %v6341_v29 = vld [vmem:[#allocation6 + $0x8e8] sm:$0xf0] }
 0x200   :  { %v7858_v24 = vld [vmem:[#allocation6 + $0xacc] sm:$0xf]  ;;  %v6344_v23 = vor.u32 %v7794_v28, %v6341_v29  ;;  %4132 = vmatpush.bf16.msrb.mxu3 %v7144_v37  ;;  %v5451_v29 = vld [vmem:[#allocation6 + $0x1d0] sm:$0xf] }
 0x201   :  { %v6597_v11 = vld [vmem:[#allocation6 + $0xae8] sm:$0xf0]  ;;  %v5707_v37 = vld [vmem:[#allocation6 + $0x3d0] sm:$0xf] }
 0x202   :  { %v7922_v39 = vld [vmem:[#allocation6 + $0xccc] sm:$0xf]  ;;  %v6600_v4 = vor.u32 %v7858_v24, %v6597_v11  ;;  %4094 = vmatpush.bf16.msrb.mxu0 %v6344_v23  ;;  %v7639_v24 = vld [vmem:[#allocation6 + $0x3ec] sm:$0xf0] }
 0x203   :  { %v6853_v0 = vld [vmem:[#allocation6 + $0xce8] sm:$0xf0]  ;;  %v5963_v11 = vld [vmem:[#allocation6 + $0x5d0] sm:$0xf] }
 0x204   :  { %v7986_v32 = vld [vmem:[#allocation6 + $0xecc] sm:$0xf]  ;;  %v6856_v41 = vor.u32 %v7922_v39, %v6853_v0  ;;  %4107 = vmatpush.bf16.msrb.mxu1 %v6600_v4  ;;  %v7703_v0 = vld [vmem:[#allocation6 + $0x5ec] sm:$0xf0] }
 0x205   :  { %v7109_v61 = vld [vmem:[#allocation6 + $0xee8] sm:$0xf0] }
 0x206   :  { %v7786_v27 = vld [vmem:[#allocation6 + $0x88c] sm:$0xf]  ;;  %v7112_v42 = vor.u32 %v7986_v32, %v7109_v61  ;;  %4120 = vmatpush.bf16.msrb.mxu2 %v6856_v41  ;;  %v6219_v32 = vld [vmem:[#allocation6 + $0x7d0] sm:$0xf] }
 0x207   :  { %v6309_v40 = vld [vmem:[#allocation6 + $0x8a8] sm:$0xf0]  ;;  %v7767_v61 = vld [vmem:[#allocation6 + $0x7ec] sm:$0xf0] }
 0x208   :  { %v7850_v48 = vld [vmem:[#allocation6 + $0xa8c] sm:$0xf]  ;;  %v6312_v47 = vor.u32 %v7786_v27, %v6309_v40  ;;  %4133 = vmatpush.bf16.msrb.mxu3 %v7112_v42  ;;  %v5452_v27 = vor.u32 %v7575_v36, %v5451_v29  ;;  %v5708_v40 = vor.u32 %v7639_v24, %v5707_v37  ;;  %v5419_v41 = vld [vmem:[#allocation6 + $0x190] sm:$0xf] }
 0x209   :  { %v6565_v49 = vld [vmem:[#allocation6 + $0xaa8] sm:$0xf0]  ;;  %v7567_v42 = vld [vmem:[#allocation6 + $0x1ac] sm:$0xf0] }
 0x20a   :  { %v7914_v62 = vld [vmem:[#allocation6 + $0xc8c] sm:$0xf]  ;;  %v6568_v51 = vor.u32 %v7850_v48, %v6565_v49  ;;  %4095 = vmatpush.bf16.msrb.mxu0 %v6312_v47  ;;  %v5964_v48 = vor.u32 %v7703_v0, %v5963_v11  ;;  %v6220_v49 = vor.u32 %v7767_v61, %v6219_v32  ;;  %v5420_v17 = vor.u32 %v7567_v42, %v5419_v41  ;;  %v7559_v47 = vld [vmem:[#allocation6 + $0x16c] sm:$0xf0] }
 0x20b   :  { %v6821_v14 = vld [vmem:[#allocation6 + $0xca8] sm:$0xf0]  ;;  %v5323_v29 = vld [vmem:[#allocation6 + $0xd0] sm:$0xf] }
 0x20c   :  { %v7978_v15 = vld [vmem:[#allocation6 + $0xe8c] sm:$0xf]  ;;  %v6824_v25 = vor.u32 %v7914_v62, %v6821_v14  ;;  %4108 = vmatpush.bf16.msrb.mxu1 %v6568_v51  ;;  %v5675_v62 = vld [vmem:[#allocation6 + $0x390] sm:$0xf] }
 0x20d   :  { %v7077_v16 = vld [vmem:[#allocation6 + $0xea8] sm:$0xf0]  ;;  %v7695_v14 = vld [vmem:[#allocation6 + $0x5ac] sm:$0xf0]  ;;  %v5676_v13 = vor.u32 %v7631_v31, %v5675_v62  ;;  %v3917_v31 = vpop.f32.mrf.mxu2 }
 0x20e   :  { %v7778_v44 = vld [vmem:[#allocation6 + $0x84c] sm:$0xf]  ;;  %v7080_v56 = vor.u32 %v7978_v15, %v7077_v16  ;;  %4121 = vmatpush.bf16.msrb.mxu2 %v6824_v25  ;;  %v6187_v15 = vld [vmem:[#allocation6 + $0x790] sm:$0xf]  ;;  %v5932_v51 = vor.u32 %v7695_v14, %v5931_v63  ;;  %v3930_v63 = vpop.f32.mrf.mxu3 }
 0x20f   :  { %v6277_v52 = vld [vmem:[#allocation6 + $0x868] sm:$0xf0]  ;;  %v7759_v16 = vld [vmem:[#allocation6 + $0x7ac] sm:$0xf0] }
 0x210   :  { %v7842_v60 = vld [vmem:[#allocation6 + $0xa4c] sm:$0xf]  ;;  %v6280_v18 = vor.u32 %v7778_v44, %v6277_v52  ;;  %4134 = vmatpush.bf16.msrb.mxu3 %v7080_v56  ;;  %v6188_v44 = vor.u32 %v7759_v16, %v6187_v15  ;;  %v5643_v52 = vld [vmem:[#allocation6 + $0x350] sm:$0xf] }
 0x211   :  { %v6533_v19 = vld [vmem:[#allocation6 + $0xa68] sm:$0xf0]  ;;  %v7623_v25 = vld [vmem:[#allocation6 + $0x36c] sm:$0xf0] }
 0x212   :  { %v7906_v9 = vld [vmem:[#allocation6 + $0xc4c] sm:$0xf]  ;;  %v6536_v5 = vor.u32 %v7842_v60, %v6533_v19  ;;  %4096 = vmatpush.bf16.msrb.mxu0 %v6280_v18  ;;  %v5899_v56 = vld [vmem:[#allocation6 + $0x550] sm:$0xf] }
 0x213   :  { %v6789_v20 = vld [vmem:[#allocation6 + $0xc68] sm:$0xf0]  ;;  %v7687_v60 = vld [vmem:[#allocation6 + $0x56c] sm:$0xf0] }
 0x214   :  { %v7970_v2 = vld [vmem:[#allocation6 + $0xe4c] sm:$0xf]  ;;  %v6792_v53 = vor.u32 %v7906_v9, %v6789_v20  ;;  %4109 = vmatpush.bf16.msrb.mxu1 %v6536_v5  ;;  %v6155_v19 = vld [vmem:[#allocation6 + $0x750] sm:$0xf]  ;;  %v5388_v20 = vor.u32 %v7559_v47, %v5387_v46  ;;  %v5900_v18 = vor.u32 %v7687_v60, %v5899_v56 }
 0x215   :  { %v7045_v57 = vld [vmem:[#allocation6 + $0xe68] sm:$0xf0]  ;;  %v7751_v9 = vld [vmem:[#allocation6 + $0x76c] sm:$0xf0] }
 0x216   :  { %v7770_v58 = vld [vmem:[#allocation6 + $0x80c] sm:$0xf]  ;;  %v7048_v59 = vor.u32 %v7970_v2, %v7045_v57  ;;  %4122 = vmatpush.bf16.msrb.mxu2 %v6792_v53  ;;  %v5644_v2 = vor.u32 %v7623_v25, %v5643_v52  ;;  %v5355_v57 = vld [vmem:[#allocation6 + $0x110] sm:$0xf]  ;;  %v6156_v5 = vor.u32 %v7751_v9, %v6155_v19 }
 0x217   :  { %v6245_v3 = vld [vmem:[#allocation6 + $0x828] sm:$0xf0]  ;;  %v7679_v53 = vld [vmem:[#allocation6 + $0x52c] sm:$0xf0] }
 0x218   :  { %v7834_v12 = vld [vmem:[#allocation6 + $0xa0c] sm:$0xf]  ;;  %v6248_v39 = vor.u32 %v7770_v58, %v6245_v3  ;;  %4135 = vmatpush.bf16.msrb.mxu3 %v7048_v59  ;;  %v7551_v58 = vld [vmem:[#allocation6 + $0x12c] sm:$0xf0] }
 0x219   :  { %v6501_v35 = vld [vmem:[#allocation6 + $0xa28] sm:$0xf0]  ;;  %v5611_v3 = vld [vmem:[#allocation6 + $0x310] sm:$0xf]  ;;  %v5356_v26 = vor.u32 %v7551_v58, %v5355_v57 }
 0x21a   :  { %v7898_v6 = vld [vmem:[#allocation6 + $0xc0c] sm:$0xf]  ;;  %v6504_v30 = vor.u32 %v7834_v12, %v6501_v35  ;;  %4097 = vmatpush.bf16.msrb.mxu0 %v6248_v39  ;;  %v7615_v12 = vld [vmem:[#allocation6 + $0x32c] sm:$0xf0] }
 0x21b   :  { %v6757_v33 = vld [vmem:[#allocation6 + $0xc28] sm:$0xf0]  ;;  %v5867_v35 = vld [vmem:[#allocation6 + $0x510] sm:$0xf] }
 0x21c   :  { %v7962_v7 = vld [vmem:[#allocation6 + $0xe0c] sm:$0xf]  ;;  %v6760_v23 = vor.u32 %v7898_v6, %v6757_v33  ;;  %4110 = vmatpush.bf16.msrb.mxu1 %v6504_v30  ;;  %v6123_v59 = vld [vmem:[#allocation6 + $0x710] sm:$0xf]  ;;  %v3891_v33 = vpop.f32.mrf.mxu0  ;;  %v5868_v37 = vor.u32 %v7679_v53, %v5867_v35 }
 0x21d   :  { %v7013_v28 = vld [vmem:[#allocation6 + $0xe28] sm:$0xf0]  ;;  %4098 = vmatmul.bf16.vlgmr.msrb.gmra.mxu0 %v8580_v34  ;;  %v7743_v6 = vld [vmem:[#allocation6 + $0x72c] sm:$0xf0]  ;;  %v3892_v1 = vadd.f32 %v3891_v33, %v8618_v21 }
 0x21e   :  { %v7016_v4 = vor.u32 %v7962_v7, %v7013_v28  ;;  %4123 = vmatpush.bf16.msrb.mxu2 %v6760_v23  ;;  %4142 = vmatpush.bf16.msra.mxu0 %v5452_v27  ;;  %v3904_v7 = vpop.f32.mrf.mxu1  ;;  %v5612_v28 = vor.u32 %v7615_v12, %v5611_v3  ;;  %v7543_v36 = vld [vmem:[#allocation6 + $0xec] sm:$0xf0]  ;;  %v6124_v24 = vor.u32 %v7743_v6, %v6123_v59 }
 0x21f   :  { %4111 = vmatmul.bf16.vlgmr.msrb.gmra.mxu1 %v8582_v38  ;;  %v5579_v11 = vld [vmem:[#allocation6 + $0x2d0] sm:$0xf]  ;;  %v3905_v0 = vadd.f32 %v3904_v7, %v3892_v1 }
 0x220   :  { %4136 = vmatpush.bf16.msrb.mxu3 %v7016_v4  ;;  %4155 = vmatpush.bf16.msra.mxu1 %v5708_v40  ;;  %v7607_v39 = vld [vmem:[#allocation6 + $0x2ec] sm:$0xf0]  ;;  %v5324_v4 = vor.u32 %v7543_v36, %v5323_v29 }
 0x221   :  { %4124 = vmatmul.bf16.vlgmr.msrb.gmra.mxu2 %v8584_v43  ;;  %v5835_v30 = vld [vmem:[#allocation6 + $0x4d0] sm:$0xf]  ;;  %v5580_v27 = vor.u32 %v7607_v39, %v5579_v11 }
 0x222   :  { %4168 = vmatpush.bf16.msra.mxu2 %v5964_v48  ;;  %4143 = vmatpush.bf16.msra.mxu0 %v5420_v17  ;;  %v7671_v32 = vld [vmem:[#allocation6 + $0x4ec] sm:$0xf0]  ;;  %v3918_v17 = vadd.f32 %v3917_v31, %v3905_v0 }
 0x223   :  { %4137 = vmatmul.bf16.vlgmr.msrb.gmra.mxu3 %v8586_v22  ;;  %v6091_v61 = vld [vmem:[#allocation6 + $0x6d0] sm:$0xf]  ;;  %v5836_v41 = vor.u32 %v7671_v32, %v5835_v30 }
 0x224   :  { %4181 = vmatpush.bf16.msra.mxu3 %v6220_v49  ;;  %4156 = vmatpush.bf16.msra.mxu1 %v5676_v13  ;;  %v7735_v23 = vld [vmem:[#allocation6 + $0x6ec] sm:$0xf0]  ;;  %v3893_v13 = vpop.f32.mrf.mxu0  ;;  %v8625_v25 = vadd.f32 %v3930_v63, %v3918_v17 }
 0x225   :  { %v5291_v21 = vld [vmem:[#allocation6 + $0x90] sm:$0xf]  ;;  %v6092_v42 = vor.u32 %v7735_v23, %v6091_v61 }
 0x226   :  { %4169 = vmatpush.bf16.msra.mxu2 %v5932_v51  ;;  %4144 = vmatpush.bf16.msra.mxu0 %v5388_v20  ;;  %v7535_v40 = vld [vmem:[#allocation6 + $0xac] sm:$0xf0]  ;;  %v3906_v46 = vpop.f32.mrf.mxu1 }
 0x227   :  { %v5547_v48 = vld [vmem:[#allocation6 + $0x290] sm:$0xf]  ;;  %v5292_v47 = vor.u32 %v7535_v40, %v5291_v21 }
 0x228   :  { %4182 = vmatpush.bf16.msra.mxu3 %v6188_v44  ;;  %4157 = vmatpush.bf16.msra.mxu1 %v5644_v2  ;;  %v7599_v49 = vld [vmem:[#allocation6 + $0x2ac] sm:$0xf0] }
 0x229   :  { %v5803_v62 = vld [vmem:[#allocation6 + $0x490] sm:$0xf]  ;;  %v5548_v51 = vor.u32 %v7599_v49, %v5547_v48 }
 0x22a   :  { %4170 = vmatpush.bf16.msra.mxu2 %v5900_v18  ;;  %4145 = vmatpush.bf16.msra.mxu0 %v5356_v26  ;;  %v7663_v14 = vld [vmem:[#allocation6 + $0x4ac] sm:$0xf0]  ;;  %v3919_v26 = vpop.f32.mrf.mxu2 }
 0x22b   :  { %v6059_v15 = vld [vmem:[#allocation6 + $0x690] sm:$0xf]  ;;  %v5804_v56 = vor.u32 %v7663_v14, %v5803_v62 }
 0x22c   :  { %4183 = vmatpush.bf16.msra.mxu3 %v6156_v5  ;;  %4158 = vmatpush.bf16.msra.mxu1 %v5612_v28  ;;  %v7727_v16 = vld [vmem:[#allocation6 + $0x6ac] sm:$0xf0]  ;;  %v3932_v28 = vpop.f32.mrf.mxu3 }
 0x22d   :  { %v5259_v44 = vld [vmem:[#allocation6 + $0x50] sm:$0xf]  ;;  %v6060_v60 = vor.u32 %v7727_v16, %v6059_v15 }
 0x22e   :  { %4171 = vmatpush.bf16.msra.mxu2 %v5868_v37  ;;  %4146 = vmatpush.bf16.msra.mxu0 %v5324_v4  ;;  %v7527_v52 = vld [vmem:[#allocation6 + $0x6c] sm:$0xf0]  ;;  %v3956_v26 = vpop.f32.mrf.mxu1 }
 0x22f   :  { %v5515_v19 = vld [vmem:[#allocation6 + $0x250] sm:$0xf]  ;;  %v5260_v5 = vor.u32 %v7527_v52, %v5259_v44 }
 0x230   :  { %4184 = vmatpush.bf16.msra.mxu3 %v6124_v24  ;;  %4159 = vmatpush.bf16.msra.mxu1 %v5580_v27  ;;  %v7591_v9 = vld [vmem:[#allocation6 + $0x26c] sm:$0xf0] }
 0x231   :  { %v5771_v20 = vld [vmem:[#allocation6 + $0x450] sm:$0xf]  ;;  %v5516_v3 = vor.u32 %v7591_v9, %v5515_v19 }
 0x232   :  { %4172 = vmatpush.bf16.msra.mxu2 %v5836_v41  ;;  %v7655_v2 = vld [vmem:[#allocation6 + $0x46c] sm:$0xf0]  ;;  %4147 = vmatpush.bf16.msra.mxu0 %v5292_v47 }
 0x233   :  { %v6027_v57 = vld [vmem:[#allocation6 + $0x650] sm:$0xf]  ;;  %v5772_v59 = vor.u32 %v7655_v2, %v5771_v20 }
 0x234   :  { %4185 = vmatpush.bf16.msra.mxu3 %v6092_v42  ;;  %v7719_v58 = vld [vmem:[#allocation6 + $0x66c] sm:$0xf0]  ;;  %4160 = vmatpush.bf16.msra.mxu1 %v5548_v51 }
 0x235   :  { %v5227_v18 = vld [vmem:[#allocation6 + $0x10] sm:$0xf]  ;;  %v6028_v6 = vor.u32 %v7719_v58, %v6027_v57  ;;  %v1152_v58 = vperm.slane %v8604_v45, 2 }
 0x236   :  { %v7519_v12 = vld [vmem:[#allocation6 + $0x2c] sm:$0xf0]  ;;  %4173 = vmatpush.bf16.msra.mxu2 %v5804_v56  ;;  %4148 = vmatpush.bf16.msra.mxu0 %v5260_v5 }
 0x237   :  { %v5483_v35 = vld [vmem:[#allocation6 + $0x210] sm:$0xf]  ;;  %v5228_v30 = vor.u32 %v7519_v12, %v5227_v18 }
 0x238   :  { %v7583_v53 = vld [vmem:[#allocation6 + $0x22c] sm:$0xf0]  ;;  %4186 = vmatpush.bf16.msra.mxu3 %v6060_v60  ;;  %4161 = vmatpush.bf16.msra.mxu1 %v5516_v3 }
 0x239   :  { %v5739_v33 = vld [vmem:[#allocation6 + $0x410] sm:$0xf]  ;;  %v5484_v0 = vor.u32 %v7583_v53, %v5483_v35 }
 0x23a   :  { %v7647_v7 = vld [vmem:[#allocation6 + $0x42c] sm:$0xf0]  ;;  %4174 = vmatpush.bf16.msra.mxu2 %v5772_v59  ;;  %4149 = vmatpush.bf16.msra.mxu0 %v5228_v30 }
 0x23b   :  { %v5995_v1 = vld [vmem:[#allocation6 + $0x610] sm:$0xf]  ;;  %v5740_v4 = vor.u32 %v7647_v7, %v5739_v33 }
 0x23c   :  { %v7711_v29 = vld [vmem:[#allocation6 + $0x62c] sm:$0xf0]  ;;  %4187 = vmatpush.bf16.msra.mxu3 %v6028_v6  ;;  %4162 = vmatpush.bf16.msra.mxu1 %v5484_v0 }
 0x23d   :  { %v6475_v36 = vld [vmem:[#allocation6 + $0x9d0] sm:$0xf]  ;;  %v5996_v27 = vor.u32 %v7711_v29, %v5995_v1  ;;  %4150 = vmatmul.bf16.vlgmr.msra.gmra.mxu0 %v8556_v10  ;;  %v3943_v1 = vpop.f32.mrf.mxu0 }
 0x23e   :  { %v7831_v37 = vld [vmem:[#allocation6 + $0x9ec] sm:$0xf0]  ;;  %4175 = vmatpush.bf16.msra.mxu2 %v5740_v4  ;;  %v3944_v28 = vadd.f32 %v3943_v1, %v1152_v58 }
 0x23f   :  { %v6731_v24 = vld [vmem:[#allocation6 + $0xbd0] sm:$0xf]  ;;  %v6476_v21 = vor.u32 %v7831_v37, %v6475_v36  ;;  %4163 = vmatmul.bf16.vlgmr.msra.gmra.mxu1 %v8558_v54 }
 0x240   :  { %v7895_v11 = vld [vmem:[#allocation6 + $0xbec] sm:$0xf0]  ;;  %4188 = vmatpush.bf16.msra.mxu3 %v5996_v27 }
 0x241   :  { %v6987_v39 = vld [vmem:[#allocation6 + $0xdd0] sm:$0xf]  ;;  %v6732_v40 = vor.u32 %v7895_v11, %v6731_v24  ;;  %4194 = vmatpush.bf16.msrb.mxu0 %v6476_v21  ;;  %4176 = vmatmul.bf16.vlgmr.msra.gmra.mxu2 %v8560_v55 }
 0x242   :  { %v7959_v32 = vld [vmem:[#allocation6 + $0xdec] sm:$0xf0] }
 0x243   :  { %v7243_v61 = vld [vmem:[#allocation6 + $0xfd0] sm:$0xf]  ;;  %v6988_v48 = vor.u32 %v7959_v32, %v6987_v39  ;;  %4207 = vmatpush.bf16.msrb.mxu1 %v6732_v40  ;;  %4189 = vmatmul.bf16.vlgmr.msra.gmra.mxu3 %v8562_v8  ;;  %v3957_v32 = vadd.f32 %v3956_v26, %v3944_v28 }
 0x244   :  { %v8023_v23 = vld [vmem:[#allocation6 + $0xfec] sm:$0xf0] }
 0x245   :  { %v6443_v41 = vld [vmem:[#allocation6 + $0x990] sm:$0xf]  ;;  %v7244_v49 = vor.u32 %v8023_v23, %v7243_v61  ;;  %4220 = vmatpush.bf16.msrb.mxu2 %v6988_v48 }
 0x246   :  { %v7823_v42 = vld [vmem:[#allocation6 + $0x9ac] sm:$0xf0] }
 0x247   :  { %v6699_v62 = vld [vmem:[#allocation6 + $0xb90] sm:$0xf]  ;;  %v6444_v17 = vor.u32 %v7823_v42, %v6443_v41  ;;  %4233 = vmatpush.bf16.msrb.mxu3 %v7244_v49 }
 0x248   :  { %v7887_v31 = vld [vmem:[#allocation6 + $0xbac] sm:$0xf0] }
 0x249   :  { %v6955_v63 = vld [vmem:[#allocation6 + $0xd90] sm:$0xf]  ;;  %v6700_v13 = vor.u32 %v7887_v31, %v6699_v62  ;;  %4195 = vmatpush.bf16.msrb.mxu0 %v6444_v17 }
 0x24a   :  { %v7951_v14 = vld [vmem:[#allocation6 + $0xdac] sm:$0xf0] }
 0x24b   :  { %v7211_v15 = vld [vmem:[#allocation6 + $0xf90] sm:$0xf]  ;;  %v6956_v51 = vor.u32 %v7951_v14, %v6955_v63  ;;  %4208 = vmatpush.bf16.msrb.mxu1 %v6700_v13  ;;  %v3969_v63 = vpop.f32.mrf.mxu2  ;;  %v3982_v14 = vpop.f32.mrf.mxu3 }
 0x24c   :  { %v8015_v16 = vld [vmem:[#allocation6 + $0xfac] sm:$0xf0]  ;;  %v3970_v13 = vadd.f32 %v3969_v63, %v3957_v32  ;;  %v5677_v63 = vld [vmem:[#allocation6 + $0x3b0] sm:$0xf0] }
 0x24d   :  { %v6411_v46 = vld [vmem:[#allocation6 + $0x950] sm:$0xf]  ;;  %v7212_v44 = vor.u32 %v8015_v16, %v7211_v15  ;;  %4221 = vmatpush.bf16.msrb.mxu2 %v6956_v51 }
 0x24e   :  { %v7815_v47 = vld [vmem:[#allocation6 + $0x96c] sm:$0xf0] }
 0x24f   :  { %v6667_v52 = vld [vmem:[#allocation6 + $0xb50] sm:$0xf]  ;;  %v6412_v2 = vor.u32 %v7815_v47, %v6411_v46  ;;  %4234 = vmatpush.bf16.msrb.mxu3 %v7212_v44  ;;  %v3945_v46 = vpop.f32.mrf.mxu0  ;;  %v3958_v47 = vpop.f32.mrf.mxu1 }
 0x250   :  { %v7879_v56 = vld [vmem:[#allocation6 + $0xb6c] sm:$0xf0]  ;;  %v7555_v47 = vld [vmem:[#allocation6 + $0x154] sm:$0xf] }
 0x251   :  { %v6923_v60 = vld [vmem:[#allocation6 + $0xd50] sm:$0xf]  ;;  %v6668_v57 = vor.u32 %v7879_v56, %v6667_v52  ;;  %4196 = vmatpush.bf16.msrb.mxu0 %v6412_v2 }
 0x252   :  { %v7943_v19 = vld [vmem:[#allocation6 + $0xd6c] sm:$0xf0] }
 0x253   :  { %v7179_v9 = vld [vmem:[#allocation6 + $0xf50] sm:$0xf]  ;;  %v6924_v3 = vor.u32 %v7943_v19, %v6923_v60  ;;  %4209 = vmatpush.bf16.msrb.mxu1 %v6668_v57  ;;  %v8632_v60 = vadd.f32 %v3982_v14, %v3970_v13  ;;  %v7691_v14 = vld [vmem:[#allocation6 + $0x594] sm:$0xf] }
 0x254   :  { %v8007_v20 = vld [vmem:[#allocation6 + $0xf6c] sm:$0xf0] }
 0x255   :  { %v6379_v18 = vld [vmem:[#allocation6 + $0x910] sm:$0xf]  ;;  %v7180_v12 = vor.u32 %v8007_v20, %v7179_v9  ;;  %4222 = vmatpush.bf16.msrb.mxu2 %v6924_v3 }
 0x256   :  { %v7807_v5 = vld [vmem:[#allocation6 + $0x92c] sm:$0xf0] }
 0x257   :  { %v6635_v35 = vld [vmem:[#allocation6 + $0xb10] sm:$0xf]  ;;  %v6380_v29 = vor.u32 %v7807_v5, %v6379_v18  ;;  %4235 = vmatpush.bf16.msrb.mxu3 %v7180_v12 }
 0x258   :  { %v7871_v53 = vld [vmem:[#allocation6 + $0xb2c] sm:$0xf0] }
 0x259   :  { %v6891_v59 = vld [vmem:[#allocation6 + $0xd10] sm:$0xf]  ;;  %v6636_v36 = vor.u32 %v7871_v53, %v6635_v35  ;;  %4197 = vmatpush.bf16.msrb.mxu0 %v6380_v29  ;;  %v3971_v29 = vpop.f32.mrf.mxu2 }
 0x25a   :  { %v7935_v6 = vld [vmem:[#allocation6 + $0xd2c] sm:$0xf0] }
 0x25b   :  { %v7147_v33 = vld [vmem:[#allocation6 + $0xf10] sm:$0xf]  ;;  %v6892_v24 = vor.u32 %v7935_v6, %v6891_v59  ;;  %4210 = vmatpush.bf16.msrb.mxu1 %v6636_v36  ;;  %v3984_v36 = vpop.f32.mrf.mxu3 }
 0x25c   :  { %v7999_v7 = vld [vmem:[#allocation6 + $0xf2c] sm:$0xf0] }
 0x25d   :  { %v6347_v45 = vld [vmem:[#allocation6 + $0x8d0] sm:$0xf]  ;;  %v7148_v11 = vor.u32 %v7999_v7, %v7147_v33  ;;  %4223 = vmatpush.bf16.msrb.mxu2 %v6892_v24  ;;  %v5453_v24 = vld [vmem:[#allocation6 + $0x1f0] sm:$0xf0] }
 0x25e   :  { %v7799_v37 = vld [vmem:[#allocation6 + $0x8ec] sm:$0xf0] }
 0x25f   :  { %v6603_v39 = vld [vmem:[#allocation6 + $0xad0] sm:$0xf]  ;;  %v6348_v27 = vor.u32 %v7799_v37, %v6347_v45  ;;  %4236 = vmatpush.bf16.msrb.mxu3 %v7148_v11  ;;  %v7571_v37 = vld [vmem:[#allocation6 + $0x1d4] sm:$0xf] }
 0x260   :  { %v7863_v30 = vld [vmem:[#allocation6 + $0xaec] sm:$0xf0]  ;;  %v7635_v11 = vld [vmem:[#allocation6 + $0x3d4] sm:$0xf] }
 0x261   :  { %v6859_v0 = vld [vmem:[#allocation6 + $0xcd0] sm:$0xf]  ;;  %v6604_v21 = vor.u32 %v7863_v30, %v6603_v39  ;;  %4198 = vmatpush.bf16.msrb.mxu0 %v6348_v27  ;;  %v5709_v39 = vld [vmem:[#allocation6 + $0x3f0] sm:$0xf0] }
 0x262   :  { %v7927_v61 = vld [vmem:[#allocation6 + $0xcec] sm:$0xf0]  ;;  %v7699_v30 = vld [vmem:[#allocation6 + $0x5d4] sm:$0xf] }
 0x263   :  { %v7115_v23 = vld [vmem:[#allocation6 + $0xed0] sm:$0xf]  ;;  %v6860_v42 = vor.u32 %v7927_v61, %v6859_v0  ;;  %4211 = vmatpush.bf16.msrb.mxu1 %v6604_v21  ;;  %v5965_v61 = vld [vmem:[#allocation6 + $0x5f0] sm:$0xf0] }
 0x264   :  { %v7991_v4 = vld [vmem:[#allocation6 + $0xeec] sm:$0xf0] }
 0x265   :  { %v6315_v40 = vld [vmem:[#allocation6 + $0x890] sm:$0xf]  ;;  %v7116_v48 = vor.u32 %v7991_v4, %v7115_v23  ;;  %4224 = vmatpush.bf16.msrb.mxu2 %v6860_v42  ;;  %v7763_v23 = vld [vmem:[#allocation6 + $0x7d4] sm:$0xf] }
 0x266   :  { %v7791_v41 = vld [vmem:[#allocation6 + $0x8ac] sm:$0xf0]  ;;  %v6221_v4 = vld [vmem:[#allocation6 + $0x7f0] sm:$0xf0] }
 0x267   :  { %v6571_v49 = vld [vmem:[#allocation6 + $0xa90] sm:$0xf]  ;;  %v6316_v51 = vor.u32 %v7791_v41, %v6315_v40  ;;  %4237 = vmatpush.bf16.msrb.mxu3 %v7116_v48  ;;  %v5456_v40 = vor.u32 %v7571_v37, %v5453_v24  ;;  %v5712_v41 = vor.u32 %v7635_v11, %v5709_v39  ;;  %v7563_v42 = vld [vmem:[#allocation6 + $0x194] sm:$0xf] }
 0x268   :  { %v7855_v62 = vld [vmem:[#allocation6 + $0xaac] sm:$0xf0]  ;;  %v5421_v48 = vld [vmem:[#allocation6 + $0x1b0] sm:$0xf0] }
 0x269   :  { %v6827_v31 = vld [vmem:[#allocation6 + $0xc90] sm:$0xf]  ;;  %v6572_v44 = vor.u32 %v7855_v62, %v6571_v49  ;;  %4199 = vmatpush.bf16.msrb.mxu0 %v6316_v51  ;;  %v5968_v49 = vor.u32 %v7699_v30, %v5965_v61  ;;  %v6224_v62 = vor.u32 %v7763_v23, %v6221_v4  ;;  %v5424_v13 = vor.u32 %v7563_v42, %v5421_v48  ;;  %v5389_v51 = vld [vmem:[#allocation6 + $0x170] sm:$0xf0] }
 0x26a   :  { %v7919_v15 = vld [vmem:[#allocation6 + $0xcac] sm:$0xf0]  ;;  %v7539_v37 = vld [vmem:[#allocation6 + $0xd4] sm:$0xf] }
 0x26b   :  { %v7083_v16 = vld [vmem:[#allocation6 + $0xe90] sm:$0xf]  ;;  %v6828_v19 = vor.u32 %v7919_v15, %v6827_v31  ;;  %4212 = vmatpush.bf16.msrb.mxu1 %v6572_v44  ;;  %v7627_v31 = vld [vmem:[#allocation6 + $0x394] sm:$0xf] }
 0x26c   :  { %v7983_v17 = vld [vmem:[#allocation6 + $0xeac] sm:$0xf0]  ;;  %v5933_v15 = vld [vmem:[#allocation6 + $0x5b0] sm:$0xf0]  ;;  %v5680_v46 = vor.u32 %v7627_v31, %v5677_v63  ;;  %v4021_v63 = vpop.f32.mrf.mxu2 }
 0x26d   :  { %v6283_v52 = vld [vmem:[#allocation6 + $0x850] sm:$0xf]  ;;  %v7084_v9 = vor.u32 %v7983_v17, %v7083_v16  ;;  %4225 = vmatpush.bf16.msrb.mxu2 %v6828_v19  ;;  %v7755_v16 = vld [vmem:[#allocation6 + $0x794] sm:$0xf]  ;;  %v5936_v44 = vor.u32 %v7691_v14, %v5933_v15  ;;  %v4034_v14 = vpop.f32.mrf.mxu3 }
 0x26e   :  { %v7783_v56 = vld [vmem:[#allocation6 + $0x86c] sm:$0xf0]  ;;  %v6189_v17 = vld [vmem:[#allocation6 + $0x7b0] sm:$0xf0] }
 0x26f   :  { %v6539_v20 = vld [vmem:[#allocation6 + $0xa50] sm:$0xf]  ;;  %v6284_v12 = vor.u32 %v7783_v56, %v6283_v52  ;;  %4238 = vmatpush.bf16.msrb.mxu3 %v7084_v9  ;;  %v6192_v52 = vor.u32 %v7755_v16, %v6189_v17  ;;  %v7619_v56 = vld [vmem:[#allocation6 + $0x354] sm:$0xf] }
 0x270   :  { %v7847_v2 = vld [vmem:[#allocation6 + $0xa6c] sm:$0xf0]  ;;  %v5645_v19 = vld [vmem:[#allocation6 + $0x370] sm:$0xf0] }
 0x271   :  { %v6795_v57 = vld [vmem:[#allocation6 + $0xc50] sm:$0xf]  ;;  %v6540_v35 = vor.u32 %v7847_v2, %v6539_v20  ;;  %4200 = vmatpush.bf16.msrb.mxu0 %v6284_v12  ;;  %v7683_v9 = vld [vmem:[#allocation6 + $0x554] sm:$0xf] }
 0x272   :  { %v7911_v58 = vld [vmem:[#allocation6 + $0xc6c] sm:$0xf0]  ;;  %v5901_v20 = vld [vmem:[#allocation6 + $0x570] sm:$0xf0] }
 0x273   :  { %v7051_v18 = vld [vmem:[#allocation6 + $0xe50] sm:$0xf]  ;;  %v6796_v33 = vor.u32 %v7911_v58, %v6795_v57  ;;  %4213 = vmatpush.bf16.msrb.mxu1 %v6540_v35  ;;  %v7747_v2 = vld [vmem:[#allocation6 + $0x754] sm:$0xf]  ;;  %v5392_v58 = vor.u32 %v7555_v47, %v5389_v51  ;;  %v5904_v12 = vor.u32 %v7683_v9, %v5901_v20 }
 0x274   :  { %v7975_v5 = vld [vmem:[#allocation6 + $0xe6c] sm:$0xf0]  ;;  %v6157_v57 = vld [vmem:[#allocation6 + $0x770] sm:$0xf0] }
 0x275   :  { %v6251_v3 = vld [vmem:[#allocation6 + $0x810] sm:$0xf]  ;;  %v7052_v7 = vor.u32 %v7975_v5, %v7051_v18  ;;  %4226 = vmatpush.bf16.msrb.mxu2 %v6796_v33  ;;  %v5648_v18 = vor.u32 %v7619_v56, %v5645_v19  ;;  %v7547_v5 = vld [vmem:[#allocation6 + $0x114] sm:$0xf]  ;;  %v6160_v35 = vor.u32 %v7747_v2, %v6157_v57 }
 0x276   :  { %v7775_v53 = vld [vmem:[#allocation6 + $0x82c] sm:$0xf0]  ;;  %v5869_v33 = vld [vmem:[#allocation6 + $0x530] sm:$0xf0] }
 0x277   :  { %v6507_v59 = vld [vmem:[#allocation6 + $0xa10] sm:$0xf]  ;;  %v6252_v0 = vor.u32 %v7775_v53, %v6251_v3  ;;  %4239 = vmatpush.bf16.msrb.mxu3 %v7052_v7  ;;  %v5357_v3 = vld [vmem:[#allocation6 + $0x130] sm:$0xf0] }
 0x278   :  { %v7839_v6 = vld [vmem:[#allocation6 + $0xa2c] sm:$0xf0]  ;;  %v7611_v53 = vld [vmem:[#allocation6 + $0x314] sm:$0xf]  ;;  %v5360_v36 = vor.u32 %v7547_v5, %v5357_v3 }
 0x279   :  { %v6763_v1 = vld [vmem:[#allocation6 + $0xc10] sm:$0xf]  ;;  %v6508_v32 = vor.u32 %v7839_v6, %v6507_v59  ;;  %4201 = vmatpush.bf16.msrb.mxu0 %v6252_v0  ;;  %v5613_v59 = vld [vmem:[#allocation6 + $0x330] sm:$0xf0] }
 0x27a   :  { %v7903_v26 = vld [vmem:[#allocation6 + $0xc2c] sm:$0xf0]  ;;  %v7675_v6 = vld [vmem:[#allocation6 + $0x514] sm:$0xf] }
 0x27b   :  { %v7019_v28 = vld [vmem:[#allocation6 + $0xe10] sm:$0xf]  ;;  %v6764_v27 = vor.u32 %v7903_v26, %v6763_v1  ;;  %4214 = vmatpush.bf16.msrb.mxu1 %v6508_v32  ;;  %v7739_v7 = vld [vmem:[#allocation6 + $0x714] sm:$0xf]  ;;  %v3995_v26 = vpop.f32.mrf.mxu0  ;;  %v5872_v11 = vor.u32 %v7675_v6, %v5869_v33 }
 0x27c   :  { %v7967_v45 = vld [vmem:[#allocation6 + $0xe2c] sm:$0xf0]  ;;  %4202 = vmatmul.bf16.vlgmr.msrb.gmra.mxu0 %v8580_v34  ;;  %v6125_v1 = vld [vmem:[#allocation6 + $0x730] sm:$0xf0]  ;;  %v3996_v29 = vadd.f32 %v3995_v26, %v8632_v60 }
 0x27d   :  { %v7020_v21 = vor.u32 %v7967_v45, %v7019_v28  ;;  %4227 = vmatpush.bf16.msrb.mxu2 %v6764_v27  ;;  %4246 = vmatpush.bf16.msra.mxu0 %v5456_v40  ;;  %v4008_v28 = vpop.f32.mrf.mxu1  ;;  %v5616_v45 = vor.u32 %v7611_v53, %v5613_v59  ;;  %v5325_v24 = vld [vmem:[#allocation6 + $0xf0] sm:$0xf0]  ;;  %v6128_v39 = vor.u32 %v7739_v7, %v6125_v1 }
 0x27e   :  { %4215 = vmatmul.bf16.vlgmr.msrb.gmra.mxu1 %v8582_v38  ;;  %v7603_v30 = vld [vmem:[#allocation6 + $0x2d4] sm:$0xf]  ;;  %v4009_v61 = vadd.f32 %v4008_v28, %v3996_v29 }
 0x27f   :  { %4240 = vmatpush.bf16.msrb.mxu3 %v7020_v21  ;;  %4259 = vmatpush.bf16.msra.mxu1 %v5712_v41  ;;  %v5581_v0 = vld [vmem:[#allocation6 + $0x2f0] sm:$0xf0]  ;;  %v5328_v21 = vor.u32 %v7539_v37, %v5325_v24 }
 0x280   :  { %4228 = vmatmul.bf16.vlgmr.msrb.gmra.mxu2 %v8584_v43  ;;  %v7667_v32 = vld [vmem:[#allocation6 + $0x4d4] sm:$0xf]  ;;  %v5584_v40 = vor.u32 %v7603_v30, %v5581_v0 }
 0x281   :  { %4272 = vmatpush.bf16.msra.mxu2 %v5968_v49  ;;  %4247 = vmatpush.bf16.msra.mxu0 %v5424_v13  ;;  %v5837_v23 = vld [vmem:[#allocation6 + $0x4f0] sm:$0xf0]  ;;  %v4022_v13 = vadd.f32 %v4021_v63, %v4009_v61 }
 0x282   :  { %4241 = vmatmul.bf16.vlgmr.msrb.gmra.mxu3 %v8586_v22  ;;  %v7731_v4 = vld [vmem:[#allocation6 + $0x6d4] sm:$0xf]  ;;  %v5840_v42 = vor.u32 %v7667_v32, %v5837_v23 }
 0x283   :  { %4285 = vmatpush.bf16.msra.mxu3 %v6224_v62  ;;  %4260 = vmatpush.bf16.msra.mxu1 %v5680_v46  ;;  %v6093_v27 = vld [vmem:[#allocation6 + $0x6f0] sm:$0xf0]  ;;  %v3997_v46 = vpop.f32.mrf.mxu0  ;;  %v8639_v19 = vadd.f32 %v4034_v14, %v4022_v13 }
 0x284   :  { %v7531_v60 = vld [vmem:[#allocation6 + $0x94] sm:$0xf]  ;;  %v6096_v48 = vor.u32 %v7731_v4, %v6093_v27 }
 0x285   :  { %4273 = vmatpush.bf16.msra.mxu2 %v5936_v44  ;;  %4248 = vmatpush.bf16.msra.mxu0 %v5392_v58  ;;  %v5293_v41 = vld [vmem:[#allocation6 + $0xb0] sm:$0xf0]  ;;  %v4010_v47 = vpop.f32.mrf.mxu1 }
 0x286   :  { %v7595_v49 = vld [vmem:[#allocation6 + $0x294] sm:$0xf]  ;;  %v5296_v51 = vor.u32 %v7531_v60, %v5293_v41 }
 0x287   :  { %4286 = vmatpush.bf16.msra.mxu3 %v6192_v52  ;;  %4261 = vmatpush.bf16.msra.mxu1 %v5648_v18  ;;  %v5549_v62 = vld [vmem:[#allocation6 + $0x2b0] sm:$0xf0] }
 0x288   :  { %v7659_v31 = vld [vmem:[#allocation6 + $0x494] sm:$0xf]  ;;  %v5552_v44 = vor.u32 %v7595_v49, %v5549_v62 }
 0x289   :  { %4274 = vmatpush.bf16.msra.mxu2 %v5904_v12  ;;  %4249 = vmatpush.bf16.msra.mxu0 %v5360_v36  ;;  %v5805_v15 = vld [vmem:[#allocation6 + $0x4b0] sm:$0xf0]  ;;  %v4023_v36 = vpop.f32.mrf.mxu2 }
 0x28a   :  { %v7723_v16 = vld [vmem:[#allocation6 + $0x694] sm:$0xf]  ;;  %v5808_v9 = vor.u32 %v7659_v31, %v5805_v15 }
 0x28b   :  { %4287 = vmatpush.bf16.msra.mxu3 %v6160_v35  ;;  %4262 = vmatpush.bf16.msra.mxu1 %v5616_v45  ;;  %v6061_v17 = vld [vmem:[#allocation6 + $0x6b0] sm:$0xf0]  ;;  %v4036_v45 = vpop.f32.mrf.mxu3  ;;  %v4047_v36 = vpop.f32.mrf.mxu0 }
 0x28c   :  { %v7523_v52 = vld [vmem:[#allocation6 + $0x54] sm:$0xf]  ;;  %v6064_v20 = vor.u32 %v7723_v16, %v6061_v17 }
 0x28d   :  { %4275 = vmatpush.bf16.msra.mxu2 %v5872_v11  ;;  %4250 = vmatpush.bf16.msra.mxu0 %v5328_v21  ;;  %v5261_v56 = vld [vmem:[#allocation6 + $0x70] sm:$0xf0]  ;;  %v4060_v45 = vpop.f32.mrf.mxu1 }
 0x28e   :  { %v7587_v2 = vld [vmem:[#allocation6 + $0x254] sm:$0xf]  ;;  %v5264_v35 = vor.u32 %v7523_v52, %v5261_v56 }
 0x28f   :  { %4288 = vmatpush.bf16.msra.mxu3 %v6128_v39  ;;  %4263 = vmatpush.bf16.msra.mxu1 %v5584_v40  ;;  %v5517_v57 = vld [vmem:[#allocation6 + $0x270] sm:$0xf0] }
 0x290   :  { %v7651_v58 = vld [vmem:[#allocation6 + $0x454] sm:$0xf]  ;;  %v5520_v53 = vor.u32 %v7587_v2, %v5517_v57 }
 0x291   :  { %4276 = vmatpush.bf16.msra.mxu2 %v5840_v42  ;;  %v5773_v18 = vld [vmem:[#allocation6 + $0x470] sm:$0xf0]  ;;  %4251 = vmatpush.bf16.msra.mxu0 %v5296_v51 }
 0x292   :  { %v7715_v5 = vld [vmem:[#allocation6 + $0x654] sm:$0xf]  ;;  %v5776_v7 = vor.u32 %v7651_v58, %v5773_v18 }
 0x293   :  { %4289 = vmatpush.bf16.msra.mxu3 %v6096_v48  ;;  %v6029_v3 = vld [vmem:[#allocation6 + $0x670] sm:$0xf0]  ;;  %4264 = vmatpush.bf16.msra.mxu1 %v5552_v44 }
 0x294   :  { %v7515_v12 = vld [vmem:[#allocation6 + $0x14] sm:$0xf]  ;;  %v6032_v1 = vor.u32 %v7715_v5, %v6029_v3  ;;  %v8645_v3 = vld [vmem:[#allocation7] sm:$0xff] }
 0x295   :  { %v5229_v59 = vld [vmem:[#allocation6 + $0x30] sm:$0xf0]  ;;  %4277 = vmatpush.bf16.msra.mxu2 %v5808_v9  ;;  %4252 = vmatpush.bf16.msra.mxu0 %v5264_v35 }
 0x296   :  { %v7579_v6 = vld [vmem:[#allocation6 + $0x214] sm:$0xf]  ;;  %v5232_v32 = vor.u32 %v7515_v12, %v5229_v59  ;;  %v1153_v12 = vperm.slane %v8645_v3, 3 }
 0x297   :  { %v5485_v33 = vld [vmem:[#allocation6 + $0x230] sm:$0xf0]  ;;  %4290 = vmatpush.bf16.msra.mxu3 %v6064_v20  ;;  %4265 = vmatpush.bf16.msra.mxu1 %v5520_v53 }
 0x298   :  { %v7643_v26 = vld [vmem:[#allocation6 + $0x414] sm:$0xf]  ;;  %v5488_v61 = vor.u32 %v7579_v6, %v5485_v33 }
 0x299   :  { %v5741_v28 = vld [vmem:[#allocation6 + $0x430] sm:$0xf0]  ;;  %4278 = vmatpush.bf16.msra.mxu2 %v5776_v7  ;;  %4253 = vmatpush.bf16.msra.mxu0 %v5232_v32 }
 0x29a   :  { %v7707_v29 = vld [vmem:[#allocation6 + $0x614] sm:$0xf]  ;;  %v5744_v21 = vor.u32 %v7643_v26, %v5741_v28 }
 0x29b   :  { %v5997_v37 = vld [vmem:[#allocation6 + $0x630] sm:$0xf0]  ;;  %4291 = vmatpush.bf16.msra.mxu3 %v6032_v1  ;;  %4266 = vmatpush.bf16.msra.mxu1 %v5488_v61 }
 0x29c   :  { %v7827_v24 = vld [vmem:[#allocation6 + $0x9d4] sm:$0xf]  ;;  %v6000_v40 = vor.u32 %v7707_v29, %v5997_v37  ;;  %4254 = vmatmul.bf16.vlgmr.msra.gmra.mxu0 %v8556_v10  ;;  %v4048_v37 = vadd.f32 %v4047_v36, %v1153_v12 }
 0x29d   :  { %v6477_v11 = vld [vmem:[#allocation6 + $0x9f0] sm:$0xf0]  ;;  %4279 = vmatpush.bf16.msra.mxu2 %v5744_v21 }
 0x29e   :  { %v7891_v39 = vld [vmem:[#allocation6 + $0xbd4] sm:$0xf]  ;;  %v6480_v60 = vor.u32 %v7827_v24, %v6477_v11  ;;  %4267 = vmatmul.bf16.vlgmr.msra.gmra.mxu1 %v8558_v54 }
 0x29f   :  { %v6733_v30 = vld [vmem:[#allocation6 + $0xbf0] sm:$0xf0]  ;;  %4292 = vmatpush.bf16.msra.mxu3 %v6000_v40 }
 0x2a0   :  { %v7955_v0 = vld [vmem:[#allocation6 + $0xdd4] sm:$0xf]  ;;  %v6736_v41 = vor.u32 %v7891_v39, %v6733_v30  ;;  %4298 = vmatpush.bf16.msrb.mxu0 %v6480_v60  ;;  %4280 = vmatmul.bf16.vlgmr.msra.gmra.mxu2 %v8560_v55 }
 0x2a1   :  { %v6989_v23 = vld [vmem:[#allocation6 + $0xdf0] sm:$0xf0] }
 0x2a2   :  { %v8019_v4 = vld [vmem:[#allocation6 + $0xfd4] sm:$0xf]  ;;  %v6992_v49 = vor.u32 %v7955_v0, %v6989_v23  ;;  %4311 = vmatpush.bf16.msrb.mxu1 %v6736_v41  ;;  %4293 = vmatmul.bf16.vlgmr.msra.gmra.mxu3 %v8562_v8 }
 0x2a3   :  { %v7245_v27 = vld [vmem:[#allocation6 + $0xff0] sm:$0xf0] }
 0x2a4   :  { %v7819_v42 = vld [vmem:[#allocation6 + $0x994] sm:$0xf]  ;;  %v7248_v62 = vor.u32 %v8019_v4, %v7245_v27  ;;  %4324 = vmatpush.bf16.msrb.mxu2 %v6992_v49  ;;  %v4061_v27 = vadd.f32 %v4060_v45, %v4048_v37 }
 0x2a5   :  { %v6445_v48 = vld [vmem:[#allocation6 + $0x9b0] sm:$0xf0] }
 0x2a6   :  { %v7883_v31 = vld [vmem:[#allocation6 + $0xb94] sm:$0xf]  ;;  %v6448_v13 = vor.u32 %v7819_v42, %v6445_v48  ;;  %4337 = vmatpush.bf16.msrb.mxu3 %v7248_v62 }
 0x2a7   :  { %v6701_v63 = vld [vmem:[#allocation6 + $0xbb0] sm:$0xf0] }
 0x2a8   :  { %v7947_v14 = vld [vmem:[#allocation6 + $0xd94] sm:$0xf]  ;;  %v6704_v46 = vor.u32 %v7883_v31, %v6701_v63  ;;  %4299 = vmatpush.bf16.msrb.mxu0 %v6448_v13 }
 0x2a9   :  { %v6957_v15 = vld [vmem:[#allocation6 + $0xdb0] sm:$0xf0] }
 0x2aa   :  { %v8011_v16 = vld [vmem:[#allocation6 + $0xf94] sm:$0xf]  ;;  %v6960_v44 = vor.u32 %v7947_v14, %v6957_v15  ;;  %4312 = vmatpush.bf16.msrb.mxu1 %v6704_v46 }
 0x2ab   :  { %v7213_v17 = vld [vmem:[#allocation6 + $0xfb0] sm:$0xf0] }
 0x2ac   :  { %v7811_v47 = vld [vmem:[#allocation6 + $0x954] sm:$0xf]  ;;  %v7216_v52 = vor.u32 %v8011_v16, %v7213_v17  ;;  %4325 = vmatpush.bf16.msrb.mxu2 %v6960_v44  ;;  %v4073_v16 = vpop.f32.mrf.mxu2  ;;  %v4086_v17 = vpop.f32.mrf.mxu3 }
 0x2ad   :  { %v6413_v51 = vld [vmem:[#allocation6 + $0x970] sm:$0xf0]  ;;  %v4049_v44 = vpop.f32.mrf.mxu0 }
 0x2ae   :  { %v7875_v56 = vld [vmem:[#allocation6 + $0xb54] sm:$0xf]  ;;  %v6416_v18 = vor.u32 %v7811_v47, %v6413_v51  ;;  %4338 = vmatpush.bf16.msrb.mxu3 %v7216_v52  ;;  %v4074_v51 = vadd.f32 %v4073_v16, %v4061_v27  ;;  %v4062_v52 = vpop.f32.mrf.mxu1  ;;  %v5971_v27 = vld [vmem:[#allocation6 + $0x5d8] sm:$0xf] }
 0x2af   :  { %v6669_v9 = vld [vmem:[#allocation6 + $0xb70] sm:$0xf0]  ;;  %v7760_v44 = vld [vmem:[#allocation6 + $0x7b4] sm:$0xf0] }
 0x2b0   :  { %v7939_v20 = vld [vmem:[#allocation6 + $0xd54] sm:$0xf]  ;;  %v6672_v5 = vor.u32 %v7875_v56, %v6669_v9  ;;  %4300 = vmatpush.bf16.msrb.mxu0 %v6416_v18 }
 0x2b1   :  { %v6925_v2 = vld [vmem:[#allocation6 + $0xd70] sm:$0xf0] }
 0x2b2   :  { %v8003_v57 = vld [vmem:[#allocation6 + $0xf54] sm:$0xf]  ;;  %v6928_v59 = vor.u32 %v7939_v20, %v6925_v2  ;;  %4313 = vmatpush.bf16.msrb.mxu1 %v6672_v5 }
 0x2b3   :  { %v7181_v58 = vld [vmem:[#allocation6 + $0xf70] sm:$0xf0] }
 0x2b4   :  { %v7803_v35 = vld [vmem:[#allocation6 + $0x914] sm:$0xf]  ;;  %v7184_v6 = vor.u32 %v8003_v57, %v7181_v58  ;;  %4326 = vmatpush.bf16.msrb.mxu2 %v6928_v59  ;;  %v8648_v57 = vadd.f32 %v4086_v17, %v4074_v51  ;;  %v5683_v17 = vld [vmem:[#allocation6 + $0x398] sm:$0xf] }
 0x2b5   :  { %v6381_v53 = vld [vmem:[#allocation6 + $0x930] sm:$0xf0]  ;;  %v6195_v51 = vld [vmem:[#allocation6 + $0x798] sm:$0xf] }
 0x2b6   :  { %v7867_v33 = vld [vmem:[#allocation6 + $0xb14] sm:$0xf]  ;;  %v6384_v24 = vor.u32 %v7803_v35, %v6381_v53  ;;  %4339 = vmatpush.bf16.msrb.mxu3 %v7184_v6 }
 0x2b7   :  { %v6637_v7 = vld [vmem:[#allocation6 + $0xb30] sm:$0xf0] }
 0x2b8   :  { %v7931_v1 = vld [vmem:[#allocation6 + $0xd14] sm:$0xf]  ;;  %v6640_v11 = vor.u32 %v7867_v33, %v6637_v7  ;;  %4301 = vmatpush.bf16.msrb.mxu0 %v6384_v24 }
 0x2b9   :  { %v6893_v26 = vld [vmem:[#allocation6 + $0xd30] sm:$0xf0] }
 0x2ba   :  { %v7995_v28 = vld [vmem:[#allocation6 + $0xf14] sm:$0xf]  ;;  %v6896_v0 = vor.u32 %v7931_v1, %v6893_v26  ;;  %4314 = vmatpush.bf16.msrb.mxu1 %v6640_v11 }
 0x2bb   :  { %v7149_v29 = vld [vmem:[#allocation6 + $0xf30] sm:$0xf0] }
 0x2bc   :  { %v7795_v39 = vld [vmem:[#allocation6 + $0x8d4] sm:$0xf]  ;;  %v7152_v32 = vor.u32 %v7995_v28, %v7149_v29  ;;  %4327 = vmatpush.bf16.msrb.mxu2 %v6896_v0 }
 0x2bd   :  { %v6349_v30 = vld [vmem:[#allocation6 + $0x8f0] sm:$0xf0] }
 0x2be   :  { %v7859_v61 = vld [vmem:[#allocation6 + $0xad4] sm:$0xf]  ;;  %v6352_v41 = vor.u32 %v7795_v39, %v6349_v30  ;;  %4340 = vmatpush.bf16.msrb.mxu3 %v7152_v32  ;;  %v4075_v39 = vpop.f32.mrf.mxu2  ;;  %v4088_v30 = vpop.f32.mrf.mxu3  ;;  %v5459_v32 = vld [vmem:[#allocation6 + $0x1d8] sm:$0xf] }
 0x2bf   :  { %v6605_v23 = vld [vmem:[#allocation6 + $0xaf0] sm:$0xf0]  ;;  %v4099_v39 = vpop.f32.mrf.mxu0  ;;  %v4112_v30 = vpop.f32.mrf.mxu1 }
 0x2c0   :  { %v7923_v4 = vld [vmem:[#allocation6 + $0xcd4] sm:$0xf]  ;;  %v6608_v42 = vor.u32 %v7859_v61, %v6605_v23  ;;  %4302 = vmatpush.bf16.msrb.mxu0 %v6352_v41  ;;  %v7576_v61 = vld [vmem:[#allocation6 + $0x1f4] sm:$0xf0] }
 0x2c1   :  { %v6861_v21 = vld [vmem:[#allocation6 + $0xcf0] sm:$0xf0]  ;;  %v5715_v23 = vld [vmem:[#allocation6 + $0x3d8] sm:$0xf] }
 0x2c2   :  { %v7987_v40 = vld [vmem:[#allocation6 + $0xed4] sm:$0xf]  ;;  %v6864_v62 = vor.u32 %v7923_v4, %v6861_v21  ;;  %4315 = vmatpush.bf16.msrb.mxu1 %v6608_v42  ;;  %v7640_v4 = vld [vmem:[#allocation6 + $0x3f4] sm:$0xf0] }
 0x2c3   :  { %v7117_v60 = vld [vmem:[#allocation6 + $0xef0] sm:$0xf0]  ;;  %v6227_v41 = vld [vmem:[#allocation6 + $0x7d8] sm:$0xf] }
 0x2c4   :  { %v7787_v48 = vld [vmem:[#allocation6 + $0x894] sm:$0xf]  ;;  %v7120_v31 = vor.u32 %v7987_v40, %v7117_v60  ;;  %4328 = vmatpush.bf16.msrb.mxu2 %v6864_v62  ;;  %v7704_v60 = vld [vmem:[#allocation6 + $0x5f4] sm:$0xf0]  ;;  %v5460_v62 = vor.u32 %v7576_v61, %v5459_v32 }
 0x2c5   :  { %v6317_v49 = vld [vmem:[#allocation6 + $0x8b0] sm:$0xf0]  ;;  %v7768_v42 = vld [vmem:[#allocation6 + $0x7f4] sm:$0xf0] }
 0x2c6   :  { %v7851_v63 = vld [vmem:[#allocation6 + $0xa94] sm:$0xf]  ;;  %v6320_v56 = vor.u32 %v7787_v48, %v6317_v49  ;;  %4341 = vmatpush.bf16.msrb.mxu3 %v7120_v31  ;;  %v5716_v31 = vor.u32 %v7640_v4, %v5715_v23  ;;  %v6228_v16 = vor.u32 %v7768_v42, %v6227_v41  ;;  %v5331_v23 = vld [vmem:[#allocation6 + $0xd8] sm:$0xf] }
 0x2c7   :  { %v6573_v14 = vld [vmem:[#allocation6 + $0xab0] sm:$0xf0]  ;;  %v7544_v4 = vld [vmem:[#allocation6 + $0xf4] sm:$0xf0] }
 0x2c8   :  { %v7915_v15 = vld [vmem:[#allocation6 + $0xc94] sm:$0xf]  ;;  %v6576_v9 = vor.u32 %v7851_v63, %v6573_v14  ;;  %4303 = vmatpush.bf16.msrb.mxu0 %v6320_v56  ;;  %v5427_v63 = vld [vmem:[#allocation6 + $0x198] sm:$0xf] }
 0x2c9   :  { %v6829_v13 = vld [vmem:[#allocation6 + $0xcb0] sm:$0xf0]  ;;  %v7568_v14 = vld [vmem:[#allocation6 + $0x1b4] sm:$0xf0] }
 0x2ca   :  { %v7979_v46 = vld [vmem:[#allocation6 + $0xe94] sm:$0xf]  ;;  %v6832_v58 = vor.u32 %v7915_v15, %v6829_v13  ;;  %4316 = vmatpush.bf16.msrb.mxu1 %v6576_v9  ;;  %v5972_v15 = vor.u32 %v7704_v60, %v5971_v27  ;;  %v7632_v13 = vld [vmem:[#allocation6 + $0x3b4] sm:$0xf0]  ;;  %v5428_v52 = vor.u32 %v7568_v14, %v5427_v63 }
 0x2cb   :  { %v7085_v47 = vld [vmem:[#allocation6 + $0xeb0] sm:$0xf0]  ;;  %v5684_v56 = vor.u32 %v7632_v13, %v5683_v17  ;;  %v5395_v9 = vld [vmem:[#allocation6 + $0x158] sm:$0xf] }
 0x2cc   :  { %v7779_v20 = vld [vmem:[#allocation6 + $0x854] sm:$0xf]  ;;  %v7088_v18 = vor.u32 %v7979_v46, %v7085_v47  ;;  %4329 = vmatpush.bf16.msrb.mxu2 %v6832_v58  ;;  %v5939_v46 = vld [vmem:[#allocation6 + $0x598] sm:$0xf]  ;;  %v6196_v58 = vor.u32 %v7760_v44, %v6195_v51  ;;  %v4138_v51 = vpop.f32.mrf.mxu3 }
 0x2cd   :  { %v6285_v2 = vld [vmem:[#allocation6 + $0x870] sm:$0xf0]  ;;  %v7696_v47 = vld [vmem:[#allocation6 + $0x5b4] sm:$0xf0] }
 0x2ce   :  { %v7843_v5 = vld [vmem:[#allocation6 + $0xa54] sm:$0xf]  ;;  %v6288_v7 = vor.u32 %v7779_v20, %v6285_v2  ;;  %4342 = vmatpush.bf16.msrb.mxu3 %v7088_v18  ;;  %v7560_v20 = vld [vmem:[#allocation6 + $0x174] sm:$0xf0]  ;;  %v5940_v2 = vor.u32 %v7696_v47, %v5939_v46  ;;  %v4125_v47 = vpop.f32.mrf.mxu2 }
 0x2cf   :  { %v6541_v12 = vld [vmem:[#allocation6 + $0xa70] sm:$0xf0]  ;;  %v5651_v18 = vld [vmem:[#allocation6 + $0x358] sm:$0xf] }
 0x2d0   :  { %v7907_v35 = vld [vmem:[#allocation6 + $0xc54] sm:$0xf]  ;;  %v6544_v1 = vor.u32 %v7843_v5, %v6541_v12  ;;  %4304 = vmatpush.bf16.msrb.mxu0 %v6288_v7  ;;  %v7624_v5 = vld [vmem:[#allocation6 + $0x374] sm:$0xf0] }
 0x2d1   :  { %v6797_v53 = vld [vmem:[#allocation6 + $0xc70] sm:$0xf0]  ;;  %v5907_v12 = vld [vmem:[#allocation6 + $0x558] sm:$0xf] }
 0x2d2   :  { %v7971_v59 = vld [vmem:[#allocation6 + $0xe54] sm:$0xf]  ;;  %v6800_v36 = vor.u32 %v7907_v35, %v6797_v53  ;;  %4317 = vmatpush.bf16.msrb.mxu1 %v6544_v1  ;;  %v7688_v35 = vld [vmem:[#allocation6 + $0x574] sm:$0xf0] }
 0x2d3   :  { %v7053_v6 = vld [vmem:[#allocation6 + $0xe70] sm:$0xf0]  ;;  %v6163_v53 = vld [vmem:[#allocation6 + $0x758] sm:$0xf] }
 0x2d4   :  { %v7771_v33 = vld [vmem:[#allocation6 + $0x814] sm:$0xf]  ;;  %v7056_v45 = vor.u32 %v7971_v59, %v7053_v6  ;;  %4330 = vmatpush.bf16.msrb.mxu2 %v6800_v36  ;;  %v7752_v59 = vld [vmem:[#allocation6 + $0x774] sm:$0xf0]  ;;  %v5396_v6 = vor.u32 %v7560_v20, %v5395_v9  ;;  %v4101_v20 = vpop.f32.mrf.mxu0 }
 0x2d5   :  { %v6253_v26 = vld [vmem:[#allocation6 + $0x830] sm:$0xf0]  ;;  %v5363_v7 = vld [vmem:[#allocation6 + $0x118] sm:$0xf] }
 0x2d6   :  { %v7835_v28 = vld [vmem:[#allocation6 + $0xa14] sm:$0xf]  ;;  %v6256_v21 = vor.u32 %v7771_v33, %v6253_v26  ;;  %4343 = vmatpush.bf16.msrb.mxu3 %v7056_v45  ;;  %v5652_v33 = vor.u32 %v7624_v5, %v5651_v18  ;;  %v7552_v1 = vld [vmem:[#allocation6 + $0x134] sm:$0xf0]  ;;  %v5908_v26 = vor.u32 %v7688_v35, %v5907_v12 }
 0x2d7   :  { %v6509_v29 = vld [vmem:[#allocation6 + $0xa30] sm:$0xf0]  ;;  %v7616_v36 = vld [vmem:[#allocation6 + $0x334] sm:$0xf0]  ;;  %v5364_v32 = vor.u32 %v7552_v1, %v5363_v7 }
 0x2d8   :  { %v7899_v37 = vld [vmem:[#allocation6 + $0xc14] sm:$0xf]  ;;  %v6512_v40 = vor.u32 %v7835_v28, %v6509_v29  ;;  %4305 = vmatpush.bf16.msrb.mxu0 %v6256_v21  ;;  %v6164_v28 = vor.u32 %v7752_v59, %v6163_v53  ;;  %v5619_v29 = vld [vmem:[#allocation6 + $0x318] sm:$0xf] }
 0x2d9   :  { %v6765_v24 = vld [vmem:[#allocation6 + $0xc30] sm:$0xf0]  ;;  %v5875_v45 = vld [vmem:[#allocation6 + $0x518] sm:$0xf]  ;;  %v5620_v61 = vor.u32 %v7616_v36, %v5619_v29 }
 0x2da   :  { %v7963_v11 = vld [vmem:[#allocation6 + $0xe14] sm:$0xf]  ;;  %v6768_v48 = vor.u32 %v7899_v37, %v6765_v24  ;;  %4318 = vmatpush.bf16.msrb.mxu1 %v6512_v40  ;;  %v7680_v37 = vld [vmem:[#allocation6 + $0x534] sm:$0xf0] }
 0x2db   :  { %v7021_v0 = vld [vmem:[#allocation6 + $0xe30] sm:$0xf0]  ;;  %4306 = vmatmul.bf16.vlgmr.msrb.gmra.mxu0 %v8580_v34  ;;  %v6131_v24 = vld [vmem:[#allocation6 + $0x718] sm:$0xf]  ;;  %v5876_v27 = vor.u32 %v7680_v37, %v5875_v45 }
 0x2dc   :  { %v7024_v49 = vor.u32 %v7963_v11, %v7021_v0  ;;  %4331 = vmatpush.bf16.msrb.mxu2 %v6768_v48  ;;  %4350 = vmatpush.bf16.msra.mxu0 %v5460_v62  ;;  %v7744_v11 = vld [vmem:[#allocation6 + $0x734] sm:$0xf0]  ;;  %v4100_v0 = vadd.f32 %v4099_v39, %v8648_v57 }
 0x2dd   :  { %4319 = vmatmul.bf16.vlgmr.msrb.gmra.mxu1 %v8582_v38  ;;  %v6132_v21 = vor.u32 %v7744_v11, %v6131_v24  ;;  %v5587_v40 = vld [vmem:[#allocation6 + $0x2d8] sm:$0xf] }
 0x2de   :  { %4344 = vmatpush.bf16.msrb.mxu3 %v7024_v49  ;;  %4363 = vmatpush.bf16.msra.mxu1 %v5716_v31  ;;  %v7608_v60 = vld [vmem:[#allocation6 + $0x2f4] sm:$0xf0]  ;;  %v4113_v42 = vadd.f32 %v4112_v30, %v4100_v0  ;;  %v5332_v31 = vor.u32 %v7544_v4, %v5331_v23  ;;  %v4127_v23 = vpop.f32.mrf.mxu2  ;;  %v4140_v4 = vpop.f32.mrf.mxu3 }
 0x2df   :  { %4332 = vmatmul.bf16.vlgmr.msrb.gmra.mxu2 %v8584_v43  ;;  %v5843_v41 = vld [vmem:[#allocation6 + $0x4d8] sm:$0xf]  ;;  %v5588_v63 = vor.u32 %v7608_v60, %v5587_v40  ;;  %v4151_v4 = vpop.f32.mrf.mxu0 }
 0x2e0   :  { %4376 = vmatpush.bf16.msra.mxu2 %v5972_v15  ;;  %4351 = vmatpush.bf16.msra.mxu0 %v5428_v52  ;;  %v7672_v48 = vld [vmem:[#allocation6 + $0x4f4] sm:$0xf0]  ;;  %v4126_v9 = vadd.f32 %v4125_v47, %v4113_v42 }
 0x2e1   :  { %4345 = vmatmul.bf16.vlgmr.msrb.gmra.mxu3 %v8586_v22  ;;  %v6099_v49 = vld [vmem:[#allocation6 + $0x6d8] sm:$0xf]  ;;  %v5844_v15 = vor.u32 %v7672_v48, %v5843_v41 }
 0x2e2   :  { %4389 = vmatpush.bf16.msra.mxu3 %v6228_v16  ;;  %4364 = vmatpush.bf16.msra.mxu1 %v5684_v56  ;;  %v7736_v62 = vld [vmem:[#allocation6 + $0x6f4] sm:$0xf0]  ;;  %v8655_v35 = vadd.f32 %v4138_v51, %v4126_v9 }
 0x2e3   :  { %v5299_v57 = vld [vmem:[#allocation6 + $0x98] sm:$0xf]  ;;  %v6100_v16 = vor.u32 %v7736_v62, %v6099_v49 }
 0x2e4   :  { %4377 = vmatpush.bf16.msra.mxu2 %v5940_v2  ;;  %4352 = vmatpush.bf16.msra.mxu0 %v5396_v6  ;;  %v7536_v14 = vld [vmem:[#allocation6 + $0xb4] sm:$0xf0]  ;;  %v4114_v2 = vpop.f32.mrf.mxu1 }
 0x2e5   :  { %v5555_v17 = vld [vmem:[#allocation6 + $0x298] sm:$0xf] }
 0x2e6   :  { %4390 = vmatpush.bf16.msra.mxu3 %v6196_v58  ;;  %4365 = vmatpush.bf16.msra.mxu1 %v5652_v33  ;;  %v7600_v13 = vld [vmem:[#allocation6 + $0x2b4] sm:$0xf0]  ;;  %v5300_v58 = vor.u32 %v7536_v14, %v5299_v57 }
 0x2e7   :  { %v5811_v46 = vld [vmem:[#allocation6 + $0x498] sm:$0xf]  ;;  %v5556_v18 = vor.u32 %v7600_v13, %v5555_v17 }
 0x2e8   :  { %4378 = vmatpush.bf16.msra.mxu2 %v5908_v26  ;;  %4353 = vmatpush.bf16.msra.mxu0 %v5364_v32  ;;  %v7664_v44 = vld [vmem:[#allocation6 + $0x4b4] sm:$0xf0] }
 0x2e9   :  { %v6067_v52 = vld [vmem:[#allocation6 + $0x698] sm:$0xf]  ;;  %v5812_v53 = vor.u32 %v7664_v44, %v5811_v46 }
 0x2ea   :  { %4391 = vmatpush.bf16.msra.mxu3 %v6164_v28  ;;  %4366 = vmatpush.bf16.msra.mxu1 %v5620_v61  ;;  %v7728_v56 = vld [vmem:[#allocation6 + $0x6b4] sm:$0xf0] }
 0x2eb   :  { %v5267_v5 = vld [vmem:[#allocation6 + $0x58] sm:$0xf]  ;;  %v6068_v59 = vor.u32 %v7728_v56, %v6067_v52 }
 0x2ec   :  { %4379 = vmatpush.bf16.msra.mxu2 %v5876_v27  ;;  %4354 = vmatpush.bf16.msra.mxu0 %v5332_v31  ;;  %v7528_v12 = vld [vmem:[#allocation6 + $0x74] sm:$0xf0] }
 0x2ed   :  { %v5523_v6 = vld [vmem:[#allocation6 + $0x258] sm:$0xf]  ;;  %v5268_v36 = vor.u32 %v7528_v12, %v5267_v5 }
 0x2ee   :  { %4392 = vmatpush.bf16.msra.mxu3 %v6132_v21  ;;  %4367 = vmatpush.bf16.msra.mxu1 %v5588_v63  ;;  %v7592_v33 = vld [vmem:[#allocation6 + $0x274] sm:$0xf0] }
 0x2ef   :  { %v5779_v7 = vld [vmem:[#allocation6 + $0x458] sm:$0xf]  ;;  %v5524_v45 = vor.u32 %v7592_v33, %v5523_v6 }
 0x2f0   :  { %4380 = vmatpush.bf16.msra.mxu2 %v5844_v15  ;;  %v7656_v1 = vld [vmem:[#allocation6 + $0x474] sm:$0xf0]  ;;  %4355 = vmatpush.bf16.msra.mxu0 %v5300_v58 }
 0x2f1   :  { %v6035_v26 = vld [vmem:[#allocation6 + $0x658] sm:$0xf]  ;;  %v5780_v39 = vor.u32 %v7656_v1, %v5779_v7 }
 0x2f2   :  { %4393 = vmatpush.bf16.msra.mxu3 %v6100_v16  ;;  %v7720_v28 = vld [vmem:[#allocation6 + $0x674] sm:$0xf0]  ;;  %4368 = vmatpush.bf16.msra.mxu1 %v5556_v18 }
 0x2f3   :  { %v5235_v29 = vld [vmem:[#allocation6 + $0x18] sm:$0xf]  ;;  %v6036_v30 = vor.u32 %v7720_v28, %v6035_v26 }
 0x2f4   :  { %v7520_v37 = vld [vmem:[#allocation6 + $0x34] sm:$0xf0]  ;;  %4381 = vmatpush.bf16.msra.mxu2 %v5812_v53  ;;  %4356 = vmatpush.bf16.msra.mxu0 %v5268_v36  ;;  %v1154_v36 = vperm.slane %v8645_v3, 4 }
 0x2f5   :  { %v5491_v24 = vld [vmem:[#allocation6 + $0x218] sm:$0xf]  ;;  %v5236_v48 = vor.u32 %v7520_v37, %v5235_v29 }
 0x2f6   :  { %v7584_v11 = vld [vmem:[#allocation6 + $0x234] sm:$0xf0]  ;;  %4394 = vmatpush.bf16.msra.mxu3 %v6068_v59  ;;  %4369 = vmatpush.bf16.msra.mxu1 %v5524_v45 }
 0x2f7   :  { %v5747_v0 = vld [vmem:[#allocation6 + $0x418] sm:$0xf]  ;;  %v5492_v49 = vor.u32 %v7584_v11, %v5491_v24 }
 0x2f8   :  { %v7648_v32 = vld [vmem:[#allocation6 + $0x434] sm:$0xf0]  ;;  %4382 = vmatpush.bf16.msra.mxu2 %v5780_v39  ;;  %4357 = vmatpush.bf16.msra.mxu0 %v5236_v48 }
 0x2f9   :  { %v6003_v61 = vld [vmem:[#allocation6 + $0x618] sm:$0xf]  ;;  %v5748_v57 = vor.u32 %v7648_v32, %v5747_v0 }
 0x2fa   :  { %v7712_v27 = vld [vmem:[#allocation6 + $0x634] sm:$0xf0]  ;;  %4395 = vmatpush.bf16.msra.mxu3 %v6036_v30  ;;  %4370 = vmatpush.bf16.msra.mxu1 %v5492_v49 }
 0x2fb   :  { %v6483_v21 = vld [vmem:[#allocation6 + $0x9d8] sm:$0xf]  ;;  %v6004_v14 = vor.u32 %v7712_v27, %v6003_v61  ;;  %4358 = vmatmul.bf16.vlgmr.msra.gmra.mxu0 %v8556_v10  ;;  %v4164_v27 = vpop.f32.mrf.mxu1 }
 0x2fc   :  { %v7832_v40 = vld [vmem:[#allocation6 + $0x9f4] sm:$0xf0]  ;;  %4383 = vmatpush.bf16.msra.mxu2 %v5748_v57 }
 0x2fd   :  { %v6739_v60 = vld [vmem:[#allocation6 + $0xbd8] sm:$0xf]  ;;  %v6484_v15 = vor.u32 %v7832_v40, %v6483_v21  ;;  %4371 = vmatmul.bf16.vlgmr.msra.gmra.mxu1 %v8558_v54  ;;  %v4152_v21 = vadd.f32 %v4151_v4, %v1154_v36 }
 0x2fe   :  { %v7896_v41 = vld [vmem:[#allocation6 + $0xbf4] sm:$0xf0]  ;;  %4396 = vmatpush.bf16.msra.mxu3 %v6004_v14 }
 0x2ff   :  { %v6995_v42 = vld [vmem:[#allocation6 + $0xdd8] sm:$0xf]  ;;  %v6740_v16 = vor.u32 %v7896_v41, %v6739_v60  ;;  %4402 = vmatpush.bf16.msrb.mxu0 %v6484_v15  ;;  %4384 = vmatmul.bf16.vlgmr.msra.gmra.mxu2 %v8560_v55 }
 0x300   :  { %v7960_v62 = vld [vmem:[#allocation6 + $0xdf4] sm:$0xf0] }
 0x301   :  { %v7251_v31 = vld [vmem:[#allocation6 + $0xfd8] sm:$0xf]  ;;  %v6996_v46 = vor.u32 %v7960_v62, %v6995_v42  ;;  %4415 = vmatpush.bf16.msrb.mxu1 %v6740_v16  ;;  %4397 = vmatmul.bf16.vlgmr.msra.gmra.mxu3 %v8562_v8 }
 0x302   :  { %v8024_v63 = vld [vmem:[#allocation6 + $0xff4] sm:$0xf0] }
 0x303   :  { %v6451_v17 = vld [vmem:[#allocation6 + $0x998] sm:$0xf]  ;;  %v7252_v47 = vor.u32 %v8024_v63, %v7251_v31  ;;  %4428 = vmatpush.bf16.msrb.mxu2 %v6996_v46  ;;  %v4165_v63 = vadd.f32 %v4164_v27, %v4152_v21 }
 0x304   :  { %v7824_v13 = vld [vmem:[#allocation6 + $0x9b4] sm:$0xf0] }
 0x305   :  { %v6707_v51 = vld [vmem:[#allocation6 + $0xb98] sm:$0xf]  ;;  %v6452_v2 = vor.u32 %v7824_v13, %v6451_v17  ;;  %4441 = vmatpush.bf16.msrb.mxu3 %v7252_v47 }
 0x306   :  { %v7888_v44 = vld [vmem:[#allocation6 + $0xbb4] sm:$0xf0] }
 0x307   :  { %v6963_v52 = vld [vmem:[#allocation6 + $0xd98] sm:$0xf]  ;;  %v6708_v58 = vor.u32 %v7888_v44, %v6707_v51  ;;  %4403 = vmatpush.bf16.msrb.mxu0 %v6452_v2 }
 0x308   :  { %v7952_v56 = vld [vmem:[#allocation6 + $0xdb4] sm:$0xf0] }
 0x309   :  { %v7219_v9 = vld [vmem:[#allocation6 + $0xf98] sm:$0xf]  ;;  %v6964_v12 = vor.u32 %v7952_v56, %v6963_v52  ;;  %4416 = vmatpush.bf16.msrb.mxu1 %v6708_v58 }
 0x30a   :  { %v8016_v20 = vld [vmem:[#allocation6 + $0xfb4] sm:$0xf0] }
 0x30b   :  { %v6419_v18 = vld [vmem:[#allocation6 + $0x958] sm:$0xf]  ;;  %v7220_v53 = vor.u32 %v8016_v20, %v7219_v9  ;;  %4429 = vmatpush.bf16.msrb.mxu2 %v6964_v12  ;;  %v4177_v9 = vpop.f32.mrf.mxu2  ;;  %v4190_v20 = vpop.f32.mrf.mxu3 }
 0x30c   :  { %v7816_v5 = vld [vmem:[#allocation6 + $0x974] sm:$0xf0]  ;;  %v4153_v12 = vpop.f32.mrf.mxu0 }
 0x30d   :  { %v6675_v59 = vld [vmem:[#allocation6 + $0xb58] sm:$0xf]  ;;  %v6420_v28 = vor.u32 %v7816_v5, %v6419_v18  ;;  %4442 = vmatpush.bf16.msrb.mxu3 %v7220_v53  ;;  %v4178_v5 = vadd.f32 %v4177_v9, %v4165_v63  ;;  %v4166_v53 = vpop.f32.mrf.mxu1  ;;  %v7700_v63 = vld [vmem:[#allocation6 + $0x5dc] sm:$0xf] }
 0x30e   :  { %v7880_v6 = vld [vmem:[#allocation6 + $0xb74] sm:$0xf0]  ;;  %v6197_v12 = vld [vmem:[#allocation6 + $0x7b8] sm:$0xf0] }
 0x30f   :  { %v6931_v33 = vld [vmem:[#allocation6 + $0xd58] sm:$0xf]  ;;  %v6676_v29 = vor.u32 %v7880_v6, %v6675_v59  ;;  %4404 = vmatpush.bf16.msrb.mxu0 %v6420_v28 }
 0x310   :  { %v7944_v7 = vld [vmem:[#allocation6 + $0xd74] sm:$0xf0] }
 0x311   :  { %v7187_v1 = vld [vmem:[#allocation6 + $0xf58] sm:$0xf]  ;;  %v6932_v24 = vor.u32 %v7944_v7, %v6931_v33  ;;  %4417 = vmatpush.bf16.msrb.mxu1 %v6676_v29 }
 0x312   :  { %v8008_v26 = vld [vmem:[#allocation6 + $0xf74] sm:$0xf0] }
 0x313   :  { %v6387_v45 = vld [vmem:[#allocation6 + $0x918] sm:$0xf]  ;;  %v7188_v11 = vor.u32 %v8008_v26, %v7187_v1  ;;  %4430 = vmatpush.bf16.msrb.mxu2 %v6932_v24  ;;  %v8662_v1 = vadd.f32 %v4190_v20, %v4178_v5  ;;  %v7628_v20 = vld [vmem:[#allocation6 + $0x39c] sm:$0xf] }
 0x314   :  { %v7808_v37 = vld [vmem:[#allocation6 + $0x934] sm:$0xf0]  ;;  %v7756_v5 = vld [vmem:[#allocation6 + $0x79c] sm:$0xf] }
 0x315   :  { %v6643_v39 = vld [vmem:[#allocation6 + $0xb18] sm:$0xf]  ;;  %v6388_v40 = vor.u32 %v7808_v37, %v6387_v45  ;;  %4443 = vmatpush.bf16.msrb.mxu3 %v7188_v11 }
 0x316   :  { %v7872_v30 = vld [vmem:[#allocation6 + $0xb34] sm:$0xf0] }
 0x317   :  { %v6899_v0 = vld [vmem:[#allocation6 + $0xd18] sm:$0xf]  ;;  %v6644_v60 = vor.u32 %v7872_v30, %v6643_v39  ;;  %4405 = vmatpush.bf16.msrb.mxu0 %v6388_v40 }
 0x318   :  { %v7936_v32 = vld [vmem:[#allocation6 + $0xd34] sm:$0xf0] }
 0x319   :  { %v7155_v61 = vld [vmem:[#allocation6 + $0xf18] sm:$0xf]  ;;  %v6900_v42 = vor.u32 %v7936_v32, %v6899_v0  ;;  %4418 = vmatpush.bf16.msrb.mxu1 %v6644_v60 }
 0x31a   :  { %v8000_v23 = vld [vmem:[#allocation6 + $0xf34] sm:$0xf0] }
 0x31b   :  { %v6355_v3 = vld [vmem:[#allocation6 + $0x8d8] sm:$0xf]  ;;  %v7156_v48 = vor.u32 %v8000_v23, %v7155_v61  ;;  %4431 = vmatpush.bf16.msrb.mxu2 %v6900_v42 }
 0x31c   :  { %v7800_v41 = vld [vmem:[#allocation6 + $0x8f4] sm:$0xf0] }
 0x31d   :  { %v6611_v49 = vld [vmem:[#allocation6 + $0xad8] sm:$0xf]  ;;  %v6356_v16 = vor.u32 %v7800_v41, %v6355_v3  ;;  %4444 = vmatpush.bf16.msrb.mxu3 %v7156_v48  ;;  %v4179_v3 = vpop.f32.mrf.mxu2  ;;  %v4192_v41 = vpop.f32.mrf.mxu3  ;;  %v7572_v48 = vld [vmem:[#allocation6 + $0x1dc] sm:$0xf] }
 0x31e   :  { %v7864_v62 = vld [vmem:[#allocation6 + $0xaf4] sm:$0xf0]  ;;  %v4203_v3 = vpop.f32.mrf.mxu0  ;;  %v4216_v41 = vpop.f32.mrf.mxu1 }
 0x31f   :  { %v6867_v31 = vld [vmem:[#allocation6 + $0xcd8] sm:$0xf]  ;;  %v6612_v17 = vor.u32 %v7864_v62, %v6611_v49  ;;  %4406 = vmatpush.bf16.msrb.mxu0 %v6356_v16  ;;  %v5461_v49 = vld [vmem:[#allocation6 + $0x1f8] sm:$0xf0] }
 0x320   :  { %v7928_v57 = vld [vmem:[#allocation6 + $0xcf4] sm:$0xf0]  ;;  %v7636_v62 = vld [vmem:[#allocation6 + $0x3dc] sm:$0xf] }
 0x321   :  { %v7123_v14 = vld [vmem:[#allocation6 + $0xed8] sm:$0xf]  ;;  %v6868_v47 = vor.u32 %v7928_v57, %v6867_v31  ;;  %4419 = vmatpush.bf16.msrb.mxu1 %v6612_v17  ;;  %v5717_v31 = vld [vmem:[#allocation6 + $0x3f8] sm:$0xf0] }
 0x322   :  { %v7992_v15 = vld [vmem:[#allocation6 + $0xef4] sm:$0xf0]  ;;  %v7764_v16 = vld [vmem:[#allocation6 + $0x7dc] sm:$0xf] }
 0x323   :  { %v6323_v13 = vld [vmem:[#allocation6 + $0x898] sm:$0xf]  ;;  %v7124_v51 = vor.u32 %v7992_v15, %v7123_v14  ;;  %4432 = vmatpush.bf16.msrb.mxu2 %v6868_v47  ;;  %v5973_v15 = vld [vmem:[#allocation6 + $0x5f8] sm:$0xf0]  ;;  %v5464_v47 = vor.u32 %v7572_v48, %v5461_v49 }
 0x324   :  { %v7792_v46 = vld [vmem:[#allocation6 + $0x8b4] sm:$0xf0]  ;;  %v6229_v17 = vld [vmem:[#allocation6 + $0x7f8] sm:$0xf0] }
 0x325   :  { %v6579_v44 = vld [vmem:[#allocation6 + $0xa98] sm:$0xf]  ;;  %v6324_v59 = vor.u32 %v7792_v46, %v6323_v13  ;;  %4445 = vmatpush.bf16.msrb.mxu3 %v7124_v51  ;;  %v5720_v51 = vor.u32 %v7636_v62, %v5717_v31  ;;  %v6232_v9 = vor.u32 %v7764_v16, %v6229_v17  ;;  %v7540_v62 = vld [vmem:[#allocation6 + $0xdc] sm:$0xf] }
 0x326   :  { %v7856_v52 = vld [vmem:[#allocation6 + $0xab4] sm:$0xf0]  ;;  %v5333_v31 = vld [vmem:[#allocation6 + $0xf8] sm:$0xf0] }
 0x327   :  { %v6835_v56 = vld [vmem:[#allocation6 + $0xc98] sm:$0xf]  ;;  %v6580_v6 = vor.u32 %v7856_v52, %v6579_v44  ;;  %4407 = vmatpush.bf16.msrb.mxu0 %v6324_v59  ;;  %v7564_v44 = vld [vmem:[#allocation6 + $0x19c] sm:$0xf] }
 0x328   :  { %v7920_v2 = vld [vmem:[#allocation6 + $0xcb4] sm:$0xf0]  ;;  %v5429_v52 = vld [vmem:[#allocation6 + $0x1b8] sm:$0xf0] }
 0x329   :  { %v7091_v58 = vld [vmem:[#allocation6 + $0xe98] sm:$0xf]  ;;  %v6836_v26 = vor.u32 %v7920_v2, %v6835_v56  ;;  %4420 = vmatpush.bf16.msrb.mxu1 %v6580_v6  ;;  %v5976_v56 = vor.u32 %v7700_v63, %v5973_v15  ;;  %v5685_v2 = vld [vmem:[#allocation6 + $0x3b8] sm:$0xf0]  ;;  %v5432_v53 = vor.u32 %v7564_v44, %v5429_v52 }
 0x32a   :  { %v7984_v18 = vld [vmem:[#allocation6 + $0xeb4] sm:$0xf0]  ;;  %v5688_v59 = vor.u32 %v7628_v20, %v5685_v2  ;;  %v7556_v6 = vld [vmem:[#allocation6 + $0x15c] sm:$0xf] }
 0x32b   :  { %v6291_v33 = vld [vmem:[#allocation6 + $0x858] sm:$0xf]  ;;  %v7092_v28 = vor.u32 %v7984_v18, %v7091_v58  ;;  %4433 = vmatpush.bf16.msrb.mxu2 %v6836_v26  ;;  %v7692_v58 = vld [vmem:[#allocation6 + $0x59c] sm:$0xf]  ;;  %v6200_v26 = vor.u32 %v7756_v5, %v6197_v12  ;;  %v4242_v5 = vpop.f32.mrf.mxu3 }
 0x32c   :  { %v7784_v7 = vld [vmem:[#allocation6 + $0x874] sm:$0xf0]  ;;  %v5941_v18 = vld [vmem:[#allocation6 + $0x5b8] sm:$0xf0] }
 0x32d   :  { %v6547_v29 = vld [vmem:[#allocation6 + $0xa58] sm:$0xf]  ;;  %v6292_v30 = vor.u32 %v7784_v7, %v6291_v33  ;;  %4446 = vmatpush.bf16.msrb.mxu3 %v7092_v28  ;;  %v5397_v33 = vld [vmem:[#allocation6 + $0x178] sm:$0xf0]  ;;  %v5944_v7 = vor.u32 %v7692_v58, %v5941_v18  ;;  %v4229_v18 = vpop.f32.mrf.mxu2 }
 0x32e   :  { %v7848_v36 = vld [vmem:[#allocation6 + $0xa74] sm:$0xf0]  ;;  %v7620_v28 = vld [vmem:[#allocation6 + $0x35c] sm:$0xf] }
 0x32f   :  { %v6803_v45 = vld [vmem:[#allocation6 + $0xc58] sm:$0xf]  ;;  %v6548_v0 = vor.u32 %v7848_v36, %v6547_v29  ;;  %4408 = vmatpush.bf16.msrb.mxu0 %v6292_v30  ;;  %v5653_v29 = vld [vmem:[#allocation6 + $0x378] sm:$0xf0] }
 0x330   :  { %v7912_v37 = vld [vmem:[#allocation6 + $0xc74] sm:$0xf0]  ;;  %v7684_v36 = vld [vmem:[#allocation6 + $0x55c] sm:$0xf] }
 0x331   :  { %v7059_v24 = vld [vmem:[#allocation6 + $0xe58] sm:$0xf]  ;;  %v6804_v4 = vor.u32 %v7912_v37, %v6803_v45  ;;  %4421 = vmatpush.bf16.msrb.mxu1 %v6548_v0  ;;  %v5909_v45 = vld [vmem:[#allocation6 + $0x578] sm:$0xf0] }
 0x332   :  { %v7976_v11 = vld [vmem:[#allocation6 + $0xe74] sm:$0xf0]  ;;  %v7748_v37 = vld [vmem:[#allocation6 + $0x75c] sm:$0xf] }
 0x333   :  { %v6259_v39 = vld [vmem:[#allocation6 + $0x818] sm:$0xf]  ;;  %v7060_v27 = vor.u32 %v7976_v11, %v7059_v24  ;;  %4434 = vmatpush.bf16.msrb.mxu2 %v6804_v4  ;;  %v6165_v24 = vld [vmem:[#allocation6 + $0x778] sm:$0xf0]  ;;  %v5400_v11 = vor.u32 %v7556_v6, %v5397_v33  ;;  %v4205_v33 = vpop.f32.mrf.mxu0 }
 0x334   :  { %v7776_v32 = vld [vmem:[#allocation6 + $0x834] sm:$0xf0]  ;;  %v7548_v30 = vld [vmem:[#allocation6 + $0x11c] sm:$0xf] }
 0x335   :  { %v6515_v61 = vld [vmem:[#allocation6 + $0xa18] sm:$0xf]  ;;  %v6260_v57 = vor.u32 %v7776_v32, %v6259_v39  ;;  %4447 = vmatpush.bf16.msrb.mxu3 %v7060_v27  ;;  %v5656_v39 = vor.u32 %v7620_v28, %v5653_v29  ;;  %v5365_v0 = vld [vmem:[#allocation6 + $0x138] sm:$0xf0]  ;;  %v5912_v32 = vor.u32 %v7684_v36, %v5909_v45 }
 0x336   :  { %v7840_v23 = vld [vmem:[#allocation6 + $0xa34] sm:$0xf0]  ;;  %v5621_v4 = vld [vmem:[#allocation6 + $0x338] sm:$0xf0]  ;;  %v5368_v48 = vor.u32 %v7548_v30, %v5365_v0 }
 0x337   :  { %v6771_v21 = vld [vmem:[#allocation6 + $0xc18] sm:$0xf]  ;;  %v6516_v14 = vor.u32 %v7840_v23, %v6515_v61  ;;  %4409 = vmatpush.bf16.msrb.mxu0 %v6260_v57  ;;  %v6168_v61 = vor.u32 %v7748_v37, %v6165_v24  ;;  %v7612_v23 = vld [vmem:[#allocation6 + $0x31c] sm:$0xf] }
 0x338   :  { %v7904_v40 = vld [vmem:[#allocation6 + $0xc34] sm:$0xf0]  ;;  %v7676_v27 = vld [vmem:[#allocation6 + $0x51c] sm:$0xf]  ;;  %v5624_v49 = vor.u32 %v7612_v23, %v5621_v4 }
 0x339   :  { %v7027_v60 = vld [vmem:[#allocation6 + $0xe18] sm:$0xf]  ;;  %v6772_v13 = vor.u32 %v7904_v40, %v6771_v21  ;;  %4422 = vmatpush.bf16.msrb.mxu1 %v6516_v14  ;;  %v5877_v21 = vld [vmem:[#allocation6 + $0x538] sm:$0xf0] }
 0x33a   :  { %v7968_v42 = vld [vmem:[#allocation6 + $0xe34] sm:$0xf0]  ;;  %4410 = vmatmul.bf16.vlgmr.msrb.gmra.mxu0 %v8580_v34  ;;  %v7740_v40 = vld [vmem:[#allocation6 + $0x71c] sm:$0xf]  ;;  %v5880_v63 = vor.u32 %v7676_v27, %v5877_v21 }
 0x33b   :  { %v7028_v46 = vor.u32 %v7968_v42, %v7027_v60  ;;  %4435 = vmatpush.bf16.msrb.mxu2 %v6772_v13  ;;  %4454 = vmatpush.bf16.msra.mxu0 %v5464_v47  ;;  %v6133_v60 = vld [vmem:[#allocation6 + $0x738] sm:$0xf0]  ;;  %v4204_v42 = vadd.f32 %v4203_v3, %v8662_v1 }
 0x33c   :  { %4423 = vmatmul.bf16.vlgmr.msrb.gmra.mxu1 %v8582_v38  ;;  %v6136_v57 = vor.u32 %v7740_v40, %v6133_v60  ;;  %v7604_v14 = vld [vmem:[#allocation6 + $0x2dc] sm:$0xf] }
 0x33d   :  { %4448 = vmatpush.bf16.msrb.mxu3 %v7028_v46  ;;  %4467 = vmatpush.bf16.msra.mxu1 %v5720_v51  ;;  %v5589_v15 = vld [vmem:[#allocation6 + $0x2f8] sm:$0xf0]  ;;  %v4217_v17 = vadd.f32 %v4216_v41, %v4204_v42  ;;  %v5336_v51 = vor.u32 %v7540_v62, %v5333_v31  ;;  %v4231_v62 = vpop.f32.mrf.mxu2  ;;  %v4244_v31 = vpop.f32.mrf.mxu3 }
 0x33e   :  { %4436 = vmatmul.bf16.vlgmr.msrb.gmra.mxu2 %v8584_v43  ;;  %v7668_v16 = vld [vmem:[#allocation6 + $0x4dc] sm:$0xf]  ;;  %v5592_v44 = vor.u32 %v7604_v14, %v5589_v15 }
 0x33f   :  { %4480 = vmatpush.bf16.msra.mxu2 %v5976_v56  ;;  %4455 = vmatpush.bf16.msra.mxu0 %v5432_v53  ;;  %v5845_v13 = vld [vmem:[#allocation6 + $0x4f8] sm:$0xf0]  ;;  %v4230_v6 = vadd.f32 %v4229_v18, %v4217_v17 }
 0x340   :  { %4449 = vmatmul.bf16.vlgmr.msrb.gmra.mxu3 %v8586_v22  ;;  %v7732_v46 = vld [vmem:[#allocation6 + $0x6dc] sm:$0xf]  ;;  %v5848_v56 = vor.u32 %v7668_v16, %v5845_v13 }
 0x341   :  { %4493 = vmatpush.bf16.msra.mxu3 %v6232_v9  ;;  %4468 = vmatpush.bf16.msra.mxu1 %v5688_v59  ;;  %v6101_v47 = vld [vmem:[#allocation6 + $0x6f8] sm:$0xf0]  ;;  %v8669_v45 = vadd.f32 %v4242_v5, %v4230_v6 }
 0x342   :  { %v7532_v1 = vld [vmem:[#allocation6 + $0x9c] sm:$0xf]  ;;  %v6104_v9 = vor.u32 %v7732_v46, %v6101_v47 }
 0x343   :  { %4481 = vmatpush.bf16.msra.mxu2 %v5944_v7  ;;  %4456 = vmatpush.bf16.msra.mxu0 %v5400_v11  ;;  %v5301_v52 = vld [vmem:[#allocation6 + $0xb8] sm:$0xf0]  ;;  %v4218_v7 = vpop.f32.mrf.mxu1 }
 0x344   :  { %v7596_v20 = vld [vmem:[#allocation6 + $0x29c] sm:$0xf] }
 0x345   :  { %4494 = vmatpush.bf16.msra.mxu3 %v6200_v26  ;;  %4469 = vmatpush.bf16.msra.mxu1 %v5656_v39  ;;  %v5557_v2 = vld [vmem:[#allocation6 + $0x2b8] sm:$0xf0]  ;;  %v5304_v26 = vor.u32 %v7532_v1, %v5301_v52 }
 0x346   :  { %v7660_v58 = vld [vmem:[#allocation6 + $0x49c] sm:$0xf]  ;;  %v5560_v28 = vor.u32 %v7596_v20, %v5557_v2 }
 0x347   :  { %4482 = vmatpush.bf16.msra.mxu2 %v5912_v32  ;;  %4457 = vmatpush.bf16.msra.mxu0 %v5368_v48  ;;  %v5813_v12 = vld [vmem:[#allocation6 + $0x4b8] sm:$0xf0] }
 0x348   :  { %v7724_v53 = vld [vmem:[#allocation6 + $0x69c] sm:$0xf]  ;;  %v5816_v37 = vor.u32 %v7660_v58, %v5813_v12 }
 0x349   :  { %4495 = vmatpush.bf16.msra.mxu3 %v6168_v61  ;;  %4470 = vmatpush.bf16.msra.mxu1 %v5624_v49  ;;  %v6069_v59 = vld [vmem:[#allocation6 + $0x6b8] sm:$0xf0] }
 0x34a   :  { %v7524_v29 = vld [vmem:[#allocation6 + $0x5c] sm:$0xf]  ;;  %v6072_v24 = vor.u32 %v7724_v53, %v6069_v59 }
 0x34b   :  { %4483 = vmatpush.bf16.msra.mxu2 %v5880_v63  ;;  %4458 = vmatpush.bf16.msra.mxu0 %v5336_v51  ;;  %v5269_v36 = vld [vmem:[#allocation6 + $0x78] sm:$0xf0] }
 0x34c   :  { %v7588_v11 = vld [vmem:[#allocation6 + $0x25c] sm:$0xf]  ;;  %v5272_v4 = vor.u32 %v7524_v29, %v5269_v36 }
 0x34d   :  { %4496 = vmatpush.bf16.msra.mxu3 %v6136_v57  ;;  %4471 = vmatpush.bf16.msra.mxu1 %v5592_v44  ;;  %v5525_v39 = vld [vmem:[#allocation6 + $0x278] sm:$0xf0] }
 0x34e   :  { %v7652_v30 = vld [vmem:[#allocation6 + $0x45c] sm:$0xf]  ;;  %v5528_v27 = vor.u32 %v7588_v11, %v5525_v39 }
 0x34f   :  { %4484 = vmatpush.bf16.msra.mxu2 %v5848_v56  ;;  %v5781_v0 = vld [vmem:[#allocation6 + $0x478] sm:$0xf0]  ;;  %4459 = vmatpush.bf16.msra.mxu0 %v5304_v26 }
 0x350   :  { %v7716_v32 = vld [vmem:[#allocation6 + $0x65c] sm:$0xf]  ;;  %v5784_v3 = vor.u32 %v7652_v30, %v5781_v0 }
 0x351   :  { %4497 = vmatpush.bf16.msra.mxu3 %v6104_v9  ;;  %v6037_v61 = vld [vmem:[#allocation6 + $0x678] sm:$0xf0]  ;;  %4472 = vmatpush.bf16.msra.mxu1 %v5560_v28 }
 0x352   :  { %v7516_v23 = vld [vmem:[#allocation6 + $0x1c] sm:$0xf]  ;;  %v6040_v41 = vor.u32 %v7716_v32, %v6037_v61 }
 0x353   :  { %v5237_v21 = vld [vmem:[#allocation6 + $0x38] sm:$0xf0]  ;;  %4485 = vmatpush.bf16.msra.mxu2 %v5816_v37  ;;  %4460 = vmatpush.bf16.msra.mxu0 %v5272_v4 }
 0x354   :  { %v7580_v40 = vld [vmem:[#allocation6 + $0x21c] sm:$0xf]  ;;  %v5240_v13 = vor.u32 %v7516_v23, %v5237_v21 }
 0x355   :  { %v5493_v60 = vld [vmem:[#allocation6 + $0x238] sm:$0xf0]  ;;  %4498 = vmatpush.bf16.msra.mxu3 %v6072_v24  ;;  %4473 = vmatpush.bf16.msra.mxu1 %v5528_v27 }
 0x356   :  { %v7644_v42 = vld [vmem:[#allocation6 + $0x41c] sm:$0xf]  ;;  %v5496_v46 = vor.u32 %v7580_v40, %v5493_v60 }
 0x357   :  { %v5749_v48 = vld [vmem:[#allocation6 + $0x438] sm:$0xf0]  ;;  %4486 = vmatpush.bf16.msra.mxu2 %v5784_v3  ;;  %4461 = vmatpush.bf16.msra.mxu0 %v5240_v13 }
 0x358   :  { %v7708_v49 = vld [vmem:[#allocation6 + $0x61c] sm:$0xf]  ;;  %v5752_v1 = vor.u32 %v7644_v42, %v5749_v48  ;;  %v8675_v48 = vpop.f32.mrf.mxu0 }
 0x359   :  { %v6005_v63 = vld [vmem:[#allocation6 + $0x638] sm:$0xf0]  ;;  %4499 = vmatpush.bf16.msra.mxu3 %v6040_v41  ;;  %4474 = vmatpush.bf16.msra.mxu1 %v5496_v46 }
 0x35a   :  { %v7828_v57 = vld [vmem:[#allocation6 + $0x9dc] sm:$0xf]  ;;  %v6008_v52 = vor.u32 %v7708_v49, %v6005_v63  ;;  %4462 = vmatmul.bf16.vlgmr.msra.gmra.mxu0 %v8556_v10 }
 0x35b   :  { %v6485_v14 = vld [vmem:[#allocation6 + $0x9f8] sm:$0xf0]  ;;  %4487 = vmatpush.bf16.msra.mxu2 %v5752_v1 }
 0x35c   :  { %v7892_v15 = vld [vmem:[#allocation6 + $0xbdc] sm:$0xf]  ;;  %v6488_v56 = vor.u32 %v7828_v57, %v6485_v14  ;;  %4475 = vmatmul.bf16.vlgmr.msra.gmra.mxu1 %v8558_v54 }
 0x35d   :  { %v6741_v16 = vld [vmem:[#allocation6 + $0xbf8] sm:$0xf0]  ;;  %4500 = vmatpush.bf16.msra.mxu3 %v6008_v52 }
 0x35e   :  { %v7956_v17 = vld [vmem:[#allocation6 + $0xddc] sm:$0xf]  ;;  %v6744_v9 = vor.u32 %v7892_v15, %v6741_v16  ;;  %4506 = vmatpush.bf16.msrb.mxu0 %v6488_v56  ;;  %4488 = vmatmul.bf16.vlgmr.msra.gmra.mxu2 %v8560_v55  ;;  %v8677_v55 = vpop.f32.mrf.mxu1 }
 0x35f   :  { %v6997_v47 = vld [vmem:[#allocation6 + $0xdf8] sm:$0xf0] }
 0x360   :  { %v8020_v51 = vld [vmem:[#allocation6 + $0xfdc] sm:$0xf]  ;;  %v7000_v58 = vor.u32 %v7956_v17, %v6997_v47  ;;  %4519 = vmatpush.bf16.msrb.mxu1 %v6744_v9  ;;  %4501 = vmatmul.bf16.vlgmr.msra.gmra.mxu3 %v8562_v8 }
 0x361   :  { %v7253_v44 = vld [vmem:[#allocation6 + $0xff8] sm:$0xf0] }
 0x362   :  { %v7820_v20 = vld [vmem:[#allocation6 + $0x99c] sm:$0xf]  ;;  %v7256_v18 = vor.u32 %v8020_v51, %v7253_v44  ;;  %4532 = vmatpush.bf16.msrb.mxu2 %v7000_v58  ;;  %v8679_v58 = vpop.f32.mrf.mxu2 }
 0x363   :  { %v6453_v2 = vld [vmem:[#allocation6 + $0x9b8] sm:$0xf0] }
 0x364   :  { %v7884_v5 = vld [vmem:[#allocation6 + $0xb9c] sm:$0xf]  ;;  %v6456_v7 = vor.u32 %v7820_v20, %v6453_v2  ;;  %4545 = vmatpush.bf16.msrb.mxu3 %v7256_v18  ;;  %v8681_v18 = vpop.f32.mrf.mxu3 }
 0x365   :  { %v6709_v12 = vld [vmem:[#allocation6 + $0xbb8] sm:$0xf0] }
 0x366   :  { %v7948_v53 = vld [vmem:[#allocation6 + $0xd9c] sm:$0xf]  ;;  %v6712_v26 = vor.u32 %v7884_v5, %v6709_v12  ;;  %4507 = vmatpush.bf16.msrb.mxu0 %v6456_v7 }
 0x367   :  { %v6965_v59 = vld [vmem:[#allocation6 + $0xdb8] sm:$0xf0] }
 0x368   :  { %v8012_v6 = vld [vmem:[#allocation6 + $0xf9c] sm:$0xf]  ;;  %v6968_v36 = vor.u32 %v7948_v53, %v6965_v59  ;;  %4520 = vmatpush.bf16.msrb.mxu1 %v6712_v26  ;;  %v4257_v59 = vpop.f32.mrf.mxu0 }
 0x369   :  { %v7221_v33 = vld [vmem:[#allocation6 + $0xfb8] sm:$0xf0] }
 0x36a   :  { %v7812_v28 = vld [vmem:[#allocation6 + $0x95c] sm:$0xf]  ;;  %v7224_v37 = vor.u32 %v8012_v6, %v7221_v33  ;;  %4533 = vmatpush.bf16.msrb.mxu2 %v6968_v36  ;;  %v4270_v6 = vpop.f32.mrf.mxu1 }
 0x36b   :  { %v6421_v29 = vld [vmem:[#allocation6 + $0x978] sm:$0xf0] }
 0x36c   :  { %v7876_v24 = vld [vmem:[#allocation6 + $0xb5c] sm:$0xf]  ;;  %v6424_v61 = vor.u32 %v7812_v28, %v6421_v29  ;;  %4546 = vmatpush.bf16.msrb.mxu3 %v7224_v37 }
 0x36d   :  { %v6677_v11 = vld [vmem:[#allocation6 + $0xb78] sm:$0xf0] }
 0x36e   :  { %v7940_v39 = vld [vmem:[#allocation6 + $0xd5c] sm:$0xf]  ;;  %v6680_v23 = vor.u32 %v7876_v24, %v6677_v11  ;;  %4508 = vmatpush.bf16.msrb.mxu0 %v6424_v61 }
 0x36f   :  { %v6933_v30 = vld [vmem:[#allocation6 + $0xd78] sm:$0xf0] }
 0x370   :  { %v8004_v0 = vld [vmem:[#allocation6 + $0xf5c] sm:$0xf]  ;;  %v6936_v21 = vor.u32 %v7940_v39, %v6933_v30  ;;  %4521 = vmatpush.bf16.msrb.mxu1 %v6680_v23 }
 0x371   :  { %v7189_v32 = vld [vmem:[#allocation6 + $0xf78] sm:$0xf0] }
 0x372   :  { %v7804_v4 = vld [vmem:[#allocation6 + $0x91c] sm:$0xf]  ;;  %v7192_v40 = vor.u32 %v8004_v0, %v7189_v32  ;;  %4534 = vmatpush.bf16.msrb.mxu2 %v6936_v21 }
 0x373   :  { %v6389_v27 = vld [vmem:[#allocation6 + $0x938] sm:$0xf0] }
 0x374   :  { %v7868_v10 = vld [vmem:[#allocation6 + $0xb1c] sm:$0xf]  ;;  %v6392_v8 = vor.u32 %v7804_v4, %v6389_v27  ;;  %4547 = vmatpush.bf16.msrb.mxu3 %v7192_v40 }
 0x375   :  { %v6645_v60 = vld [vmem:[#allocation6 + $0xb38] sm:$0xf0] }
 0x376   :  { %v7932_v54 = vld [vmem:[#allocation6 + $0xd1c] sm:$0xf]  ;;  %v6648_v49 = vor.u32 %v7868_v10, %v6645_v60  ;;  %4509 = vmatpush.bf16.msrb.mxu0 %v6392_v8 }
 0x377   :  { %v6901_v3 = vld [vmem:[#allocation6 + $0xd38] sm:$0xf0] }
 0x378   :  { %v7996_v41 = vld [vmem:[#allocation6 + $0xf1c] sm:$0xf]  ;;  %v6904_v63 = vor.u32 %v7932_v54, %v6901_v3  ;;  %4522 = vmatpush.bf16.msrb.mxu1 %v6648_v49  ;;  %v4283_v54 = vpop.f32.mrf.mxu2  ;;  %v4296_v3 = vpop.f32.mrf.mxu3 }
 0x379   :  { %v7157_v42 = vld [vmem:[#allocation6 + $0xf38] sm:$0xf0] }
 0x37a   :  { %v7796_v62 = vld [vmem:[#allocation6 + $0x8dc] sm:$0xf]  ;;  %v7160_v57 = vor.u32 %v7996_v41, %v7157_v42  ;;  %4535 = vmatpush.bf16.msrb.mxu2 %v6904_v63 }
 0x37b   :  { %v6357_v31 = vld [vmem:[#allocation6 + $0x8f8] sm:$0xf0] }
 0x37c   :  { %v7860_v14 = vld [vmem:[#allocation6 + $0xadc] sm:$0xf]  ;;  %v6360_v47 = vor.u32 %v7796_v62, %v6357_v31  ;;  %4548 = vmatpush.bf16.msrb.mxu3 %v7160_v57  ;;  %v8032_v57 = vld [vmem:[%s8913_s5 + $0x38] sm:$0xff] }
 0x37d   :  { %v6613_v15 = vld [vmem:[#allocation6 + $0xaf8] sm:$0xf0] }
 0x37e   :  { %v7924_v16 = vld [vmem:[#allocation6 + $0xcdc] sm:$0xf]  ;;  %v6616_v51 = vor.u32 %v7860_v14, %v6613_v15  ;;  %4510 = vmatpush.bf16.msrb.mxu0 %v6360_v47  ;;  %v8040_v14 = vld [vmem:[%s8913_s5 + $0x78] sm:$0xff]  ;;  %v8055_v47 = vld [vmem:[%s8913_s5 + $0xf0] sm:$0xff] }
 0x37f   :  { %v6869_v17 = vld [vmem:[#allocation6 + $0xcf8] sm:$0xf0]  ;;  %v8048_v15 = vld [vmem:[%s8913_s5 + $0xb8] sm:$0xff] }
 0x380   :  { %v7988_v13 = vld [vmem:[#allocation6 + $0xedc] sm:$0xf]  ;;  %v6872_v52 = vor.u32 %v7924_v16, %v6869_v17  ;;  %4523 = vmatpush.bf16.msrb.mxu1 %v6616_v51  ;;  %v8056_v16 = vld [vmem:[%s8913_s5 + $0xf8] sm:$0xff]  ;;  %v8031_v17 = vld [vmem:[%s8913_s5 + $0x30] sm:$0xff]  ;;  %v8753_v59 = vpop.f32.mrf.mxu3 }
 0x381   :  { %v7125_v46 = vld [vmem:[#allocation6 + $0xef8] sm:$0xf0]  ;;  %v8030_v51 = vld [vmem:[%s8913_s5 + $0x28] sm:$0xff] }
 0x382   :  { %v7788_v44 = vld [vmem:[#allocation6 + $0x89c] sm:$0xf]  ;;  %v7128_v56 = vor.u32 %v7988_v13, %v7125_v46  ;;  %4536 = vmatpush.bf16.msrb.mxu2 %v6872_v52  ;;  %v8039_v13 = vld [vmem:[%s8913_s5 + $0x70] sm:$0xff] }
 0x383   :  { %v6325_v1 = vld [vmem:[#allocation6 + $0x8b8] sm:$0xf0]  ;;  %v8047_v46 = vld [vmem:[%s8913_s5 + $0xb0] sm:$0xff] }
 0x384   :  { %v7852_v9 = vld [vmem:[#allocation6 + $0xa9c] sm:$0xf]  ;;  %v6328_v33 = vor.u32 %v7788_v44, %v6325_v1  ;;  %4549 = vmatpush.bf16.msrb.mxu3 %v7128_v56  ;;  %v8038_v44 = vld [vmem:[%s8913_s5 + $0x68] sm:$0xff] }
 0x385   :  { %v6581_v20 = vld [vmem:[#allocation6 + $0xab8] sm:$0xf0] }
 0x386   :  { %v7916_v2 = vld [vmem:[#allocation6 + $0xc9c] sm:$0xf]  ;;  %v6584_v7 = vor.u32 %v7852_v9, %v6581_v20  ;;  %4511 = vmatpush.bf16.msrb.mxu0 %v6328_v33  ;;  %v8028_v20 = vld [vmem:[%s8913_s5 + $0x18] sm:$0xff] }
 0x387   :  { %v6837_v5 = vld [vmem:[#allocation6 + $0xcb8] sm:$0xf0] }
 0x388   :  { %v7980_v12 = vld [vmem:[#allocation6 + $0xe9c] sm:$0xf]  ;;  %v6840_v29 = vor.u32 %v7916_v2, %v6837_v5  ;;  %4524 = vmatpush.bf16.msrb.mxu1 %v6584_v7  ;;  %v8036_v2 = vld [vmem:[%s8913_s5 + $0x58] sm:$0xff]  ;;  %v8027_v7 = vld [vmem:[%s8913_s5 + $0x10] sm:$0xff] }
 0x389   :  { %v7093_v53 = vld [vmem:[#allocation6 + $0xeb8] sm:$0xf0]  ;;  %v8044_v5 = vld [vmem:[%s8913_s5 + $0x98] sm:$0xff] }
 0x38a   :  { %v7780_v26 = vld [vmem:[#allocation6 + $0x85c] sm:$0xf]  ;;  %v7096_v36 = vor.u32 %v7980_v12, %v7093_v53  ;;  %4537 = vmatpush.bf16.msrb.mxu2 %v6840_v29  ;;  %v8052_v12 = vld [vmem:[%s8913_s5 + $0xd8] sm:$0xff]  ;;  %v8751_v53 = vpop.f32.mrf.mxu2  ;;  %v8051_v29 = vld [vmem:[%s8913_s5 + $0xd0] sm:$0xff] }
 0x38b   :  { %v6293_v28 = vld [vmem:[#allocation6 + $0x878] sm:$0xf0] }
 0x38c   :  { %v7844_v37 = vld [vmem:[#allocation6 + $0xa5c] sm:$0xf]  ;;  %v6296_v32 = vor.u32 %v7780_v26, %v6293_v28  ;;  %4550 = vmatpush.bf16.msrb.mxu3 %v7096_v36  ;;  %v8035_v26 = vld [vmem:[%s8913_s5 + $0x50] sm:$0xff]  ;;  %v8026_v36 = vld [vmem:[%s8913_s5 + $0x8] sm:$0xff] }
 0x38d   :  { %v6549_v24 = vld [vmem:[#allocation6 + $0xa78] sm:$0xf0]  ;;  %v8043_v28 = vld [vmem:[%s8913_s5 + $0x90] sm:$0xff] }
 0x38e   :  { %v7908_v11 = vld [vmem:[#allocation6 + $0xc5c] sm:$0xf]  ;;  %v6552_v61 = vor.u32 %v7844_v37, %v6549_v24  ;;  %4512 = vmatpush.bf16.msrb.mxu0 %v6296_v32  ;;  %v8034_v37 = vld [vmem:[%s8913_s5 + $0x48] sm:$0xff] }
 0x38f   :  { %v6805_v39 = vld [vmem:[#allocation6 + $0xc78] sm:$0xf0]  ;;  %v8042_v24 = vld [vmem:[%s8913_s5 + $0x88] sm:$0xff] }
 0x390   :  { %v7972_v30 = vld [vmem:[#allocation6 + $0xe5c] sm:$0xf]  ;;  %v6808_v27 = vor.u32 %v7908_v11, %v6805_v39  ;;  %4525 = vmatpush.bf16.msrb.mxu1 %v6552_v61  ;;  %v8050_v11 = vld [vmem:[%s8913_s5 + $0xc8] sm:$0xff]  ;;  %v4558_v61 = vmax.f32 %v8611_v50, 0.0  ;;  %v4561_v50 = vmax.f32 %v8655_v35, 0.0 }
 0x391   :  { %v7061_v0 = vld [vmem:[#allocation6 + $0xe78] sm:$0xf0] }
 0x392   :  { %v7772_v23 = vld [vmem:[#allocation6 + $0x81c] sm:$0xf]  ;;  %v7064_v21 = vor.u32 %v7972_v30, %v7061_v0  ;;  %4538 = vmatpush.bf16.msrb.mxu2 %v6808_v27  ;;  %v4335_v39 = vpop.f32.mrf.mxu2  ;;  %v4348_v30 = vpop.f32.mrf.mxu3  ;;  %v4566_v54 = vpack.c.bf16 %v4558_v61, %v4558_v61 }
 0x393   :  { %v6261_v4 = vld [vmem:[#allocation6 + $0x838] sm:$0xf0] }
 0x394   :  { %v7836_v40 = vld [vmem:[#allocation6 + $0xa1c] sm:$0xf]  ;;  %v6264_v49 = vor.u32 %v7772_v23, %v6261_v4  ;;  %4551 = vmatpush.bf16.msrb.mxu3 %v7064_v21  ;;  %v4559_v23 = vmax.f32 %v8625_v25, 0.0  ;;  %v8787_v4 = vld [vmem:[#allocation7] sm:$0xff]  ;;  %v8064_v25 = vld [vmem:[%s8913_s5 + $0x138] sm:$0xff] }
 0x395   :  { %v6517_v10 = vld [vmem:[#allocation6 + $0xa38] sm:$0xf0]  ;;  %v1155_v27 = vperm.slane %v8787_v4, 5 }
 0x396   :  { %v7900_v60 = vld [vmem:[#allocation6 + $0xc1c] sm:$0xf]  ;;  %v6520_v62 = vor.u32 %v7836_v40, %v6517_v10  ;;  %4513 = vmatpush.bf16.msrb.mxu0 %v6264_v49  ;;  %v4560_v10 = vmax.f32 %v8639_v19, 0.0  ;;  %v4567_v3 = vpack.c.bf16 %v4559_v23, %v4559_v23  ;;  %v8080_v19 = vld [vmem:[%s8913_s5 + $0x1b8] sm:$0xff]  ;;  %v8071_v49 = vld [vmem:[%s8913_s5 + $0x170] sm:$0xff] }
 0x397   :  { %v6773_v41 = vld [vmem:[#allocation6 + $0xc38] sm:$0xf0] }
 0x398   :  { %v7964_v42 = vld [vmem:[#allocation6 + $0xe1c] sm:$0xf]  ;;  %v6776_v31 = vor.u32 %v7900_v60, %v6773_v41  ;;  %4526 = vmatpush.bf16.msrb.mxu1 %v6520_v62  ;;  %v8072_v60 = vld [vmem:[%s8913_s5 + $0x178] sm:$0xff]  ;;  %v4256_v41 = vadd.f32 %v8675_v48, %v1155_v27  ;;  %v4568_v35 = vpack.c.bf16 %v4560_v10, %v4560_v10  ;;  %v8079_v62 = vld [vmem:[%s8913_s5 + $0x1b0] sm:$0xff] }
 0x399   :  { %v7029_v8 = vld [vmem:[#allocation6 + $0xe38] sm:$0xf0]  ;;  %4514 = vmatmul.bf16.vlgmr.msrb.gmra.mxu0 %v8580_v34  ;;  %v8046_v34 = vld [vmem:[%s8913_s5 + $0xa8] sm:$0xff] }
 0x39a   :  { %v7032_v63 = vor.u32 %v7964_v42, %v7029_v8  ;;  %4539 = vmatpush.bf16.msrb.mxu2 %v6776_v31  ;;  %5090 = vmatpush.bf16.msra.mxu0 %v8032_v57  ;;  %v8029_v1 = vld [vmem:[%s8913_s5 + $0x20] sm:$0xff]  ;;  %v4569_v42 = vpack.c.bf16 %v4561_v50, %v4561_v50  ;;  %v8063_v8 = vld [vmem:[%s8913_s5 + $0x130] sm:$0xff]  ;;  %v4269_v48 = vadd.f32 %v8677_v55, %v4256_v41  ;;  %v8062_v31 = vld [vmem:[%s8913_s5 + $0x128] sm:$0xff] }
 0x39b   :  { %4527 = vmatmul.bf16.vlgmr.msrb.gmra.mxu1 %v8582_v38  ;;  %v8054_v38 = vld [vmem:[%s8913_s5 + $0xe8] sm:$0xff]  ;;  %v8037_v52 = vld [vmem:[%s8913_s5 + $0x60] sm:$0xff]  ;;  %v8088_v50 = vld [vmem:[%s8913_s5 + $0x1f8] sm:$0xff] }
 0x39c   :  { %4552 = vmatpush.bf16.msrb.mxu3 %v7032_v63  ;;  %5103 = vmatpush.bf16.msra.mxu1 %v8040_v14  ;;  %v8045_v56 = vld [vmem:[%s8913_s5 + $0xa0] sm:$0xff]  ;;  %v8070_v63 = vld [vmem:[%s8913_s5 + $0x168] sm:$0xff]  ;;  %v4282_v57 = vadd.f32 %v8679_v58, %v4269_v48 }
 0x39d   :  { %4540 = vmatmul.bf16.vlgmr.msrb.gmra.mxu2 %v8584_v43  ;;  %v8723_v43 = vpop.f32.mrf.mxu0  ;;  %v8053_v9 = vld [vmem:[%s8913_s5 + $0xe0] sm:$0xff]  ;;  %v8078_v55 = vld [vmem:[%s8913_s5 + $0x1a8] sm:$0xff] }
 0x39e   :  { %5116 = vmatpush.bf16.msra.mxu2 %v8048_v15  ;;  %5091 = vmatpush.bf16.msra.mxu0 %v8031_v17  ;;  %v8025_v0 = vld [vmem:[%s8913_s5] sm:$0xff] }
 0x39f   :  { %4553 = vmatmul.bf16.vlgmr.msrb.gmra.mxu3 %v8586_v22  ;;  %v8725_v22 = vpop.f32.mrf.mxu1  ;;  %v8033_v32 = vld [vmem:[%s8913_s5 + $0x40] sm:$0xff] }
 0x3a0   :  { %5129 = vmatpush.bf16.msra.mxu3 %v8056_v16  ;;  %5104 = vmatpush.bf16.msra.mxu1 %v8039_v13  ;;  %v8041_v21 = vld [vmem:[%s8913_s5 + $0x80] sm:$0xff]  ;;  %v4295_v13 = vadd.f32 %v8681_v18, %v4282_v57 }
 0x3a1   :  { %v8049_v40 = vld [vmem:[%s8913_s5 + $0xc0] sm:$0xff] }
 0x3a2   :  { %5117 = vmatpush.bf16.msra.mxu2 %v8047_v46  ;;  %5092 = vmatpush.bf16.msra.mxu0 %v8030_v51  ;;  %v8061_v16 = vld [vmem:[%s8913_s5 + $0x120] sm:$0xff]  ;;  %v4308_v58 = vadd.f32 %v8723_v43, %v4295_v13  ;;  %v8068_v51 = vld [vmem:[%s8913_s5 + $0x158] sm:$0xff]  ;;  %v1157_v13 = vperm.slane %v8787_v4, 7 }
 0x3a3   :  { %v8069_v17 = vld [vmem:[%s8913_s5 + $0x160] sm:$0xff] }
 0x3a4   :  { %5130 = vmatpush.bf16.msra.mxu3 %v8055_v47  ;;  %5105 = vmatpush.bf16.msra.mxu1 %v8038_v44  ;;  %v8077_v46 = vld [vmem:[%s8913_s5 + $0x1a0] sm:$0xff]  ;;  %v8060_v47 = vld [vmem:[%s8913_s5 + $0x118] sm:$0xff]  ;;  %v4385_v44 = vpop.f32.mrf.mxu2  ;;  %v4321_v18 = vadd.f32 %v8725_v22, %v4308_v58  ;;  %v8075_v22 = vld [vmem:[%s8913_s5 + $0x190] sm:$0xff] }
 0x3a5   :  { %v4309_v6 = vpop.f32.mrf.mxu0 }
 0x3a6   :  { %5118 = vmatpush.bf16.msra.mxu2 %v8046_v34  ;;  %5093 = vmatpush.bf16.msra.mxu0 %v8029_v1  ;;  %v4398_v34 = vpop.f32.mrf.mxu3  ;;  %v8076_v1 = vld [vmem:[%s8913_s5 + $0x198] sm:$0xff] }
 0x3a7   :  { %v4322_v33 = vpop.f32.mrf.mxu1 }
 0x3a8   :  { %5131 = vmatpush.bf16.msra.mxu3 %v8054_v38  ;;  %5106 = vmatpush.bf16.msra.mxu1 %v8037_v52  ;;  %v8059_v52 = vld [vmem:[%s8913_s5 + $0x110] sm:$0xff]  ;;  %v8074_v33 = vld [vmem:[%s8913_s5 + $0x188] sm:$0xff] }
 0x3aa   :  { %5119 = vmatpush.bf16.msra.mxu2 %v8045_v56  ;;  %5094 = vmatpush.bf16.msra.mxu0 %v8028_v20  ;;  %v8067_v56 = vld [vmem:[%s8913_s5 + $0x150] sm:$0xff]  ;;  %v8058_v20 = vld [vmem:[%s8913_s5 + $0x108] sm:$0xff] }
 0x3ac   :  { %5132 = vmatpush.bf16.msra.mxu3 %v8053_v9  ;;  %5107 = vmatpush.bf16.msra.mxu1 %v8036_v2  ;;  %v4334_v9 = vadd.f32 %v8751_v53, %v4321_v18  ;;  %v8066_v2 = vld [vmem:[%s8913_s5 + $0x148] sm:$0xff]  ;;  %v1156_v53 = vperm.slane %v8787_v4, 6  ;;  %v8110_v4 = vld [vmem:[#allocation9] ss:$0 sm:$0xff] }
 0x3ad   :  { %v4359_v14 = vpop.f32.mrf.mxu0 }
 0x3ae   :  { %5120 = vmatpush.bf16.msra.mxu2 %v8044_v5  ;;  %5095 = vmatpush.bf16.msra.mxu0 %v8027_v7  ;;  %v4347_v5 = vadd.f32 %v8753_v59, %v4334_v9  ;;  %v4400_v6 = vpop.f32.mrf.mxu3  ;;  %v8057_v7 = vld [vmem:[%s8913_s5 + $0x100] sm:$0xff]  ;;  %v4562_v59 = vmax.f32 %v8669_v45, 0.0 }
 0x3af   :  { %v4372_v15 = vpop.f32.mrf.mxu1 }
 0x3b0   :  { %5133 = vmatpush.bf16.msra.mxu3 %v8052_v12  ;;  %5108 = vmatpush.bf16.msra.mxu1 %v8035_v26  ;;  %v4387_v12 = vpop.f32.mrf.mxu2  ;;  %v8065_v26 = vld [vmem:[%s8913_s5 + $0x140] sm:$0xff] }
 0x3b2   :  { %5121 = vmatpush.bf16.msra.mxu2 %v8043_v28  ;;  %5096 = vmatpush.bf16.msra.mxu0 %v8026_v36  ;;  %v4563_v28 = vmax.f32 %v4347_v5, 0.0  ;;  %v8073_v36 = vld [vmem:[%s8913_s5 + $0x180] sm:$0xff] }
 0x3b4   :  { %5134 = vmatpush.bf16.msra.mxu3 %v8051_v29  ;;  %5109 = vmatpush.bf16.msra.mxu1 %v8034_v37  ;;  %v4360_v29 = vadd.f32 %v4359_v14, %v1156_v53  ;;  %v4570_v37 = vpack.c.bf16 %v4562_v59, %v4562_v59 }
 0x3b5   :  { %v4361_v38 = vpop.f32.mrf.mxu0 }
 0x3b6   :  { %5122 = vmatpush.bf16.msra.mxu2 %v8042_v24  ;;  %5097 = vmatpush.bf16.msra.mxu0 %v8025_v0  ;;  %v4571_v24 = vpack.c.bf16 %v4563_v28, %v4563_v28 }
 0x3b7   :  { %v4374_v43 = vpop.f32.mrf.mxu1 }
 0x3b8   :  { %5135 = vmatpush.bf16.msra.mxu3 %v8050_v11  ;;  %5110 = vmatpush.bf16.msra.mxu1 %v8033_v32  ;;  %v4373_v11 = vadd.f32 %v4372_v15, %v4360_v29 }
 0x3b9   :  { %5098 = vmatmul.bf16.vlgmr.msra.gmra.mxu0 %v4566_v54  ;;  %v8087_v54 = vld [vmem:[%s8913_s5 + $0x1f0] sm:$0xff] }
 0x3ba   :  { %5123 = vmatpush.bf16.msra.mxu2 %v8041_v21  ;;  %5142 = vmatpush.bf16.msrb.mxu0 %v8064_v25  ;;  %v4386_v39 = vadd.f32 %v4385_v44, %v4373_v11 }
 0x3bb   :  { %5111 = vmatmul.bf16.vlgmr.msra.gmra.mxu1 %v4567_v3 }
 0x3bc   :  { %5136 = vmatpush.bf16.msra.mxu3 %v8049_v40  ;;  %5155 = vmatpush.bf16.msrb.mxu1 %v8072_v60  ;;  %v4399_v30 = vadd.f32 %v4398_v34, %v4386_v39 }
 0x3bd   :  { %5124 = vmatmul.bf16.vlgmr.msra.gmra.mxu2 %v4568_v35  ;;  %v4411_v0 = vpop.f32.mrf.mxu0  ;;  %v8086_v35 = vld [vmem:[%s8913_s5 + $0x1e8] sm:$0xff] }
 0x3be   :  { %5168 = vmatpush.bf16.msrb.mxu2 %v8080_v19  ;;  %5143 = vmatpush.bf16.msrb.mxu0 %v8063_v8  ;;  %v4412_v45 = vadd.f32 %v4411_v0, %v4399_v30  ;;  %v8084_v8 = vld [vmem:[%s8913_s5 + $0x1d8] sm:$0xff] }
 0x3bf   :  { %5137 = vmatmul.bf16.vlgmr.msra.gmra.mxu3 %v4569_v42  ;;  %v4424_v32 = vpop.f32.mrf.mxu1  ;;  %v8085_v42 = vld [vmem:[%s8913_s5 + $0x1e0] sm:$0xff] }
 0x3c0   :  { %5156 = vmatpush.bf16.msrb.mxu1 %v8071_v49  ;;  %v4425_v61 = vadd.f32 %v4424_v32, %v4412_v45  ;;  %5181 = vmatpush.bf16.msrb.mxu3 %v8088_v50 }
 0x3c1   :  { %v4437_v23 = vpop.f32.mrf.mxu2 }
 0x3c2   :  { %5169 = vmatpush.bf16.msrb.mxu2 %v8079_v62  ;;  %5144 = vmatpush.bf16.msrb.mxu0 %v8062_v31  ;;  %v4438_v21 = vadd.f32 %v4437_v23, %v4425_v61  ;;  %v8083_v62 = vld [vmem:[%s8913_s5 + $0x1d0] sm:$0xff]  ;;  %v8082_v31 = vld [vmem:[%s8913_s5 + $0x1c8] sm:$0xff] }
 0x3c3   :  { %v4450_v27 = vpop.f32.mrf.mxu3 }
 0x3c4   :  { %5157 = vmatpush.bf16.msrb.mxu1 %v8070_v63  ;;  %v4451_v25 = vadd.f32 %v4450_v27, %v4438_v21  ;;  %5182 = vmatpush.bf16.msrb.mxu3 %v8087_v54 }
 0x3c5   :  { %v4413_v40 = vpop.f32.mrf.mxu0 }
 0x3c6   :  { %5170 = vmatpush.bf16.msrb.mxu2 %v8078_v55  ;;  %5145 = vmatpush.bf16.msrb.mxu0 %v8061_v16  ;;  %v4564_v60 = vmax.f32 %v4451_v25, 0.0  ;;  %v8081_v55 = vld [vmem:[%s8913_s5 + $0x1c0] sm:$0xff] }
 0x3c7   :  { %v4426_v10 = vpop.f32.mrf.mxu1 }
 0x3c8   :  { %5158 = vmatpush.bf16.msrb.mxu1 %v8069_v17  ;;  %v4572_v3 = vpack.c.bf16 %v4564_v60, %v4564_v60  ;;  %5183 = vmatpush.bf16.msrb.mxu3 %v8086_v35 }
 0x3c9   :  { %v4439_v41 = vpop.f32.mrf.mxu2 }
 0x3ca   :  { %5171 = vmatpush.bf16.msrb.mxu2 %v8077_v46  ;;  %5146 = vmatpush.bf16.msrb.mxu0 %v8060_v47 }
 0x3cb   :  { %v4452_v19 = vpop.f32.mrf.mxu3 }
 0x3cc   :  { %5159 = vmatpush.bf16.msrb.mxu1 %v8068_v51  ;;  %5184 = vmatpush.bf16.msrb.mxu3 %v8085_v42 }
 0x3ce   :  { %5172 = vmatpush.bf16.msrb.mxu2 %v8076_v1  ;;  %5147 = vmatpush.bf16.msrb.mxu0 %v8059_v52 }
 0x3d0   :  { %5160 = vmatpush.bf16.msrb.mxu1 %v8067_v56  ;;  %5185 = vmatpush.bf16.msrb.mxu3 %v8084_v8 }
 0x3d2   :  { %5173 = vmatpush.bf16.msrb.mxu2 %v8075_v22  ;;  %5148 = vmatpush.bf16.msrb.mxu0 %v8058_v20 }
 0x3d4   :  { %5161 = vmatpush.bf16.msrb.mxu1 %v8066_v2  ;;  %5186 = vmatpush.bf16.msrb.mxu3 %v8083_v62 }
 0x3d6   :  { %5174 = vmatpush.bf16.msrb.mxu2 %v8074_v33  ;;  %5149 = vmatpush.bf16.msrb.mxu0 %v8057_v7 }
 0x3d7   :  { %v4463_v49 = vpop.f32.mrf.mxu0 }
 0x3d8   :  { %5162 = vmatpush.bf16.msrb.mxu1 %v8065_v26  ;;  %5187 = vmatpush.bf16.msrb.mxu3 %v8082_v31  ;;  %v4464_v58 = vadd.f32 %v4463_v49, %v1157_v13 }
 0x3d9   :  { %5150 = vmatmul.bf16.vlgmr.msrb.gmra.mxu0 %v4570_v37  ;;  %v4476_v48 = vpop.f32.mrf.mxu1 }
 0x3da   :  { %5175 = vmatpush.bf16.msrb.mxu2 %v8073_v36  ;;  %v4477_v46 = vadd.f32 %v4476_v48, %v4464_v58 }
 0x3db   :  { %5163 = vmatmul.bf16.vlgmr.msrb.gmra.mxu1 %v4571_v24 }
 0x3dc   :  { %5188 = vmatpush.bf16.msrb.mxu3 %v8081_v55 }
 0x3dd   :  { %5176 = vmatmul.bf16.vlgmr.msrb.gmra.mxu2 %v4572_v3 }
 0x3df   :  { %v4465_v14 = vpop.f32.mrf.mxu0 }
 0x3e1   :  { %v4489_v63 = vpop.f32.mrf.mxu2  ;;  %v4478_v15 = vpop.f32.mrf.mxu1 }
 0x3e2   :  { %v4490_v47 = vadd.f32 %v4489_v63, %v4477_v46 }
 0x3e3   :  { %v4502_v57 = vpop.f32.mrf.mxu3 }
 0x3e4   :  { %v4503_v51 = vadd.f32 %v4502_v57, %v4490_v47 }
 0x3e9   :  { %v4491_v16 = vpop.f32.mrf.mxu2 }
 0x3eb   :  { %v4504_v17 = vpop.f32.mrf.mxu3 }
 0x416   :  { %v4515_v44 = vpop.f32.mrf.mxu0 }
 0x417   :  { %v4516_v18 = vadd.f32 %v4515_v44, %v4503_v51 }
 0x418   :  { %v4528_v34 = vpop.f32.mrf.mxu1 }
 0x419   :  { %v4529_v38 = vadd.f32 %v4528_v34, %v4516_v18 }
 0x41e   :  { %v4517_v56 = vpop.f32.mrf.mxu0 }
 0x420   :  { %v4541_v43 = vpop.f32.mrf.mxu2  ;;  %v4530_v9 = vpop.f32.mrf.mxu1 }
 0x421   :  { %v4542_v52 = vadd.f32 %v4541_v43, %v4529_v38 }
 0x422   :  { %v4554_v1 = vpop.f32.mrf.mxu3 }
 0x423   :  { %v4555_v22 = vadd.f32 %v4554_v1, %v4542_v52 }
 0x425   :  { %v4565_v20 = vmax.f32 %v4555_v22, 0.0 }
 0x427   :  { %v4573_v2 = vpack.c.bf16 %v4565_v20, %v4565_v20 }
 0x428   :  { %v4543_v5 = vpop.f32.mrf.mxu2 }
 0x429   :  { %5189 = vmatmul.bf16.vlgmr.msrb.gmra.mxu3 %v4573_v2 }
 0x42a   :  { %v4556_v12 = vpop.f32.mrf.mxu3 }
 0x436   :  { %v5099_v6 = vpop.f32.mrf.mxu0 }
 0x437   :  { %v5100_v33 = vadd.f32 %v8110_v4, %v5099_v6 }
 0x438   :  { %v5112_v53 = vpop.f32.mrf.mxu1 }
 0x439   :  { %v5113_v7 = vadd.f32 %v5112_v53, %v5100_v33 }
 0x43e   :  { %v5101_v29 = vpop.f32.mrf.mxu0 }
 0x440   :  { %v5125_v26 = vpop.f32.mrf.mxu2  ;;  %v5114_v36 = vpop.f32.mrf.mxu1 }
 0x441   :  { %v5126_v28 = vadd.f32 %v5125_v26, %v5113_v7 }
 0x442   :  { %v5138_v59 = vpop.f32.mrf.mxu3 }
 0x443   :  { %v5139_v37 = vadd.f32 %v5138_v59, %v5126_v28 }
 0x448   :  { %v5127_v24 = vpop.f32.mrf.mxu2 }
 0x44a   :  { %v5140_v11 = vpop.f32.mrf.mxu3 }
 0x456   :  { %v5151_v39 = vpop.f32.mrf.mxu0 }
 0x457   :  { %v5152_v0 = vadd.f32 %v5151_v39, %v5139_v37 }
 0x458   :  { %v5164_v30 = vpop.f32.mrf.mxu1 }
 0x459   :  { %v5165_v32 = vadd.f32 %v5164_v30, %v5152_v0 }
 0x45e   :  { %v5153_v45 = vpop.f32.mrf.mxu0 }
 0x460   :  { %v5166_v61 = vpop.f32.mrf.mxu1  ;;  %v5177_v23 = vpop.f32.mrf.mxu2 }
 0x461   :  { %v5178_v21 = vadd.f32 %v5177_v23, %v5165_v32 }
 0x468   :  { %v5179_v27 = vpop.f32.mrf.mxu2 }
 0x4ac   :  { %v5190_v40 = vpop.f32.mrf.mxu3 }
 0x4ad   :  { %v5191_v10 = vadd.f32 %v5190_v40, %v5178_v21 }
 0x4af   :  { %5195 = vst.msk [vmem:[%s8915_s7] sm:$0xff] %vm5194_vm6, %v5191_v10 }
 0x4b4   :  { %v5192_v50 = vpop.f32.mrf.mxu3 }
 0x4b5   :  { %5200 = vsyncpa [#allocation3], 1 }
 0x4b6   :  { %5201 = vsyncpa [#allocation5], 1 }
 0x4b7   :  { %5202 = vsyncpa [#allocation8], 1 }

</bundles_post_ra>
